<compile_context>
chip_gen: v6e
topology: v6e:2x2x1
jax: 0.10.0
libtpu: 0.0.40
codegen_flags: <defaults>
</compile_context>

<pallas_src>
import jax
import jax.numpy as jnp
from jax.experimental import pallas as pl
from jax.experimental.pallas import tpu as pltpu

_CP = 128  # lane-dense channel padding (multiple of 128)
_VMEM_LIMIT = 32 * 1024 * 1024


def _round_up(x, m):
    return ((x + m - 1) // m) * m


# ----------------------------- Pallas kernels / wrappers -------------------

def _conv3x3_relu(x_nhwc, w9, b2):
    """3x3 'same' conv + bias + ReLU.

    x_nhwc: (N, H, W, Cin) bf16, w9: (9, Cin, Cp) bf16, b2: (1, Cp) f32.
    Grid over batch; each grid step holds the full (H+2, W+2, Cin) padded image
    tile in VMEM and does im2col in-kernel as 9 shifted matmuls (f32 accumulate).
    Output channels are pre-padded to Cp (multiple of 128) -> unmasked lane-dense stores.
    """
    N, H, W, Cin = x_nhwc.shape
    _, wcin, Cp = w9.shape
    assert wcin == Cin, "weight Cin must match activation channels"

    # Spatial zero-pad is thin XLA glue (1x activation traffic, not 9x im2col).
    xp = jnp.pad(x_nhwc, ((0, 0), (1, 1), (1, 1), (0, 0)))

    def kernel(x_ref, w_ref, b_ref, o_ref):
        acc = None
        for dy in range(3):
            for dx in range(3):
                a = x_ref[0, dy:dy + H, dx:dx + W, :].reshape(H * W, Cin)
                t = jnp.dot(a, w_ref[3 * dy + dx],
                            preferred_element_type=jnp.float32)
                acc = t if acc is None else acc + t
        y = jnp.maximum(acc + b_ref[...], 0.0)       # f32 epilogue (v5e-safe)
        o_ref[0] = y.astype(o_ref.dtype)

    out = pl.pallas_call(
        kernel,
        out_shape=jax.ShapeDtypeStruct((N, H * W, Cp), jnp.bfloat16),
        grid_spec=pltpu.PrefetchScalarGridSpec(
            num_scalar_prefetch=0,
            grid=(N,),
            in_specs=[pl.BlockSpec((1, H + 2, W + 2, Cin), lambda n: (n, 0, 0, 0)),
                      pl.BlockSpec((9, Cin, Cp), lambda n: (0, 0, 0)),
                      pl.BlockSpec((1, Cp), lambda n: (0, 0))],
            out_specs=pl.BlockSpec((1, H * W, Cp), lambda n: (n, 0, 0))),
        compiler_params=pltpu.CompilerParams(
            dimension_semantics=("parallel",),          # shards across TCs on v7x
            vmem_limit_bytes=_VMEM_LIMIT),
    )(xp, w9, b2)
    return out.reshape(N, H, W, Cp)


def _maxpool2(x_nhwc):
    # TODO(synk): 2x2 maxpool kept as XLA glue; fusing it into the conv epilogue
    # would save one HBM round-trip of the conv output.
    N, H, W, C = x_nhwc.shape
    return jnp.max(x_nhwc.reshape(N, H // 2, 2, W // 2, 2, C), axis=(2, 4))


def _fro_diff_kernel(a_ref, b_ref, o_ref, acc_ref):
    # Tiled sqrt(sum((a-b)^2)): accumulate sum-of-squares across the grid.
    @pl.when(pl.program_id(0) == 0)
    def _():
        acc_ref[...] = jnp.zeros_like(acc_ref)

    d = a_ref[...].astype(jnp.float32) - b_ref[...].astype(jnp.float32)
    acc_ref[...] += jnp.sum(d * d, axis=(0, 1), keepdims=True)

    @pl.when(pl.program_id(0) == pl.num_programs(0) - 1)
    def _():
        o_ref[...] = jnp.sqrt(acc_ref[...])


def _pick_tile(m):
    for t in (2048, 1024, 512, 256, 128, 64, 32, 16, 8):
        if m % t == 0:
            return t
    return m


def _fro_norm_diff(stacked2d, half_rows):
    """stacked2d: (2*M, C) with rows [0:M] = x features, [M:2M] = gt features."""
    M = half_rows
    C = stacked2d.shape[-1]
    assert M % 8 == 0, "flattened feature rows must be a multiple of 8"
    tm = _pick_tile(M)
    nblk = M // tm

    out = pl.pallas_call(
        _fro_diff_kernel,
        out_shape=jax.ShapeDtypeStruct((1, 1), jnp.float32),
        grid_spec=pltpu.PrefetchScalarGridSpec(
            num_scalar_prefetch=0,
            grid=(nblk,),
            in_specs=[pl.BlockSpec((tm, C), lambda i: (i, 0)),
                      pl.BlockSpec((tm, C), lambda i, nb=nblk: (i + nb, 0))],
            out_specs=pl.BlockSpec((1, 1), lambda i: (0, 0)),
            scratch_shapes=[pltpu.VMEM((1, 1), jnp.float32)]),
        compiler_params=pltpu.CompilerParams(
            dimension_semantics=("arbitrary",),
            vmem_limit_bytes=_VMEM_LIMIT),
    )(stacked2d, stacked2d)
    return out[0, 0]


# ----------------------------- "VGG" feature extractor --------------------

def _init_vgg_params(key):
    # Truncated VGG19-style feature stack with deterministic synthetic weights.
    # TODO(synk): pretrained VGG19 weights cannot be loaded here; same op
    # structure (conv3x3+ReLU blocks + maxpool) with PRNGKey-derived weights.
    cfg = [(3, 64), (64, 64), "pool", (64, 128), (128, 128)]
    params = []
    for item in cfg:
        if item == "pool":
            params.append("pool")
            continue
        cin, cout = item
        key, kw = jax.random.split(key)
        scale = (2.0 / (9.0 * cin)) ** 0.5
        w = jax.random.normal(kw, (3, 3, cin, cout), jnp.float32) * scale  # HWIO
        b = jnp.zeros((cout,), jnp.float32)
        # Zero-pad channels to lane-dense widths (padded channels stay exactly 0
        # through conv/ReLU/pool, so they never affect the loss).
        cin_p = cin if cin == 3 else _round_up(cin, _CP)
        cout_p = _round_up(cout, _CP)
        w_p = jnp.zeros((3, 3, cin_p, cout_p), jnp.float32)
        w_p = w_p.at[:, :, :cin, :cout].set(w)
        b_p = jnp.zeros((cout_p,), jnp.float32).at[:cout].set(b)
        params.append((w_p.astype(jnp.bfloat16).reshape(9, cin_p, cout_p),
                       b_p.reshape(1, cout_p)))
    return params


def _vgg_features(x_nchw, params):
    x = jnp.transpose(x_nchw, (0, 2, 3, 1)).astype(jnp.bfloat16)  # NCHW -> NHWC bf16
    for p in params:
        if isinstance(p, str):  # "pool"
            x = _maxpool2(x)
        else:
            w9, b2 = p
            x = _conv3x3_relu(x, w9, b2)
    return x


def perceptual_loss(x, gt, params):
    """Matches PerceptualLoss.forward: fro-norm of (vgg(x) - vgg(gt))."""
    stacked = jnp.concatenate([x, gt], axis=0)        # single feature pass
    feats = _vgg_features(stacked, params)            # (2B, h, w, Cp) bf16
    B = x.shape[0]
    M = B * feats.shape[1] * feats.shape[2]
    f2 = feats.reshape(2 * M, feats.shape[-1])
    return _fro_norm_diff(f2, M)


# ----------------------------- demo ---------------------------------------

if __name__ == "__main__":
    key = jax.random.PRNGKey(0)
    kx, kg, kp = jax.random.split(key, 3)
    x = jax.random.uniform(kx, (2, 3, 16, 16), jnp.float32)   # NCHW like PyTorch
    gt = jax.random.uniform(kg, (2, 3, 16, 16), jnp.float32)
    params = _init_vgg_params(kp)

    loss_fn = jax.jit(lambda a, b: perceptual_loss(a, b, params))
    loss = loss_fn(x, gt)
    jax.block_until_ready(loss)
    assert loss.shape == () and jnp.isfinite(loss)
    print("KERNEL_OK")
</pallas_src>

<mosaic_0001>
module attributes {stable_mosaic.version = 11 : i64} {
  func.func @kernel(%arg0: i32, %arg1: memref<1x18x18x3xbf16, #tpu.memory_space<vmem>>, %arg2: memref<9x3x128xbf16, #tpu.memory_space<vmem>>, %arg3: memref<1x128xf32, #tpu.memory_space<vmem>>, %arg4: memref<1x256x128xbf16, #tpu.memory_space<vmem>>) attributes {dimension_semantics = [#tpu.dimension_semantics<parallel>], iteration_bounds = array<i64: 4>, scalar_prefetch = 0 : i64, scratch_operands = 0 : i64, tpu.core_type = #tpu.core_type<tc>, window_params = [{transform_indices = @transform_0, window_bounds = array<i64: 1, 18, 18, 3>}, {pipeline_mode = #tpu.pipeline_mode<synchronous>, transform_indices = @transform_1, window_bounds = array<i64: 9, 3, 128>}, {pipeline_mode = #tpu.pipeline_mode<synchronous>, transform_indices = @transform_2, window_bounds = array<i64: 1, 128>}, {transform_indices = @transform_3, window_bounds = array<i64: 1, 256, 128>}]} {
    %c0 = arith.constant 0 : index
    %c0_0 = arith.constant 0 : index
    %c0_1 = arith.constant 0 : index
    %c0_2 = arith.constant 0 : index
    %0 = vector.load %arg1[%c0, %c0_0, %c0_1, %c0_2] : memref<1x18x18x3xbf16, #tpu.memory_space<vmem>>, vector<1x16x16x3xbf16>
    %1 = vector.shape_cast %0 : vector<1x16x16x3xbf16> to vector<16x16x3xbf16>
    %2 = vector.shape_cast %1 : vector<16x16x3xbf16> to vector<256x3xbf16>
    %c0_3 = arith.constant 0 : index
    %c0_4 = arith.constant 0 : index
    %c0_5 = arith.constant 0 : index
    %3 = vector.load %arg2[%c0_3, %c0_4, %c0_5] : memref<9x3x128xbf16, #tpu.memory_space<vmem>>, vector<1x3x128xbf16>
    %4 = vector.shape_cast %3 : vector<1x3x128xbf16> to vector<3x128xbf16>
    %cst = arith.constant dense<0.000000e+00> : vector<256x128xf32>
    %5 = tpu.matmul %2, %4, %cst {dimension_numbers = #tpu.dot_dimension_numbers<[1], [0], [0], [1], [0, 0, 1, 1], [], []>} : vector<256x3xbf16>, vector<3x128xbf16>, vector<256x128xf32> -> vector<256x128xf32>
    %c0_6 = arith.constant 0 : index
    %c0_7 = arith.constant 0 : index
    %c1 = arith.constant 1 : index
    %c0_8 = arith.constant 0 : index
    %6 = vector.load %arg1[%c0_6, %c0_7, %c1, %c0_8] : memref<1x18x18x3xbf16, #tpu.memory_space<vmem>>, vector<1x16x16x3xbf16>
    %7 = vector.shape_cast %6 : vector<1x16x16x3xbf16> to vector<16x16x3xbf16>
    %8 = vector.shape_cast %7 : vector<16x16x3xbf16> to vector<256x3xbf16>
    %c1_9 = arith.constant 1 : index
    %c0_10 = arith.constant 0 : index
    %c0_11 = arith.constant 0 : index
    %9 = vector.load %arg2[%c1_9, %c0_10, %c0_11] : memref<9x3x128xbf16, #tpu.memory_space<vmem>>, vector<1x3x128xbf16>
    %10 = vector.shape_cast %9 : vector<1x3x128xbf16> to vector<3x128xbf16>
    %cst_12 = arith.constant dense<0.000000e+00> : vector<256x128xf32>
    %11 = tpu.matmul %8, %10, %cst_12 {dimension_numbers = #tpu.dot_dimension_numbers<[1], [0], [0], [1], [0, 0, 1, 1], [], []>} : vector<256x3xbf16>, vector<3x128xbf16>, vector<256x128xf32> -> vector<256x128xf32>
    %12 = arith.addf %5, %11 : vector<256x128xf32>
    %c0_13 = arith.constant 0 : index
    %c0_14 = arith.constant 0 : index
    %c2 = arith.constant 2 : index
    %c0_15 = arith.constant 0 : index
    %13 = vector.load %arg1[%c0_13, %c0_14, %c2, %c0_15] : memref<1x18x18x3xbf16, #tpu.memory_space<vmem>>, vector<1x16x16x3xbf16>
    %14 = vector.shape_cast %13 : vector<1x16x16x3xbf16> to vector<16x16x3xbf16>
    %15 = vector.shape_cast %14 : vector<16x16x3xbf16> to vector<256x3xbf16>
    %c2_16 = arith.constant 2 : index
    %c0_17 = arith.constant 0 : index
    %c0_18 = arith.constant 0 : index
    %16 = vector.load %arg2[%c2_16, %c0_17, %c0_18] : memref<9x3x128xbf16, #tpu.memory_space<vmem>>, vector<1x3x128xbf16>
    %17 = vector.shape_cast %16 : vector<1x3x128xbf16> to vector<3x128xbf16>
    %cst_19 = arith.constant dense<0.000000e+00> : vector<256x128xf32>
    %18 = tpu.matmul %15, %17, %cst_19 {dimension_numbers = #tpu.dot_dimension_numbers<[1], [0], [0], [1], [0, 0, 1, 1], [], []>} : vector<256x3xbf16>, vector<3x128xbf16>, vector<256x128xf32> -> vector<256x128xf32>
    %19 = arith.addf %12, %18 : vector<256x128xf32>
    %c0_20 = arith.constant 0 : index
    %c1_21 = arith.constant 1 : index
    %c0_22 = arith.constant 0 : index
    %c0_23 = arith.constant 0 : index
    %20 = vector.load %arg1[%c0_20, %c1_21, %c0_22, %c0_23] : memref<1x18x18x3xbf16, #tpu.memory_space<vmem>>, vector<1x16x16x3xbf16>
    %21 = vector.shape_cast %20 : vector<1x16x16x3xbf16> to vector<16x16x3xbf16>
    %22 = vector.shape_cast %21 : vector<16x16x3xbf16> to vector<256x3xbf16>
    %c3 = arith.constant 3 : index
    %c0_24 = arith.constant 0 : index
    %c0_25 = arith.constant 0 : index
    %23 = vector.load %arg2[%c3, %c0_24, %c0_25] : memref<9x3x128xbf16, #tpu.memory_space<vmem>>, vector<1x3x128xbf16>
    %24 = vector.shape_cast %23 : vector<1x3x128xbf16> to vector<3x128xbf16>
    %cst_26 = arith.constant dense<0.000000e+00> : vector<256x128xf32>
    %25 = tpu.matmul %22, %24, %cst_26 {dimension_numbers = #tpu.dot_dimension_numbers<[1], [0], [0], [1], [0, 0, 1, 1], [], []>} : vector<256x3xbf16>, vector<3x128xbf16>, vector<256x128xf32> -> vector<256x128xf32>
    %26 = arith.addf %19, %25 : vector<256x128xf32>
    %c0_27 = arith.constant 0 : index
    %c1_28 = arith.constant 1 : index
    %c1_29 = arith.constant 1 : index
    %c0_30 = arith.constant 0 : index
    %27 = vector.load %arg1[%c0_27, %c1_28, %c1_29, %c0_30] : memref<1x18x18x3xbf16, #tpu.memory_space<vmem>>, vector<1x16x16x3xbf16>
    %28 = vector.shape_cast %27 : vector<1x16x16x3xbf16> to vector<16x16x3xbf16>
    %29 = vector.shape_cast %28 : vector<16x16x3xbf16> to vector<256x3xbf16>
    %c4 = arith.constant 4 : index
    %c0_31 = arith.constant 0 : index
    %c0_32 = arith.constant 0 : index
    %30 = vector.load %arg2[%c4, %c0_31, %c0_32] : memref<9x3x128xbf16, #tpu.memory_space<vmem>>, vector<1x3x128xbf16>
    %31 = vector.shape_cast %30 : vector<1x3x128xbf16> to vector<3x128xbf16>
    %cst_33 = arith.constant dense<0.000000e+00> : vector<256x128xf32>
    %32 = tpu.matmul %29, %31, %cst_33 {dimension_numbers = #tpu.dot_dimension_numbers<[1], [0], [0], [1], [0, 0, 1, 1], [], []>} : vector<256x3xbf16>, vector<3x128xbf16>, vector<256x128xf32> -> vector<256x128xf32>
    %33 = arith.addf %26, %32 : vector<256x128xf32>
    %c0_34 = arith.constant 0 : index
    %c1_35 = arith.constant 1 : index
    %c2_36 = arith.constant 2 : index
    %c0_37 = arith.constant 0 : index
    %34 = vector.load %arg1[%c0_34, %c1_35, %c2_36, %c0_37] : memref<1x18x18x3xbf16, #tpu.memory_space<vmem>>, vector<1x16x16x3xbf16>
    %35 = vector.shape_cast %34 : vector<1x16x16x3xbf16> to vector<16x16x3xbf16>
    %36 = vector.shape_cast %35 : vector<16x16x3xbf16> to vector<256x3xbf16>
    %c5 = arith.constant 5 : index
    %c0_38 = arith.constant 0 : index
    %c0_39 = arith.constant 0 : index
    %37 = vector.load %arg2[%c5, %c0_38, %c0_39] : memref<9x3x128xbf16, #tpu.memory_space<vmem>>, vector<1x3x128xbf16>
    %38 = vector.shape_cast %37 : vector<1x3x128xbf16> to vector<3x128xbf16>
    %cst_40 = arith.constant dense<0.000000e+00> : vector<256x128xf32>
    %39 = tpu.matmul %36, %38, %cst_40 {dimension_numbers = #tpu.dot_dimension_numbers<[1], [0], [0], [1], [0, 0, 1, 1], [], []>} : vector<256x3xbf16>, vector<3x128xbf16>, vector<256x128xf32> -> vector<256x128xf32>
    %40 = arith.addf %33, %39 : vector<256x128xf32>
    %c0_41 = arith.constant 0 : index
    %c2_42 = arith.constant 2 : index
    %c0_43 = arith.constant 0 : index
    %c0_44 = arith.constant 0 : index
    %41 = vector.load %arg1[%c0_41, %c2_42, %c0_43, %c0_44] : memref<1x18x18x3xbf16, #tpu.memory_space<vmem>>, vector<1x16x16x3xbf16>
    %42 = vector.shape_cast %41 : vector<1x16x16x3xbf16> to vector<16x16x3xbf16>
    %43 = vector.shape_cast %42 : vector<16x16x3xbf16> to vector<256x3xbf16>
    %c6 = arith.constant 6 : index
    %c0_45 = arith.constant 0 : index
    %c0_46 = arith.constant 0 : index
    %44 = vector.load %arg2[%c6, %c0_45, %c0_46] : memref<9x3x128xbf16, #tpu.memory_space<vmem>>, vector<1x3x128xbf16>
    %45 = vector.shape_cast %44 : vector<1x3x128xbf16> to vector<3x128xbf16>
    %cst_47 = arith.constant dense<0.000000e+00> : vector<256x128xf32>
    %46 = tpu.matmul %43, %45, %cst_47 {dimension_numbers = #tpu.dot_dimension_numbers<[1], [0], [0], [1], [0, 0, 1, 1], [], []>} : vector<256x3xbf16>, vector<3x128xbf16>, vector<256x128xf32> -> vector<256x128xf32>
    %47 = arith.addf %40, %46 : vector<256x128xf32>
    %c0_48 = arith.constant 0 : index
    %c2_49 = arith.constant 2 : index
    %c1_50 = arith.constant 1 : index
    %c0_51 = arith.constant 0 : index
    %48 = vector.load %arg1[%c0_48, %c2_49, %c1_50, %c0_51] : memref<1x18x18x3xbf16, #tpu.memory_space<vmem>>, vector<1x16x16x3xbf16>
    %49 = vector.shape_cast %48 : vector<1x16x16x3xbf16> to vector<16x16x3xbf16>
    %50 = vector.shape_cast %49 : vector<16x16x3xbf16> to vector<256x3xbf16>
    %c7 = arith.constant 7 : index
    %c0_52 = arith.constant 0 : index
    %c0_53 = arith.constant 0 : index
    %51 = vector.load %arg2[%c7, %c0_52, %c0_53] : memref<9x3x128xbf16, #tpu.memory_space<vmem>>, vector<1x3x128xbf16>
    %52 = vector.shape_cast %51 : vector<1x3x128xbf16> to vector<3x128xbf16>
    %cst_54 = arith.constant dense<0.000000e+00> : vector<256x128xf32>
    %53 = tpu.matmul %50, %52, %cst_54 {dimension_numbers = #tpu.dot_dimension_numbers<[1], [0], [0], [1], [0, 0, 1, 1], [], []>} : vector<256x3xbf16>, vector<3x128xbf16>, vector<256x128xf32> -> vector<256x128xf32>
    %54 = arith.addf %47, %53 : vector<256x128xf32>
    %c0_55 = arith.constant 0 : index
    %c2_56 = arith.constant 2 : index
    %c2_57 = arith.constant 2 : index
    %c0_58 = arith.constant 0 : index
    %55 = vector.load %arg1[%c0_55, %c2_56, %c2_57, %c0_58] : memref<1x18x18x3xbf16, #tpu.memory_space<vmem>>, vector<1x16x16x3xbf16>
    %56 = vector.shape_cast %55 : vector<1x16x16x3xbf16> to vector<16x16x3xbf16>
    %57 = vector.shape_cast %56 : vector<16x16x3xbf16> to vector<256x3xbf16>
    %c8 = arith.constant 8 : index
    %c0_59 = arith.constant 0 : index
    %c0_60 = arith.constant 0 : index
    %58 = vector.load %arg2[%c8, %c0_59, %c0_60] : memref<9x3x128xbf16, #tpu.memory_space<vmem>>, vector<1x3x128xbf16>
    %59 = vector.shape_cast %58 : vector<1x3x128xbf16> to vector<3x128xbf16>
    %cst_61 = arith.constant dense<0.000000e+00> : vector<256x128xf32>
    %60 = tpu.matmul %57, %59, %cst_61 {dimension_numbers = #tpu.dot_dimension_numbers<[1], [0], [0], [1], [0, 0, 1, 1], [], []>} : vector<256x3xbf16>, vector<3x128xbf16>, vector<256x128xf32> -> vector<256x128xf32>
    %61 = arith.addf %54, %60 : vector<256x128xf32>
    %c0_62 = arith.constant 0 : index
    %c0_63 = arith.constant 0 : index
    %62 = vector.load %arg3[%c0_62, %c0_63] : memref<1x128xf32, #tpu.memory_space<vmem>>, vector<1x128xf32>
    %63 = vector.broadcast %62 : vector<1x128xf32> to vector<256x128xf32>
    %64 = arith.addf %61, %63 : vector<256x128xf32>
    %cst_64 = arith.constant 0.000000e+00 : f32
    %65 = vector.broadcast %cst_64 : f32 to vector<256x128xf32>
    %66 = arith.maximumf %64, %65 : vector<256x128xf32>
    %67 = arith.truncf %66 : vector<256x128xf32> to vector<256x128xbf16>
    %c0_65 = arith.constant 0 : index
    %c0_66 = arith.constant 0 : index
    %c0_67 = arith.constant 0 : index
    %68 = vector.load %arg4[%c0_65, %c0_66, %c0_67] : memref<1x256x128xbf16, #tpu.memory_space<vmem>>, vector<1x256x128xbf16>
    %69 = vector.shape_cast %68 : vector<1x256x128xbf16> to vector<256x128xbf16>
    %70 = vector.shape_cast %67 : vector<256x128xbf16> to vector<1x256x128xbf16>
    tpu.vector_store %arg4[%c0_65, %c0_66, %c0_67], %70 {strides = array<i32>} : memref<1x256x128xbf16, #tpu.memory_space<vmem>>, vector<1x256x128xbf16>,
    return
  }
  func.func @transform_0(%arg0: i32) -> (i32, i32, i32, i32) {
    %c0_i32 = arith.constant 0 : i32
    %c0_i32_0 = arith.constant 0 : i32
    %c0_i32_1 = arith.constant 0 : i32
    %c0_i32_2 = arith.constant 0 : i32
    return %arg0, %c0_i32, %c0_i32_0, %c0_i32_1 : i32, i32, i32, i32
  }
  func.func @transform_1(%arg0: i32) -> (i32, i32, i32) {
    %c0_i32 = arith.constant 0 : i32
    %c0_i32_0 = arith.constant 0 : i32
    %c0_i32_1 = arith.constant 0 : i32
    %c0_i32_2 = arith.constant 0 : i32
    return %c0_i32, %c0_i32_0, %c0_i32_1 : i32, i32, i32
  }
  func.func @transform_2(%arg0: i32) -> (i32, i32) {
    %c0_i32 = arith.constant 0 : i32
    %c0_i32_0 = arith.constant 0 : i32
    %c0_i32_1 = arith.constant 0 : i32
    return %c0_i32, %c0_i32_0 : i32, i32
  }
  func.func @transform_3(%arg0: i32) -> (i32, i32, i32) {
    %c0_i32 = arith.constant 0 : i32
    %c0_i32_0 = arith.constant 0 : i32
    %c0_i32_1 = arith.constant 0 : i32
    return %arg0, %c0_i32, %c0_i32_0 : i32, i32, i32
  }
}

module attributes {stable_mosaic.version = 11 : i64} {
  func.func @kernel(%arg0: i32, %arg1: memref<1x18x18x128xbf16, #tpu.memory_space<vmem>>, %arg2: memref<9x128x128xbf16, #tpu.memory_space<vmem>>, %arg3: memref<1x128xf32, #tpu.memory_space<vmem>>, %arg4: memref<1x256x128xbf16, #tpu.memory_space<vmem>>) attributes {dimension_semantics = [#tpu.dimension_semantics<parallel>], iteration_bounds = array<i64: 4>, scalar_prefetch = 0 : i64, scratch_operands = 0 : i64, tpu.core_type = #tpu.core_type<tc>, window_params = [{transform_indices = @transform_0, window_bounds = array<i64: 1, 18, 18, 128>}, {pipeline_mode = #tpu.pipeline_mode<synchronous>, transform_indices = @transform_1, window_bounds = array<i64: 9, 128, 128>}, {pipeline_mode = #tpu.pipeline_mode<synchronous>, transform_indices = @transform_2, window_bounds = array<i64: 1, 128>}, {transform_indices = @transform_3, window_bounds = array<i64: 1, 256, 128>}]} {
    %c0 = arith.constant 0 : index
    %c0_0 = arith.constant 0 : index
    %c0_1 = arith.constant 0 : index
    %c0_2 = arith.constant 0 : index
    %0 = vector.load %arg1[%c0, %c0_0, %c0_1, %c0_2] : memref<1x18x18x128xbf16, #tpu.memory_space<vmem>>, vector<1x16x16x128xbf16>
    %1 = vector.shape_cast %0 : vector<1x16x16x128xbf16> to vector<16x16x128xbf16>
    %2 = vector.shape_cast %1 : vector<16x16x128xbf16> to vector<256x128xbf16>
    %c0_3 = arith.constant 0 : index
    %c0_4 = arith.constant 0 : index
    %c0_5 = arith.constant 0 : index
    %3 = vector.load %arg2[%c0_3, %c0_4, %c0_5] : memref<9x128x128xbf16, #tpu.memory_space<vmem>>, vector<1x128x128xbf16>
    %4 = vector.shape_cast %3 : vector<1x128x128xbf16> to vector<128x128xbf16>
    %cst = arith.constant dense<0.000000e+00> : vector<256x128xf32>
    %5 = tpu.matmul %2, %4, %cst {dimension_numbers = #tpu.dot_dimension_numbers<[1], [0], [0], [1], [0, 0, 1, 1], [], []>} : vector<256x128xbf16>, vector<128x128xbf16>, vector<256x128xf32> -> vector<256x128xf32>
    %c0_6 = arith.constant 0 : index
    %c0_7 = arith.constant 0 : index
    %c1 = arith.constant 1 : index
    %c0_8 = arith.constant 0 : index
    %6 = vector.load %arg1[%c0_6, %c0_7, %c1, %c0_8] : memref<1x18x18x128xbf16, #tpu.memory_space<vmem>>, vector<1x16x16x128xbf16>
    %7 = vector.shape_cast %6 : vector<1x16x16x128xbf16> to vector<16x16x128xbf16>
    %8 = vector.shape_cast %7 : vector<16x16x128xbf16> to vector<256x128xbf16>
    %c1_9 = arith.constant 1 : index
    %c0_10 = arith.constant 0 : index
    %c0_11 = arith.constant 0 : index
    %9 = vector.load %arg2[%c1_9, %c0_10, %c0_11] : memref<9x128x128xbf16, #tpu.memory_space<vmem>>, vector<1x128x128xbf16>
    %10 = vector.shape_cast %9 : vector<1x128x128xbf16> to vector<128x128xbf16>
    %cst_12 = arith.constant dense<0.000000e+00> : vector<256x128xf32>
    %11 = tpu.matmul %8, %10, %cst_12 {dimension_numbers = #tpu.dot_dimension_numbers<[1], [0], [0], [1], [0, 0, 1, 1], [], []>} : vector<256x128xbf16>, vector<128x128xbf16>, vector<256x128xf32> -> vector<256x128xf32>
    %12 = arith.addf %5, %11 : vector<256x128xf32>
    %c0_13 = arith.constant 0 : index
    %c0_14 = arith.constant 0 : index
    %c2 = arith.constant 2 : index
    %c0_15 = arith.constant 0 : index
    %13 = vector.load %arg1[%c0_13, %c0_14, %c2, %c0_15] : memref<1x18x18x128xbf16, #tpu.memory_space<vmem>>, vector<1x16x16x128xbf16>
    %14 = vector.shape_cast %13 : vector<1x16x16x128xbf16> to vector<16x16x128xbf16>
    %15 = vector.shape_cast %14 : vector<16x16x128xbf16> to vector<256x128xbf16>
    %c2_16 = arith.constant 2 : index
    %c0_17 = arith.constant 0 : index
    %c0_18 = arith.constant 0 : index
    %16 = vector.load %arg2[%c2_16, %c0_17, %c0_18] : memref<9x128x128xbf16, #tpu.memory_space<vmem>>, vector<1x128x128xbf16>
    %17 = vector.shape_cast %16 : vector<1x128x128xbf16> to vector<128x128xbf16>
    %cst_19 = arith.constant dense<0.000000e+00> : vector<256x128xf32>
    %18 = tpu.matmul %15, %17, %cst_19 {dimension_numbers = #tpu.dot_dimension_numbers<[1], [0], [0], [1], [0, 0, 1, 1], [], []>} : vector<256x128xbf16>, vector<128x128xbf16>, vector<256x128xf32> -> vector<256x128xf32>
    %19 = arith.addf %12, %18 : vector<256x128xf32>
    %c0_20 = arith.constant 0 : index
    %c1_21 = arith.constant 1 : index
    %c0_22 = arith.constant 0 : index
    %c0_23 = arith.constant 0 : index
    %20 = vector.load %arg1[%c0_20, %c1_21, %c0_22, %c0_23] : memref<1x18x18x128xbf16, #tpu.memory_space<vmem>>, vector<1x16x16x128xbf16>
    %21 = vector.shape_cast %20 : vector<1x16x16x128xbf16> to vector<16x16x128xbf16>
    %22 = vector.shape_cast %21 : vector<16x16x128xbf16> to vector<256x128xbf16>
    %c3 = arith.constant 3 : index
    %c0_24 = arith.constant 0 : index
    %c0_25 = arith.constant 0 : index
    %23 = vector.load %arg2[%c3, %c0_24, %c0_25] : memref<9x128x128xbf16, #tpu.memory_space<vmem>>, vector<1x128x128xbf16>
    %24 = vector.shape_cast %23 : vector<1x128x128xbf16> to vector<128x128xbf16>
    %cst_26 = arith.constant dense<0.000000e+00> : vector<256x128xf32>
    %25 = tpu.matmul %22, %24, %cst_26 {dimension_numbers = #tpu.dot_dimension_numbers<[1], [0], [0], [1], [0, 0, 1, 1], [], []>} : vector<256x128xbf16>, vector<128x128xbf16>, vector<256x128xf32> -> vector<256x128xf32>
    %26 = arith.addf %19, %25 : vector<256x128xf32>
    %c0_27 = arith.constant 0 : index
    %c1_28 = arith.constant 1 : index
    %c1_29 = arith.constant 1 : index
    %c0_30 = arith.constant 0 : index
    %27 = vector.load %arg1[%c0_27, %c1_28, %c1_29, %c0_30] : memref<1x18x18x128xbf16, #tpu.memory_space<vmem>>, vector<1x16x16x128xbf16>
    %28 = vector.shape_cast %27 : vector<1x16x16x128xbf16> to vector<16x16x128xbf16>
    %29 = vector.shape_cast %28 : vector<16x16x128xbf16> to vector<256x128xbf16>
    %c4 = arith.constant 4 : index
    %c0_31 = arith.constant 0 : index
    %c0_32 = arith.constant 0 : index
    %30 = vector.load %arg2[%c4, %c0_31, %c0_32] : memref<9x128x128xbf16, #tpu.memory_space<vmem>>, vector<1x128x128xbf16>
    %31 = vector.shape_cast %30 : vector<1x128x128xbf16> to vector<128x128xbf16>
    %cst_33 = arith.constant dense<0.000000e+00> : vector<256x128xf32>
    %32 = tpu.matmul %29, %31, %cst_33 {dimension_numbers = #tpu.dot_dimension_numbers<[1], [0], [0], [1], [0, 0, 1, 1], [], []>} : vector<256x128xbf16>, vector<128x128xbf16>, vector<256x128xf32> -> vector<256x128xf32>
    %33 = arith.addf %26, %32 : vector<256x128xf32>
    %c0_34 = arith.constant 0 : index
    %c1_35 = arith.constant 1 : index
    %c2_36 = arith.constant 2 : index
    %c0_37 = arith.constant 0 : index
    %34 = vector.load %arg1[%c0_34, %c1_35, %c2_36, %c0_37] : memref<1x18x18x128xbf16, #tpu.memory_space<vmem>>, vector<1x16x16x128xbf16>
    %35 = vector.shape_cast %34 : vector<1x16x16x128xbf16> to vector<16x16x128xbf16>
    %36 = vector.shape_cast %35 : vector<16x16x128xbf16> to vector<256x128xbf16>
    %c5 = arith.constant 5 : index
    %c0_38 = arith.constant 0 : index
    %c0_39 = arith.constant 0 : index
    %37 = vector.load %arg2[%c5, %c0_38, %c0_39] : memref<9x128x128xbf16, #tpu.memory_space<vmem>>, vector<1x128x128xbf16>
    %38 = vector.shape_cast %37 : vector<1x128x128xbf16> to vector<128x128xbf16>
    %cst_40 = arith.constant dense<0.000000e+00> : vector<256x128xf32>
    %39 = tpu.matmul %36, %38, %cst_40 {dimension_numbers = #tpu.dot_dimension_numbers<[1], [0], [0], [1], [0, 0, 1, 1], [], []>} : vector<256x128xbf16>, vector<128x128xbf16>, vector<256x128xf32> -> vector<256x128xf32>
    %40 = arith.addf %33, %39 : vector<256x128xf32>
    %c0_41 = arith.constant 0 : index
    %c2_42 = arith.constant 2 : index
    %c0_43 = arith.constant 0 : index
    %c0_44 = arith.constant 0 : index
    %41 = vector.load %arg1[%c0_41, %c2_42, %c0_43, %c0_44] : memref<1x18x18x128xbf16, #tpu.memory_space<vmem>>, vector<1x16x16x128xbf16>
    %42 = vector.shape_cast %41 : vector<1x16x16x128xbf16> to vector<16x16x128xbf16>
    %43 = vector.shape_cast %42 : vector<16x16x128xbf16> to vector<256x128xbf16>
    %c6 = arith.constant 6 : index
    %c0_45 = arith.constant 0 : index
    %c0_46 = arith.constant 0 : index
    %44 = vector.load %arg2[%c6, %c0_45, %c0_46] : memref<9x128x128xbf16, #tpu.memory_space<vmem>>, vector<1x128x128xbf16>
    %45 = vector.shape_cast %44 : vector<1x128x128xbf16> to vector<128x128xbf16>
    %cst_47 = arith.constant dense<0.000000e+00> : vector<256x128xf32>
    %46 = tpu.matmul %43, %45, %cst_47 {dimension_numbers = #tpu.dot_dimension_numbers<[1], [0], [0], [1], [0, 0, 1, 1], [], []>} : vector<256x128xbf16>, vector<128x128xbf16>, vector<256x128xf32> -> vector<256x128xf32>
    %47 = arith.addf %40, %46 : vector<256x128xf32>
    %c0_48 = arith.constant 0 : index
    %c2_49 = arith.constant 2 : index
    %c1_50 = arith.constant 1 : index
    %c0_51 = arith.constant 0 : index
    %48 = vector.load %arg1[%c0_48, %c2_49, %c1_50, %c0_51] : memref<1x18x18x128xbf16, #tpu.memory_space<vmem>>, vector<1x16x16x128xbf16>
    %49 = vector.shape_cast %48 : vector<1x16x16x128xbf16> to vector<16x16x128xbf16>
    %50 = vector.shape_cast %49 : vector<16x16x128xbf16> to vector<256x128xbf16>
    %c7 = arith.constant 7 : index
    %c0_52 = arith.constant 0 : index
    %c0_53 = arith.constant 0 : index
    %51 = vector.load %arg2[%c7, %c0_52, %c0_53] : memref<9x128x128xbf16, #tpu.memory_space<vmem>>, vector<1x128x128xbf16>
    %52 = vector.shape_cast %51 : vector<1x128x128xbf16> to vector<128x128xbf16>
    %cst_54 = arith.constant dense<0.000000e+00> : vector<256x128xf32>
    %53 = tpu.matmul %50, %52, %cst_54 {dimension_numbers = #tpu.dot_dimension_numbers<[1], [0], [0], [1], [0, 0, 1, 1], [], []>} : vector<256x128xbf16>, vector<128x128xbf16>, vector<256x128xf32> -> vector<256x128xf32>
    %54 = arith.addf %47, %53 : vector<256x128xf32>
    %c0_55 = arith.constant 0 : index
    %c2_56 = arith.constant 2 : index
    %c2_57 = arith.constant 2 : index
    %c0_58 = arith.constant 0 : index
    %55 = vector.load %arg1[%c0_55, %c2_56, %c2_57, %c0_58] : memref<1x18x18x128xbf16, #tpu.memory_space<vmem>>, vector<1x16x16x128xbf16>
    %56 = vector.shape_cast %55 : vector<1x16x16x128xbf16> to vector<16x16x128xbf16>
    %57 = vector.shape_cast %56 : vector<16x16x128xbf16> to vector<256x128xbf16>
    %c8 = arith.constant 8 : index
    %c0_59 = arith.constant 0 : index
    %c0_60 = arith.constant 0 : index
    %58 = vector.load %arg2[%c8, %c0_59, %c0_60] : memref<9x128x128xbf16, #tpu.memory_space<vmem>>, vector<1x128x128xbf16>
    %59 = vector.shape_cast %58 : vector<1x128x128xbf16> to vector<128x128xbf16>
    %cst_61 = arith.constant dense<0.000000e+00> : vector<256x128xf32>
    %60 = tpu.matmul %57, %59, %cst_61 {dimension_numbers = #tpu.dot_dimension_numbers<[1], [0], [0], [1], [0, 0, 1, 1], [], []>} : vector<256x128xbf16>, vector<128x128xbf16>, vector<256x128xf32> -> vector<256x128xf32>
    %61 = arith.addf %54, %60 : vector<256x128xf32>
    %c0_62 = arith.constant 0 : index
    %c0_63 = arith.constant 0 : index
    %62 = vector.load %arg3[%c0_62, %c0_63] : memref<1x128xf32, #tpu.memory_space<vmem>>, vector<1x128xf32>
    %63 = vector.broadcast %62 : vector<1x128xf32> to vector<256x128xf32>
    %64 = arith.addf %61, %63 : vector<256x128xf32>
    %cst_64 = arith.constant 0.000000e+00 : f32
    %65 = vector.broadcast %cst_64 : f32 to vector<256x128xf32>
    %66 = arith.maximumf %64, %65 : vector<256x128xf32>
    %67 = arith.truncf %66 : vector<256x128xf32> to vector<256x128xbf16>
    %c0_65 = arith.constant 0 : index
    %c0_66 = arith.constant 0 : index
    %c0_67 = arith.constant 0 : index
    %68 = vector.load %arg4[%c0_65, %c0_66, %c0_67] : memref<1x256x128xbf16, #tpu.memory_space<vmem>>, vector<1x256x128xbf16>
    %69 = vector.shape_cast %68 : vector<1x256x128xbf16> to vector<256x128xbf16>
    %70 = vector.shape_cast %67 : vector<256x128xbf16> to vector<1x256x128xbf16>
    tpu.vector_store %arg4[%c0_65, %c0_66, %c0_67], %70 {strides = array<i32>} : memref<1x256x128xbf16, #tpu.memory_space<vmem>>, vector<1x256x128xbf16>,
    return
  }
  func.func @transform_0(%arg0: i32) -> (i32, i32, i32, i32) {
    %c0_i32 = arith.constant 0 : i32
    %c0_i32_0 = arith.constant 0 : i32
    %c0_i32_1 = arith.constant 0 : i32
    %c0_i32_2 = arith.constant 0 : i32
    return %arg0, %c0_i32, %c0_i32_0, %c0_i32_1 : i32, i32, i32, i32
  }
  func.func @transform_1(%arg0: i32) -> (i32, i32, i32) {
    %c0_i32 = arith.constant 0 : i32
    %c0_i32_0 = arith.constant 0 : i32
    %c0_i32_1 = arith.constant 0 : i32
    %c0_i32_2 = arith.constant 0 : i32
    return %c0_i32, %c0_i32_0, %c0_i32_1 : i32, i32, i32
  }
  func.func @transform_2(%arg0: i32) -> (i32, i32) {
    %c0_i32 = arith.constant 0 : i32
    %c0_i32_0 = arith.constant 0 : i32
    %c0_i32_1 = arith.constant 0 : i32
    return %c0_i32, %c0_i32_0 : i32, i32
  }
  func.func @transform_3(%arg0: i32) -> (i32, i32, i32) {
    %c0_i32 = arith.constant 0 : i32
    %c0_i32_0 = arith.constant 0 : i32
    %c0_i32_1 = arith.constant 0 : i32
    return %arg0, %c0_i32, %c0_i32_0 : i32, i32, i32
  }
}

module attributes {stable_mosaic.version = 11 : i64} {
  func.func @kernel(%arg0: i32, %arg1: memref<1x10x10x128xbf16, #tpu.memory_space<vmem>>, %arg2: memref<9x128x128xbf16, #tpu.memory_space<vmem>>, %arg3: memref<1x128xf32, #tpu.memory_space<vmem>>, %arg4: memref<1x64x128xbf16, #tpu.memory_space<vmem>>) attributes {dimension_semantics = [#tpu.dimension_semantics<parallel>], iteration_bounds = array<i64: 4>, scalar_prefetch = 0 : i64, scratch_operands = 0 : i64, tpu.core_type = #tpu.core_type<tc>, window_params = [{transform_indices = @transform_0, window_bounds = array<i64: 1, 10, 10, 128>}, {pipeline_mode = #tpu.pipeline_mode<synchronous>, transform_indices = @transform_1, window_bounds = array<i64: 9, 128, 128>}, {pipeline_mode = #tpu.pipeline_mode<synchronous>, transform_indices = @transform_2, window_bounds = array<i64: 1, 128>}, {transform_indices = @transform_3, window_bounds = array<i64: 1, 64, 128>}]} {
    %c0 = arith.constant 0 : index
    %c0_0 = arith.constant 0 : index
    %c0_1 = arith.constant 0 : index
    %c0_2 = arith.constant 0 : index
    %0 = vector.load %arg1[%c0, %c0_0, %c0_1, %c0_2] : memref<1x10x10x128xbf16, #tpu.memory_space<vmem>>, vector<1x8x8x128xbf16>
    %1 = vector.shape_cast %0 : vector<1x8x8x128xbf16> to vector<8x8x128xbf16>
    %2 = vector.shape_cast %1 : vector<8x8x128xbf16> to vector<64x128xbf16>
    %c0_3 = arith.constant 0 : index
    %c0_4 = arith.constant 0 : index
    %c0_5 = arith.constant 0 : index
    %3 = vector.load %arg2[%c0_3, %c0_4, %c0_5] : memref<9x128x128xbf16, #tpu.memory_space<vmem>>, vector<1x128x128xbf16>
    %4 = vector.shape_cast %3 : vector<1x128x128xbf16> to vector<128x128xbf16>
    %cst = arith.constant dense<0.000000e+00> : vector<64x128xf32>
    %5 = tpu.matmul %2, %4, %cst {dimension_numbers = #tpu.dot_dimension_numbers<[1], [0], [0], [1], [0, 0, 1, 1], [], []>} : vector<64x128xbf16>, vector<128x128xbf16>, vector<64x128xf32> -> vector<64x128xf32>
    %c0_6 = arith.constant 0 : index
    %c0_7 = arith.constant 0 : index
    %c1 = arith.constant 1 : index
    %c0_8 = arith.constant 0 : index
    %6 = vector.load %arg1[%c0_6, %c0_7, %c1, %c0_8] : memref<1x10x10x128xbf16, #tpu.memory_space<vmem>>, vector<1x8x8x128xbf16>
    %7 = vector.shape_cast %6 : vector<1x8x8x128xbf16> to vector<8x8x128xbf16>
    %8 = vector.shape_cast %7 : vector<8x8x128xbf16> to vector<64x128xbf16>
    %c1_9 = arith.constant 1 : index
    %c0_10 = arith.constant 0 : index
    %c0_11 = arith.constant 0 : index
    %9 = vector.load %arg2[%c1_9, %c0_10, %c0_11] : memref<9x128x128xbf16, #tpu.memory_space<vmem>>, vector<1x128x128xbf16>
    %10 = vector.shape_cast %9 : vector<1x128x128xbf16> to vector<128x128xbf16>
    %cst_12 = arith.constant dense<0.000000e+00> : vector<64x128xf32>
    %11 = tpu.matmul %8, %10, %cst_12 {dimension_numbers = #tpu.dot_dimension_numbers<[1], [0], [0], [1], [0, 0, 1, 1], [], []>} : vector<64x128xbf16>, vector<128x128xbf16>, vector<64x128xf32> -> vector<64x128xf32>
    %12 = arith.addf %5, %11 : vector<64x128xf32>
    %c0_13 = arith.constant 0 : index
    %c0_14 = arith.constant 0 : index
    %c2 = arith.constant 2 : index
    %c0_15 = arith.constant 0 : index
    %13 = vector.load %arg1[%c0_13, %c0_14, %c2, %c0_15] : memref<1x10x10x128xbf16, #tpu.memory_space<vmem>>, vector<1x8x8x128xbf16>
    %14 = vector.shape_cast %13 : vector<1x8x8x128xbf16> to vector<8x8x128xbf16>
    %15 = vector.shape_cast %14 : vector<8x8x128xbf16> to vector<64x128xbf16>
    %c2_16 = arith.constant 2 : index
    %c0_17 = arith.constant 0 : index
    %c0_18 = arith.constant 0 : index
    %16 = vector.load %arg2[%c2_16, %c0_17, %c0_18] : memref<9x128x128xbf16, #tpu.memory_space<vmem>>, vector<1x128x128xbf16>
    %17 = vector.shape_cast %16 : vector<1x128x128xbf16> to vector<128x128xbf16>
    %cst_19 = arith.constant dense<0.000000e+00> : vector<64x128xf32>
    %18 = tpu.matmul %15, %17, %cst_19 {dimension_numbers = #tpu.dot_dimension_numbers<[1], [0], [0], [1], [0, 0, 1, 1], [], []>} : vector<64x128xbf16>, vector<128x128xbf16>, vector<64x128xf32> -> vector<64x128xf32>
    %19 = arith.addf %12, %18 : vector<64x128xf32>
    %c0_20 = arith.constant 0 : index
    %c1_21 = arith.constant 1 : index
    %c0_22 = arith.constant 0 : index
    %c0_23 = arith.constant 0 : index
    %20 = vector.load %arg1[%c0_20, %c1_21, %c0_22, %c0_23] : memref<1x10x10x128xbf16, #tpu.memory_space<vmem>>, vector<1x8x8x128xbf16>
    %21 = vector.shape_cast %20 : vector<1x8x8x128xbf16> to vector<8x8x128xbf16>
    %22 = vector.shape_cast %21 : vector<8x8x128xbf16> to vector<64x128xbf16>
    %c3 = arith.constant 3 : index
    %c0_24 = arith.constant 0 : index
    %c0_25 = arith.constant 0 : index
    %23 = vector.load %arg2[%c3, %c0_24, %c0_25] : memref<9x128x128xbf16, #tpu.memory_space<vmem>>, vector<1x128x128xbf16>
    %24 = vector.shape_cast %23 : vector<1x128x128xbf16> to vector<128x128xbf16>
    %cst_26 = arith.constant dense<0.000000e+00> : vector<64x128xf32>
    %25 = tpu.matmul %22, %24, %cst_26 {dimension_numbers = #tpu.dot_dimension_numbers<[1], [0], [0], [1], [0, 0, 1, 1], [], []>} : vector<64x128xbf16>, vector<128x128xbf16>, vector<64x128xf32> -> vector<64x128xf32>
    %26 = arith.addf %19, %25 : vector<64x128xf32>
    %c0_27 = arith.constant 0 : index
    %c1_28 = arith.constant 1 : index
    %c1_29 = arith.constant 1 : index
    %c0_30 = arith.constant 0 : index
    %27 = vector.load %arg1[%c0_27, %c1_28, %c1_29, %c0_30] : memref<1x10x10x128xbf16, #tpu.memory_space<vmem>>, vector<1x8x8x128xbf16>
    %28 = vector.shape_cast %27 : vector<1x8x8x128xbf16> to vector<8x8x128xbf16>
    %29 = vector.shape_cast %28 : vector<8x8x128xbf16> to vector<64x128xbf16>
    %c4 = arith.constant 4 : index
    %c0_31 = arith.constant 0 : index
    %c0_32 = arith.constant 0 : index
    %30 = vector.load %arg2[%c4, %c0_31, %c0_32] : memref<9x128x128xbf16, #tpu.memory_space<vmem>>, vector<1x128x128xbf16>
    %31 = vector.shape_cast %30 : vector<1x128x128xbf16> to vector<128x128xbf16>
    %cst_33 = arith.constant dense<0.000000e+00> : vector<64x128xf32>
    %32 = tpu.matmul %29, %31, %cst_33 {dimension_numbers = #tpu.dot_dimension_numbers<[1], [0], [0], [1], [0, 0, 1, 1], [], []>} : vector<64x128xbf16>, vector<128x128xbf16>, vector<64x128xf32> -> vector<64x128xf32>
    %33 = arith.addf %26, %32 : vector<64x128xf32>
    %c0_34 = arith.constant 0 : index
    %c1_35 = arith.constant 1 : index
    %c2_36 = arith.constant 2 : index
    %c0_37 = arith.constant 0 : index
    %34 = vector.load %arg1[%c0_34, %c1_35, %c2_36, %c0_37] : memref<1x10x10x128xbf16, #tpu.memory_space<vmem>>, vector<1x8x8x128xbf16>
    %35 = vector.shape_cast %34 : vector<1x8x8x128xbf16> to vector<8x8x128xbf16>
    %36 = vector.shape_cast %35 : vector<8x8x128xbf16> to vector<64x128xbf16>
    %c5 = arith.constant 5 : index
    %c0_38 = arith.constant 0 : index
    %c0_39 = arith.constant 0 : index
    %37 = vector.load %arg2[%c5, %c0_38, %c0_39] : memref<9x128x128xbf16, #tpu.memory_space<vmem>>, vector<1x128x128xbf16>
    %38 = vector.shape_cast %37 : vector<1x128x128xbf16> to vector<128x128xbf16>
    %cst_40 = arith.constant dense<0.000000e+00> : vector<64x128xf32>
    %39 = tpu.matmul %36, %38, %cst_40 {dimension_numbers = #tpu.dot_dimension_numbers<[1], [0], [0], [1], [0, 0, 1, 1], [], []>} : vector<64x128xbf16>, vector<128x128xbf16>, vector<64x128xf32> -> vector<64x128xf32>
    %40 = arith.addf %33, %39 : vector<64x128xf32>
    %c0_41 = arith.constant 0 : index
    %c2_42 = arith.constant 2 : index
    %c0_43 = arith.constant 0 : index
    %c0_44 = arith.constant 0 : index
    %41 = vector.load %arg1[%c0_41, %c2_42, %c0_43, %c0_44] : memref<1x10x10x128xbf16, #tpu.memory_space<vmem>>, vector<1x8x8x128xbf16>
    %42 = vector.shape_cast %41 : vector<1x8x8x128xbf16> to vector<8x8x128xbf16>
    %43 = vector.shape_cast %42 : vector<8x8x128xbf16> to vector<64x128xbf16>
    %c6 = arith.constant 6 : index
    %c0_45 = arith.constant 0 : index
    %c0_46 = arith.constant 0 : index
    %44 = vector.load %arg2[%c6, %c0_45, %c0_46] : memref<9x128x128xbf16, #tpu.memory_space<vmem>>, vector<1x128x128xbf16>
    %45 = vector.shape_cast %44 : vector<1x128x128xbf16> to vector<128x128xbf16>
    %cst_47 = arith.constant dense<0.000000e+00> : vector<64x128xf32>
    %46 = tpu.matmul %43, %45, %cst_47 {dimension_numbers = #tpu.dot_dimension_numbers<[1], [0], [0], [1], [0, 0, 1, 1], [], []>} : vector<64x128xbf16>, vector<128x128xbf16>, vector<64x128xf32> -> vector<64x128xf32>
    %47 = arith.addf %40, %46 : vector<64x128xf32>
    %c0_48 = arith.constant 0 : index
    %c2_49 = arith.constant 2 : index
    %c1_50 = arith.constant 1 : index
    %c0_51 = arith.constant 0 : index
    %48 = vector.load %arg1[%c0_48, %c2_49, %c1_50, %c0_51] : memref<1x10x10x128xbf16, #tpu.memory_space<vmem>>, vector<1x8x8x128xbf16>
    %49 = vector.shape_cast %48 : vector<1x8x8x128xbf16> to vector<8x8x128xbf16>
    %50 = vector.shape_cast %49 : vector<8x8x128xbf16> to vector<64x128xbf16>
    %c7 = arith.constant 7 : index
    %c0_52 = arith.constant 0 : index
    %c0_53 = arith.constant 0 : index
    %51 = vector.load %arg2[%c7, %c0_52, %c0_53] : memref<9x128x128xbf16, #tpu.memory_space<vmem>>, vector<1x128x128xbf16>
    %52 = vector.shape_cast %51 : vector<1x128x128xbf16> to vector<128x128xbf16>
    %cst_54 = arith.constant dense<0.000000e+00> : vector<64x128xf32>
    %53 = tpu.matmul %50, %52, %cst_54 {dimension_numbers = #tpu.dot_dimension_numbers<[1], [0], [0], [1], [0, 0, 1, 1], [], []>} : vector<64x128xbf16>, vector<128x128xbf16>, vector<64x128xf32> -> vector<64x128xf32>
    %54 = arith.addf %47, %53 : vector<64x128xf32>
    %c0_55 = arith.constant 0 : index
    %c2_56 = arith.constant 2 : index
    %c2_57 = arith.constant 2 : index
    %c0_58 = arith.constant 0 : index
    %55 = vector.load %arg1[%c0_55, %c2_56, %c2_57, %c0_58] : memref<1x10x10x128xbf16, #tpu.memory_space<vmem>>, vector<1x8x8x128xbf16>
    %56 = vector.shape_cast %55 : vector<1x8x8x128xbf16> to vector<8x8x128xbf16>
    %57 = vector.shape_cast %56 : vector<8x8x128xbf16> to vector<64x128xbf16>
    %c8 = arith.constant 8 : index
    %c0_59 = arith.constant 0 : index
    %c0_60 = arith.constant 0 : index
    %58 = vector.load %arg2[%c8, %c0_59, %c0_60] : memref<9x128x128xbf16, #tpu.memory_space<vmem>>, vector<1x128x128xbf16>
    %59 = vector.shape_cast %58 : vector<1x128x128xbf16> to vector<128x128xbf16>
    %cst_61 = arith.constant dense<0.000000e+00> : vector<64x128xf32>
    %60 = tpu.matmul %57, %59, %cst_61 {dimension_numbers = #tpu.dot_dimension_numbers<[1], [0], [0], [1], [0, 0, 1, 1], [], []>} : vector<64x128xbf16>, vector<128x128xbf16>, vector<64x128xf32> -> vector<64x128xf32>
    %61 = arith.addf %54, %60 : vector<64x128xf32>
    %c0_62 = arith.constant 0 : index
    %c0_63 = arith.constant 0 : index
    %62 = vector.load %arg3[%c0_62, %c0_63] : memref<1x128xf32, #tpu.memory_space<vmem>>, vector<1x128xf32>
    %63 = vector.broadcast %62 : vector<1x128xf32> to vector<64x128xf32>
    %64 = arith.addf %61, %63 : vector<64x128xf32>
    %cst_64 = arith.constant 0.000000e+00 : f32
    %65 = vector.broadcast %cst_64 : f32 to vector<64x128xf32>
    %66 = arith.maximumf %64, %65 : vector<64x128xf32>
    %67 = arith.truncf %66 : vector<64x128xf32> to vector<64x128xbf16>
    %c0_65 = arith.constant 0 : index
    %c0_66 = arith.constant 0 : index
    %c0_67 = arith.constant 0 : index
    %68 = vector.load %arg4[%c0_65, %c0_66, %c0_67] : memref<1x64x128xbf16, #tpu.memory_space<vmem>>, vector<1x64x128xbf16>
    %69 = vector.shape_cast %68 : vector<1x64x128xbf16> to vector<64x128xbf16>
    %70 = vector.shape_cast %67 : vector<64x128xbf16> to vector<1x64x128xbf16>
    tpu.vector_store %arg4[%c0_65, %c0_66, %c0_67], %70 {strides = array<i32>} : memref<1x64x128xbf16, #tpu.memory_space<vmem>>, vector<1x64x128xbf16>,
    return
  }
  func.func @transform_0(%arg0: i32) -> (i32, i32, i32, i32) {
    %c0_i32 = arith.constant 0 : i32
    %c0_i32_0 = arith.constant 0 : i32
    %c0_i32_1 = arith.constant 0 : i32
    %c0_i32_2 = arith.constant 0 : i32
    return %arg0, %c0_i32, %c0_i32_0, %c0_i32_1 : i32, i32, i32, i32
  }
  func.func @transform_1(%arg0: i32) -> (i32, i32, i32) {
    %c0_i32 = arith.constant 0 : i32
    %c0_i32_0 = arith.constant 0 : i32
    %c0_i32_1 = arith.constant 0 : i32
    %c0_i32_2 = arith.constant 0 : i32
    return %c0_i32, %c0_i32_0, %c0_i32_1 : i32, i32, i32
  }
  func.func @transform_2(%arg0: i32) -> (i32, i32) {
    %c0_i32 = arith.constant 0 : i32
    %c0_i32_0 = arith.constant 0 : i32
    %c0_i32_1 = arith.constant 0 : i32
    return %c0_i32, %c0_i32_0 : i32, i32
  }
  func.func @transform_3(%arg0: i32) -> (i32, i32, i32) {
    %c0_i32 = arith.constant 0 : i32
    %c0_i32_0 = arith.constant 0 : i32
    %c0_i32_1 = arith.constant 0 : i32
    return %arg0, %c0_i32, %c0_i32_0 : i32, i32, i32
  }
}

module attributes {stable_mosaic.version = 11 : i64} {
  func.func @_fro_diff_kernel(%arg0: i32, %arg1: memref<128x128xbf16, #tpu.memory_space<vmem>>, %arg2: memref<128x128xbf16, #tpu.memory_space<vmem>>, %arg3: memref<1x1xf32, #tpu.memory_space<vmem>>, %arg4: memref<1x1xf32, #tpu.memory_space<vmem>>) attributes {dimension_semantics = [#tpu.dimension_semantics<arbitrary>], iteration_bounds = array<i64: 1>, scalar_prefetch = 0 : i64, scratch_operands = 1 : i64, tpu.core_type = #tpu.core_type<tc>, window_params = [{transform_indices = @transform_0, window_bounds = array<i64: 128, 128>}, {transform_indices = @transform_1, window_bounds = array<i64: 128, 128>}, {pipeline_mode = #tpu.pipeline_mode<synchronous>, transform_indices = @transform_2, window_bounds = array<i64: 1, 1>}]} {
    %c0_i32 = arith.constant 0 : i32
    %0 = arith.cmpi eq, %arg0, %c0_i32 : i32
    %1 = arith.extui %0 : i1 to i32
    %c0_i32_0 = arith.constant 0 : i32
    %2 = arith.cmpi ne, %1, %c0_i32_0 : i32
    scf.if %2 {
      %cst_10 = arith.constant 0.000000e+00 : f32
      %20 = vector.broadcast %cst_10 : f32 to vector<1x1xf32>
      %c0_11 = arith.constant 0 : index
      %c0_12 = arith.constant 0 : index
      %21 = vector.load %arg4[%c0_11, %c0_12] : memref<1x1xf32, #tpu.memory_space<vmem>>, vector<1x1xf32>
      tpu.vector_store %arg4[%c0_11, %c0_12], %20 {strides = array<i32>} : memref<1x1xf32, #tpu.memory_space<vmem>>, vector<1x1xf32>,
    } else {
    }
    %c0 = arith.constant 0 : index
    %c0_1 = arith.constant 0 : index
    %3 = vector.load %arg1[%c0, %c0_1] : memref<128x128xbf16, #tpu.memory_space<vmem>>, vector<128x128xbf16>
    %4 = arith.extf %3 : vector<128x128xbf16> to vector<128x128xf32>
    %c0_2 = arith.constant 0 : index
    %c0_3 = arith.constant 0 : index
    %5 = vector.load %arg2[%c0_2, %c0_3] : memref<128x128xbf16, #tpu.memory_space<vmem>>, vector<128x128xbf16>
    %6 = arith.extf %5 : vector<128x128xbf16> to vector<128x128xf32>
    %7 = arith.subf %4, %6 : vector<128x128xf32>
    %c0_4 = arith.constant 0 : index
    %c0_5 = arith.constant 0 : index
    %8 = vector.load %arg4[%c0_4, %c0_5] : memref<1x1xf32, #tpu.memory_space<vmem>>, vector<1x1xf32>
    %9 = arith.mulf %7, %7 : vector<128x128xf32>
    %10 = vector.shape_cast %9 : vector<128x128xf32> to vector<1x128x128xf32>
    %cst = arith.constant dense<0.000000e+00> : vector<1xf32>
    %11 = vector.multi_reduction <add>, %10, %cst [1, 2] : vector<1x128x128xf32> to vector<1xf32>
    %12 = vector.shape_cast %11 : vector<1xf32> to vector<1x1x1xf32>
    %13 = vector.extract %12[0, 0, 0] : f32 from vector<1x1x1xf32>
    %14 = vector.broadcast %13 : f32 to vector<1x1xf32>
    %15 = arith.addf %8, %14 : vector<1x1xf32>
    %c0_6 = arith.constant 0 : index
    %c0_7 = arith.constant 0 : index
    %16 = vector.load %arg4[%c0_6, %c0_7] : memref<1x1xf32, #tpu.memory_space<vmem>>, vector<1x1xf32>
    tpu.vector_store %arg4[%c0_6, %c0_7], %15 {strides = array<i32>} : memref<1x1xf32, #tpu.memory_space<vmem>>, vector<1x1xf32>,
    %c0_i32_8 = arith.constant 0 : i32
    %17 = arith.cmpi eq, %arg0, %c0_i32_8 : i32
    %18 = arith.extui %17 : i1 to i32
    %c0_i32_9 = arith.constant 0 : i32
    %19 = arith.cmpi ne, %18, %c0_i32_9 : i32
    scf.if %19 {
      %c0_10 = arith.constant 0 : index
      %c0_11 = arith.constant 0 : index
      %20 = vector.load %arg4[%c0_10, %c0_11] : memref<1x1xf32, #tpu.memory_space<vmem>>, vector<1x1xf32>
      %21 = math.sqrt %20 : vector<1x1xf32>
      %c0_12 = arith.constant 0 : index
      %c0_13 = arith.constant 0 : index
      %22 = vector.load %arg3[%c0_12, %c0_13] : memref<1x1xf32, #tpu.memory_space<vmem>>, vector<1x1xf32>
      tpu.vector_store %arg3[%c0_12, %c0_13], %21 {strides = array<i32>} : memref<1x1xf32, #tpu.memory_space<vmem>>, vector<1x1xf32>,
    } else {
    }
    return
  }
  func.func @transform_0(%arg0: i32) -> (i32, i32) {
    %c0_i32 = arith.constant 0 : i32
    %c0_i32_0 = arith.constant 0 : i32
    return %arg0, %c0_i32 : i32, i32
  }
  func.func @transform_1(%arg0: i32) -> (i32, i32) {
    %c1_i32 = arith.constant 1 : i32
    %0 = arith.addi %arg0, %c1_i32 : i32
    %c0_i32 = arith.constant 0 : i32
    %c0_i32_0 = arith.constant 0 : i32
    return %0, %c0_i32 : i32, i32
  }
  func.func @transform_2(%arg0: i32) -> (i32, i32) {
    %c0_i32 = arith.constant 0 : i32
    %c0_i32_0 = arith.constant 0 : i32
    %c0_i32_1 = arith.constant 0 : i32
    return %c0_i32, %c0_i32_0 : i32, i32
  }
}

</mosaic_0001>

<bundles_post_ra>
// kernel: _lambda_.7
= control target key start
LH: loop header
LB: loop body
LE: loop exit
PB: predicated region body
PF: predicated region fallthrough
CT: control target
= control target key end

     0   :  { %s3095_s12 = smov 0   ;;  %s3641_s0 = inlined_call_operand.vmem [shape: bf16[4,10,10,128], index: 0, kind: input, shape index: {}]   ;;  %s3642_s1 = inlined_call_operand.vmem [shape: bf16[9,128,128], index: 1, kind: input, shape index: {}]   ;;  %s3643_s2 = inlined_call_operand.vmem [shape: f32[1,128], index: 2, kind: input, shape index: {}]   ;;  %s3644_s3 = inlined_call_operand.vmem [shape: bf16[4,64,128], index: 3, kind: output, shape index: {}]  }
   0x1 LB: > { %s2259_s13 = sadd.s32 4294967295, %s3073_s12   ;;  %p2263_p0 = scmp.ge.s32.totalorder %s3073_s12, 1  ;;  %s3073_s12 = sphi %s3095_s12, %s13_s12  }
   0x2   : > { %p137_p1 = scmp.lt.s32.totalorder %s3073_s12, 5 }
   0x4   : > { %p138_p2 = pnand %p2263_p0, %p137_p1 }
   0x6   : > { %141 = sbr.rel (%p138_p2) target bundleno = 381 (0x17d), region = 32 }
   0xb   : > { %v2983_v0 = vld [vmem:[%s3642_s1 + $0x78] sm:$0xff]   ;;  %p161_p3 = scmp.lt.s32.totalorder %s2259_s13, 3  ;;  %v2985_v2 = vld [vmem:[%s3642_s1 + $0x70] sm:$0xff]   ;;  %v2987_v4 = vld [vmem:[%s3642_s1 + $0x68] sm:$0xff]   ;;  %vm204_vm0 = vsmask.f32 3328 }
   0xc   : > { %v2984_v1 = vld [vmem:[%s3642_s1 + $0x38] sm:$0xff]   ;;  %2742 = vmatprep.subr.bf16.mxu0 %v2983_v0  ;;  %v2986_v3 = vld [vmem:[%s3642_s1 + $0x30] sm:$0xff]   ;;  %v2988_v5 = vld [vmem:[%s3642_s1 + $0x28] sm:$0xff]   ;;  %vm205_vm1 = vsmask.f32 7440  ;;  %vm626_vm3 = vcmask 1042432  }
   0xd   : > { %2766 = vmatprep.subr.bf16.mxu1 %v2984_v1  ;;  %2743 = vmatpush3.bf16.msra.mxu0 %v2983_v0  ;;  %s3656_s13 = smov (!%p161_p3, %s2259_s13), 3  ;;  %v2989_v6 = vld [vmem:[%s3642_s1 + $0x60] sm:$0xff]   ;;  %v2991_v8 = vld [vmem:[%s3642_s1 + $0x58] sm:$0xff]   ;;  %v2993_v10 = vld [vmem:[%s3642_s1 + $0x50] sm:$0xff]   ;;  %vm627_vm4 = vcmask 1046532  }
   0xe   : > { %2767 = vmatpush3.bf16.msra.mxu1 %v2984_v1  ;;  %2744 = vmatprep.subr.bf16.mxu0 %v2985_v2  ;;  %v2990_v7 = vld [vmem:[%s3642_s1 + $0x20] sm:$0xff]   ;;  %s2974_s30 = smul.u32 80, %s3656_s13  ;;  %v2992_v9 = vld [vmem:[%s3642_s1 + $0x18] sm:$0xff]   ;;  %v2994_v14 = vld [vmem:[%s3642_s1 + $0x10] sm:$0xff]   ;;  %s2602_s18 = sshll.u32 %s3656_s13, 5 }
   0xf   : > { %2768 = vmatprep.subr.bf16.mxu1 %v2986_v3  ;;  %v2995_v17 = vld [vmem:[%s3642_s1 + $0x48] sm:$0xff]   ;;  %vm3182_vm2 = vmor %vm204_vm0, %vm205_vm1  ;;  %v2997_v46 = vld [vmem:[%s3642_s1 + $0x40] sm:$0xff]   ;;  %s170_s21 = scalar_lea.vmem %s3644_s3, %s2602_s18 }
  0x10   : > { %s3139_s10 = scalar_lea.vmem %s3641_s0, %s2974_s30  ;;  %v2996_v23 = vld [vmem:[%s3642_s1 + $0x8] sm:$0xff]   ;;  %v2998_v50 = vld [vmem:[%s3642_s1] sm:$0xff]   ;;  %v3001_v59 = vld [vmem:[%s3642_s1 + $0xb8] sm:$0xff]  }
  0x11   : > { %2745 = vmatpush3.bf16.msra.mxu0 %v2985_v2  ;;  %v172_v11 = vld [vmem:[%s3139_s10] sm:$0xf]  ;;  %v173_v12 = vld [vmem:[%s3139_s10 + $0x8] sm:$0xf]  ;;  %v3147_v13 = vld [vmem:[%s3139_s10 + $0x4] sm:$0x1] }
  0x12   : > { %2769 = vmatpush3.bf16.msra.mxu1 %v2986_v3  ;;  %2746 = vmatprep.subr.bf16.mxu0 %v2987_v4  ;;  %v3153_v15 = vld [vmem:[%s3139_s10 + $0xc] sm:$0x1]  ;;  %v2295_v16 = vcombine.low %v172_v11, %v173_v12  ;;  %v208_v18 = vshrl.u32 %v172_v11, 16  ;;  %v211_v19 = vshll.u32 %v172_v11, 16  ;;  %v217_v20 = vshll.u32 %v3147_v13, 16  ;;  %v3002_v62 = vld [vmem:[%s3642_s1 + $0xf8] sm:$0xff]   ;;  %vm3265_vm5 = vmor %vm626_vm3, %vm627_vm4 }
  0x13   : > { %2770 = vmatprep.subr.bf16.mxu1 %v2988_v5  ;;  %v222_v21 = vshrl.u32 %v173_v12, 16  ;;  %v3160_v22 = vld [vmem:[%s3139_s10 + $0x10] sm:$0xf]  ;;  %v225_v24 = vshll.u32 %v173_v12, 16  ;;  %v231_v25 = vshll.u32 %v3153_v15, 16  ;;  %v3006_v11 = vld [vmem:[%s3642_s1 + $0xe8] sm:$0xff]  }
  0x14   : > { %2782 = vmatprep.mubr.bf16.mxu1 %v2295_v16  ;;  %v3167_v26 = vld [vmem:[%s3139_s10 + $0x18] sm:$0xf]  ;;  %v210_v27 = vrot.slane %v208_v18, 4  ;;  %v213_v28 = vrot.slane %v211_v19, 5  ;;  %v219_v29 = vrot.slane %v217_v20, 5  ;;  %v236_v35 = vshrl.u32 %v3160_v22, 16 }
  0x15   : > { %2747 = vmatpush3.bf16.msra.mxu0 %v2987_v4  ;;  %v224_v30 = vrot.slane %v222_v21, 4  ;;  %v3170_v31 = vld [vmem:[%s3139_s10 + $0x14] sm:$0x1]  ;;  %v227_v32 = vrot.slane %v225_v24, 5  ;;  %v233_v33 = vrot.slane %v231_v25, 5  ;;  %v239_v36 = vshll.u32 %v3160_v22, 16 }
  0x16   : > { %2771 = vmatpush3.bf16.msra.mxu1 %v2988_v5  ;;  %2748 = vmatprep.subr.bf16.mxu0 %v2989_v6  ;;  %v3173_v34 = vld [vmem:[%s3139_s10 + $0x1c] sm:$0x1]  ;;  %v214_v37 = vor.u32 %v213_v28, %v210_v27  ;;  %v245_v38 = vshll.u32 %v3170_v31, 16  ;;  %v250_v39 = vshrl.u32 %v3167_v26, 16  ;;  %v253_v40 = vshll.u32 %v3167_v26, 16  ;;  %v3003_v3 = vld [vmem:[%s3642_s1 + $0xb0] sm:$0xff]  }
  0x17   : > { %2772 = vmatprep.subr.bf16.mxu1 %v2990_v7  ;;  %v228_v42 = vor.u32 %v227_v32, %v224_v30  ;;  %v238_v43 = vrot.slane %v236_v35, 4  ;;  %v241_v44 = vrot.slane %v239_v36, 5  ;;  %v259_v45 = vshll.u32 %v3173_v34, 16  ;;  %v3004_v5 = vld [vmem:[%s3642_s1 + $0xf0] sm:$0xff]   ;;  %v3238_v28 = vld [vmem:[%s3139_s10 + $0x3c] sm:$0x1] }
  0x18   : > { %v215_v47 = vrot.slane %v214_v37, 4  ;;  %v252_v48 = vrot.slane %v250_v39, 4  ;;  %v255_v49 = vrot.slane %v253_v40, 5  ;;  %v247_v53 = vrot.slane %v245_v38, 5  ;;  %v178_v18 = vld [vmem:[%s3139_s10 + $0x30] sm:$0xf] }
  0x19   : > { %2749 = vmatpush3.bf16.msra.mxu0 %v2989_v6  ;;  %v229_v51 = vrot.slane %v228_v42, 4  ;;  %v242_v52 = vor.u32 %v241_v44, %v238_v43  ;;  %v261_v56 = vrot.slane %v259_v45, 5  ;;  %v2296_v2 = vcombine.low %v3160_v22, %v3167_v26  ;;  %v176_v6 = vld [vmem:[%s3139_s10 + $0x20] sm:$0xf]  ;;  %v179_v22 = vld [vmem:[%s3139_s10 + $0x38] sm:$0xf] }
  0x1a   : > { %2773 = vmatpush3.bf16.msra.mxu1 %v2990_v7  ;;  %2750 = vmatprep.subr.bf16.mxu0 %v2991_v8  ;;  %v220_v54 = vsel %vm3182_vm2, %v215_v47, %v219_v29  ;;  %v256_v55 = vor.u32 %v255_v49, %v252_v48  ;;  %v631_v4 = vrot.slane %v3147_v13, 5  ;;  %v3005_v7 = vld [vmem:[%s3642_s1 + $0xa8] sm:$0xff]   ;;  %v264_v12 = vshrl.u32 %v176_v6, 16  ;;  %v3007_v39 = vld [vmem:[%s3642_s1 + $0xa0] sm:$0xff]   ;;  %v605_v13 = vld [vmem:[%s3139_s10 + $0x18] sm:$0xe] }
  0x1b   : > { %2774 = vmatprep.subr.bf16.mxu1 %v2992_v9  ;;  %v234_v57 = vsel %vm3182_vm2, %v229_v51, %v233_v33  ;;  %v243_v58 = vrot.slane %v242_v52, 4  ;;  %v292_v32 = vshrl.u32 %v178_v18, 16  ;;  %v295_v33 = vshll.u32 %v178_v18, 16  ;;  %v3008_v45 = vld [vmem:[%s3642_s1 + $0xe0] sm:$0xff]  }
  0x1c   : > { %v2283_v60 = vcombine.low %v220_v54, %v234_v57  ;;  %v257_v61 = vrot.slane %v256_v55, 4  ;;  %v266_v24 = vrot.slane %v264_v12, 4  ;;  %v306_v37 = vshrl.u32 %v179_v22, 16  ;;  %v3009_v57 = vld [vmem:[%s3642_s1 + $0x98] sm:$0xff]  }
  0x1d   : > { %2751 = vmatpush3.bf16.msra.mxu0 %v2991_v8  ;;  %v248_v63 = vsel %vm3182_vm2, %v243_v58, %v247_v53  ;;  %v177_v8 = vld [vmem:[%s3139_s10 + $0x28] sm:$0xf]  ;;  %v309_v38 = vshll.u32 %v179_v22, 16  ;;  %v294_v42 = vrot.slane %v292_v32, 4  ;;  %v297_v43 = vrot.slane %v295_v33, 5 }
  0x1e   : > { %2775 = vmatpush3.bf16.msra.mxu1 %v2992_v9  ;;  %2752 = vmatprep.subr.bf16.mxu0 %v2993_v10  ;;  %v262_v0 = vsel %vm3182_vm2, %v257_v61, %v261_v56  ;;  %v3222_v9 = vld [vmem:[%s3139_s10 + $0x24] sm:$0x1]  ;;  %v281_v19 = vshll.u32 %v177_v8, 16  ;;  %v2297_v21 = vcombine.low %v176_v6, %v177_v8  ;;  %v315_v44 = vshll.u32 %v3238_v28, 16 }
  0x1f   : > { %2776 = vmatprep.subr.bf16.mxu1 %v2994_v14  ;;  %2758 = vmatprep.mubr.bf16.mxu0 %v2283_v60  ;;  %v2284_v1 = vcombine.low %v248_v63, %v262_v0  ;;  %v273_v16 = vshll.u32 %v3222_v9, 16  ;;  %v308_v47 = vrot.slane %v306_v37, 4  ;;  %v311_v48 = vrot.slane %v309_v38, 5  ;;  %v602_v63 = vld [vmem:[%s3139_s10] sm:$0xe] }
  0x20   : > { %v283_v29 = vrot.slane %v281_v19, 5  ;;  %v2298_v52 = vcombine.low %v178_v18, %v179_v22  ;;  %v635_v53 = vrot.slane %v3153_v15, 5  ;;  %v317_v56 = vrot.slane %v315_v44, 5  ;;  %v3010_v15 = vld [vmem:[%s3642_s1 + $0xd8] sm:$0xff]   ;;  %v603_v0 = vld [vmem:[%s3139_s10 + $0x8] sm:$0xe] }
  0x21   : > { %2753 = vmatpush3.bf16.msra.mxu0 %v2993_v10  ;;  %v3225_v10 = vld [vmem:[%s3139_s10 + $0x2c] sm:$0x1]  ;;  %v275_v26 = vrot.slane %v273_v16, 5  ;;  %v312_v55 = vor.u32 %v311_v48, %v308_v47  ;;  %v604_v18 = vld [vmem:[%s3139_s10 + $0x10] sm:$0xe]  ;;  %v639_v19 = vrot.slane %v3170_v31, 5 }
  0x22   : > { %2777 = vmatpush3.bf16.msra.mxu1 %v2994_v14  ;;  %2754 = vmatprep.subr.bf16.mxu0 %v2995_v17  ;;  %v267_v14 = vshll.u32 %v176_v6, 16  ;;  %v287_v20 = vshll.u32 %v3225_v10, 16  ;;  %v3015_v16 = vld [vmem:[%s3642_s1 + $0x88] sm:$0xff]   ;;  %v2310_v22 = vrot.slane %v605_v13, 9  ;;  %v3018_v31 = vld [vmem:[%s3642_s1 + $0xc0] sm:$0xff]  }
  0x23   : > { %2778 = vmatprep.subr.bf16.mxu1 %v2996_v23  ;;  %v313_v61 = vrot.slane %v312_v55, 4  ;;  %v3020_v37 = vld [vmem:[%s3139_s10 + $0x18] ss:$8 sps:$4 sm:$0xff]   ;;  %v3027_v48 = vld [vmem:[%s3139_s10 + $0x28] ss:$8 sps:$4 sm:$0xff]  }
  0x24   : > { %v269_v25 = vrot.slane %v267_v14, 5  ;;  %v289_v30 = vrot.slane %v287_v20, 5  ;;  %v643_v20 = vrot.slane %v3173_v34, 5  ;;  %v651_v34 = vrot.slane %v3225_v10, 5  ;;  %v3022_v10 = vld [vmem:[%s3642_s1 + $0x178] sm:$0xff]  }
  0x25   : > { %2755 = vmatpush3.bf16.msra.mxu0 %v2995_v17  ;;  %v278_v17 = vshrl.u32 %v177_v8, 16  ;;  %v3019_v8 = vld [vmem:[%s3139_s10 + $0x8] ss:$8 sps:$4 sm:$0xff]  }
  0x26   : > { %2779 = vmatpush3.bf16.msra.mxu1 %v2996_v23  ;;  %2756 = vmatprep.subr.bf16.mxu0 %v2997_v46  ;;  %v3235_v23 = vld [vmem:[%s3139_s10 + $0x34] sm:$0x1]  ;;  %v270_v35 = vor.u32 %v269_v25, %v266_v24  ;;  %v606_v24 = vld [vmem:[%s3139_s10 + $0x20] sm:$0xe]  ;;  %v607_v25 = vld [vmem:[%s3139_s10 + $0x28] sm:$0xe] }
  0x27   : > { %2780 = vmatprep.subr.bf16.mxu1 %v2998_v50  ;;  %v280_v27 = vrot.slane %v278_v17, 4  ;;  %v301_v36 = vshll.u32 %v3235_v23, 16  ;;  %v2312_v32 = vrot.slane %v607_v25, 9  ;;  %v655_v38 = vrot.slane %v3235_v23, 5  ;;  %v3024_v23 = vld [vmem:[%s3642_s1 + $0x170] sm:$0xff]  }
  0x28   : > { %v2379_v55 = vld [vmem:[%s3139_s10 + $0x8] sm:$0xf]  ;;  %v2386_v25 = vld [vmem:[%s3139_s10 + $0x24] sm:$0x1] }
  0x29   : > { %2757 = vmatpush3.bf16.msra.mxu0 %v2997_v46  ;;  %v284_v40 = vor.u32 %v283_v29, %v280_v27  ;;  %v271_v46 = vrot.slane %v270_v35, 4  ;;  %v303_v51 = vrot.slane %v301_v36, 5  ;;  %v647_v27 = vrot.slane %v3222_v9, 5  ;;  %v3021_v29 = vld [vmem:[%s3642_s1 + $0x138] sm:$0xff]   ;;  %v608_v35 = vld [vmem:[%s3139_s10 + $0x30] sm:$0xe] }
  0x2a   : > { %2781 = vmatpush3.bf16.msra.mxu1 %v2998_v50  ;;  %2790 = vmatprep.subr.bf16.mxu0 %v3001_v59  ;;  %v298_v50 = vor.u32 %v297_v43, %v294_v42  ;;  %v644_v9 = vsel %vm3265_vm5, %v2310_v22, %v643_v20  ;;  %v609_v36 = vld [vmem:[%s3139_s10 + $0x38] sm:$0xe]  ;;  %v652_v42 = vsel %vm3265_vm5, %v2312_v32, %v651_v34  ;;  %v659_v43 = vrot.slane %v3238_v28, 5  ;;  %v2384_v20 = vld [vmem:[%s3139_s10 + $0x1c] sm:$0x1] }
  0x2b   : > { %2814 = vmatprep.subr.bf16.mxu1 %v3002_v62  ;;  %v285_v49 = vrot.slane %v284_v40, 4  ;;  %v276_v54 = vsel %vm3182_vm2, %v271_v46, %v275_v26  ;;  %v3017_v26 = vld [vmem:[%s3642_s1 + $0x80] sm:$0xff]   ;;  %v2313_v44 = vrot.slane %v608_v35, 9  ;;  %v3023_v46 = vld [vmem:[%s3642_s1 + $0x130] sm:$0xff]   ;;  %v3031_v22 = vld [vmem:[%s3642_s1 + $0x118] sm:$0xff]  }
  0x2c   : > { %2759 = vmatmul.mubr.bf16.vlgmr.msra.gmra.mxu0 %v2284_v1  ;;  %v3032_v34 = vld [vmem:[%s3642_s1 + $0x158] sm:$0xff]   ;;  %v3033_v35 = vld [vmem:[%s3642_s1 + $0x110] sm:$0xff]  }
  0x2d   : > { %2783 = vmatmul.mubr.bf16.vlgmr.msra.gmra.mxu1 %v2296_v2  ;;  %2791 = vmatpush3.bf16.msra.mxu0 %v3001_v59  ;;  %v290_v58 = vsel %vm3182_vm2, %v285_v49, %v289_v30  ;;  %v299_v59 = vrot.slane %v298_v50, 4  ;;  %v318_v2 = vsel %vm3182_vm2, %v313_v61, %v317_v56  ;;  %v2311_v30 = vrot.slane %v606_v24, 9  ;;  %v3025_v50 = vld [vmem:[%s3642_s1 + $0x128] sm:$0xff]  }
  0x2e   : > { %2815 = vmatpush3.bf16.msra.mxu1 %v3002_v62  ;;  %2792 = vmatprep.subr.bf16.mxu0 %v3003_v3  ;;  %v2285_v60 = vcombine.low %v276_v54, %v290_v58  ;;  %v656_v28 = vsel %vm3265_vm5, %v2313_v44, %v655_v38  ;;  %v3029_v54 = vld [vmem:[%s3642_s1 + $0x120] sm:$0xff]   ;;  %v2380_v56 = vld [vmem:[%s3139_s10 + $0xc] sm:$0x1]  ;;  %v2381_v58 = vld [vmem:[%s3139_s10 + $0x10] sm:$0xf] }
  0x2f   : > { %2816 = vmatprep.subr.bf16.mxu1 %v3004_v5  ;;  %2786 = vmatprep.mubr.bf16.mxu1 %v2297_v21  ;;  %v304_v62 = vsel %vm3182_vm2, %v299_v59, %v303_v51  ;;  %v2309_v21 = vrot.slane %v604_v18, 9  ;;  %v648_v40 = vsel %vm3265_vm5, %v2311_v30, %v647_v27  ;;  %v3026_v51 = vld [vmem:[%s3642_s1 + $0x168] sm:$0xff]   ;;  %v2382_v59 = vld [vmem:[%s3139_s10 + $0x14] sm:$0x1]  ;;  %v1012_v61 = vshll.u32 %v2380_v56, 16 }
  0x30   : > { %2762 = vmatprep.mubr.bf16.mxu0 %v2285_v60  ;;  %v2286_v6 = vcombine.low %v304_v62, %v318_v2  ;;  %v2333_v47 = vcombine.low %v648_v40, %v652_v42  ;;  %v1006_v60 = vshll.u32 %v2379_v55, 16  ;;  %v1017_v62 = vshrl.u32 %v2381_v58, 16  ;;  %v2423_v2 = vld [vmem:[%s3139_s10 + $0x8] sm:$0xe]  ;;  %v3034_v40 = vld [vmem:[%s3642_s1 + $0x150] sm:$0xff]  }
  0x31   : > { %2793 = vmatpush3.bf16.msra.mxu0 %v3003_v3  ;;  %v2307_v3 = vrot.slane %v602_v63, 9  ;;  %v640_v33 = vsel %vm3265_vm5, %v2309_v21, %v639_v19  ;;  %v1020_v63 = vshll.u32 %v2381_v58, 16  ;;  %v1298_v19 = vrot.slane %v2382_v59, 5  ;;  %v2385_v21 = vld [vmem:[%s3139_s10 + $0x20] sm:$0xf] }
  0x32   : > { %2817 = vmatpush3.bf16.msra.mxu1 %v3004_v5  ;;  %2794 = vmatprep.subr.bf16.mxu0 %v3005_v7  ;;  %v2308_v5 = vrot.slane %v603_v0, 9  ;;  %v1026_v0 = vshll.u32 %v2382_v59, 16  ;;  %v1045_v32 = vshrl.u32 %v2385_v21, 16  ;;  %v2387_v59 = vld [vmem:[%s3139_s10 + $0x28] sm:$0xf] }
  0x33   : > { %2818 = vmatprep.subr.bf16.mxu1 %v3006_v11  ;;  %v632_v12 = vsel %vm3265_vm5, %v2307_v3, %v631_v4  ;;  %v3016_v4 = vld [vmem:[%s3642_s1 + $0xc8] sm:$0xff]  }
  0x34   : > { %v636_v14 = vsel %vm3265_vm5, %v2308_v5, %v635_v53  ;;  %2763 = vmatmul.mubr.bf16.gmra.mxu0 %v2286_v6  ;;  %v1008_v5 = vrot.slane %v1006_v60, 5  ;;  %v2424_v6 = vld [vmem:[%s3139_s10 + $0x10] sm:$0xe]  ;;  %v1047_v44 = vrot.slane %v1045_v32, 4 }
  0x35   : > { %2795 = vmatpush3.bf16.msra.mxu0 %v3005_v7  ;;  %2787 = vmatmul.mubr.bf16.gmra.mxu1 %v2298_v52  ;;  %v3013_v7 = vld [vmem:[%s3642_s1 + $0x90] sm:$0xff]   ;;  %v2331_v17 = vcombine.low %v632_v12, %v636_v14  ;;  %v3028_v52 = vld [vmem:[%s3139_s10 + $0x38] ss:$8 sps:$4 sm:$0xff]   ;;  %v1019_v12 = vrot.slane %v1017_v62, 4  ;;  %v1022_v14 = vrot.slane %v1020_v63, 5 }
  0x36   : > { %2819 = vmatpush3.bf16.msra.mxu1 %v3006_v11  ;;  %2796 = vmatprep.subr.bf16.mxu0 %v3007_v39  ;;  %v3014_v11 = vld [vmem:[%s3642_s1 + $0xd0] sm:$0xff]  }
  0x37   : > { %2820 = vmatprep.subr.bf16.mxu1 %v3008_v45  ;;  %2830 = vmatprep.mubr.bf16.mxu1 %v3019_v8  ;;  %v1294_v8 = vrot.slane %v2380_v56, 5  ;;  %v1023_v24 = vor.u32 %v1022_v14, %v1019_v12  ;;  %v3036_v56 = vld [vmem:[%s3642_s1 + $0x148] sm:$0xff]   ;;  %v2389_v60 = vld [vmem:[%s3139_s10 + $0x30] sm:$0xf]  ;;  %v3409_v63 = vld [vmem:[%s3139_s10 + $0x34] sm:$0x1] }
  0x38   : > { %2806 = vmatprep.mubr.bf16.mxu0 %v2331_v17  ;;  %v2383_v17 = vld [vmem:[%s3139_s10 + $0x18] sm:$0xf]  ;;  %v3420_v12 = vld [vmem:[%s3139_s10 + $0x3c] sm:$0x1] }
  0x39   : > { %2797 = vmatpush3.bf16.msra.mxu0 %v3007_v39  ;;  %v2332_v39 = vcombine.low %v640_v33, %v644_v9  ;;  %v1034_v27 = vshll.u32 %v2383_v17, 16  ;;  %v1048_v33 = vshll.u32 %v2385_v21, 16  ;;  %v2425_v9 = vld [vmem:[%s3139_s10 + $0x18] sm:$0xe]  ;;  %v3425_v21 = vld [vmem:[%s3139_s10 + $0x44] sm:$0x1] }
  0x3a   : > { %2821 = vmatpush3.bf16.msra.mxu1 %v3008_v45  ;;  %2798 = vmatprep.subr.bf16.mxu0 %v3009_v57  ;;  %v2314_v45 = vrot.slane %v609_v36, 9  ;;  %v1024_v36 = vrot.slane %v1023_v24, 4  ;;  %v3038_v24 = vld [vmem:[%s3642_s1 + $0x140] sm:$0xff]  }
  0x3b   : > { %2822 = vmatprep.subr.bf16.mxu1 %v3010_v15  ;;  %v1036_v38 = vrot.slane %v1034_v27, 5 }
  0x3c   : > { %v660_v49 = vsel %vm3265_vm5, %v2314_v45, %v659_v43  ;;  %v1050_v45 = vrot.slane %v1048_v33, 5 }
  0x3d   : > { %2799 = vmatpush3.bf16.msra.mxu0 %v3009_v57  ;;  %v2334_v53 = vcombine.low %v656_v28, %v660_v49  ;;  %v3030_v57 = vld [vmem:[%s3642_s1 + $0x160] sm:$0xff]  }
  0x3e   : > { %2823 = vmatpush3.bf16.msra.mxu1 %v3010_v15  ;;  %2800 = vmatprep.subr.bf16.mxu0 %v3013_v7  ;;  %v1003_v15 = vshrl.u32 %v2379_v55, 16  ;;  %v1051_v49 = vor.u32 %v1050_v45, %v1047_v44  ;;  %v1306_v55 = vrot.slane %v2386_v25, 5 }
  0x3f   : > { %2824 = vmatprep.subr.bf16.mxu1 %v3014_v11 }
  0x40   : > { %v1005_v3 = vrot.slane %v1003_v15, 4  ;;  %v3397_v15 = vld [vmem:[%s3139_s10 + $0x2c] sm:$0x1] }
  0x41   : > { %2801 = vmatpush3.bf16.msra.mxu0 %v3013_v7  ;;  %v2431_v7 = vrot.slane %v2423_v2, 9  ;;  %v1062_v2 = vshll.u32 %v2387_v59, 16 }
  0x42   : > { %2825 = vmatpush3.bf16.msra.mxu1 %v3014_v11  ;;  %2802 = vmatprep.subr.bf16.mxu0 %v3015_v16  ;;  %v1014_v11 = vrot.slane %v1012_v61, 5  ;;  %v1009_v18 = vor.u32 %v1008_v5, %v1005_v3  ;;  %v2391_v3 = vld [vmem:[%s3139_s10 + $0x38] sm:$0xf]  ;;  %v3037_v5 = vld [vmem:[%s3642_s1 + $0x100] sm:$0xff]  }
  0x43   : > { %2826 = vmatprep.subr.bf16.mxu1 %v3016_v4  ;;  %v1295_v13 = vsel %vm3265_vm5, %v2431_v7, %v1294_v8  ;;  %v1068_v7 = vshll.u32 %v3397_v15, 16  ;;  %v1073_v8 = vshrl.u32 %v2389_v60, 16 }
  0x45   : > { %2803 = vmatpush3.bf16.msra.mxu0 %v3015_v16  ;;  %v1028_v16 = vrot.slane %v1026_v0, 5  ;;  %v1059_v0 = vshrl.u32 %v2387_v59, 16 }
  0x46   : > { %2827 = vmatpush3.bf16.msra.mxu1 %v3016_v4  ;;  %2804 = vmatprep.subr.bf16.mxu0 %v3017_v26  ;;  %v2432_v4 = vrot.slane %v2424_v6, 9 }
  0x47   : > { %2828 = vmatprep.subr.bf16.mxu1 %v3018_v31  ;;  %v1061_v14 = vrot.slane %v1059_v0, 4  ;;  %v3043_v0 = vld [vmem:[%s3642_s1 + $0x1a8] sm:$0xff]  }
  0x48   : > { %v1299_v30 = vsel %vm3265_vm5, %v2432_v4, %v1298_v19  ;;  %v1070_v4 = vrot.slane %v1068_v7, 5  ;;  %v1075_v19 = vrot.slane %v1073_v8, 4  ;;  %v3044_v8 = vld [vmem:[%s3642_s1 + $0x1e8] sm:$0xff]  }
  0x49   : > { %2805 = vmatpush3.bf16.msra.mxu0 %v3017_v26  ;;  %v1031_v26 = vshrl.u32 %v2383_v17, 16  ;;  %v1082_v17 = vshll.u32 %v3409_v63, 16 }
  0x4a   : > { %2829 = vmatpush3.bf16.msra.mxu1 %v3018_v31  ;;  %2838 = vmatprep.subr.bf16.mxu0 %v3021_v29  ;;  %v1040_v31 = vshll.u32 %v2384_v20, 16 }
  0x4b   : > { %2862 = vmatprep.subr.bf16.mxu1 %v3022_v10 }
  0x4c   : > { %2807 = vmatmul.mubr.bf16.vlgmr.msra.gmra.mxu0 %v2332_v39  ;;  %v2426_v39 = vld [vmem:[%s3139_s10 + $0x20] sm:$0xe]  ;;  %v3377_v43 = vrot.slane %v1040_v31, 5  ;;  %v1096_v31 = vshll.u32 %v3420_v12, 16 }
  0x4d   : > { %2831 = vmatmul.mubr.bf16.vlgmr.msra.gmra.mxu1 %v3020_v37  ;;  %2839 = vmatpush3.bf16.msra.mxu0 %v3021_v29  ;;  %v1010_v29 = vrot.slane %v1009_v18, 4  ;;  %v2455_v37 = vcombine.low %v1295_v13, %v1299_v30  ;;  %v2393_v18 = vld [vmem:[%s3139_s10 + $0x40] sm:$0xf]  ;;  %v1087_v13 = vshrl.u32 %v2391_v3, 16 }
  0x4e   : > { %2863 = vmatpush3.bf16.msra.mxu1 %v3022_v10  ;;  %2840 = vmatprep.subr.bf16.mxu0 %v3023_v46  ;;  %v1033_v10 = vrot.slane %v1031_v26, 4  ;;  %v1084_v26 = vrot.slane %v1082_v17, 5  ;;  %v1101_v30 = vshrl.u32 %v2393_v18, 16  ;;  %v1104_v32 = vshll.u32 %v2393_v18, 16  ;;  %v3055_v17 = vld [vmem:[%s3139_s10 + $0x10] ss:$8 sps:$4 sm:$0xff]  }
  0x4f   : > { %2864 = vmatprep.subr.bf16.mxu1 %v3024_v23  ;;  %2810 = vmatprep.mubr.bf16.mxu0 %v2333_v47  ;;  %v1015_v42 = vsel %vm3182_vm2, %v1010_v29, %v1014_v11  ;;  %v1054_v47 = vshll.u32 %v2386_v25, 16  ;;  %v1076_v11 = vshll.u32 %v2389_v60, 16  ;;  %v1089_v27 = vrot.slane %v1087_v13, 4  ;;  %v3042_v60 = vld [vmem:[%s3642_s1 + $0x1f0] sm:$0xff]  }
  0x50   : > { %2834 = vmatprep.mubr.bf16.mxu1 %v3027_v48  ;;  %v2433_v48 = vrot.slane %v2425_v9, 9  ;;  %v3039_v9 = vld [vmem:[%s3642_s1 + $0x1b8] sm:$0xff]   ;;  %v1098_v45 = vrot.slane %v1096_v31, 5  ;;  %v2503_v18 = vld [vmem:[%s3139_s10 + $0x10] sm:$0xf] }
  0x51   : > { %2841 = vmatpush3.bf16.msra.mxu0 %v3023_v46  ;;  %v1029_v46 = vsel %vm3182_vm2, %v1024_v36, %v1028_v16  ;;  %v1064_v16 = vrot.slane %v1062_v2, 5  ;;  %v1110_v36 = vshll.u32 %v3425_v21, 16  ;;  %v3485_v13 = vld [vmem:[%s3139_s10 + $0x14] sm:$0x1] }
  0x52   : > { %2865 = vmatpush3.bf16.msra.mxu1 %v3024_v23  ;;  %2842 = vmatprep.subr.bf16.mxu0 %v3025_v50  ;;  %v1037_v23 = vor.u32 %v1036_v38, %v1033_v10  ;;  %v2411_v28 = vcombine.low %v1015_v42, %v1029_v46  ;;  %v3040_v10 = vld [vmem:[%s3642_s1 + $0x1f8] sm:$0xff]   ;;  %v1106_v42 = vrot.slane %v1104_v32, 5  ;;  %v2427_v46 = vld [vmem:[%s3139_s10 + $0x28] sm:$0xe] }
  0x53   : > { %2866 = vmatprep.subr.bf16.mxu1 %v3026_v51  ;;  %v1065_v25 = vor.u32 %v1064_v16, %v1061_v14  ;;  %v3045_v14 = vld [vmem:[%s3642_s1 + $0x1a0] sm:$0xff]  }
  0x54   : > { %2811 = vmatmul.mubr.bf16.gmra.mxu0 %v2334_v53  ;;  %v3384_v53 = vrot.slane %v1037_v23, 4  ;;  %v2428_v23 = vld [vmem:[%s3139_s10 + $0x30] sm:$0xe]  ;;  %v3046_v16 = vld [vmem:[%s3642_s1 + $0x1e0] sm:$0xff]  }
  0x55   : > { %2843 = vmatpush3.bf16.msra.mxu0 %v3025_v50  ;;  %2835 = vmatmul.mubr.bf16.gmra.mxu1 %v3028_v52  ;;  %v1302_v50 = vrot.slane %v2384_v20, 5  ;;  %v3035_v52 = vld [vmem:[%s3642_s1 + $0x108] sm:$0xff]   ;;  %v1078_v20 = vrot.slane %v1076_v11, 5 }
  0x56   : > { %2867 = vmatpush3.bf16.msra.mxu1 %v3026_v51  ;;  %2844 = vmatprep.subr.bf16.mxu0 %v3029_v54  ;;  %v2434_v51 = vrot.slane %v2426_v39, 9  ;;  %v1043_v61 = vsel %vm3182_vm2, %v3384_v53, %v3377_v43  ;;  %v2430_v53 = vld [vmem:[%s3139_s10 + $0x40] sm:$0xe] }
  0x57   : > { %2868 = vmatprep.subr.bf16.mxu1 %v3030_v57  ;;  %2878 = vmatprep.mubr.bf16.mxu1 %v2455_v37  ;;  %v3393_v58 = vsel %vm3265_vm5, %v2433_v48, %v1302_v50  ;;  %v1310_v37 = vrot.slane %v3397_v15, 5  ;;  %v3041_v48 = vld [vmem:[%s3642_s1 + $0x1b0] sm:$0xff]   ;;  %v1112_v50 = vrot.slane %v1110_v36, 5  ;;  %v2438_v15 = vrot.slane %v2430_v53, 9 }
  0x58   : > { %2854 = vmatprep.mubr.bf16.mxu0 %v2411_v28  ;;  %v3406_v62 = vsel %vm3265_vm5, %v2434_v51, %v1306_v55  ;;  %v2435_v51 = vrot.slane %v2427_v46, 9  ;;  %v2436_v55 = vrot.slane %v2428_v23, 9 }
  0x59   : > { %2845 = vmatpush3.bf16.msra.mxu0 %v3029_v54  ;;  %v3386_v54 = vrot.slane %v1054_v47, 5  ;;  %v2456_v33 = vcombine.low %v3393_v58, %v3406_v62  ;;  %v1314_v47 = vrot.slane %v3409_v63, 5  ;;  %v1322_v63 = vrot.slane %v3425_v21, 5 }
  0x5a   : > { %2869 = vmatpush3.bf16.msra.mxu1 %v3030_v57  ;;  %2846 = vmatprep.subr.bf16.mxu0 %v3031_v22  ;;  %v1052_v57 = vrot.slane %v1051_v49, 4  ;;  %v1311_v59 = vsel %vm3265_vm5, %v2435_v51, %v1310_v37  ;;  %v1669_v21 = vshll.u32 %v2503_v18, 16  ;;  %v3504_v37 = vld [vmem:[%s3139_s10 + $0x24] sm:$0x1] }
  0x5b   : > { %2870 = vmatprep.subr.bf16.mxu1 %v3032_v34  ;;  %v1315_v62 = vsel %vm3265_vm5, %v2436_v55, %v1314_v47  ;;  %v1323_v7 = vsel %vm3265_vm5, %v2438_v15, %v1322_v63  ;;  %v1703_v46 = vshll.u32 %v3504_v37, 16  ;;  %v2511_v63 = vld [vmem:[%s3139_s10 + $0x30] sm:$0xf] }
  0x5c   : > { %v1057_v6 = vsel %vm3182_vm2, %v1052_v57, %v3386_v54  ;;  %v1318_v57 = vrot.slane %v3420_v12, 5  ;;  %v2457_v2 = vcombine.low %v1311_v59, %v1315_v62 }
  0x5d   : > { %2847 = vmatpush3.bf16.msra.mxu0 %v3031_v22  ;;  %v1090_v22 = vshll.u32 %v2391_v3, 16  ;;  %v2412_v43 = vcombine.low %v1043_v61, %v1057_v6  ;;  %v1705_v59 = vrot.slane %v1703_v46, 5  ;;  %v3058_v46 = vld [vmem:[%s3642_s1 + $0x230] sm:$0xff]  }
  0x5e   : > { %2871 = vmatpush3.bf16.msra.mxu1 %v3032_v34  ;;  %2848 = vmatprep.subr.bf16.mxu0 %v3033_v35  ;;  %v1079_v34 = vor.u32 %v1078_v20, %v1075_v19  ;;  %v3489_v19 = vld [vmem:[%s3139_s10 + $0x1c] sm:$0x1]  ;;  %v1666_v20 = vshrl.u32 %v2503_v18, 16 }
  0x5f   : > { %2872 = vmatprep.subr.bf16.mxu1 %v3034_v40  ;;  %v1092_v29 = vrot.slane %v1090_v22, 5  ;;  %v1675_v22 = vshll.u32 %v3485_v13, 16 }
  0x60   : > { %v1080_v38 = vrot.slane %v1079_v34, 4  ;;  %v1668_v31 = vrot.slane %v1666_v20, 4  ;;  %v1671_v34 = vrot.slane %v1669_v21, 5 }
  0x61   : > { %2849 = vmatpush3.bf16.msra.mxu0 %v3033_v35  ;;  %v1066_v35 = vrot.slane %v1065_v25, 4  ;;  %v1093_v39 = vor.u32 %v1092_v29, %v1089_v27  ;;  %v3047_v27 = vld [vmem:[%s3642_s1 + $0x198] sm:$0xff]  }
  0x62   : > { %2873 = vmatpush3.bf16.msra.mxu1 %v3034_v40  ;;  %2850 = vmatprep.subr.bf16.mxu0 %v3035_v52  ;;  %v1103_v40 = vrot.slane %v1101_v30, 4  ;;  %v1085_v28 = vsel %vm3182_vm2, %v1080_v38, %v1084_v26  ;;  %v1689_v26 = vshll.u32 %v3489_v19, 16  ;;  %v3048_v29 = vld [vmem:[%s3642_s1 + $0x1d8] sm:$0xff]   ;;  %v1677_v30 = vrot.slane %v1675_v22, 5  ;;  %v3508_v38 = vld [vmem:[%s3139_s10 + $0x2c] sm:$0x1] }
  0x63   : > { %2874 = vmatprep.subr.bf16.mxu1 %v3036_v56  ;;  %v1071_v44 = vsel %vm3182_vm2, %v1066_v35, %v1070_v4  ;;  %v1094_v54 = vrot.slane %v1093_v39, 4  ;;  %v2505_v4 = vld [vmem:[%s3139_s10 + $0x18] sm:$0xf]  ;;  %v3049_v35 = vld [vmem:[%s3642_s1 + $0x190] sm:$0xff]   ;;  %v1672_v36 = vor.u32 %v1671_v34, %v1668_v31  ;;  %v3547_v22 = vld [vmem:[%s3139_s10 + $0x44] sm:$0x1] }
  0x64   : > { %v1107_v49 = vor.u32 %v1106_v42, %v1103_v40  ;;  %v2413_v61 = vcombine.low %v1071_v44, %v1085_v28  ;;  %v1683_v25 = vshll.u32 %v2505_v4, 16  ;;  %v3050_v39 = vld [vmem:[%s3642_s1 + $0x1d0] sm:$0xff]   ;;  %v1691_v42 = vrot.slane %v1689_v26, 5 }
  0x65   : > { %2851 = vmatpush3.bf16.msra.mxu0 %v3035_v52  ;;  %v2429_v52 = vld [vmem:[%s3139_s10 + $0x38] sm:$0xe]  ;;  %v1099_v3 = vsel %vm3182_vm2, %v1094_v54, %v1098_v45  ;;  %v1673_v45 = vrot.slane %v1672_v36, 4  ;;  %v3051_v54 = vld [vmem:[%s3642_s1 + $0x188] sm:$0xff]  }
  0x66   : > { %2875 = vmatpush3.bf16.msra.mxu1 %v3036_v56  ;;  %2852 = vmatprep.subr.bf16.mxu0 %v3037_v5  ;;  %v2437_v56 = vrot.slane %v2429_v52, 9  ;;  %v1108_v58 = vrot.slane %v1107_v49, 4 }
  0x67   : > { %2876 = vmatprep.subr.bf16.mxu1 %v3038_v24  ;;  %v1678_v51 = vsel %vm3182_vm2, %v1673_v45, %v1677_v30  ;;  %v3551_v30 = vld [vmem:[%s3139_s10 + $0x4c] sm:$0x1] }
  0x68   : > { %v1319_v6 = vsel %vm3265_vm5, %v2437_v56, %v1318_v57  ;;  %v3052_v57 = vld [vmem:[%s3642_s1 + $0x1c8] sm:$0xff]  }
  0x69   : > { %2853 = vmatpush3.bf16.msra.mxu0 %v3037_v5  ;;  %v1113_v5 = vsel %vm3182_vm2, %v1108_v58, %v1112_v50  ;;  %v2458_v12 = vcombine.low %v1319_v6, %v1323_v7  ;;  %v1717_v50 = vshll.u32 %v3508_v38, 16  ;;  %v1725_v6 = vshll.u32 %v2511_v63, 16  ;;  %v3053_v7 = vld [vmem:[%s3642_s1 + $0x180] sm:$0xff]  }
  0x6a   : > { %2877 = vmatpush3.bf16.msra.mxu1 %v3038_v24  ;;  %2886 = vmatprep.subr.bf16.mxu0 %v3039_v9  ;;  %v2414_v11 = vcombine.low %v1099_v3, %v1113_v5  ;;  %v1680_v24 = vshrl.u32 %v2505_v4, 16  ;;  %v3531_v3 = vld [vmem:[%s3139_s10 + $0x3c] sm:$0x1]  ;;  %v1722_v5 = vshrl.u32 %v2511_v63, 16 }
  0x6b   : > { %2910 = vmatprep.subr.bf16.mxu1 %v3040_v10  ;;  %v1727_v20 = vrot.slane %v1725_v6, 5  ;;  %v1745_v21 = vshll.u32 %v3531_v3, 16 }
  0x6c   : > { %2855 = vmatmul.mubr.bf16.vlgmr.msra.gmra.mxu0 %v2412_v43  ;;  %v1682_v32 = vrot.slane %v1680_v24, 4  ;;  %v1724_v4 = vrot.slane %v1722_v5, 4  ;;  %v2552_v5 = vld [vmem:[%s3139_s10 + $0x38] sm:$0xe] }
  0x6d   : > { %2879 = vmatmul.mubr.bf16.vlgmr.msra.gmra.mxu1 %v2456_v33  ;;  %2887 = vmatpush3.bf16.msra.mxu0 %v3039_v9  ;;  %v1685_v33 = vrot.slane %v1683_v25, 5  ;;  %v2507_v9 = vld [vmem:[%s3139_s10 + $0x20] sm:$0xf] }
  0x6e   : > { %2911 = vmatpush3.bf16.msra.mxu1 %v3040_v10  ;;  %2888 = vmatprep.subr.bf16.mxu0 %v3041_v48  ;;  %v2509_v10 = vld [vmem:[%s3139_s10 + $0x28] sm:$0xf]  ;;  %v1694_v43 = vshrl.u32 %v2507_v9, 16  ;;  %v1697_v44 = vshll.u32 %v2507_v9, 16  ;;  %v1728_v34 = vor.u32 %v1727_v20, %v1724_v4  ;;  %v3063_v20 = vld [vmem:[%s3642_s1 + $0x218] sm:$0xff]  }
  0x6f   : > { %2912 = vmatprep.subr.bf16.mxu1 %v3042_v60  ;;  %2858 = vmatprep.mubr.bf16.mxu0 %v2413_v61  ;;  %v1686_v40 = vor.u32 %v1685_v33, %v1682_v32  ;;  %v1708_v23 = vshrl.u32 %v2509_v10, 16  ;;  %v1711_v47 = vshll.u32 %v2509_v10, 16  ;;  %v1719_v61 = vrot.slane %v1717_v50, 5  ;;  %v3056_v9 = vld [vmem:[%s3139_s10 + $0x20] ss:$8 sps:$4 sm:$0xff]  }
  0x70   : > { %2882 = vmatprep.mubr.bf16.mxu1 %v2457_v2  ;;  %v1696_v28 = vrot.slane %v1694_v43, 4  ;;  %v1699_v49 = vrot.slane %v1697_v44, 5  ;;  %v2513_v2 = vld [vmem:[%s3139_s10 + $0x38] sm:$0xf]  ;;  %v1759_v33 = vshll.u32 %v3547_v22, 16  ;;  %v1773_v44 = vshll.u32 %v3551_v30, 16 }
  0x71   : > { %2889 = vmatpush3.bf16.msra.mxu0 %v3041_v48  ;;  %v1687_v48 = vrot.slane %v1686_v40, 4  ;;  %v1710_v52 = vrot.slane %v1708_v23, 4  ;;  %v1713_v53 = vrot.slane %v1711_v47, 5 }
  0x72   : > { %2913 = vmatpush3.bf16.msra.mxu1 %v3042_v60  ;;  %2890 = vmatprep.subr.bf16.mxu0 %v3043_v0  ;;  %v1700_v56 = vor.u32 %v1699_v49, %v1696_v28  ;;  %v3059_v28 = vld [vmem:[%s3139_s10 + $0x30] ss:$8 sps:$4 sm:$0xff]  }
  0x73   : > { %2914 = vmatprep.subr.bf16.mxu1 %v3044_v8  ;;  %v1692_v55 = vsel %vm3182_vm2, %v1687_v48, %v1691_v42  ;;  %v1714_v15 = vor.u32 %v1713_v53, %v1710_v52  ;;  %v1729_v42 = vrot.slane %v1728_v34, 4  ;;  %v1775_v52 = vrot.slane %v1773_v44, 5 }
  0x74   : > { %2859 = vmatmul.mubr.bf16.gmra.mxu0 %v2414_v11  ;;  %v2535_v58 = vcombine.low %v1678_v51, %v1692_v55  ;;  %v1701_v60 = vrot.slane %v1700_v56, 4  ;;  %v1761_v51 = vrot.slane %v1759_v33, 5  ;;  %v1957_v56 = vrot.slane %v3485_v13, 5  ;;  %v3061_v13 = vld [vmem:[%s3642_s1 + $0x228] sm:$0xff]  }
  0x75   : > { %2891 = vmatpush3.bf16.msra.mxu0 %v3043_v0  ;;  %2883 = vmatmul.mubr.bf16.gmra.mxu1 %v2458_v12  ;;  %v1715_v62 = vrot.slane %v1714_v15, 4  ;;  %v3527_v0 = vld [vmem:[%s3139_s10 + $0x34] sm:$0x1]  ;;  %v1736_v12 = vshrl.u32 %v2513_v2, 16  ;;  %v2548_v15 = vld [vmem:[%s3139_s10 + $0x18] sm:$0xe] }
  0x76   : > { %2915 = vmatpush3.bf16.msra.mxu1 %v3044_v8  ;;  %2892 = vmatprep.subr.bf16.mxu0 %v3045_v14  ;;  %v1706_v8 = vsel %vm3182_vm2, %v1701_v60, %v1705_v59  ;;  %v1731_v11 = vshll.u32 %v3527_v0, 16  ;;  %v2547_v59 = vld [vmem:[%s3139_s10 + $0x10] sm:$0xe]  ;;  %v1961_v60 = vrot.slane %v3489_v19, 5  ;;  %v2556_v63 = vrot.slane %v2548_v15, 9 }
  0x77   : > { %2916 = vmatprep.subr.bf16.mxu1 %v3046_v16  ;;  %2902 = vmatprep.mubr.bf16.mxu0 %v3055_v17  ;;  %v3054_v17 = vld [vmem:[%s3642_s1 + $0x1c0] sm:$0xff]   ;;  %v1720_v18 = vsel %vm3182_vm2, %v1715_v62, %v1719_v61  ;;  %v1738_v25 = vrot.slane %v1736_v12, 4  ;;  %v2555_v62 = vrot.slane %v2547_v59, 9  ;;  %v1969_v33 = vrot.slane %v3508_v38, 5 }
  0x78   : > { %2926 = vmatprep.mubr.bf16.mxu1 %v2535_v58  ;;  %v1733_v24 = vrot.slane %v1731_v11, 5  ;;  %v2536_v45 = vcombine.low %v1706_v8, %v1720_v18  ;;  %v2560_v8 = vrot.slane %v2552_v5, 9  ;;  %v1977_v11 = vrot.slane %v3531_v3, 5  ;;  %v3060_v12 = vld [vmem:[%s3139_s10 + $0x40] ss:$8 sps:$4 sm:$0xff]  }
  0x79   : > { %2893 = vmatpush3.bf16.msra.mxu0 %v3045_v14  ;;  %v1739_v14 = vshll.u32 %v2513_v2, 16  ;;  %v2551_v2 = vld [vmem:[%s3139_s10 + $0x30] sm:$0xe]  ;;  %v3062_v3 = vld [vmem:[%s3642_s1 + $0x220] sm:$0xff]  }
  0x7a   : > { %2917 = vmatpush3.bf16.msra.mxu1 %v3046_v16  ;;  %2894 = vmatprep.subr.bf16.mxu0 %v3047_v27  ;;  %v2515_v16 = vld [vmem:[%s3139_s10 + $0x40] sm:$0xf]  ;;  %v1734_v49 = vsel %vm3182_vm2, %v1729_v42, %v1733_v24  ;;  %v2559_v19 = vrot.slane %v2551_v2, 9  ;;  %v3065_v24 = vld [vmem:[%s3642_s1 + $0x208] sm:$0xff]  }
  0x7b   : > { %2918 = vmatprep.subr.bf16.mxu1 %v3048_v29  ;;  %v1741_v26 = vrot.slane %v1739_v14, 5  ;;  %v1750_v31 = vshrl.u32 %v2515_v16, 16  ;;  %v1753_v32 = vshll.u32 %v2515_v16, 16  ;;  %v1958_v14 = vsel %vm3265_vm5, %v2555_v62, %v1957_v56 }
  0x7c   : > { %v1962_v16 = vsel %vm3265_vm5, %v2556_v63, %v1961_v60 }
  0x7d   : > { %2895 = vmatpush3.bf16.msra.mxu0 %v3047_v27  ;;  %v2517_v27 = vld [vmem:[%s3139_s10 + $0x48] sm:$0xf]  ;;  %v1742_v36 = vor.u32 %v1741_v26, %v1738_v25  ;;  %v1752_v10 = vrot.slane %v1750_v31, 4  ;;  %v1755_v43 = vrot.slane %v1753_v32, 5  ;;  %v2579_v18 = vcombine.low %v1958_v14, %v1962_v16  ;;  %v2549_v25 = vld [vmem:[%s3139_s10 + $0x20] sm:$0xe] }
  0x7e   : > { %2919 = vmatpush3.bf16.msra.mxu1 %v3048_v29  ;;  %2896 = vmatprep.subr.bf16.mxu0 %v3049_v35  ;;  %v1747_v29 = vrot.slane %v1745_v21, 5  ;;  %v1767_v40 = vshll.u32 %v2517_v27, 16  ;;  %v3064_v21 = vld [vmem:[%s3642_s1 + $0x210] sm:$0xff]   ;;  %v2550_v26 = vld [vmem:[%s3139_s10 + $0x28] sm:$0xe]  ;;  %v2557_v34 = vrot.slane %v2549_v25, 9 }
  0x7f   : > { %2920 = vmatprep.subr.bf16.mxu1 %v3050_v39  ;;  %v1743_v23 = vrot.slane %v1742_v36, 4  ;;  %v1756_v50 = vor.u32 %v1755_v43, %v1752_v10  ;;  %v2554_v31 = vld [vmem:[%s3139_s10 + $0x48] sm:$0xe]  ;;  %v2558_v32 = vrot.slane %v2550_v26, 9  ;;  %v3066_v36 = vld [vmem:[%s3642_s1 + $0x200] sm:$0xff]  }
  0x80   : > { %v1769_v48 = vrot.slane %v1767_v40, 5 }
  0x81   : > { %2897 = vmatpush3.bf16.msra.mxu0 %v3049_v35  ;;  %v3057_v35 = vld [vmem:[%s3642_s1 + $0x238] sm:$0xff]   ;;  %v1748_v53 = vsel %vm3182_vm2, %v1743_v23, %v1747_v29  ;;  %v1757_v55 = vrot.slane %v1756_v50, 4  ;;  %v1965_v29 = vrot.slane %v3504_v37, 5  ;;  %v1970_v38 = vsel %vm3265_vm5, %v2558_v32, %v1969_v33 }
  0x82   : > { %2921 = vmatpush3.bf16.msra.mxu1 %v3050_v39  ;;  %2898 = vmatprep.subr.bf16.mxu0 %v3051_v54  ;;  %v1764_v39 = vshrl.u32 %v2517_v27, 16  ;;  %v2553_v27 = vld [vmem:[%s3139_s10 + $0x40] sm:$0xe] }
  0x83   : > { %2922 = vmatprep.subr.bf16.mxu1 %v3052_v57  ;;  %v1762_v61 = vsel %vm3182_vm2, %v1757_v55, %v1761_v51  ;;  %v2561_v10 = vrot.slane %v2553_v27, 9  ;;  %v1966_v37 = vsel %vm3265_vm5, %v2557_v34, %v1965_v29 }
  0x84   : > { %v1766_v47 = vrot.slane %v1764_v39, 4  ;;  %v2562_v39 = vrot.slane %v2554_v31, 9  ;;  %v2580_v40 = vcombine.low %v1966_v37, %v1970_v38 }
  0x85   : > { %2899 = vmatpush3.bf16.msra.mxu0 %v3051_v54 }
  0x86   : > { %2923 = vmatpush3.bf16.msra.mxu1 %v3052_v57  ;;  %2900 = vmatprep.subr.bf16.mxu0 %v3053_v7  ;;  %v1770_v54 = vor.u32 %v1769_v48, %v1766_v47  ;;  %v2537_v57 = vcombine.low %v1734_v49, %v1748_v53 }
  0x87   : > { %2924 = vmatprep.subr.bf16.mxu1 %v3054_v17 }
  0x88   : > { %v1771_v58 = vrot.slane %v1770_v54, 4 }
  0x89   : > { %2901 = vmatpush3.bf16.msra.mxu0 %v3053_v7  ;;  %v1973_v7 = vrot.slane %v3527_v0, 5  ;;  %v1978_v0 = vsel %vm3265_vm5, %v2560_v8, %v1977_v11 }
  0x8a   : > { %2925 = vmatpush3.bf16.msra.mxu1 %v3054_v17  ;;  %2934 = vmatprep.subr.bf16.mxu0 %v3057_v35  ;;  %v1776_v6 = vsel %vm3182_vm2, %v1771_v58, %v1775_v52 }
  0x8b   : > { %2958 = vmatprep.subr.bf16.mxu1 %v3057_v35  ;;  %v2538_v17 = vcombine.low %v1762_v61, %v1776_v6  ;;  %v1974_v41 = vsel %vm3265_vm5, %v2559_v19, %v1973_v7 }
  0x8c   : > { %2903 = vmatmul.mubr.bf16.vlgmr.msra.gmra.mxu0 %v3056_v9  ;;  %v2581_v4 = vcombine.low %v1974_v41, %v1978_v0  ;;  %v1981_v9 = vrot.slane %v3547_v22, 5 }
  0x8d   : > { %2927 = vmatmul.mubr.bf16.vlgmr.msra.gmra.mxu1 %v2536_v45  ;;  %2935 = vmatpush3.bf16.msra.mxu0 %v3057_v35 }
  0x8e   : > { %2966 = vmatpush3.bf16.msra.mxu1 %v3057_v35  ;;  %2936 = vmatprep.subr.bf16.mxu0 %v3058_v46  ;;  %v1985_v35 = vrot.slane %v3551_v30, 5  ;;  %v1982_v22 = vsel %vm3265_vm5, %v2561_v10, %v1981_v9 }
  0x8f   : > { %2959 = vmatprep.subr.bf16.mxu1 %v3058_v46  ;;  %2906 = vmatprep.mubr.bf16.mxu0 %v3059_v28 }
  0x90   : > { %2930 = vmatprep.mubr.bf16.mxu1 %v2537_v57  ;;  %v1986_v30 = vsel %vm3265_vm5, %v2562_v39, %v1985_v35 }
  0x91   : > { %2937 = vmatpush3.bf16.msra.mxu0 %v3058_v46  ;;  %v2582_v42 = vcombine.low %v1982_v22, %v1986_v30 }
  0x92   : > { %2967 = vmatpush3.bf16.msra.mxu1 %v3058_v46  ;;  %2938 = vmatprep.subr.bf16.mxu0 %v3061_v13 }
  0x93   : > { %2960 = vmatprep.subr.bf16.mxu1 %v3061_v13 }
  0x94   : > { %2907 = vmatmul.mubr.bf16.gmra.mxu0 %v3060_v12 }
  0x95   : > { %2939 = vmatpush3.bf16.msra.mxu0 %v3061_v13  ;;  %2931 = vmatmul.mubr.bf16.gmra.mxu1 %v2538_v17 }
  0x96   : > { %2968 = vmatpush3.bf16.msra.mxu1 %v3061_v13  ;;  %2940 = vmatprep.subr.bf16.mxu0 %v3062_v3 }
  0x97   : > { %2961 = vmatprep.subr.bf16.mxu1 %v3062_v3  ;;  %2950 = vmatprep.mubr.bf16.mxu0 %v2579_v18 }
  0x98   : > { %2954 = vmatprep.mubr.bf16.mxu1 %v2581_v4 }
  0x99   : > { %2941 = vmatpush3.bf16.msra.mxu0 %v3062_v3 }
  0x9a   : > { %2969 = vmatpush3.bf16.msra.mxu1 %v3062_v3  ;;  %2942 = vmatprep.subr.bf16.mxu0 %v3063_v20 }
  0x9b   : > { %2962 = vmatprep.subr.bf16.mxu1 %v3063_v20 }
  0x9d   : > { %2943 = vmatpush3.bf16.msra.mxu0 %v3063_v20 }
  0x9e   : > { %2970 = vmatpush3.bf16.msra.mxu1 %v3063_v20  ;;  %2944 = vmatprep.subr.bf16.mxu0 %v3064_v21 }
  0x9f   : > { %2963 = vmatprep.subr.bf16.mxu1 %v3064_v21 }
  0xa1   : > { %2945 = vmatpush3.bf16.msra.mxu0 %v3064_v21 }
  0xa2   : > { %2971 = vmatpush3.bf16.msra.mxu1 %v3064_v21  ;;  %2946 = vmatprep.subr.bf16.mxu0 %v3065_v24 }
  0xa3   : > { %2964 = vmatprep.subr.bf16.mxu1 %v3065_v24 }
  0xa5   : > { %2947 = vmatpush3.bf16.msra.mxu0 %v3065_v24 }
  0xa6   : > { %2972 = vmatpush3.bf16.msra.mxu1 %v3065_v24  ;;  %2948 = vmatprep.subr.bf16.mxu0 %v3066_v36 }
  0xa7   : > { %2965 = vmatprep.subr.bf16.mxu1 %v3066_v36 }
  0xa9   : > { %2949 = vmatpush3.bf16.msra.mxu0 %v3066_v36 }
  0xaa   : > { %2973 = vmatpush3.bf16.msra.mxu1 %v3066_v36 }
  0xac   : > { %2951 = vmatmul.mubr.bf16.vlgmr.msra.gmra.mxu0 %v2580_v40 }
  0xad   : > { %2955 = vmatmul.mubr.bf16.vlgmr.msra.gmra.mxu1 %v2582_v42 }
  0xec   : > { %v2760_v43 = vpop.f32.mrf.mxu0 }
  0xed   : > { %v2784_v45 = vpop.f32.mrf.mxu1 }
  0xee   : > { %v434_v44 = vpop.f32.mrf.mxu0  ;;  %v580_v9 = vadd.f32 %v2784_v45, %v2760_v43 }
  0xef   : > { %v571_v23 = vpop.f32.mrf.mxu1 }
  0xf0   : > { %v2761_v46 = vpop.f32.mrf.mxu0  ;;  %v572_v39 = vadd.f32 %v571_v23, %v434_v44 }
  0xf1   : > { %v2785_v28 = vpop.f32.mrf.mxu1 }
  0xf2   : > { %v437_v47 = vpop.f32.mrf.mxu0  ;;  %v583_v30 = vadd.f32 %v2785_v28, %v2761_v46 }
  0xf3   : > { %v574_v50 = vpop.f32.mrf.mxu1 }
  0xf4   : > { %v2764_v48 = vpop.f32.mrf.mxu0 }
  0xf5   : > { %v2788_v51 = vpop.f32.mrf.mxu1 }
  0xf6   : > { %v450_v49 = vpop.f32.mrf.mxu0  ;;  %v596_v36 = vadd.f32 %v2788_v51, %v2764_v48 }
  0xf7   : > { %v587_v52 = vpop.f32.mrf.mxu1 }
  0xf8   : > { %v2765_v1 = vpop.f32.mrf.mxu0  ;;  %v588_v38 = vadd.f32 %v587_v52, %v450_v49 }
  0xf9   : > { %v2789_v55 = vpop.f32.mrf.mxu1 }
  0xfa   : > { %v453_v53 = vpop.f32.mrf.mxu0 }
  0xfb   : > { %v590_v57 = vpop.f32.mrf.mxu1 }
  0xfc   : > { %v591_v44 = vadd.f32 %v590_v57, %v453_v53 }
 0x10c   : > { %v2808_v54 = vpop.f32.mrf.mxu0 }
 0x10d   : > { %v2832_v58 = vpop.f32.mrf.mxu1  ;;  %v809_v37 = vadd.f32 %v2808_v54, %v580_v9 }
 0x10e   : > { %v776_v56 = vpop.f32.mrf.mxu0 }
 0x10f   : > { %v947_v15 = vpop.f32.mrf.mxu1  ;;  %v807_v40 = vadd.f32 %v776_v56, %v572_v39  ;;  %v980_v48 = vadd.f32 %v2832_v58, %v809_v37 }
 0x110   : > { %v2809_v59 = vpop.f32.mrf.mxu0 }
 0x111   : > { %v2833_v61 = vpop.f32.mrf.mxu1  ;;  %v810_v51 = vadd.f32 %v2809_v59, %v583_v30  ;;  %v978_v49 = vadd.f32 %v947_v15, %v807_v40 }
 0x112   : > { %v779_v60 = vpop.f32.mrf.mxu0 }
 0x113   : > { %v950_v63 = vpop.f32.mrf.mxu1  ;;  %v981_v56 = vadd.f32 %v2833_v61, %v810_v51 }
 0x114   : > { %v2812_v62 = vpop.f32.mrf.mxu0 }
 0x115   : > { %v2836_v5 = vpop.f32.mrf.mxu1  ;;  %v813_v22 = vadd.f32 %v2812_v62, %v596_v36 }
 0x116   : > { %v792_v2 = vpop.f32.mrf.mxu0 }
 0x117   : > { %v963_v6 = vpop.f32.mrf.mxu1  ;;  %v811_v43 = vadd.f32 %v792_v2, %v588_v38  ;;  %v984_v9 = vadd.f32 %v2836_v5, %v813_v22 }
 0x118   : > { %v2813_v13 = vpop.f32.mrf.mxu0 }
 0x119   : > { %v2837_v7 = vpop.f32.mrf.mxu1  ;;  %v982_v62 = vadd.f32 %v963_v6, %v811_v43 }
 0x11a   : > { %v795_v19 = vpop.f32.mrf.mxu0 }
 0x11b   : > { %v966_v11 = vpop.f32.mrf.mxu1  ;;  %v812_v28 = vadd.f32 %v795_v19, %v591_v44 }
 0x11d   : > { %v983_v58 = vadd.f32 %v966_v11, %v812_v28 }
 0x12c   : > { %v2856_v8 = vpop.f32.mrf.mxu0 }
 0x12d   : > { %v2880_v14 = vpop.f32.mrf.mxu1  ;;  %v1262_v36 = vadd.f32 %v2856_v8, %v980_v48 }
 0x12e   : > { %v1229_v12 = vpop.f32.mrf.mxu0 }
 0x12f   : > { %v1439_v17 = vpop.f32.mrf.mxu1 }
 0x130   : > { %v2857_v16 = vpop.f32.mrf.mxu0 }
 0x131   : > { %v2881_v0 = vpop.f32.mrf.mxu1 }
 0x132   : > { %v1232_v41 = vpop.f32.mrf.mxu0 }
 0x133   : > { %v3622_v18 = vpop.f32.mrf.mxu1 }
 0x134   : > { %v2860_v3 = vpop.f32.mrf.mxu0  ;;  %3649 = vst [vmem:[#allocation2_spill] sm:$0xff] %v3622_v18  ;;  %v599_v18 = vadd.f32 %v2789_v55, %v2765_v1 }
 0x135   : > { %v2884_v4 = vpop.f32.mrf.mxu1  ;;  %v1266_v46 = vadd.f32 %v2860_v3, %v984_v9 }
 0x136   : > { %v1245_v20 = vpop.f32.mrf.mxu0  ;;  %v814_v54 = vadd.f32 %v2813_v13, %v599_v18 }
 0x137   : > { %v1455_v21 = vpop.f32.mrf.mxu1  ;;  %v1264_v2 = vadd.f32 %v1245_v20, %v982_v62  ;;  %v1476_v59 = vadd.f32 %v2884_v4, %v1266_v46 }
 0x138   : > { %v2861_v24 = vpop.f32.mrf.mxu0  ;;  %v985_v55 = vadd.f32 %v2837_v7, %v814_v54 }
 0x139   : > { %v2885_v25 = vpop.f32.mrf.mxu1  ;;  %v1474_v6 = vadd.f32 %v1455_v21, %v1264_v2 }
 0x13a   : > { %v1248_v26 = vpop.f32.mrf.mxu0  ;;  %v1267_v53 = vadd.f32 %v2861_v24, %v985_v55 }
 0x13b   : > { %v1458_v31 = vpop.f32.mrf.mxu1  ;;  %v1265_v19 = vadd.f32 %v1248_v26, %v983_v58  ;;  %v3652_v20 = vld [vmem:[#allocation2_spill] sm:$0xff] }
 0x13d   : > { %v1475_v4 = vadd.f32 %v1458_v31, %v1265_v19 }
 0x14c   : > { %v2904_v27 = vpop.f32.mrf.mxu0 }
 0x14d   : > { %v2928_v34 = vpop.f32.mrf.mxu1 }
 0x14e   : > { %v1610_v29 = vpop.f32.mrf.mxu0 }
 0x14f   : > { %v1892_v32 = vpop.f32.mrf.mxu1 }
 0x150   : > { %v2905_v33 = vpop.f32.mrf.mxu0 }
 0x151   : > { %v3624_v35 = vpop.f32.mrf.mxu1 }
 0x152   : > { %3650 = vst [vmem:[#allocation3_spill] sm:$0xff] %v3624_v35  ;;  %v1613_v10 = vpop.f32.mrf.mxu0  ;;  %v575_v35 = vadd.f32 %v574_v50, %v437_v47  ;;  %v1472_v47 = vadd.f32 %v2880_v14, %v1262_v36  ;;  %v1263_v50 = vadd.f32 %v2857_v16, %v981_v56 }
 0x153   : > { %v3626_v42 = vpop.f32.mrf.mxu1 }
 0x154   : > { %3651 = vst [vmem:[#allocation4_spill] sm:$0xff] %v3626_v42  ;;  %v2908_v45 = vpop.f32.mrf.mxu0  ;;  %v808_v52 = vadd.f32 %v779_v60, %v575_v35  ;;  %v1260_v42 = vadd.f32 %v1229_v12, %v978_v49  ;;  %v1643_v60 = vadd.f32 %v2904_v27, %v1472_v47  ;;  %v1473_v3 = vadd.f32 %v2881_v0, %v1263_v50  ;;  %v2591_v0 = vld [vmem:[%s3643_s2] ss:$0 sm:$0xff] }
 0x155   : > { %v2932_v23 = vpop.f32.mrf.mxu1  ;;  %v1647_v8 = vadd.f32 %v2908_v45, %v1476_v59  ;;  %v1477_v12 = vadd.f32 %v2885_v25, %v1267_v53 }
 0x156   : > { %v1626_v39 = vpop.f32.mrf.mxu0  ;;  %v979_v38 = vadd.f32 %v950_v63, %v808_v52  ;;  %v1470_v5 = vadd.f32 %v1439_v17, %v1260_v42  ;;  %v1925_v14 = vadd.f32 %v2928_v34, %v1643_v60  ;;  %v1644_v16 = vadd.f32 %v2905_v33, %v1473_v3 }
 0x157   : > { %v1908_v1 = vpop.f32.mrf.mxu1  ;;  %v1645_v18 = vadd.f32 %v1626_v39, %v1474_v6  ;;  %v1929_v24 = vadd.f32 %v2932_v23, %v1647_v8 }
 0x158   : > { %v2909_v57 = vpop.f32.mrf.mxu0  ;;  %v1261_v15 = vadd.f32 %v1232_v41, %v979_v38  ;;  %v1641_v61 = vadd.f32 %v1610_v29, %v1470_v5 }
 0x159   : > { %v2933_v13 = vpop.f32.mrf.mxu1  ;;  %v1648_v35 = vadd.f32 %v2909_v57, %v1477_v12  ;;  %v1927_v26 = vadd.f32 %v1908_v1, %v1645_v18  ;;  %v3653_v30 = vld [vmem:[#allocation3_spill] sm:$0xff] }
 0x15a   : > { %v1629_v7 = vpop.f32.mrf.mxu0  ;;  %v1471_v63 = vadd.f32 %v3652_v20, %v1261_v15  ;;  %v1923_v41 = vadd.f32 %v1892_v32, %v1641_v61  ;;  %v1926_v34 = vadd.f32 %v3653_v30, %v1644_v16 }
 0x15b   : > { %v1911_v11 = vpop.f32.mrf.mxu1  ;;  %v1646_v22 = vadd.f32 %v1629_v7, %v1475_v4  ;;  %v1930_v40 = vadd.f32 %v2933_v13, %v1648_v35  ;;  %v3654_v32 = vld [vmem:[#allocation4_spill] sm:$0xff] }
 0x15c   : > { %v1642_v27 = vadd.f32 %v1613_v10, %v1471_v63 }
 0x15d   : > { %v1928_v23 = vadd.f32 %v1911_v11, %v1646_v22 }
 0x15e   : > { %v1924_v10 = vadd.f32 %v3654_v32, %v1642_v27 }
 0x16c   : > { %v2952_v17 = vpop.f32.mrf.mxu0 }
 0x16d   : > { %v2135_v37 = vadd.f32 %v2952_v17, %v1925_v14  ;;  %v2956_v21 = vpop.f32.mrf.mxu1 }
 0x16e   : > { %v2139_v25 = vadd.f32 %v2956_v21, %v1929_v24  ;;  %v2102_v29 = vpop.f32.mrf.mxu0 }
 0x16f   : > { %v2133_v33 = vadd.f32 %v2102_v29, %v1923_v41  ;;  %v2118_v31 = vpop.f32.mrf.mxu1  ;;  %v2150_v45 = vadd.f32 %v2591_v0, %v2135_v37 }
 0x170   : > { %v2137_v42 = vadd.f32 %v2118_v31, %v1927_v26  ;;  %v2953_v43 = vpop.f32.mrf.mxu0  ;;  %v2154_v44 = vadd.f32 %v2591_v0, %v2139_v25 }
 0x171   : > { %v2136_v48 = vadd.f32 %v2953_v43, %v1926_v34  ;;  %v2957_v51 = vpop.f32.mrf.mxu1  ;;  %v2148_v49 = vadd.f32 %v2591_v0, %v2133_v33  ;;  %v2158_v56 = vmax.f32 %v2150_v45, 0.0 }
 0x172   : > { %v2140_v9 = vadd.f32 %v2957_v51, %v1930_v40  ;;  %v2105_v54 = vpop.f32.mrf.mxu0  ;;  %v2152_v28 = vadd.f32 %v2591_v0, %v2137_v42  ;;  %v2162_v2 = vmax.f32 %v2154_v44, 0.0 }
 0x173   : > { %v2151_v52 = vadd.f32 %v2591_v0, %v2136_v48  ;;  %v2134_v36 = vadd.f32 %v2105_v54, %v1924_v10  ;;  %v2121_v62 = vpop.f32.mrf.mxu1  ;;  %v2156_v50 = vmax.f32 %v2148_v49, 0.0 }
 0x174   : > { %v2155_v46 = vadd.f32 %v2591_v0, %v2140_v9  ;;  %v2138_v39 = vadd.f32 %v2121_v62, %v1928_v23  ;;  %v2160_v53 = vmax.f32 %v2152_v28, 0.0 }
 0x175   : > { %v2159_v1 = vmax.f32 %v2151_v52, 0.0  ;;  %v2149_v55 = vadd.f32 %v2591_v0, %v2134_v36 }
 0x176   : > { %v2163_v38 = vmax.f32 %v2155_v46, 0.0  ;;  %v2153_v47 = vadd.f32 %v2591_v0, %v2138_v39 }
 0x177   : > { %v2619_v58 = vpack.c.bf16 %v2159_v1, %v2158_v56  ;;  %v2157_v59 = vmax.f32 %v2149_v55, 0.0 }
 0x178   : > { %v2629_v57 = vpack.c.bf16 %v2163_v38, %v2162_v2  ;;  %v2161_v5 = vmax.f32 %v2153_v47, 0.0 }
 0x179   : > { %2631 = vst [vmem:[%s170_s21 + $0x8] sm:$0xff] %v2619_v58   ;;  %v2614_v15 = vpack.c.bf16 %v2157_v59, %v2156_v50 }
 0x17a   : > { %2633 = vst [vmem:[%s170_s21 + $0x18] sm:$0xff] %v2629_v57   ;;  %v2624_v60 = vpack.c.bf16 %v2161_v5, %v2160_v53 }
 0x17b   : > { %2615 = vst [vmem:[%s170_s21] sm:$0xff] %v2614_v15  }
 0x17c   : > { %2632 = vst [vmem:[%s170_s21 + $0x10] sm:$0xff] %v2624_v60  }
 0x17d PF: > { %s13_s12 = sadd.s32 1, %s3073_s12  }
 0x17e   : > { %p10_p4 = scmp.ge.s32.totalorder %s13_s12, 6  }
 0x180   :  { %12 = sbr.rel (!%p10_p4) target bundleno = 1 (0x1), region = 72 }

// kernel: _lambda_.5
= control target key start
LH: loop header
LB: loop body
LE: loop exit
PB: predicated region body
PF: predicated region fallthrough
CT: control target
= control target key end

     0   :  { %s6280_s12 = smov 0   ;;  %s8861_s0 = inlined_call_operand.vmem [shape: bf16[4,18,18,3], index: 0, kind: input, shape index: {}]   ;;  %s8862_s1 = inlined_call_operand.vmem [shape: bf16[9,3,128], index: 1, kind: input, shape index: {}]   ;;  %s8863_s2 = inlined_call_operand.vmem [shape: f32[1,128], index: 2, kind: input, shape index: {}]   ;;  %s8864_s3 = inlined_call_operand.vmem [shape: bf16[4,256,128], index: 3, kind: output, shape index: {}]  }
   0x1 LB: > { %s5020_s13 = sadd.s32 4294967295, %s6257_s12   ;;  %p5024_p0 = scmp.ge.s32.totalorder %s6257_s12, 1  ;;  %s6257_s12 = sphi %s6280_s12, %s13_s12  }
   0x2   : > { %p137_p1 = scmp.lt.s32.totalorder %s6257_s12, 5 }
   0x4   : > { %p138_p2 = pnand %p5024_p0, %p137_p1 }
   0x6   : > { %141 = sbr.rel (%p138_p2) target bundleno = 558 (0x22e), region = 32 }
   0xb   : > { %v5028_v0 = vld [vmem:[%s8862_s1 + $0x2] sm:$0x3]  ;;  %vm707_vm0 = vcmask 1040384   ;;  %vm708_vm1 = vcmask 1041408   ;;  %p161_p3 = scmp.lt.s32.totalorder %s5020_s13, 3  ;;  %v6259_v1 = vmov 65535  }
   0xc   : > { %v709_v2 = vsel %vm707_vm0, 4294967295, %v6259_v1  ;;  %v204_v4 = vld [vmem:[%s8862_s1] sm:$0x3]  ;;  %v5109_v5 = vld [vmem:[%s8862_s1 + $0x4] sm:$0x3]  ;;  %vm658_vm4 = vcmask 23552  }
   0xd   : > { %v6291_v3 = vsel %vm708_vm1, %v709_v2, 0  ;;  %s9070_s13 = smov (!%p161_p3, %s5020_s13), 3  ;;  %vm221_vm2 = vsmask.f32 3328  ;;  %vm222_vm3 = vsmask.f32 7440 }
   0xe   : > { %8894 = vst [vmem:[#allocation2_spill] sm:$0xff] %v6291_v3  ;;  %v712_v6 = vand.u32 %v5028_v0, %v6291_v3  ;;  %v6303_v7 = vand.u32 %v6291_v3, %v204_v4  ;;  %v6306_v8 = vand.u32 %v5109_v5, %v6291_v3  ;;  %s6188_s20 = smul.u32 216, %s9070_s13  ;;  %v5174_v9 = vld [vmem:[%s8862_s1 + $0x6] sm:$0x3]  ;;  %v5255_v10 = vld [vmem:[%s8862_s1 + $0x8] sm:$0x3]  ;;  %vm6364_vm5 = vmor %vm221_vm2, %vm222_vm3 }
   0xf   : > { %v6346_v22 = vand.u32 %v5174_v9, %v6291_v3  ;;  %v6349_v23 = vand.u32 %v5255_v10, %v6291_v3  ;;  %vm1215_vm6 = vcmask 1042432   ;;  %vm1216_vm7 = vcmask 1046532   ;;  %s5599_s11 = sshll.u32 %s9070_s13, 7 }
  0x10   : > { %6186 = vmatprep.subr.bf16.mxu1 %v712_v6  ;;  %5880 = vmatprep.subr.bf16.mxu0 %v712_v6  ;;  %s6312_s23 = scalar_lea.vmem %s8861_s0, %s6188_s20  ;;  %vm6630_vm8 = vmor %vm1215_vm6, %vm1216_vm7  ;;  %s8764_s15 = scalar_lea.vmem %s8864_s3, %s5599_s11 }
  0x11   : > { %6187 = vmatpush3.bf16.msra.mxu1 %v712_v6  ;;  %5881 = vmatpush3.bf16.msra.mxu0 %v712_v6  ;;  %v6321_v11 = vld [vmem:[%s6312_s23] sm:$0xf]  ;;  %v6324_v12 = vld [vmem:[%s6312_s23 + $0x4] sm:$0xf]  ;;  %v6327_v13 = vld [vmem:[%s6312_s23 + $0x8] sm:$0x1] }
  0x12   : > { %5914 = vmatprep.subr.bf16.mxu1 %v6303_v7  ;;  %5948 = vmatprep.subr.bf16.mxu0 %v6306_v8  ;;  %v225_v14 = vshrl.u32 %v6321_v11, 16  ;;  %v228_v15 = vshll.u32 %v6321_v11, 16  ;;  %v234_v16 = vshll.u32 %v6324_v12, 16  ;;  %v238_v17 = vshrl.u32 %v6324_v12, 16  ;;  %v6336_v18 = vld [vmem:[%s6312_s23 + $0x60] sm:$0xf] }
  0x13   : > { %v244_v19 = vshll.u32 %v6327_v13, 16  ;;  %v6340_v20 = vld [vmem:[%s6312_s23 + $0x64] sm:$0xf]  ;;  %v6343_v21 = vld [vmem:[%s6312_s23 + $0x68] sm:$0x1]  ;;  %v417_v29 = vshrl.u32 %v6336_v18, 16 }
  0x14   : > { %v227_v24 = vrot.slane %v225_v14, 4  ;;  %v230_v25 = vrot.slane %v228_v15, 5  ;;  %v236_v26 = vrot.slane %v234_v16, 5  ;;  %v240_v27 = vrot.slane %v238_v17, 4  ;;  %v6357_v36 = vld [vmem:[%s6312_s23 + $0xc] sm:$0xf] }
  0x15   : > { %v246_v28 = vrot.slane %v244_v19, 5  ;;  %v420_v30 = vshll.u32 %v6336_v18, 16  ;;  %v426_v31 = vshll.u32 %v6340_v20, 16  ;;  %v430_v34 = vshrl.u32 %v6340_v20, 16  ;;  %v6360_v37 = vld [vmem:[%s6312_s23 + $0x10] sm:$0xf] }
  0x16   : > { %v231_v32 = vor.u32 %v230_v25, %v227_v24  ;;  %v241_v33 = vor.u32 %v240_v27, %v236_v26  ;;  %v436_v35 = vshll.u32 %v6343_v21, 16  ;;  %v419_v40 = vrot.slane %v417_v29, 4  ;;  %v6370_v48 = vld [vmem:[%s6312_s23 + $0x14] sm:$0x1]  ;;  %v190_v60 = vld [vmem:[%s6312_s23 + $0x6c] sm:$0xf] }
  0x17   : > { %v422_v41 = vrot.slane %v420_v30, 5  ;;  %v428_v42 = vrot.slane %v426_v31, 5  ;;  %v432_v45 = vrot.slane %v430_v34, 4  ;;  %v249_v49 = vshrl.u32 %v6357_v36, 16  ;;  %v6383_v1 = vld [vmem:[%s6312_s23 + $0x70] sm:$0xf] }
  0x18   : > { %v232_v43 = vrot.slane %v231_v32, 4  ;;  %v242_v44 = vrot.slane %v241_v33, 4  ;;  %v438_v46 = vrot.slane %v436_v35, 5  ;;  %v252_v50 = vshll.u32 %v6357_v36, 16  ;;  %v6391_v9 = vld [vmem:[%s6312_s23 + $0x74] sm:$0x1] }
  0x19   : > { %v423_v47 = vor.u32 %v422_v41, %v419_v40  ;;  %v258_v51 = vshll.u32 %v6360_v37, 16  ;;  %v433_v54 = vor.u32 %v432_v45, %v428_v42  ;;  %v262_v55 = vshrl.u32 %v6360_v37, 16  ;;  %v6396_v17 = vld [vmem:[%s6312_s23 + $0x18] sm:$0xf]  ;;  %v6402_v31 = vld [vmem:[%s6312_s23 + $0x1c] sm:$0xf] }
  0x1a   : > { %v237_v52 = vsel %vm6364_vm5, %v232_v43, %v236_v26  ;;  %v247_v53 = vsel %vm6364_vm5, %v242_v44, %v246_v28  ;;  %v251_v58 = vrot.slane %v249_v49, 4  ;;  %v254_v59 = vrot.slane %v252_v50, 5  ;;  %v6408_v35 = vld [vmem:[%s6312_s23 + $0x20] sm:$0x1]  ;;  %v192_v45 = vld [vmem:[%s6312_s23 + $0x78] sm:$0xf] }
  0x1b   : > { %v5029_v56 = vcombine.low %v237_v52, %v247_v53  ;;  %v424_v57 = vrot.slane %v423_v47, 4  ;;  %v434_v61 = vrot.slane %v433_v54, 4  ;;  %v260_v62 = vrot.slane %v258_v51, 5 }
  0x1c   : > { %v264_v63 = vrot.slane %v262_v55, 4  ;;  %v268_v0 = vshll.u32 %v6370_v48, 16  ;;  %v255_v4 = vor.u32 %v254_v59, %v251_v58  ;;  %v441_v16 = vshrl.u32 %v190_v60, 16  ;;  %v6419_v55 = vld [vmem:[%s6312_s23 + $0x7c] sm:$0xf] }
  0x1d   : > { %5882 = vmatprep.mubr.msk.bf16.mxu0 %vm658_vm4, %v5029_v56  ;;  %v429_v2 = vsel %vm6364_vm5, %v424_v57, %v428_v42  ;;  %v439_v10 = vsel %vm6364_vm5, %v434_v61, %v438_v46  ;;  %v444_v25 = vshll.u32 %v190_v60, 16  ;;  %v450_v26 = vshll.u32 %v6383_v1, 16  ;;  %8897 = vst [vmem:[#allocation3_spill] sm:$0xff] %v6419_v55 }
  0x1e   : > { %v265_v14 = vor.u32 %v264_v63, %v260_v62  ;;  %v270_v15 = vrot.slane %v268_v0, 5  ;;  %v5037_v19 = vcombine.low %v429_v2, %v439_v10  ;;  %v256_v24 = vrot.slane %v255_v4, 4  ;;  %v6424_v0 = vld [vmem:[%s6312_s23 + $0x80] sm:$0x1] }
  0x1f   : > { %v443_v28 = vrot.slane %v441_v16, 4  ;;  %v454_v29 = vshrl.u32 %v6383_v1, 16  ;;  %v460_v30 = vshll.u32 %v6391_v9, 16  ;;  %v446_v33 = vrot.slane %v444_v25, 5  ;;  %8898 = vst [vmem:[#allocation4_spill] sm:$0xff] %v6424_v0 }
  0x20   : > { %v266_v27 = vrot.slane %v265_v14, 4  ;;  %5898 = vmatprep.mubr.msk.bf16.mxu1 %vm658_vm4, %v5037_v19  ;;  %v261_v32 = vsel %vm6364_vm5, %v256_v24, %v260_v62  ;;  %v452_v34 = vrot.slane %v450_v26, 5  ;;  %v273_v40 = vshrl.u32 %v6396_v17, 16  ;;  %v6437_v25 = vld [vmem:[%s6312_s23 + $0x28] sm:$0xf] }
  0x21   : > { %v456_v42 = vrot.slane %v454_v29, 4  ;;  %v462_v43 = vrot.slane %v460_v30, 5  ;;  %v276_v44 = vshll.u32 %v6396_v17, 16  ;;  %v447_v47 = vor.u32 %v446_v33, %v443_v28 }
  0x22   : > { %v271_v41 = vsel %vm6364_vm5, %v266_v27, %v270_v15  ;;  %v275_v49 = vrot.slane %v273_v40, 4  ;;  %v282_v50 = vshll.u32 %v6402_v31, 16  ;;  %v286_v53 = vshrl.u32 %v6402_v31, 16  ;;  %v6430_v15 = vld [vmem:[%s6312_s23 + $0x24] sm:$0xf] }
  0x23   : > { %v5030_v46 = vcombine.low %v261_v32, %v271_v41  ;;  %v457_v51 = vor.u32 %v456_v42, %v452_v34  ;;  %v278_v52 = vrot.slane %v276_v44, 5  ;;  %v292_v54 = vshll.u32 %v6408_v35, 16 }
  0x24   : > { %v448_v56 = vrot.slane %v447_v47, 4  ;;  %v284_v57 = vrot.slane %v282_v50, 5  ;;  %v465_v58 = vshrl.u32 %v192_v45, 16  ;;  %v468_v59 = vshll.u32 %v192_v45, 16  ;;  %v6450_v45 = vld [vmem:[%s6312_s23 + $0x84] sm:$0xf] }
  0x25   : > { %5883 = vmatmul.mubr.msk.bf16.vlgmr.msra.gmra.mxu0 %vm658_vm4, %v5030_v46  ;;  %v458_v60 = vrot.slane %v457_v51, 4  ;;  %v279_v61 = vor.u32 %v278_v52, %v275_v49  ;;  %v288_v62 = vrot.slane %v286_v53, 4  ;;  %v294_v63 = vrot.slane %v292_v54, 5  ;;  %v6457_v51 = vld [vmem:[%s6312_s23 + $0x88] sm:$0xf] }
  0x26   : > { %5949 = vmatpush3.bf16.msra.mxu0 %v6306_v8  ;;  %v453_v2 = vsel %vm6364_vm5, %v448_v56, %v452_v34  ;;  %v467_v4 = vrot.slane %v465_v58, 4  ;;  %v470_v10 = vrot.slane %v468_v59, 5  ;;  %v474_v14 = vshll.u32 %v6419_v55, 16  ;;  %v6443_v34 = vld [vmem:[%s6312_s23 + $0x2c] sm:$0x1] }
  0x27   : > { %6016 = vmatprep.subr.bf16.mxu0 %v6349_v23  ;;  %v463_v8 = vsel %vm6364_vm5, %v458_v60, %v462_v43  ;;  %v280_v16 = vrot.slane %v279_v61, 4  ;;  %v289_v19 = vor.u32 %v288_v62, %v284_v57  ;;  %v478_v24 = vshrl.u32 %v6419_v55, 16  ;;  %v6464_v59 = vld [vmem:[%s6312_s23 + $0x8c] sm:$0x1] }
  0x28   : > { %v5038_v26 = vcombine.low %v453_v2, %v463_v8  ;;  %v471_v27 = vor.u32 %v470_v10, %v467_v4  ;;  %v476_v28 = vrot.slane %v474_v14, 5  ;;  %v484_v29 = vshll.u32 %v6424_v0, 16  ;;  %v6472_v4 = vld [vmem:[%s6312_s23 + $0x30] sm:$0xf] }
  0x29   : > { %v285_v30 = vsel %vm6364_vm5, %v280_v16, %v284_v57  ;;  %v290_v32 = vrot.slane %v289_v19, 4  ;;  %v480_v33 = vrot.slane %v478_v24, 4  ;;  %v297_v40 = vshrl.u32 %v6430_v15, 16  ;;  %v6477_v19 = vld [vmem:[%s6312_s23 + $0x34] sm:$0xf] }
  0x2a   : > { %5899 = vmatmul.mubr.msk.bf16.vlgmr.msra.gmra.mxu1 %vm658_vm4, %v5038_v26  ;;  %v472_v41 = vrot.slane %v471_v27, 4  ;;  %v486_v42 = vrot.slane %v484_v29, 5  ;;  %v300_v43 = vshll.u32 %v6430_v15, 16  ;;  %v306_v44 = vshll.u32 %v6437_v25, 16 }
  0x2b   : > { %5915 = vmatpush3.bf16.msra.mxu1 %v6303_v7  ;;  %v295_v46 = vsel %vm6364_vm5, %v290_v32, %v294_v63  ;;  %v481_v47 = vor.u32 %v480_v33, %v476_v28  ;;  %v299_v49 = vrot.slane %v297_v40, 4  ;;  %v310_v50 = vshrl.u32 %v6437_v25, 16 }
  0x2c   : > { %v5031_v52 = vcombine.low %v285_v30, %v295_v46  ;;  %v477_v53 = vsel %vm6364_vm5, %v472_v41, %v476_v28  ;;  %v302_v54 = vrot.slane %v300_v43, 5  ;;  %v308_v56 = vrot.slane %v306_v44, 5  ;;  %5982 = vmatprep.subr.bf16.mxu1 %v6346_v22  ;;  %v6490_v46 = vld [vmem:[%s6312_s23 + $0x90] sm:$0xf] }
  0x2d   : > { %v482_v7 = vrot.slane %v481_v47, 4  ;;  %v312_v57 = vrot.slane %v310_v50, 4  ;;  %v316_v58 = vshll.u32 %v6443_v34, 16  ;;  %v489_v60 = vshrl.u32 %v6450_v45, 16 }
  0x2e   : > { %5886 = vmatprep.mubr.msk.bf16.mxu0 %vm658_vm4, %v5031_v52  ;;  %v303_v61 = vor.u32 %v302_v54, %v299_v49  ;;  %v492_v62 = vshll.u32 %v6450_v45, 16  ;;  %v498_v63 = vshll.u32 %v6457_v51, 16  ;;  %v502_v2 = vshrl.u32 %v6457_v51, 16 }
  0x2f   : > { %v487_v10 = vsel %vm6364_vm5, %v482_v7, %v486_v42  ;;  %v313_v14 = vor.u32 %v312_v57, %v308_v56  ;;  %v318_v8 = vrot.slane %v316_v58, 5  ;;  %v491_v16 = vrot.slane %v489_v60, 4  ;;  %v6485_v42 = vld [vmem:[%s6312_s23 + $0x38] sm:$0x1] }
  0x30   : > { %v5039_v24 = vcombine.low %v477_v53, %v487_v10  ;;  %v304_v26 = vrot.slane %v303_v61, 4  ;;  %v494_v27 = vrot.slane %v492_v62, 5  ;;  %v500_v28 = vrot.slane %v498_v63, 5  ;;  %v6495_v53 = vld [vmem:[%s6312_s23 + $0x94] sm:$0xf] }
  0x31   : > { %v314_v29 = vrot.slane %v313_v14, 4  ;;  %v504_v30 = vrot.slane %v502_v2, 4  ;;  %v508_v32 = vshll.u32 %v6464_v59, 16  ;;  %v321_v33 = vshrl.u32 %v6472_v4, 16  ;;  %v6504_v10 = vld [vmem:[%s6312_s23 + $0x98] sm:$0x1] }
  0x32   : > { %5902 = vmatprep.mubr.msk.bf16.mxu1 %vm658_vm4, %v5039_v24  ;;  %v309_v40 = vsel %vm6364_vm5, %v304_v26, %v308_v56  ;;  %v495_v41 = vor.u32 %v494_v27, %v491_v16  ;;  %v324_v43 = vshll.u32 %v6472_v4, 16  ;;  %v330_v44 = vshll.u32 %v6477_v19, 16  ;;  %8899 = vst [vmem:[#allocation5_spill] sm:$0xff] %v6504_v10  ;;  %v6509_v16 = vld [vmem:[%s6312_s23 + $0x3c] sm:$0xf] }
  0x33   : > { %v319_v47 = vsel %vm6364_vm5, %v314_v29, %v318_v8  ;;  %v505_v49 = vor.u32 %v504_v30, %v500_v28  ;;  %v510_v50 = vrot.slane %v508_v32, 5  ;;  %v323_v52 = vrot.slane %v321_v33, 4  ;;  %v6514_v30 = vld [vmem:[%s6312_s23 + $0x40] sm:$0xf] }
  0x34   : > { %v5032_v54 = vcombine.low %v309_v40, %v319_v47  ;;  %v496_v56 = vrot.slane %v495_v41, 4  ;;  %v326_v7 = vrot.slane %v324_v43, 5  ;;  %v332_v57 = vrot.slane %v330_v44, 5 }
  0x35   : > { %v506_v58 = vrot.slane %v505_v49, 4  ;;  %v334_v60 = vshrl.u32 %v6477_v19, 16  ;;  %v340_v61 = vshll.u32 %v6485_v42, 16  ;;  %v513_v62 = vshrl.u32 %v6490_v46, 16 }
  0x36   : > { %5887 = vmatmul.mubr.msk.bf16.gmra.mxu0 %vm658_vm4, %v5032_v54  ;;  %v501_v63 = vsel %vm6364_vm5, %v496_v56, %v500_v28  ;;  %v327_v2 = vor.u32 %v326_v7, %v323_v52  ;;  %v516_v14 = vshll.u32 %v6490_v46, 16  ;;  %v522_v8 = vshll.u32 %v6495_v53, 16  ;;  %v6523_v52 = vld [vmem:[%s6312_s23 + $0x44] sm:$0x1]  ;;  %v6528_v7 = vld [vmem:[%s6312_s23 + $0x9c] sm:$0xf] }
  0x37   : > { %v511_v24 = vsel %vm6364_vm5, %v506_v58, %v510_v50  ;;  %v336_v26 = vrot.slane %v334_v60, 4  ;;  %v342_v27 = vrot.slane %v340_v61, 5  ;;  %v515_v29 = vrot.slane %v513_v62, 4  ;;  %8900 = vst [vmem:[#allocation6_spill] sm:$0xff] %v6528_v7 }
  0x38   : > { %v5040_v28 = vcombine.low %v501_v63, %v511_v24  ;;  %v328_v32 = vrot.slane %v327_v2, 4  ;;  %v518_v33 = vrot.slane %v516_v14, 5  ;;  %v524_v40 = vrot.slane %v522_v8, 5  ;;  %v6532_v8 = vld [vmem:[%s6312_s23 + $0xa0] sm:$0xf] }
  0x39   : > { %v337_v41 = vor.u32 %v336_v26, %v332_v57  ;;  %v526_v43 = vshrl.u32 %v6495_v53, 16  ;;  %v532_v44 = vshll.u32 %v6504_v10, 16  ;;  %v345_v47 = vshrl.u32 %v6509_v16, 16  ;;  %8901 = vst [vmem:[#allocation7_spill] sm:$0xff] %v6532_v8  ;;  %v1168_v10 = vld [vmem:[%s6312_s23 + $0xc] sm:$0xe] }
  0x3a   : > { %5903 = vmatmul.mubr.msk.bf16.gmra.mxu1 %vm658_vm4, %v5040_v28  ;;  %v333_v49 = vsel %vm6364_vm5, %v328_v32, %v332_v57  ;;  %v519_v50 = vor.u32 %v518_v33, %v515_v29  ;;  %v348_v54 = vshll.u32 %v6509_v16, 16  ;;  %v354_v56 = vshll.u32 %v6514_v30, 16  ;;  %v6538_v28 = vld [vmem:[%s6312_s23 + $0xa4] sm:$0x1]  ;;  %v6542_v33 = vld [vmem:[%s6312_s23 + $0x48] sm:$0xf] }
  0x3b   : > { %v338_v58 = vrot.slane %v337_v41, 4  ;;  %v528_v60 = vrot.slane %v526_v43, 4  ;;  %v534_v61 = vrot.slane %v532_v44, 5  ;;  %v347_v62 = vrot.slane %v345_v47, 4  ;;  %8902 = vst [vmem:[#allocation8_spill] sm:$0xff] %v6538_v28 }
  0x3c   : > { %v520_v63 = vrot.slane %v519_v50, 4  ;;  %v350_v2 = vrot.slane %v348_v54, 5  ;;  %v356_v14 = vrot.slane %v354_v56, 5  ;;  %v358_v57 = vshrl.u32 %v6514_v30, 16 }
  0x3d   : > { %v343_v24 = vsel %vm6364_vm5, %v338_v58, %v342_v27  ;;  %v529_v26 = vor.u32 %v528_v60, %v524_v40  ;;  %v364_v29 = vshll.u32 %v6523_v52, 16  ;;  %v537_v32 = vshrl.u32 %v6528_v7, 16 }
  0x3e   : > { %v5033_v41 = vcombine.low %v333_v49, %v343_v24  ;;  %v525_v43 = vsel %vm6364_vm5, %v520_v63, %v524_v40  ;;  %v351_v44 = vor.u32 %v350_v2, %v347_v62  ;;  %v360_v47 = vrot.slane %v358_v57, 4  ;;  %v6551_v24 = vld [vmem:[%s6312_s23 + $0x4c] sm:$0xf]  ;;  %v6557_v2 = vld [vmem:[%s6312_s23 + $0x50] sm:$0x1] }
  0x3f   : > { %v530_v50 = vrot.slane %v529_v26, 4  ;;  %v366_v54 = vrot.slane %v364_v29, 5  ;;  %v539_v27 = vrot.slane %v537_v32, 4  ;;  %v540_v56 = vshll.u32 %v6528_v7, 16 }
  0x40   : > { %5890 = vmatprep.mubr.msk.bf16.mxu0 %vm658_vm4, %v5033_v41  ;;  %v352_v58 = vrot.slane %v351_v44, 4  ;;  %v361_v60 = vor.u32 %v360_v47, %v356_v14  ;;  %v546_v6 = vshll.u32 %v6532_v8, 16  ;;  %v550_v49 = vshrl.u32 %v6532_v8, 16  ;;  %v6563_v44 = vld [vmem:[%s6312_s23 + $0xa8] sm:$0xf] }
  0x41   : > { %v535_v40 = vsel %vm6364_vm5, %v530_v50, %v534_v61  ;;  %v542_v62 = vrot.slane %v540_v56, 5  ;;  %v556_v63 = vshll.u32 %v6538_v28, 16  ;;  %v369_v57 = vshrl.u32 %v6542_v33, 16  ;;  %8903 = vst [vmem:[#allocation9_spill] sm:$0xff] %v6563_v44 }
  0x42   : > { %v5041_v26 = vcombine.low %v525_v43, %v535_v40  ;;  %v357_v29 = vsel %vm6364_vm5, %v352_v58, %v356_v14  ;;  %v362_v32 = vrot.slane %v361_v60, 4  ;;  %v548_v41 = vrot.slane %v546_v6, 5 }
  0x43   : > { %v543_v47 = vor.u32 %v542_v62, %v539_v27  ;;  %v552_v39 = vrot.slane %v550_v49, 4  ;;  %v558_v61 = vrot.slane %v556_v63, 5  ;;  %v371_v50 = vrot.slane %v369_v57, 4  ;;  %v6573_v49 = vld [vmem:[%s6312_s23 + $0xac] sm:$0xf] }
  0x44   : > { %5906 = vmatprep.mubr.msk.bf16.mxu1 %vm658_vm4, %v5041_v26  ;;  %v367_v56 = vsel %vm6364_vm5, %v362_v32, %v366_v54  ;;  %v372_v43 = vshll.u32 %v6542_v33, 16  ;;  %v378_v40 = vshll.u32 %v6551_v24, 16  ;;  %v382_v14 = vshrl.u32 %v6551_v24, 16  ;;  %8904 = vst [vmem:[#allocation10_spill] sm:$0xff] %v6573_v49  ;;  %v6576_v26 = vld [vmem:[%s6312_s23 + $0xb0] sm:$0x1] }
  0x45   : > { %v5034_v58 = vcombine.low %v357_v29, %v367_v56  ;;  %v544_v6 = vrot.slane %v543_v47, 4  ;;  %v553_v60 = vor.u32 %v552_v39, %v548_v41  ;;  %v388_v27 = vshll.u32 %v6557_v2, 16  ;;  %8905 = vst [vmem:[#allocation11_spill] sm:$0xff] %v6576_v26 }
  0x46   : > { %v374_v62 = vrot.slane %v372_v43, 5  ;;  %v380_v63 = vrot.slane %v378_v40, 5  ;;  %v384_v57 = vrot.slane %v382_v14, 4  ;;  %v561_v54 = vshrl.u32 %v6563_v44, 16  ;;  %v6585_v14 = vld [vmem:[%s6312_s23 + $0x54] sm:$0xf] }
  0x47   : > { %5891 = vmatmul.mubr.msk.bf16.gmra.mxu0 %vm658_vm4, %v5034_v58  ;;  %v549_v29 = vsel %vm6364_vm5, %v544_v6, %v548_v41  ;;  %v554_v32 = vrot.slane %v553_v60, 4  ;;  %v390_v39 = vrot.slane %v388_v27, 5  ;;  %v564_v47 = vshll.u32 %v6563_v44, 16  ;;  %v6592_v60 = vld [vmem:[%s6312_s23 + $0x58] sm:$0xf] }
  0x48   : > { %v375_v56 = vor.u32 %v374_v62, %v371_v50  ;;  %v385_v5 = vor.u32 %v384_v57, %v380_v63  ;;  %v563_v43 = vrot.slane %v561_v54, 4  ;;  %v570_v40 = vshll.u32 %v6573_v49, 16  ;;  %v6595_v54 = vld [vmem:[%s6312_s23 + $0x5c] sm:$0x1] }
  0x49   : > { %v559_v58 = vsel %vm6364_vm5, %v554_v32, %v558_v61  ;;  %v566_v3 = vrot.slane %v564_v47, 5  ;;  %v574_v41 = vshrl.u32 %v6573_v49, 16  ;;  %v580_v6 = vshll.u32 %v6576_v26, 16  ;;  %v1167_v26 = vld [vmem:[%s6312_s23] sm:$0xe] }
  0x4a   : > { %v5042_v50 = vcombine.low %v549_v29, %v559_v58  ;;  %v376_v27 = vrot.slane %v375_v56, 4  ;;  %v386_v62 = vrot.slane %v385_v5, 4  ;;  %v572_v57 = vrot.slane %v570_v40, 5  ;;  %v6606_v56 = vld [vmem:[%s6312_s23 + $0xb4] sm:$0xf] }
  0x4b   : > { %v567_v0 = vor.u32 %v566_v3, %v563_v43  ;;  %v576_v44 = vrot.slane %v574_v41, 4  ;;  %v582_v28 = vrot.slane %v580_v6, 5  ;;  %v393_v61 = vshrl.u32 %v6585_v14, 16  ;;  %8906 = vst [vmem:[#allocation12_spill] sm:$0xff] %v6606_v56  ;;  %v6609_v41 = vld [vmem:[%s6312_s23 + $0xb8] sm:$0xf] }
  0x4c   : > { %5907 = vmatmul.mubr.msk.bf16.gmra.mxu1 %vm658_vm4, %v5042_v50  ;;  %v381_v32 = vsel %vm6364_vm5, %v376_v27, %v380_v63  ;;  %v391_v29 = vsel %vm6364_vm5, %v386_v62, %v390_v39  ;;  %v396_v5 = vshll.u32 %v6585_v14, 16  ;;  %v402_v47 = vshll.u32 %v6592_v60, 16  ;;  %v6614_v39 = vld [vmem:[%s6312_s23 + $0xbc] sm:$0x1] }
  0x4d   : > { %v5035_v3 = vcombine.low %v381_v32, %v391_v29  ;;  %v568_v43 = vrot.slane %v567_v0, 4  ;;  %v577_v40 = vor.u32 %v576_v44, %v572_v57  ;;  %v395_v58 = vrot.slane %v393_v61, 4 }
  0x4e   : > { %v398_v6 = vrot.slane %v396_v5, 5  ;;  %v404_v50 = vrot.slane %v402_v47, 5  ;;  %v406_v63 = vshrl.u32 %v6592_v60, 16  ;;  %v412_v27 = vshll.u32 %v6595_v54, 16 }
  0x4f   : > { %5894 = vmatprep.mubr.msk.bf16.mxu0 %vm658_vm4, %v5035_v3  ;;  %v573_v62 = vsel %vm6364_vm5, %v568_v43, %v572_v57  ;;  %v578_v32 = vrot.slane %v577_v40, 4  ;;  %v585_v0 = vshrl.u32 %v6606_v56, 16  ;;  %v588_v44 = vshll.u32 %v6606_v56, 16 }
  0x50   : > { %v399_v61 = vor.u32 %v398_v6, %v395_v58  ;;  %v408_v29 = vrot.slane %v406_v63, 4  ;;  %v414_v5 = vrot.slane %v412_v27, 5  ;;  %v594_v47 = vshll.u32 %v6609_v41, 16 }
  0x51   : > { %v583_v49 = vsel %vm6364_vm5, %v578_v32, %v582_v28  ;;  %v587_v55 = vrot.slane %v585_v0, 4  ;;  %v590_v3 = vrot.slane %v588_v44, 5  ;;  %v598_v7 = vshrl.u32 %v6609_v41, 16 }
  0x52   : > { %v5043_v57 = vcombine.low %v573_v62, %v583_v49  ;;  %v400_v43 = vrot.slane %v399_v61, 4  ;;  %v409_v40 = vor.u32 %v408_v29, %v404_v50  ;;  %v596_v8 = vrot.slane %v594_v47, 5  ;;  %v1169_v61 = vld [vmem:[%s6312_s23 + $0x18] sm:$0xe] }
  0x53   : > { %v591_v56 = vor.u32 %v590_v3, %v587_v55  ;;  %v600_v58 = vrot.slane %v598_v7, 4  ;;  %v604_v6 = vshll.u32 %v6614_v39, 16  ;;  %v5093_v28 = vrot.slane %v1167_v26, 9 }
  0x54   : > { %5910 = vmatprep.mubr.msk.bf16.mxu1 %vm658_vm4, %v5043_v57  ;;  %v405_v49 = vsel %vm6364_vm5, %v400_v43, %v404_v50  ;;  %v410_v27 = vrot.slane %v409_v40, 4  ;;  %v1220_v62 = vrot.slane %v6324_v12, 5  ;;  %v5062_v55 = vcombine.low %v6357_v36, %v6360_v37 }
  0x55   : > { %v592_v7 = vrot.slane %v591_v56, 4  ;;  %v601_v32 = vor.u32 %v600_v58, %v596_v8  ;;  %v606_v0 = vrot.slane %v604_v6, 5  ;;  %v5094_v44 = vrot.slane %v1168_v10, 9  ;;  %v1170_v6 = vld [vmem:[%s6312_s23 + $0x24] sm:$0xe] }
  0x56   : > { %v415_v26 = vsel %vm6364_vm5, %v410_v27, %v414_v5  ;;  %v1221_v29 = vsel %vm6630_vm8, %v5093_v28, %v1220_v62  ;;  %v1222_v47 = vrot.slane %v1220_v62, 4  ;;  %v8909_v50 = vrot.slane %v6360_v37, 5 }
  0x57   : > { %v5036_v57 = vcombine.low %v405_v49, %v415_v26  ;;  %v597_v43 = vsel %vm6364_vm5, %v592_v7, %v596_v8  ;;  %v602_v56 = vrot.slane %v601_v32, 4  ;;  %v8910_v40 = vrot.slane %v6327_v13, 5 }
  0x58   : > { %v1229_v3 = vrot.slane %v8909_v50, 4  ;;  %v5063_v5 = vcombine.low %v6396_v17, %v6402_v31  ;;  %v5095_v58 = vrot.slane %v1169_v61, 9  ;;  %v5061_v49 = vcombine.low %v6321_v11, %v6324_v12  ;;  %v1171_v61 = vld [vmem:[%s6312_s23 + $0x30] sm:$0xe] }
  0x59   : > { %v1224_v10 = vsel %vm6630_vm8, %v1222_v47, %v8910_v40  ;;  %5895 = vmatmul.mubr.msk.bf16.gmra.mxu0 %vm658_vm4, %v5036_v57  ;;  %v607_v28 = vsel %vm6364_vm5, %v602_v56, %v606_v0  ;;  %v1234_v13 = vrot.slane %v6402_v31, 5  ;;  %v8911_v62 = vmov %v8909_v50 }
  0x5a   : > { %v5110_v8 = vcombine.low %v1221_v29, %v1224_v10  ;;  %v5044_v27 = vcombine.low %v597_v43, %v607_v28  ;;  %v1228_v17 = vsel %vm6630_vm8, %v5094_v44, %v8911_v62  ;;  %v8912_v7 = vrot.slane %v6370_v48, 5  ;;  %v1172_v29 = vld [vmem:[%s6312_s23 + $0x3c] sm:$0xe] }
  0x5b   : > { %v1237_v0 = vrot.slane %v6408_v35, 5  ;;  %v1235_v11 = vsel %vm6630_vm8, %v5095_v58, %v1234_v13  ;;  %v1236_v12 = vrot.slane %v1234_v13, 4  ;;  %v5096_v31 = vrot.slane %v1170_v6, 9  ;;  %v1174_v13 = vld [vmem:[%s6312_s23 + $0x54] sm:$0xe] }
  0x5c   : > { %v1231_v32 = vsel %vm6630_vm8, %v1229_v3, %v8912_v7  ;;  %5950 = vmatprep.mubr.msk.bf16.mxu0 %vm658_vm4, %v5110_v8  ;;  %v1241_v26 = vrot.slane %v6437_v25, 5  ;;  %5911 = vmatmul.mubr.msk.bf16.gmra.mxu1 %vm658_vm4, %v5044_v27  ;;  %v1244_v48 = vrot.slane %v6443_v34, 5  ;;  %v1248_v44 = vrot.slane %v6477_v19, 5  ;;  %v1173_v3 = vld [vmem:[%s6312_s23 + $0x48] sm:$0xe] }
  0x5d   : > { %5916 = vmatprep.mubr.msk.bf16.mxu1 %vm658_vm4, %v5061_v49  ;;  %v5111_v35 = vcombine.low %v1228_v17, %v1231_v32  ;;  %v1238_v47 = vsel %vm6630_vm8, %v1236_v12, %v1237_v0  ;;  %v5097_v43 = vrot.slane %v1171_v61, 9  ;;  %v1251_v56 = vrot.slane %v6485_v42, 5 }
  0x5e   : > { %v1243_v50 = vrot.slane %v1241_v26, 4  ;;  %v5112_v57 = vcombine.low %v1235_v11, %v1238_v47  ;;  %v1242_v40 = vsel %vm6630_vm8, %v5096_v31, %v1241_v26  ;;  %v1250_v34 = vrot.slane %v1248_v44, 4 }
  0x5f   : > { %v5098_v10 = vrot.slane %v1172_v29, 9  ;;  %v1255_v58 = vrot.slane %v6514_v30, 5  ;;  %v1258_v28 = vrot.slane %v6523_v52, 5  ;;  %v5099_v49 = vrot.slane %v1173_v3, 9  ;;  %v1175_v52 = vld [vmem:[%s6312_s23 + $0x60] sm:$0xe] }
  0x60   : > { %v1245_v6 = vsel %vm6630_vm8, %v1243_v50, %v1244_v48  ;;  %v1262_v8 = vrot.slane %v6551_v24, 5  ;;  %v1265_v27 = vrot.slane %v6557_v2, 5  ;;  %v1279_v62 = vrot.slane %v6343_v21, 5  ;;  %v6733_v48 = vld [vmem:[%s6312_s23 + $0x6c] sm:$0xe] }
  0x61   : > { %5951 = vmatmul.mubr.msk.bf16.vlgmr.msra.gmra.mxu0 %vm658_vm4, %v5111_v35  ;;  %v1257_v42 = vrot.slane %v1255_v58, 4  ;;  %v1249_v17 = vsel %vm6630_vm8, %v5097_v43, %v1248_v44  ;;  %v5113_v32 = vcombine.low %v1242_v40, %v1245_v6  ;;  %v1252_v0 = vsel %vm6630_vm8, %v1250_v34, %v1251_v56  ;;  %v6754_v3 = vld [vmem:[%s6312_s23 + $0x78] sm:$0xe] }
  0x62   : > { %6017 = vmatpush3.bf16.msra.mxu0 %v6349_v23  ;;  %5954 = vmatprep.mubr.msk.bf16.mxu0 %vm658_vm4, %v5112_v57  ;;  %v1264_v7 = vrot.slane %v1262_v8, 4  ;;  %v6705_v61 = vsel %vm6630_vm8, %v5098_v10, %v1255_v58  ;;  %v1269_v2 = vrot.slane %v6592_v60, 5  ;;  %v6714_v21 = vsel %vm6630_vm8, %v5099_v49, %v1262_v8  ;;  %v1179_v57 = vld [vmem:[%s6312_s23 + $0x90] sm:$0xe]  ;;  %v1180_v49 = vld [vmem:[%s6312_s23 + $0x9c] sm:$0xe] }
  0x63   : > { %v5100_v23 = vrot.slane %v1174_v13, 9  ;;  %v1272_v11 = vrot.slane %v6595_v54, 5  ;;  %v1276_v12 = vrot.slane %v6340_v20, 5  ;;  %v1259_v36 = vsel %vm6630_vm8, %v1257_v42, %v1258_v28 }
  0x64   : > { %5917 = vmatmul.mubr.msk.bf16.vlgmr.msra.gmra.mxu1 %vm658_vm4, %v5062_v55  ;;  %v6724_v37 = vsel %vm6630_vm8, %v1264_v7, %v1265_v27  ;;  %v1271_v55 = vrot.slane %v1269_v2, 4  ;;  %v5101_v31 = vrot.slane %v1175_v52, 9  ;;  %v5064_v54 = vcombine.low %v6430_v15, %v6437_v25  ;;  %v1178_v15 = vld [vmem:[%s6312_s23 + $0x84] sm:$0xe]  ;;  %v1181_v27 = vld [vmem:[%s6312_s23 + $0xa8] sm:$0xe] }
  0x65   : > { %5983 = vmatpush3.bf16.msra.mxu1 %v6346_v22  ;;  %5920 = vmatprep.mubr.msk.bf16.mxu1 %vm658_vm4, %v5063_v5  ;;  %v5065_v26 = vcombine.low %v6472_v4, %v6477_v19  ;;  %v5114_v22 = vcombine.low %v1249_v17, %v1252_v0  ;;  %v5066_v5 = vcombine.low %v6509_v16, %v6514_v30  ;;  %v1278_v47 = vrot.slane %v1276_v12, 4  ;;  %v8913_v52 = vld [vmem:[#allocation5_spill] sm:$0xff]  ;;  %v8914_v0 = vld [vmem:[#allocation7_spill] sm:$0xff] }
  0x66   : > { %v5067_v44 = vcombine.low %v6542_v33, %v6551_v24  ;;  %v5068_v29 = vcombine.low %v6585_v14, %v6592_v60  ;;  %v5069_v35 = vcombine.low %v6336_v18, %v6340_v20  ;;  %v5115_v25 = vcombine.low %v6705_v61, %v1259_v36  ;;  %v8915_v61 = vld [vmem:[#allocation6_spill] sm:$0xff] }
  0x67   : > { %v5116_v4 = vcombine.low %v6714_v21, %v6724_v37  ;;  %v6747_v19 = vsel %vm6630_vm8, %v5100_v23, %v1269_v2  ;;  %v6751_v50 = vsel %vm6630_vm8, %v1271_v55, %v1272_v11  ;;  %v6760_v43 = vsel %vm6630_vm8, %v5101_v31, %v1276_v12  ;;  %v8916_v23 = vld [vmem:[#allocation3_spill] sm:$0xff]  ;;  %v5213_v2 = vld [vmem:[%s6312_s23 + $0x24] sm:$0xf] }
  0x68   : > { %v5102_v56 = vrot.slane %v6733_v48, 9  ;;  %v1283_v40 = vrot.slane %v6383_v1, 5  ;;  %v5072_v34 = vcombine.low %v6450_v45, %v6457_v51  ;;  %v1286_v10 = vrot.slane %v6391_v9, 5  ;;  %v8919_v48 = vld [vmem:[#allocation9_spill] sm:$0xff] }
  0x69   : > { %5955 = vmatmul.mubr.msk.bf16.gmra.mxu0 %vm658_vm4, %v5113_v32  ;;  %v5104_v58 = vrot.slane %v1178_v15, 9  ;;  %v1297_v6 = vrot.slane %v6457_v51, 5  ;;  %v1300_v28 = vrot.slane %v6464_v59, 5  ;;  %v5117_v8 = vcombine.low %v6747_v19, %v6751_v50 }
  0x6a   : > { %5958 = vmatprep.mubr.msk.bf16.mxu0 %vm658_vm4, %v5114_v22  ;;  %v6775_v13 = vsel %vm6630_vm8, %v1278_v47, %v1279_v62  ;;  %v5103_v1 = vrot.slane %v6754_v3, 9  ;;  %v5105_v17 = vrot.slane %v1179_v57, 9  ;;  %v1304_v7 = vrot.slane %v6495_v53, 5  ;;  %v8918_v22 = vld [vmem:[#allocation10_spill] sm:$0xff]  ;;  %v6830_v47 = vld [vmem:[%s6312_s23 + $0x10] sm:$0xf] }
  0x6b   : > { %v6784_v9 = vsel %vm6630_vm8, %v5104_v58, %v1297_v6  ;;  %v1299_v59 = vrot.slane %v1297_v6, 4  ;;  %v1285_v62 = vrot.slane %v1283_v40, 4  ;;  %v1307_v32 = vrot.slane %v8913_v52, 5  ;;  %v8920_v58 = vld [vmem:[#allocation11_spill] sm:$0xff] }
  0x6c   : > { %5921 = vmatmul.mubr.msk.bf16.gmra.mxu1 %vm658_vm4, %v5064_v54  ;;  %v5106_v21 = vrot.slane %v1180_v49, 9  ;;  %v1290_v11 = vrot.slane %v8916_v23, 5  ;;  %v6798_v36 = vsel %vm6630_vm8, %v5105_v17, %v1304_v7  ;;  %v1306_v37 = vrot.slane %v1304_v7, 4  ;;  %v8917_v54 = vld [vmem:[#allocation8_spill] sm:$0xff] }
  0x6d   : > { %5924 = vmatprep.mubr.msk.bf16.mxu1 %vm658_vm4, %v5065_v26  ;;  %v6794_v12 = vsel %vm6630_vm8, %v1299_v59, %v1300_v28  ;;  %v1311_v31 = vrot.slane %v8914_v0, 5  ;;  %v1314_v26 = vrot.slane %v8917_v54, 5  ;;  %v5107_v3 = vrot.slane %v1181_v27, 9  ;;  %v5207_v28 = vld [vmem:[%s6312_s23 + $0xc] sm:$0xf]  ;;  %v8921_v7 = vld [vmem:[#allocation12_spill] sm:$0xff] }
  0x6e   : > { %v5121_v55 = vcombine.low %v6784_v9, %v6794_v12  ;;  %v6808_v15 = vsel %vm6630_vm8, %v1306_v37, %v1307_v32  ;;  %v1318_v57 = vrot.slane %v8918_v22, 5  ;;  %v1321_v6 = vrot.slane %v8920_v58, 5  ;;  %v1182_v32 = vld [vmem:[%s6312_s23 + $0xb4] sm:$0xe] }
  0x6f   : > { %v5122_v49 = vcombine.low %v6798_v36, %v6808_v15  ;;  %v6818_v59 = vsel %vm6630_vm8, %v5106_v21, %v1311_v31  ;;  %v1313_v17 = vrot.slane %v1311_v31, 4  ;;  %v1292_v27 = vrot.slane %v1290_v11, 4  ;;  %v8922_v37 = vld [vmem:[#allocation4_spill] sm:$0xff] }
  0x70   : > { %v1293_v54 = vrot.slane %v8922_v37, 5  ;;  %v1320_v58 = vrot.slane %v1318_v57, 4  ;;  %v6834_v21 = vsel %vm6630_vm8, %v5102_v56, %v1283_v40  ;;  %v2035_v52 = vshll.u32 %v5207_v28, 16  ;;  %v5320_v37 = vld [vmem:[%s8862_s1 + $0xa] sm:$0x3] }
  0x71   : > { %5959 = vmatmul.mubr.msk.bf16.gmra.mxu0 %vm658_vm4, %v5115_v25  ;;  %v6827_v25 = vsel %vm6630_vm8, %v5107_v3, %v1318_v57  ;;  %v6838_v31 = vsel %vm6630_vm8, %v1313_v17, %v1314_v26  ;;  %v5118_v56 = vcombine.low %v6760_v43, %v6775_v13  ;;  %v6851_v40 = vsel %vm6630_vm8, %v1285_v62, %v1286_v10  ;;  %v6860_v57 = vld [vmem:[%s6312_s23 + $0x14] sm:$0x1]  ;;  %v5211_v10 = vld [vmem:[%s6312_s23 + $0x1c] sm:$0xf]  ;;  %v5385_v13 = vld [vmem:[%s8862_s1 + $0xc] sm:$0x3] }
  0x72   : > { %5962 = vmatprep.mubr.msk.bf16.mxu0 %vm658_vm4, %v5116_v4  ;;  %v2032_v4 = vshrl.u32 %v5207_v28, 16  ;;  %v6857_v3 = vsel %vm6630_vm8, %v1320_v58, %v1321_v6  ;;  %v5210_v28 = vld [vmem:[%s6312_s23 + $0x18] sm:$0xf]  ;;  %v6869_v16 = vsel %vm6630_vm8, %v5103_v1, %v1290_v11  ;;  %v2041_v43 = vshll.u32 %v6830_v47, 16  ;;  %v8923_v1 = vld [vmem:[#allocation2_spill] sm:$0xff] }
  0x73   : > { %v6881_v33 = vsel %vm6630_vm8, %v1292_v27, %v1293_v54  ;;  %v5108_v24 = vrot.slane %v1182_v32, 9  ;;  %v6885_v62 = vand.u32 %v5320_v37, %v8923_v1  ;;  %v2037_v6 = vrot.slane %v2035_v52, 5 }
  0x74   : > { %5925 = vmatmul.mubr.msk.bf16.gmra.mxu1 %vm658_vm4, %v5066_v5  ;;  %v1325_v5 = vrot.slane %v6609_v41, 5  ;;  %v2034_v11 = vrot.slane %v2032_v4, 4  ;;  %v6887_v17 = vrot.slane %v2041_v43, 5  ;;  %v2056_v58 = vshrl.u32 %v5210_v28, 16  ;;  %v5212_v43 = vld [vmem:[%s6312_s23 + $0x20] sm:$0x1] }
  0x75   : > { %5928 = vmatprep.mubr.msk.bf16.mxu1 %vm658_vm4, %v5067_v44  ;;  %v2045_v44 = vshrl.u32 %v6830_v47, 16  ;;  %v1328_v30 = vrot.slane %v6614_v39, 5  ;;  %6050 = vmatprep.subr.bf16.mxu1 %v6885_v62  ;;  %v2059_v27 = vshll.u32 %v5210_v28, 16  ;;  %v2065_v32 = vshll.u32 %v5211_v10, 16 }
  0x76   : > { %v1327_v54 = vrot.slane %v1325_v5, 4  ;;  %v2051_v52 = vshll.u32 %v6860_v57, 16  ;;  %v2058_v4 = vrot.slane %v2056_v58, 4  ;;  %v2069_v37 = vshrl.u32 %v5211_v10, 16  ;;  %v6908_v10 = vld [vmem:[%s6312_s23 + $0x28] sm:$0xf] }
  0x77   : > { %v2047_v26 = vrot.slane %v2045_v44, 4  ;;  %v5119_v39 = vcombine.low %v6834_v21, %v6851_v40  ;;  %v2061_v28 = vrot.slane %v2059_v27, 5  ;;  %v6901_v44 = vrot.slane %v2065_v32, 5  ;;  %v6246_v32 = vld [vmem:[%s6312_s23 + $0x6c] sm:$0xf] }
  0x78   : > { %v6904_v19 = vand.u32 %v5385_v13, %v8923_v1  ;;  %v2038_v50 = vor.u32 %v2037_v6, %v2034_v11  ;;  %v2071_v42 = vrot.slane %v2069_v37, 4  ;;  %v5120_v21 = vcombine.low %v6869_v16, %v6881_v33  ;;  %v5216_v6 = vld [vmem:[%s6312_s23 + $0x30] sm:$0xf] }
  0x79   : > { %5963 = vmatmul.mubr.msk.bf16.gmra.mxu0 %vm658_vm4, %v5117_v8  ;;  %v2048_v8 = vor.u32 %v2047_v26, %v6887_v17  ;;  %v6918_v40 = vsel %vm6630_vm8, %v5108_v24, %v1325_v5  ;;  %v2062_v13 = vor.u32 %v2061_v28, %v2058_v4  ;;  %v6922_v26 = vld [vmem:[%s6312_s23 + $0x2c] sm:$0x1]  ;;  %v2083_v11 = vshll.u32 %v5213_v2, 16  ;;  %v6935_v5 = vld [vmem:[%s6312_s23 + $0x34] sm:$0xf] }
  0x7a   : > { %5966 = vmatprep.mubr.msk.bf16.mxu0 %vm658_vm4, %v5118_v56  ;;  %v2080_v56 = vshrl.u32 %v5213_v2, 16  ;;  %6084 = vmatprep.subr.bf16.mxu0 %v6904_v19  ;;  %v6931_v14 = vsel %vm6630_vm8, %v1327_v54, %v1328_v30  ;;  %v2053_v60 = vrot.slane %v2051_v52, 5  ;;  %v2075_v16 = vshll.u32 %v5212_v43, 16  ;;  %v5219_v30 = vld [vmem:[%s6312_s23 + $0x3c] sm:$0xf] }
  0x7b   : > { %v2085_v33 = vrot.slane %v2083_v11, 5  ;;  %v2089_v24 = vshll.u32 %v6908_v10, 16  ;;  %v2093_v18 = vshrl.u32 %v6908_v10, 16  ;;  %v2039_v20 = vrot.slane %v2038_v50, 4  ;;  %v6247_v54 = vld [vmem:[%s6312_s23 + $0x70] sm:$0xf] }
  0x7c   : > { %5929 = vmatmul.mubr.msk.bf16.gmra.mxu1 %vm658_vm4, %v5068_v29  ;;  %v2072_v29 = vor.u32 %v2071_v42, %v6901_v44  ;;  %v2082_v2 = vrot.slane %v2080_v56, 4  ;;  %v2063_v58 = vrot.slane %v2062_v13, 4  ;;  %v2099_v27 = vshll.u32 %v6922_v26, 16  ;;  %v6248_v42 = vld [vmem:[%s6312_s23 + $0x78] sm:$0xf] }
  0x7d   : > { %5932 = vmatprep.mubr.msk.bf16.mxu1 %vm658_vm4, %v5069_v35  ;;  %v2049_v35 = vrot.slane %v2048_v8, 4  ;;  %v5070_v52 = vcombine.low %v6246_v32, %v6247_v54  ;;  %v5071_v4 = vcombine.low %v6248_v42, %v8916_v23  ;;  %v2104_v37 = vshrl.u32 %v5216_v6, 16  ;;  %v5222_v42 = vld [vmem:[%s6312_s23 + $0x48] sm:$0xf]  ;;  %v6972_v13 = vld [vmem:[%s6312_s23 + $0x4c] sm:$0xf] }
  0x7e   : > { %v2107_v43 = vshll.u32 %v5216_v6, 16  ;;  %v2073_v28 = vrot.slane %v2072_v29, 4  ;;  %v2077_v50 = vrot.slane %v2075_v16, 5  ;;  %v2113_v8 = vshll.u32 %v6935_v5, 16  ;;  %v6954_v6 = vld [vmem:[%s6312_s23 + $0x38] sm:$0x1] }
  0x7f   : > { %v2117_v56 = vshrl.u32 %v6935_v5, 16  ;;  %v2086_v11 = vor.u32 %v2085_v33, %v2082_v2  ;;  %v6951_v32 = vrot.slane %v2089_v24, 5  ;;  %v2095_v23 = vrot.slane %v2093_v18, 4 }
  0x80   : > { %v2044_v29 = vsel %vm6364_vm5, %v2039_v20, %v6887_v17  ;;  %v6962_v16 = vrot.slane %v2099_v27, 5  ;;  %v2106_v54 = vrot.slane %v2104_v37, 4  ;;  %v2054_v2 = vsel %vm6364_vm5, %v2049_v35, %v2053_v60  ;;  %v6985_v37 = vld [vmem:[%s6312_s23 + $0x44] sm:$0x1] }
  0x81   : > { %5967 = vmatmul.mubr.msk.bf16.gmra.mxu0 %vm658_vm4, %v5119_v39  ;;  %v6957_v39 = vld [vmem:[%s6312_s23 + $0x40] sm:$0xf]  ;;  %v2068_v33 = vsel %vm6364_vm5, %v2063_v58, %v6901_v44  ;;  %v2128_v24 = vshrl.u32 %v5219_v30, 16  ;;  %v2131_v18 = vshll.u32 %v5219_v30, 16  ;;  %v2078_v17 = vsel %vm6364_vm5, %v2073_v28, %v2077_v50 }
  0x82   : > { %5970 = vmatprep.mubr.msk.bf16.mxu0 %vm658_vm4, %v5120_v21  ;;  %v2109_v21 = vrot.slane %v2107_v43, 5  ;;  %v6977_v20 = vrot.slane %v2113_v8, 5  ;;  %v2119_v27 = vrot.slane %v2117_v56, 4  ;;  %v6980_v60 = vrot.slane %v2086_v11, 4 }
  0x83   : > { %v2096_v35 = vor.u32 %v2095_v23, %v6951_v32  ;;  %v2130_v44 = vrot.slane %v2128_v24, 4  ;;  %v2133_v58 = vrot.slane %v2131_v18, 5  ;;  %v2141_v28 = vshrl.u32 %v6957_v39, 16  ;;  %v7000_v24 = vld [vmem:[%s6312_s23 + $0x50] sm:$0x1] }
  0x84   : > { %5933 = vmatmul.mubr.msk.bf16.gmra.mxu1 %vm658_vm4, %v5070_v52  ;;  %v2137_v52 = vshll.u32 %v6957_v39, 16  ;;  %v2110_v30 = vor.u32 %v2109_v21, %v2106_v54  ;;  %v6990_v50 = vcombine.low %v2044_v29, %v2054_v2  ;;  %v6992_v8 = vcombine.low %v2068_v33, %v2078_v17  ;;  %v7005_v29 = vld [vmem:[%s6312_s23 + $0x58] sm:$0xf] }
  0x85   : > { %5936 = vmatprep.mubr.msk.bf16.mxu1 %vm658_vm4, %v5071_v4  ;;  %v2123_v4 = vshll.u32 %v6954_v6, 16  ;;  %v2152_v56 = vshrl.u32 %v5222_v42, 16  ;;  %v2155_v11 = vshll.u32 %v5222_v42, 16  ;;  %v2120_v23 = vor.u32 %v2119_v27, %v6977_v20 }
  0x86   : > { %v6987_v43 = vrot.slane %v2137_v52, 5  ;;  %v2134_v54 = vor.u32 %v2133_v58, %v2130_v44  ;;  %v2143_v21 = vrot.slane %v2141_v28, 4  ;;  %v2161_v18 = vshll.u32 %v6972_v13, 16  ;;  %v5225_v52 = vld [vmem:[%s6312_s23 + $0x54] sm:$0xf] }
  0x87   : > { %v2097_v9 = vrot.slane %v2096_v35, 4  ;;  %v2147_v12 = vshll.u32 %v6985_v37, 16  ;;  %v2157_v42 = vrot.slane %v2155_v11, 5  ;;  %v2092_v2 = vsel %vm6364_vm5, %v6980_v60, %v6951_v32  ;;  %v5228_v44 = vld [vmem:[%s6312_s23 + $0x60] sm:$0xf] }
  0x88   : > { %v2111_v33 = vrot.slane %v2110_v30, 4  ;;  %v2125_v17 = vrot.slane %v2123_v4, 5  ;;  %v2165_v27 = vshrl.u32 %v6972_v13, 16  ;;  %v2144_v36 = vor.u32 %v2143_v21, %v6987_v43  ;;  %v7032_v28 = vld [vmem:[%s6312_s23 + $0x5c] sm:$0x1] }
  0x89   : > { %5971 = vmatmul.mubr.msk.bf16.gmra.mxu0 %vm658_vm4, %v5121_v55  ;;  %v2154_v55 = vrot.slane %v2152_v56, 4  ;;  %v7022_v15 = vrot.slane %v2161_v18, 5  ;;  %v2179_v35 = vshll.u32 %v5225_v52, 16  ;;  %v8924_v32 = vcombine.low %v6490_v46, %v6495_v53  ;;  %v7036_v11 = vld [vmem:[%s6312_s23 + $0x64] sm:$0xf] }
  0x8a   : > { %5974 = vmatprep.mubr.msk.bf16.mxu0 %vm658_vm4, %v5122_v49  ;;  %v2176_v49 = vshrl.u32 %v5225_v52, 16  ;;  %v2121_v60 = vrot.slane %v2120_v23, 4  ;;  %v2135_v58 = vrot.slane %v2134_v54, 4  ;;  %v2167_v30 = vrot.slane %v2165_v27, 4  ;;  %v7058_v27 = vld [vmem:[%s6312_s23 + $0x70] sm:$0xf] }
  0x8b   : > { %v2185_v45 = vshll.u32 %v7005_v29, 16  ;;  %v2149_v51 = vrot.slane %v2147_v12, 5  ;;  %v2171_v4 = vshll.u32 %v7000_v24, 16  ;;  %v2189_v56 = vshrl.u32 %v7005_v29, 16 }
  0x8c   : > { %5937 = vmatmul.mubr.msk.bf16.gmra.mxu1 %vm658_vm4, %v5072_v34  ;;  %v2158_v34 = vor.u32 %v2157_v42, %v2154_v55  ;;  %v2102_v46 = vsel %vm6364_vm5, %v2097_v9, %v6962_v16  ;;  %v2116_v53 = vsel %vm6364_vm5, %v2111_v33, %v6977_v20  ;;  %v2178_v23 = vrot.slane %v2176_v49, 4  ;;  %v5231_v55 = vld [vmem:[%s6312_s23 + $0x6c] sm:$0xf] }
  0x8d   : > { %5940 = vmatprep.mubr.msk.bf16.mxu1 %vm658_vm4, %v8924_v32  ;;  %v2181_v54 = vrot.slane %v2179_v35, 5  ;;  %v2145_v21 = vrot.slane %v2144_v36, 4  ;;  %v2168_v18 = vor.u32 %v2167_v30, %v7022_v15  ;;  %v7045_v52 = vrot.slane %v2185_v45, 5 }
  0x8e   : > { %v2191_v12 = vrot.slane %v2189_v56, 4  ;;  %v8925_v42 = vcombine.low %v6818_v59, %v6838_v31  ;;  %v2126_v16 = vsel %vm6364_vm5, %v2121_v60, %v2125_v17  ;;  %v2140_v20 = vsel %vm6364_vm5, %v2135_v58, %v6987_v43 }
  0x8f   : > { %v2200_v9 = vshrl.u32 %v5228_v44, 16  ;;  %v2203_v33 = vshll.u32 %v5228_v44, 16  ;;  %v8926_v36 = vcombine.low %v6827_v25, %v6857_v3  ;;  %v2159_v49 = vrot.slane %v2158_v34, 4 }
  0x90   : > { %v2173_v59 = vrot.slane %v2171_v4, 5  ;;  %v2209_v31 = vshll.u32 %v7036_v11, 16  ;;  %v2213_v17 = vshrl.u32 %v7036_v11, 16  ;;  %v2182_v35 = vor.u32 %v2181_v54, %v2178_v23 }
  0x91   : > { %5975 = vmatmul.mubr.msk.bf16.gmra.mxu0 %vm658_vm4, %v8925_v42  ;;  %v2195_v32 = vshll.u32 %v7032_v28, 16  ;;  %v2202_v43 = vrot.slane %v2200_v9, 4  ;;  %v2205_v60 = vrot.slane %v2203_v33, 5  ;;  %v8927_v44 = vcombine.low %v8915_v61, %v8914_v0  ;;  %v7085_v61 = vld [vmem:[%s6312_s23 + $0x68] sm:$0x1]  ;;  %v6214_v9 = vld [vmem:[%s6312_s23 + $0xc] sm:$0xff]  }
  0x92   : > { %5978 = vmatprep.mubr.msk.bf16.mxu0 %vm658_vm4, %v8926_v36  ;;  %v2150_v25 = vsel %vm6364_vm5, %v2145_v21, %v2149_v51  ;;  %v2169_v3 = vrot.slane %v2168_v18, 4  ;;  %v2192_v58 = vor.u32 %v2191_v12, %v7045_v52  ;;  %v7074_v30 = vrot.slane %v2209_v31, 5  ;;  %v7100_v18 = vld [vmem:[%s6312_s23 + $0x7c] sm:$0xf] }
  0x93   : > { %v8928_v45 = vcombine.low %v8919_v48, %v8918_v22  ;;  %v7080_v34 = vcombine.low %v2092_v2, %v2102_v46  ;;  %v7082_v0 = vcombine.low %v2116_v53, %v2126_v16  ;;  %v2215_v4 = vrot.slane %v2213_v17, 4  ;;  %v5234_v22 = vld [vmem:[%s6312_s23 + $0x78] sm:$0xf]  ;;  %8929 = vst [vmem:[#allocation5_spill] sm:$0xff] %v7100_v18 }
  0x94   : > { %5941 = vmatmul.mubr.msk.bf16.gmra.mxu1 %vm658_vm4, %v8927_v44  ;;  %v2224_v51 = vshrl.u32 %v5231_v55, 16  ;;  %v2206_v56 = vor.u32 %v2205_v60, %v2202_v43  ;;  %v2227_v23 = vshll.u32 %v5231_v55, 16  ;;  %v2233_v54 = vshll.u32 %v7058_v27, 16 }
  0x95   : > { %5944 = vmatprep.mubr.msk.bf16.mxu1 %vm658_vm4, %v8928_v45  ;;  %v2237_v21 = vshrl.u32 %v7058_v27, 16  ;;  %v7090_v48 = vcombine.low %v2140_v20, %v2150_v25  ;;  %v2164_v2 = vsel %vm6364_vm5, %v2159_v49, %v7022_v15  ;;  %v7095_v46 = vrot.slane %v2182_v35, 4  ;;  %v7109_v20 = vld [vmem:[%s6312_s23 + $0x74] sm:$0x1]  ;;  %v7127_v25 = vld [vmem:[%s6312_s23 + $0x88] sm:$0xf] }
  0x96   : > { %v7097_v53 = vrot.slane %v2195_v32, 5  ;;  %v2174_v12 = vsel %vm6364_vm5, %v2169_v3, %v2173_v59  ;;  %v7104_v55 = vrot.slane %v2192_v58, 4  ;;  %v2216_v42 = vor.u32 %v2215_v4, %v7074_v30  ;;  %8931 = vst [vmem:[#allocation7_spill] sm:$0xff] %v7127_v25 }
  0x97   : > { %v2219_v16 = vshll.u32 %v7085_v61, 16  ;;  %v8930_v15 = vcombine.low %v6918_v40, %v6931_v14  ;;  %v2226_v33 = vrot.slane %v2224_v51, 4  ;;  %v2229_v36 = vrot.slane %v2227_v23, 5  ;;  %v5237_v40 = vld [vmem:[%s6312_s23 + $0x84] sm:$0xf] }
  0x98   : > { %v2248_v49 = vshrl.u32 %v5234_v22, 16  ;;  %v2251_v59 = vshll.u32 %v5234_v22, 16  ;;  %v7118_v31 = vrot.slane %v2206_v56, 4  ;;  %v7120_v17 = vrot.slane %v2233_v54, 5  ;;  %v7140_v51 = vld [vmem:[%s6312_s23 + $0x80] sm:$0x1] }
  0x99   : > { %5979 = vmatmul.mubr.msk.bf16.gmra.mxu0 %vm658_vm4, %v8930_v15  ;;  %v2239_v35 = vrot.slane %v2237_v21, 4  ;;  %v2257_v32 = vshll.u32 %v7100_v18, 16  ;;  %v2243_v14 = vshll.u32 %v7109_v20, 16  ;;  %v2261_v44 = vshrl.u32 %v7100_v18, 16  ;;  %8933 = vst [vmem:[#allocation6_spill] sm:$0xff] %v7140_v51 }
  0x9a   : > { %6018 = vmatprep.mubr.msk.bf16.mxu0 %vm658_vm4, %v6990_v50  ;;  %v2250_v43 = vrot.slane %v2248_v49, 4  ;;  %v2253_v60 = vrot.slane %v2251_v59, 5  ;;  %v8932_v50 = vcombine.low %v8921_v7, %v6609_v41  ;;  %v7133_v3 = vcombine.low %v2164_v2, %v2174_v12  ;;  %v5240_v2 = vld [vmem:[%s6312_s23 + $0x90] sm:$0xf]  ;;  %v6216_v49 = vld [vmem:[%s6312_s23 + $0x24] sm:$0xff]  }
  0x9b   : > { %v2188_v58 = vsel %vm6364_vm5, %v7095_v46, %v7045_v52  ;;  %v2217_v45 = vrot.slane %v2216_v42, 4  ;;  %v2221_v4 = vrot.slane %v2219_v16, 5  ;;  %v2230_v41 = vor.u32 %v2229_v36, %v2226_v33  ;;  %v6215_v46 = vld [vmem:[%s6312_s23 + $0x18] sm:$0xff]  }
  0x9c   : > { %5945 = vmatmul.mubr.msk.bf16.gmra.mxu1 %vm658_vm4, %v8932_v50  ;;  %v7143_v7 = vrot.slane %v2257_v32, 5  ;;  %v2263_v56 = vrot.slane %v2261_v44, 4  ;;  %v2272_v23 = vshrl.u32 %v5237_v40, 16  ;;  %v2198_v54 = vsel %vm6364_vm5, %v7104_v55, %v7097_v53  ;;  %v7164_v53 = vld [vmem:[%s6312_s23 + $0x8c] sm:$0x1] }
  0x9d   : > { %5984 = vmatprep.mubr.msk.bf16.mxu1 %vm658_vm4, %v6214_v9  ;;  %v2212_v52 = vsel %vm6364_vm5, %v7118_v31, %v7074_v30  ;;  %v2275_v21 = vshll.u32 %v5237_v40, 16  ;;  %v2281_v22 = vshll.u32 %v7127_v25, 16  ;;  %v2240_v12 = vor.u32 %v2239_v35, %v7120_v17  ;;  %v7161_v9 = vld [vmem:[%s6312_s23 + $0x94] sm:$0xf]  ;;  %8935 = vst [vmem:[#allocation8_spill] sm:$0xff] %v7164_v53 }
  0x9e   : > { %v7157_v42 = vrot.slane %v2243_v14, 5  ;;  %v2254_v16 = vor.u32 %v2253_v60, %v2250_v43  ;;  %v2267_v15 = vshll.u32 %v7140_v51, 16  ;;  %8934 = vst [vmem:[#allocation3_spill] sm:$0xff] %v7161_v9  ;;  %v2274_v55 = vrot.slane %v2272_v23, 4  ;;  %v7193_v23 = vld [vmem:[%s6312_s23 + $0xa0] sm:$0xf] }
  0x9f   : > { %v2277_v33 = vrot.slane %v2275_v21, 5  ;;  %v7166_v30 = vrot.slane %v2281_v22, 5  ;;  %v2285_v36 = vshrl.u32 %v7127_v25, 16  ;;  %v2222_v59 = vsel %vm6364_vm5, %v2217_v45, %v2221_v4  ;;  %v5243_v4 = vld [vmem:[%s6312_s23 + $0x9c] sm:$0xf]  ;;  %8936 = vst [vmem:[#allocation10_spill] sm:$0xff] %v7193_v23 }
  0xa0   : > { %v7174_v31 = vrot.slane %v2230_v41, 4  ;;  %v2264_v35 = vor.u32 %v2263_v56, %v7143_v7  ;;  %v2296_v32 = vshrl.u32 %v5240_v2, 16  ;;  %v2299_v43 = vshll.u32 %v5240_v2, 16  ;;  %v7202_v2 = vld [vmem:[%s6312_s23 + $0x98] sm:$0x1] }
  0xa1   : > { %6019 = vmatmul.mubr.msk.bf16.vlgmr.msra.gmra.mxu0 %vm658_vm4, %v6992_v8  ;;  %v2278_v40 = vor.u32 %v2277_v33, %v2274_v55  ;;  %v2287_v14 = vrot.slane %v2285_v36, 4  ;;  %v2305_v8 = vshll.u32 %v7161_v9, 16  ;;  %v7181_v60 = vrot.slane %v2240_v12, 4  ;;  %8937 = vst [vmem:[#allocation9_spill] sm:$0xff] %v7202_v2 }
  0xa2   : > { %6085 = vmatpush3.bf16.msra.mxu0 %v6904_v19  ;;  %6022 = vmatprep.mubr.msk.bf16.mxu0 %vm658_vm4, %v7080_v34  ;;  %v2291_v44 = vshll.u32 %v7164_v53, 16  ;;  %v2298_v50 = vrot.slane %v2296_v32, 4  ;;  %v2309_v45 = vshrl.u32 %v7161_v9, 16  ;;  %v7187_v19 = vrot.slane %v2254_v16, 4  ;;  %v5246_v32 = vld [vmem:[%s6312_s23 + $0xa8] sm:$0xf] }
  0xa3   : > { %v7189_v41 = vrot.slane %v2267_v15, 5  ;;  %v2288_v34 = vor.u32 %v2287_v14, %v7166_v30  ;;  %v2301_v56 = vrot.slane %v2299_v43, 5  ;;  %v7197_v21 = vrot.slane %v2264_v35, 4  ;;  %v7225_v14 = vld [vmem:[%s6312_s23 + $0xac] sm:$0xf]  ;;  %v6218_v43 = vld [vmem:[%s6312_s23 + $0x3c] sm:$0xff]  }
  0xa4   : > { %5985 = vmatmul.mubr.msk.bf16.vlgmr.msra.gmra.mxu1 %vm658_vm4, %v6215_v46  ;;  %v7199_v22 = vrot.slane %v2278_v40, 4  ;;  %v7204_v46 = vrot.slane %v2305_v8, 5  ;;  %v2311_v12 = vrot.slane %v2309_v45, 4  ;;  %v7206_v16 = vcombine.low %v2188_v58, %v2198_v54  ;;  %v6217_v40 = vld [vmem:[%s6312_s23 + $0x30] sm:$0xff]   ;;  %8938 = vst [vmem:[#allocation11_spill] sm:$0xff] %v7225_v14  ;;  %v6219_v9 = vld [vmem:[%s6312_s23 + $0x48] sm:$0xff]  }
  0xa5   : > { %6051 = vmatpush3.bf16.msra.mxu1 %v6885_v62  ;;  %5988 = vmatprep.mubr.msk.bf16.mxu1 %vm658_vm4, %v6216_v49  ;;  %v2302_v15 = vor.u32 %v2301_v56, %v2298_v50  ;;  %v2320_v55 = vshrl.u32 %v5243_v4, 16  ;;  %v2323_v33 = vshll.u32 %v5243_v4, 16  ;;  %v7208_v62 = vcombine.low %v2212_v52, %v2222_v59  ;;  %v7247_v45 = vld [vmem:[%s6312_s23 + $0xa4] sm:$0x1] }
  0xa6   : > { %v7214_v49 = vrot.slane %v2291_v44, 5  ;;  %v2329_v35 = vshll.u32 %v7193_v23, 16  ;;  %v7219_v58 = vrot.slane %v2288_v34, 4  ;;  %v2312_v54 = vor.u32 %v2311_v12, %v7204_v46  ;;  %8939 = vst [vmem:[#allocation12_spill] sm:$0xff] %v7247_v45  ;;  %v7254_v12 = vld [vmem:[%s6312_s23 + $0xb0] sm:$0x1] }
  0xa7   : > { %v2315_v52 = vshll.u32 %v7202_v2, 16  ;;  %v2333_v59 = vshrl.u32 %v7193_v23, 16  ;;  %v7251_v4 = vrot.slane %v2302_v15, 4  ;;  %v2322_v34 = vrot.slane %v2320_v55, 4  ;;  %8940 = vst [vmem:[#allocation4_spill] sm:$0xff] %v7254_v12 }
  0xa8   : > { %v2325_v56 = vrot.slane %v2323_v33, 5  ;;  %v2344_v44 = vshrl.u32 %v5246_v32, 16  ;;  %v7256_v36 = vrot.slane %v2329_v35, 5  ;;  %v2347_v8 = vshll.u32 %v5246_v32, 16  ;;  %v5249_v23 = vld [vmem:[%s6312_s23 + $0xb4] sm:$0xf] }
  0xa9   : > { %6023 = vmatmul.mubr.msk.bf16.gmra.mxu0 %vm658_vm4, %v7082_v0  ;;  %v2335_v50 = vrot.slane %v2333_v59, 4  ;;  %v2353_v0 = vshll.u32 %v7225_v14, 16  ;;  %v7265_v15 = vrot.slane %v2312_v54, 4  ;;  %v2317_v55 = vrot.slane %v2315_v52, 5  ;;  %v7268_v35 = vld [vmem:[%s6312_s23 + $0xb8] sm:$0xf] }
  0xaa   : > { %6026 = vmatprep.mubr.msk.bf16.mxu0 %vm658_vm4, %v7090_v48  ;;  %v2294_v48 = vsel %vm6364_vm5, %v7219_v58, %v7214_v49  ;;  %v2346_v33 = vrot.slane %v2344_v44, 4  ;;  %8941 = vst [vmem:[#allocation2_spill] sm:$0xff] %v7268_v35  ;;  %v2339_v32 = vshll.u32 %v7247_v45, 16  ;;  %v2349_v59 = vrot.slane %v2347_v8, 5  ;;  %v7280_v54 = vld [vmem:[%s6312_s23 + $0xbc] sm:$0x1] }
  0xab   : > { %v7272_v2 = vrot.slane %v2353_v0, 5  ;;  %v2308_v49 = vsel %vm6364_vm5, %v7251_v4, %v7204_v46  ;;  %v2326_v58 = vor.u32 %v2325_v56, %v2322_v34  ;;  %v2368_v52 = vshrl.u32 %v5249_v23, 16  ;;  %v7289_v4 = vld [vmem:[%s6312_s23 + $0xc4] sm:$0xf] }
  0xac   : > { %5989 = vmatmul.mubr.msk.bf16.gmra.mxu1 %vm658_vm4, %v6217_v40  ;;  %v2357_v40 = vshrl.u32 %v7225_v14, 16  ;;  %v2371_v44 = vshll.u32 %v5249_v23, 16  ;;  %v2363_v8 = vshll.u32 %v7254_v12, 16  ;;  %v2377_v0 = vshll.u32 %v7268_v35, 16  ;;  %v5252_v14 = vld [vmem:[%s6312_s23 + $0xc0] sm:$0xf] }
  0xad   : > { %5992 = vmatprep.mubr.msk.bf16.mxu1 %vm658_vm4, %v6218_v43  ;;  %v2336_v43 = vor.u32 %v2335_v50, %v7256_v36  ;;  %v2350_v53 = vor.u32 %v2349_v59, %v2346_v33  ;;  %v2370_v25 = vrot.slane %v2368_v52, 4  ;;  %v2381_v46 = vshrl.u32 %v7268_v35, 16  ;;  %v6220_v23 = vld [vmem:[%s6312_s23 + $0x54] sm:$0xff]  }
  0xae   : > { %v2359_v45 = vrot.slane %v2357_v40, 4  ;;  %v2373_v51 = vrot.slane %v2371_v44, 5  ;;  %v2318_v50 = vsel %vm6364_vm5, %v7265_v15, %v2317_v55  ;;  %v2341_v34 = vrot.slane %v2339_v32, 5  ;;  %v7307_v32 = vld [vmem:[%s6312_s23 + $0xc8] sm:$0x1] }
  0xaf   : > { %v7298_v40 = vrot.slane %v2377_v0, 5  ;;  %v2383_v59 = vrot.slane %v2381_v46, 4  ;;  %v2387_v52 = vshll.u32 %v7280_v54, 16  ;;  %v2392_v44 = vshrl.u32 %v5252_v14, 16 }
  0xb0   : > { %v2360_v56 = vor.u32 %v2359_v45, %v7272_v2  ;;  %v2374_v33 = vor.u32 %v2373_v51, %v2370_v25  ;;  %v2337_v35 = vrot.slane %v2336_v43, 4  ;;  %v2395_v12 = vshll.u32 %v5252_v14, 16 }
  0xb1   : > { %6027 = vmatmul.mubr.msk.bf16.gmra.mxu0 %vm658_vm4, %v7133_v3  ;;  %v2327_v3 = vrot.slane %v2326_v58, 4  ;;  %v2401_v18 = vshll.u32 %v7289_v4, 16  ;;  %v2351_v15 = vrot.slane %v2350_v53, 4  ;;  %v2365_v55 = vrot.slane %v2363_v8, 5 }
  0xb2   : > { %6030 = vmatprep.mubr.msk.bf16.mxu0 %vm658_vm4, %v7206_v16  ;;  %v2384_v45 = vor.u32 %v2383_v59, %v7298_v40  ;;  %v2394_v16 = vrot.slane %v2392_v44, 4  ;;  %v2361_v25 = vrot.slane %v2360_v56, 4  ;;  %v2397_v51 = vrot.slane %v2395_v12, 5  ;;  %v5291_v44 = vld [vmem:[%s6312_s23 + $0x30] sm:$0xe] }
  0xb3   : > { %v7310_v0 = vrot.slane %v2401_v18, 5  ;;  %v2405_v14 = vshrl.u32 %v7289_v4, 16  ;;  %v8942_v53 = vsel %vm6364_vm5, %v7181_v60, %v7157_v42  ;;  %v8943_v58 = vsel %vm6364_vm5, %v7174_v31, %v7120_v17  ;;  %v6221_v31 = vld [vmem:[%s6312_s23 + $0x60] sm:$0xff]  }
  0xb4   : > { %5993 = vmatmul.mubr.msk.bf16.gmra.mxu1 %vm658_vm4, %v6219_v9  ;;  %v5466_v9 = vld [vmem:[%s8862_s1 + $0xe] sm:$0x3]  ;;  %v5264_v12 = vcombine.low %v8943_v58, %v8942_v53  ;;  %v2375_v18 = vrot.slane %v2374_v33, 4  ;;  %v2385_v43 = vrot.slane %v2384_v45, 4  ;;  %v2389_v8 = vrot.slane %v2387_v52, 5 }
  0xb5   : > { %5996 = vmatprep.mubr.msk.bf16.mxu1 %vm658_vm4, %v6220_v23  ;;  %v8944_v46 = vsel %vm6364_vm5, %v7197_v21, %v7189_v41  ;;  %v8945_v42 = vsel %vm6364_vm5, %v7187_v19, %v7143_v7  ;;  %v2398_v23 = vor.u32 %v2397_v51, %v2394_v16  ;;  %v2407_v56 = vrot.slane %v2405_v14, 4  ;;  %v5531_v19 = vld [vmem:[%s8862_s1 + $0x10] sm:$0x3]  ;;  %v5290_v21 = vld [vmem:[%s6312_s23 + $0x24] sm:$0xe] }
  0xb6   : > { %v5265_v60 = vcombine.low %v8945_v42, %v8944_v46  ;;  %v2411_v17 = vshll.u32 %v7307_v32, 16  ;;  %v8946_v33 = vsel %vm6364_vm5, %v7199_v22, %v7166_v30  ;;  %v7343_v52 = vcombine.low %v2308_v49, %v2318_v50  ;;  %v6222_v30 = vld [vmem:[%s6312_s23 + $0x6c] sm:$0xff]   ;;  %v5292_v14 = vld [vmem:[%s6312_s23 + $0x3c] sm:$0xe] }
  0xb7   : > { %v5266_v59 = vcombine.low %v8946_v33, %v2294_v48  ;;  %v2332_v41 = vsel %vm6364_vm5, %v2327_v3, %v7256_v36  ;;  %v7349_v7 = vand.u32 %v5466_v9, %v8923_v1  ;;  %v2342_v22 = vsel %vm6364_vm5, %v2337_v35, %v2341_v34  ;;  %v7367_v50 = vld [vmem:[%s6312_s23 + $0xc] sm:$0xe] }
  0xb8   : > { %v2356_v36 = vsel %vm6364_vm5, %v2351_v15, %v7272_v2  ;;  %v2366_v48 = vsel %vm6364_vm5, %v2361_v25, %v2365_v55  ;;  %v2408_v49 = vor.u32 %v2407_v56, %v7310_v0  ;;  %v2390_v35 = vsel %vm6364_vm5, %v2385_v43, %v2389_v8  ;;  %v5294_v56 = vld [vmem:[%s6312_s23 + $0x54] sm:$0xe] }
  0xb9   : > { %6031 = vmatmul.mubr.msk.bf16.gmra.mxu0 %vm658_vm4, %v7208_v62  ;;  %v2380_v62 = vsel %vm6364_vm5, %v2375_v18, %v7298_v40  ;;  %v7375_v34 = vrot.slane %v2398_v23, 4  ;;  %v2775_v2 = vrot.slane %v6830_v47, 5  ;;  %6118 = vmatprep.subr.bf16.mxu1 %v7349_v7  ;;  %v7382_v15 = vrot.slane %v2411_v17, 5  ;;  %v6223_v17 = vld [vmem:[%s6312_s23 + $0x78] sm:$0xff]  }
  0xba   : > { %6034 = vmatprep.mubr.msk.bf16.mxu0 %vm658_vm4, %v5264_v12  ;;  %v7380_v3 = vrot.slane %v2408_v49, 4  ;;  %v7385_v55 = vand.u32 %v5531_v19, %v8923_v1  ;;  %v5306_v45 = vrot.slane %v5290_v21, 9  ;;  %v7388_v40 = vcombine.low %v2332_v41, %v2342_v22  ;;  %v5293_v12 = vld [vmem:[%s6312_s23 + $0x48] sm:$0xe]  ;;  %v6230_v47 = vld [vmem:[%s6312_s23 + $0x18] sm:$0xff]  }
  0xbb   : > { %v7390_v16 = vcombine.low %v2356_v36, %v2366_v48  ;;  %v5304_v25 = vrot.slane %v7367_v50, 9  ;;  %v2789_v51 = vrot.slane %v6908_v10, 5  ;;  %v7396_v9 = vcombine.low %v2380_v62, %v2390_v35  ;;  %v6224_v21 = vld [vmem:[%s6312_s23 + $0x84] sm:$0xff]   ;;  %v5295_v36 = vld [vmem:[%s6312_s23 + $0x60] sm:$0xe] }
  0xbc   : > { %5997 = vmatmul.mubr.msk.bf16.gmra.mxu1 %vm658_vm4, %v6221_v31  ;;  %v2778_v1 = vrot.slane %v6860_v57, 5  ;;  %6152 = vmatprep.subr.bf16.mxu0 %v7385_v55  ;;  %v2792_v53 = vrot.slane %v6922_v26, 5  ;;  %v5307_v58 = vrot.slane %v5291_v44, 9  ;;  %v2404_v10 = vsel %vm6364_vm5, %v7375_v34, %v7310_v0 }
  0xbd   : > { %6000 = vmatprep.mubr.msk.bf16.mxu1 %vm658_vm4, %v6222_v30  ;;  %v7408_v18 = vrot.slane %v2775_v2, 4  ;;  %v7412_v43 = vsel %vm6630_vm8, %v5306_v45, %v2789_v51  ;;  %v2791_v8 = vrot.slane %v2789_v51, 4  ;;  %v2414_v26 = vsel %vm6364_vm5, %v7380_v3, %v7382_v15  ;;  %v6229_v15 = vld [vmem:[%s6312_s23 + $0xc0] sm:$0xff]  }
  0xbe   : > { %v2796_v46 = vrot.slane %v6935_v5, 5  ;;  %v2799_v42 = vrot.slane %v6954_v6, 5  ;;  %v5308_v23 = vrot.slane %v5292_v14, 9  ;;  %v2803_v33 = vrot.slane %v6957_v39, 5  ;;  %v5297_v14 = vld [vmem:[%s6312_s23 + $0x78] sm:$0xe] }
  0xbf   : > { %v7424_v31 = vsel %vm6630_vm8, %v2791_v8, %v2792_v53  ;;  %v2806_v41 = vrot.slane %v6985_v37, 5  ;;  %v5309_v19 = vrot.slane %v5293_v12, 9  ;;  %v2810_v22 = vrot.slane %v6972_v13, 5 }
  0xc0   : > { %v5323_v5 = vcombine.low %v7412_v43, %v7424_v31  ;;  %v7434_v6 = vsel %vm6630_vm8, %v5307_v58, %v2796_v46  ;;  %v2798_v30 = vrot.slane %v2796_v46, 4  ;;  %v7441_v39 = vsel %vm6630_vm8, %v5308_v23, %v2803_v33  ;;  %v5298_v23 = vld [vmem:[%s6312_s23 + $0x84] sm:$0xe] }
  0xc1   : > { %6035 = vmatmul.mubr.msk.bf16.gmra.mxu0 %vm658_vm4, %v5265_v60  ;;  %v2805_v37 = vrot.slane %v2803_v33, 4  ;;  %v2813_v60 = vrot.slane %v7000_v24, 5  ;;  %v5310_v48 = vrot.slane %v5294_v56, 9  ;;  %v7450_v62 = vsel %vm6630_vm8, %v5309_v19, %v2810_v22  ;;  %v6225_v19 = vld [vmem:[%s6312_s23 + $0x90] sm:$0xff]  }
  0xc2   : > { %6038 = vmatprep.mubr.msk.bf16.mxu0 %vm658_vm4, %v5266_v59  ;;  %v7446_v49 = vsel %vm6630_vm8, %v2798_v30, %v2799_v42  ;;  %v2812_v13 = vrot.slane %v2810_v22, 4  ;;  %v2817_v35 = vrot.slane %v7005_v29, 5  ;;  %v5296_v59 = vld [vmem:[%s6312_s23 + $0x6c] sm:$0xe]  ;;  %v2820_v45 = vrot.slane %v7032_v28, 5  ;;  %v8947_v30 = vld [vmem:[#allocation5_spill] sm:$0xff] }
  0xc3   : > { %v5324_v44 = vcombine.low %v7434_v6, %v7446_v49  ;;  %v7459_v24 = vsel %vm6630_vm8, %v2805_v37, %v2806_v41  ;;  %v5311_v51 = vrot.slane %v5295_v36, 9  ;;  %v2824_v8 = vrot.slane %v7036_v11, 5  ;;  %v5299_v36 = vld [vmem:[%s6312_s23 + $0x90] sm:$0xe]  ;;  %v8957_v28 = vld [vmem:[#allocation2_spill] sm:$0xff] }
  0xc4   : > { %6001 = vmatmul.mubr.msk.bf16.gmra.mxu1 %vm658_vm4, %v6223_v17  ;;  %v5325_v29 = vcombine.low %v7441_v39, %v7459_v24  ;;  %v7468_v53 = vsel %vm6630_vm8, %v2812_v13, %v2813_v60  ;;  %v7472_v58 = vsel %vm6630_vm8, %v5310_v48, %v2817_v35  ;;  %v2819_v12 = vrot.slane %v2817_v35, 4  ;;  %v8948_v60 = vld [vmem:[#allocation6_spill] sm:$0xff] }
  0xc5   : > { %6004 = vmatprep.mubr.msk.bf16.mxu1 %vm658_vm4, %v6224_v21  ;;  %v2827_v46 = vrot.slane %v7085_v61, 5  ;;  %v5312_v42 = vrot.slane %v5296_v59, 9  ;;  %v2831_v17 = vrot.slane %v7058_v27, 5  ;;  %v2834_v33 = vrot.slane %v7109_v20, 5  ;;  %v6226_v27 = vld [vmem:[%s6312_s23 + $0x9c] sm:$0xff]   ;;  %v6227_v21 = vld [vmem:[%s6312_s23 + $0xa8] sm:$0xff]  }
  0xc6   : > { %v7481_v56 = vsel %vm6630_vm8, %v2819_v12, %v2820_v45  ;;  %v5313_v41 = vrot.slane %v5297_v14, 9  ;;  %v7490_v11 = vsel %vm6630_vm8, %v5311_v51, %v2824_v8  ;;  %v2826_v61 = vrot.slane %v2824_v8, 4  ;;  %v8949_v45 = vld [vmem:[#allocation7_spill] sm:$0xff]  ;;  %v5300_v14 = vld [vmem:[%s6312_s23 + $0x9c] sm:$0xe] }
  0xc7   : > { %v2838_v22 = vrot.slane %v8947_v30, 5  ;;  %v7499_v20 = vsel %vm6630_vm8, %v5312_v42, %v2831_v17  ;;  %v2833_v37 = vrot.slane %v2831_v17, 4  ;;  %v2841_v48 = vrot.slane %v8948_v60, 5  ;;  %v5303_v12 = vld [vmem:[%s6312_s23 + $0xc0] sm:$0xe] }
  0xc8   : > { %v5314_v13 = vrot.slane %v5298_v23, 9  ;;  %v7506_v35 = vsel %vm6630_vm8, %v2826_v61, %v2827_v46  ;;  %v2845_v51 = vrot.slane %v8949_v45, 5  ;;  %v5315_v46 = vrot.slane %v5299_v36, 9  ;;  %v5301_v23 = vld [vmem:[%s6312_s23 + $0xa8] sm:$0xe]  ;;  %v8952_v36 = vld [vmem:[#allocation9_spill] sm:$0xff] }
  0xc9   : > { %6039 = vmatmul.mubr.msk.bf16.gmra.mxu0 %vm658_vm4, %v7343_v52  ;;  %v7510_v52 = vsel %vm6630_vm8, %v5313_v41, %v2838_v22  ;;  %v2840_v59 = vrot.slane %v2838_v22, 4  ;;  %v7518_v8 = vsel %vm6630_vm8, %v2833_v37, %v2834_v33  ;;  %v2855_v37 = vrot.slane %v8952_v36, 5  ;;  %v5302_v45 = vld [vmem:[%s6312_s23 + $0xb4] sm:$0xe] }
  0xca   : > { %6042 = vmatprep.mubr.msk.bf16.mxu0 %vm658_vm4, %v7388_v40  ;;  %v8950_v40 = vld [vmem:[#allocation8_spill] sm:$0xff]  ;;  %v7531_v61 = vsel %vm6630_vm8, %v5314_v13, %v2845_v51  ;;  %v2847_v33 = vrot.slane %v2845_v51, 4  ;;  %v5316_v60 = vrot.slane %v5300_v14, 9  ;;  %v8953_v13 = vld [vmem:[#allocation10_spill] sm:$0xff]  ;;  %v5317_v17 = vrot.slane %v5301_v23, 9  ;;  %v8955_v14 = vld [vmem:[#allocation11_spill] sm:$0xff] }
  0xcb   : > { %v2848_v42 = vrot.slane %v8950_v40, 5  ;;  %v7527_v41 = vsel %vm6630_vm8, %v2840_v59, %v2841_v48  ;;  %v2859_v59 = vrot.slane %v8953_v13, 5  ;;  %v8954_v51 = vld [vmem:[#allocation12_spill] sm:$0xff]  ;;  %v2866_v30 = vrot.slane %v8955_v14, 5 }
  0xcc   : > { %6005 = vmatmul.mubr.msk.bf16.gmra.mxu1 %vm658_vm4, %v6225_v19  ;;  %v8951_v19 = vld [vmem:[#allocation3_spill] sm:$0xff]  ;;  %v2862_v40 = vrot.slane %v8954_v51, 5  ;;  %v8956_v13 = vld [vmem:[#allocation4_spill] sm:$0xff]  ;;  %v5318_v23 = vrot.slane %v5302_v45, 9  ;;  %v2779_v0 = vsel %vm6630_vm8, %v7408_v18, %v2778_v1  ;;  %v6250_v18 = vld [vmem:[%s6312_s23 + $0x20] sm:$0x1] }
  0xcd   : > { %6008 = vmatprep.mubr.msk.bf16.mxu1 %vm658_vm4, %v6226_v27  ;;  %v2852_v22 = vrot.slane %v8951_v19, 5  ;;  %v7541_v48 = vsel %vm6630_vm8, %v2847_v33, %v2848_v42  ;;  %v7556_v42 = vsel %vm6630_vm8, %v5316_v60, %v2859_v59  ;;  %v2861_v33 = vrot.slane %v2859_v59, 4  ;;  %v6228_v27 = vld [vmem:[%s6312_s23 + $0xb4] sm:$0xff]  }
  0xce   : > { %v2869_v51 = vrot.slane %v8956_v13, 5  ;;  %v2868_v14 = vrot.slane %v2866_v30, 4  ;;  %v2873_v60 = vrot.slane %v8957_v28, 5  ;;  %v5319_v59 = vrot.slane %v5303_v12, 9 }
  0xcf   : > { %v7549_v19 = vsel %vm6630_vm8, %v5315_v46, %v2852_v22  ;;  %v2854_v36 = vrot.slane %v2852_v22, 4  ;;  %v7568_v22 = vsel %vm6630_vm8, %v5317_v17, %v2866_v30  ;;  %v2880_v12 = vrot.slane %v7289_v4, 5 }
  0xd0   : > { %v7584_v28 = vsel %vm6630_vm8, %v2868_v14, %v2869_v51  ;;  %v2875_v30 = vrot.slane %v2873_v60, 4  ;;  %v2776_v4 = vsel %vm6630_vm8, %v5304_v25, %v2775_v2  ;;  %v6232_v14 = vld [vmem:[%s6312_s23 + $0x30] sm:$0xff]  }
  0xd1   : > { %6043 = vmatmul.mubr.msk.bf16.gmra.mxu0 %vm658_vm4, %v7390_v16  ;;  %v7564_v46 = vsel %vm6630_vm8, %v2854_v36, %v2855_v37  ;;  %v7577_v16 = vsel %vm6630_vm8, %v2861_v33, %v2862_v40  ;;  %v2876_v37 = vrot.slane %v7280_v54, 5  ;;  %v2883_v40 = vrot.slane %v7307_v32, 5  ;;  %v5289_v32 = vld [vmem:[%s6312_s23 + $0x18] sm:$0xe] }
  0xd2   : > { %6046 = vmatprep.mubr.msk.bf16.mxu0 %vm658_vm4, %v7396_v9  ;;  %v7588_v9 = vsel %vm6630_vm8, %v5318_v23, %v2873_v60  ;;  %v7628_v34 = vsel %vm6630_vm8, %v5319_v59, %v2880_v12  ;;  %v2882_v2 = vrot.slane %v2880_v12, 4  ;;  %v5305_v25 = vrot.slane %v5289_v32, 9  ;;  %v6231_v23 = vld [vmem:[%s6312_s23 + $0x24] sm:$0xff]   ;;  %v5418_v60 = vld [vmem:[%s6312_s23 + $0x18] sm:$0xf] }
  0xd3   : > { %v7616_v3 = vsel %vm6630_vm8, %v2875_v30, %v2876_v37  ;;  %v5321_v1 = vcombine.low %v2776_v4, %v2779_v0  ;;  %v5419_v59 = vld [vmem:[%s6312_s23 + $0x1c] sm:$0xf]  ;;  %v5421_v30 = vld [vmem:[%s6312_s23 + $0x24] sm:$0xf]  ;;  %v3587_v12 = vshrl.u32 %v5418_v60, 16 }
  0xd4   : > { %6009 = vmatmul.mubr.msk.bf16.gmra.mxu1 %vm658_vm4, %v6227_v21  ;;  %v5271_v21 = vcombine.low %v2404_v10, %v2414_v26  ;;  %v7633_v57 = vsel %vm6630_vm8, %v2882_v2, %v2883_v40  ;;  %v2785_v26 = vrot.slane %v6250_v18, 5  ;;  %v3590_v40 = vshll.u32 %v5418_v60, 16  ;;  %v6234_v2 = vld [vmem:[%s6312_s23 + $0x48] sm:$0xff]  }
  0xd5   : > { %6012 = vmatprep.mubr.msk.bf16.mxu1 %vm658_vm4, %v6228_v27  ;;  %v6249_v27 = vld [vmem:[%s6312_s23 + $0x1c] sm:$0xf]  ;;  %v3596_v4 = vshll.u32 %v5419_v59, 16  ;;  %v3600_v32 = vshrl.u32 %v5419_v59, 16 }
  0xd6   : > { %v2782_v36 = vrot.slane %v6249_v27, 5  ;;  %v3611_v27 = vshrl.u32 %v5421_v30, 16 }
  0xd7   : > { %v3602_v18 = vrot.slane %v3600_v32, 4 }
  0xd8   : > { %v2784_v10 = vrot.slane %v2782_v36, 4  ;;  %v2783_v13 = vsel %vm6630_vm8, %v5305_v25, %v2782_v36  ;;  %v3614_v36 = vshll.u32 %v5421_v30, 16  ;;  %v3589_v25 = vrot.slane %v3587_v12, 4 }
  0xd9   : > { %6047 = vmatmul.mubr.msk.bf16.gmra.mxu0 %vm658_vm4, %v5271_v21  ;;  %v7655_v21 = vld [vmem:[%s6312_s23 + $0x28] sm:$0xf]  ;;  %v3613_v43 = vrot.slane %v3611_v27, 4 }
  0xda   : > { %6086 = vmatprep.mubr.msk.bf16.mxu0 %vm658_vm4, %v6230_v47  ;;  %v2786_v51 = vsel %vm6630_vm8, %v2784_v10, %v2785_v26  ;;  %v3620_v0 = vshll.u32 %v7655_v21, 16  ;;  %v3624_v47 = vshrl.u32 %v7655_v21, 16  ;;  %v7668_v10 = vrot.slane %v3596_v4, 5 }
  0xdb   : > { %v5322_v37 = vcombine.low %v2783_v13, %v2786_v51  ;;  %v4330_v26 = vrot.slane %v5419_v59, 5  ;;  %v7672_v13 = vld [vmem:[%s6312_s23 + $0x2c] sm:$0x1]  ;;  %v3616_v31 = vrot.slane %v3614_v36, 5  ;;  %v7682_v59 = vld [vmem:[%s6312_s23 + $0x34] sm:$0xf] }
  0xdc   : > { %6013 = vmatmul.mubr.msk.bf16.gmra.mxu1 %vm658_vm4, %v6229_v15  ;;  %v5420_v15 = vld [vmem:[%s6312_s23 + $0x20] sm:$0x1]  ;;  %v7677_v51 = vrot.slane %v3620_v0, 5  ;;  %v3603_v12 = vor.u32 %v3602_v18, %v7668_v10  ;;  %v3630_v32 = vshll.u32 %v7672_v13, 16  ;;  %v4337_v0 = vrot.slane %v7655_v21, 5 }
  0xdd   : > { %6052 = vmatprep.mubr.msk.bf16.mxu1 %vm658_vm4, %v5321_v1  ;;  %v3592_v1 = vrot.slane %v3590_v40, 5  ;;  %v4332_v40 = vrot.slane %v4330_v26, 4  ;;  %v4333_v4 = vrot.slane %v5420_v15, 5  ;;  %v3617_v36 = vor.u32 %v3616_v31, %v3613_v43  ;;  %v5427_v31 = vld [vmem:[%s6312_s23 + $0x3c] sm:$0xf] }
  0xde   : > { %v3604_v24 = vrot.slane %v3603_v12, 4  ;;  %v4339_v33 = vrot.slane %v4337_v0, 4  ;;  %v7721_v12 = vld [vmem:[%s6312_s23 + $0x38] sm:$0x1] }
  0xdf   : > { %v3593_v60 = vor.u32 %v3592_v1, %v3589_v25  ;;  %v3648_v25 = vshrl.u32 %v7682_v59, 16  ;;  %v6236_v1 = vld [vmem:[%s6312_s23 + $0x60] sm:$0xff]  }
  0xe1   : > { %6087 = vmatmul.mubr.msk.bf16.vlgmr.msra.gmra.mxu0 %vm658_vm4, %v6231_v23  ;;  %v3626_v23 = vrot.slane %v3624_v47, 4  ;;  %v3594_v18 = vrot.slane %v3593_v60, 4  ;;  %v4340_v60 = vrot.slane %v7672_v13, 5 }
  0xe2   : > { %6153 = vmatpush3.bf16.msra.mxu0 %v7385_v55  ;;  %6090 = vmatprep.mubr.msk.bf16.mxu0 %vm658_vm4, %v6232_v14  ;;  %v6233_v55 = vld [vmem:[%s6312_s23 + $0x3c] sm:$0xff]   ;;  %v5424_v14 = vld [vmem:[%s6312_s23 + $0x30] sm:$0xf] }
  0xe3   : > { %v3635_v47 = vshrl.u32 %v5424_v14, 16  ;;  %v3627_v6 = vor.u32 %v3626_v23, %v7677_v51  ;;  %v3638_v49 = vshll.u32 %v5424_v14, 16  ;;  %v3618_v14 = vrot.slane %v3617_v36, 4 }
  0xe4   : > { %6053 = vmatmul.mubr.msk.bf16.vlgmr.msra.gmra.mxu1 %vm658_vm4, %v5322_v37  ;;  %v3606_v37 = vshll.u32 %v5420_v15, 16  ;;  %v3659_v36 = vshrl.u32 %v5427_v31, 16  ;;  %v3599_v13 = vsel %vm6364_vm5, %v3594_v18, %v7668_v10  ;;  %v3654_v18 = vshll.u32 %v7721_v12, 16 }
  0xe5   : > { %6119 = vmatpush3.bf16.msra.mxu1 %v7349_v7  ;;  %6056 = vmatprep.mubr.msk.bf16.mxu1 %vm658_vm4, %v5323_v5  ;;  %v5499_v7 = vld [vmem:[%s6312_s23 + $0x18] sm:$0xe]  ;;  %v7675_v5 = vpop.f32.mrf.mxu0  ;;  %v3623_v10 = vsel %vm6364_vm5, %v3618_v14, %v7677_v51  ;;  %v4344_v14 = vrot.slane %v7682_v59, 5 }
  0xe6   : > { %v5515_v30 = vrot.slane %v5499_v7, 9  ;;  %v3608_v21 = vrot.slane %v3606_v37, 5  ;;  %v3632_v7 = vrot.slane %v3630_v32, 5  ;;  %v3637_v37 = vrot.slane %v3635_v47, 4 }
  0xe7   : > { %v7699_v15 = vpop.f32.mrf.mxu0  ;;  %v3650_v32 = vrot.slane %v3648_v25, 4  ;;  %v7789_v17 = vrot.slane %v3654_v18, 5  ;;  %v4346_v45 = vrot.slane %v4344_v14, 4 }
  0xe8   : > { %v7707_v39 = vsel %vm6630_vm8, %v5515_v30, %v4330_v26  ;;  %v3628_v30 = vrot.slane %v3627_v6, 4  ;;  %v3609_v47 = vsel %vm6364_vm5, %v3604_v24, %v3608_v21  ;;  %v7734_v6 = vld [vmem:[%s6312_s23 + $0x40] sm:$0xf]  ;;  %v8962_v21 = vcombine.low %v7472_v58, %v7481_v56  ;;  %v6237_v24 = vld [vmem:[%s6312_s23 + $0x6c] sm:$0xff]  }
  0xe9   : > { %6091 = vmatmul.mubr.msk.bf16.gmra.mxu0 %vm658_vm4, %v6233_v55  ;;  %v5500_v55 = vld [vmem:[%s6312_s23 + $0x24] sm:$0xe]  ;;  %v7718_v26 = vpop.f32.mrf.mxu0  ;;  %v3668_v58 = vshll.u32 %v7734_v6, 16  ;;  %v3672_v56 = vshrl.u32 %v7734_v6, 16 }
  0xea   : > { %6094 = vmatprep.mubr.msk.bf16.mxu0 %vm658_vm4, %v6234_v2  ;;  %v7690_v27 = vpop.f32.mrf.mxu1  ;;  %v6235_v2 = vld [vmem:[%s6312_s23 + $0x54] sm:$0xff]   ;;  %v5516_v43 = vrot.slane %v5500_v55, 9  ;;  %v3662_v55 = vshll.u32 %v5427_v31, 16  ;;  %v5501_v31 = vld [vmem:[%s6312_s23 + $0x30] sm:$0xe] }
  0xeb   : > { %8958 = vst [vmem:[#allocation5_spill] sm:$0xff] %v7690_v27  ;;  %v7763_v51 = vpop.f32.mrf.mxu0 }
  0xec   : > { %6057 = vmatmul.mubr.msk.bf16.gmra.mxu1 %vm658_vm4, %v5324_v44  ;;  %v3644_v44 = vshll.u32 %v7682_v59, 16  ;;  %v7714_v23 = vpop.f32.mrf.mxu1  ;;  %v7747_v25 = vsel %vm6630_vm8, %v5516_v43, %v4337_v0  ;;  %v3633_v0 = vsel %vm6364_vm5, %v3628_v30, %v3632_v7  ;;  %v7777_v30 = vcombine.low %v3599_v13, %v3609_v47  ;;  %v7793_v47 = vld [vmem:[%s6312_s23 + $0x58] sm:$0xf] }
  0xed   : > { %6060 = vmatprep.mubr.msk.bf16.mxu1 %vm658_vm4, %v5325_v29  ;;  %v7711_v29 = vsel %vm6630_vm8, %v4332_v40, %v4333_v4  ;;  %8959 = vst [vmem:[#allocation6_spill] sm:$0xff] %v7714_v23  ;;  %v3640_v40 = vrot.slane %v3638_v49, 5  ;;  %v8960_v49 = vcombine.low %v7450_v62, %v7468_v53  ;;  %v5430_v62 = vld [vmem:[%s6312_s23 + $0x48] sm:$0xf]  ;;  %v7756_v53 = vld [vmem:[%s6312_s23 + $0x4c] sm:$0xf]  ;;  %v7779_v59 = vcombine.low %v3623_v10, %v3633_v0 }
  0xee   : > { %v7723_v4 = vrot.slane %v3644_v44, 5  ;;  %v7740_v44 = vpop.f32.mrf.mxu1  ;;  %v3686_v50 = vshll.u32 %v5430_v62, 16  ;;  %v3692_v54 = vshll.u32 %v7756_v53, 16  ;;  %v3696_v7 = vshrl.u32 %v7756_v53, 16  ;;  %v7799_v0 = vld [vmem:[%s6312_s23 + $0x44] sm:$0x1] }
  0xef   : > { %8961 = vst [vmem:[#allocation7_spill] sm:$0xff] %v7740_v44  ;;  %v3641_v43 = vor.u32 %v3640_v40, %v3637_v37  ;;  %v4347_v13 = vrot.slane %v7721_v12, 5  ;;  %v5502_v40 = vld [vmem:[%s6312_s23 + $0x3c] sm:$0xe]  ;;  %v8965_v23 = vcombine.low %v7490_v11, %v7506_v35 }
  0xf0   : > { %v7775_v37 = vpop.f32.mrf.mxu1  ;;  %v7804_v44 = vrot.slane %v3692_v54, 5  ;;  %v3698_v12 = vrot.slane %v3696_v7, 4  ;;  %v8967_v54 = vcombine.low %v7499_v20, %v7518_v8  ;;  %v4351_v20 = vrot.slane %v7734_v6, 5  ;;  %v6240_v8 = vld [vmem:[%s6312_s23 + $0x90] sm:$0xff]   ;;  %v5436_v6 = vld [vmem:[%s6312_s23 + $0x60] sm:$0xf] }
  0xf1   : > { %6095 = vmatmul.mubr.msk.bf16.gmra.mxu0 %vm658_vm4, %v6235_v2  ;;  %v3664_v2 = vrot.slane %v3662_v55, 5  ;;  %8963 = vst [vmem:[#allocation8_spill] sm:$0xff] %v7775_v37  ;;  %v3688_v37 = vrot.slane %v3686_v50, 5  ;;  %v6239_v50 = vld [vmem:[%s6312_s23 + $0x84] sm:$0xff]   ;;  %v5518_v35 = vrot.slane %v5502_v40, 9 }
  0xf2   : > { %6098 = vmatprep.mubr.msk.bf16.mxu0 %vm658_vm4, %v6236_v1  ;;  %v7751_v1 = vsel %vm6630_vm8, %v4339_v33, %v4340_v60  ;;  %v3651_v33 = vor.u32 %v3650_v32, %v7723_v4  ;;  %v6238_v60 = vld [vmem:[%s6312_s23 + $0x78] sm:$0xff]   ;;  %v5517_v32 = vrot.slane %v5501_v31, 9 }
  0xf4   : > { %6061 = vmatmul.mubr.msk.bf16.gmra.mxu1 %vm658_vm4, %v8960_v49  ;;  %v3661_v49 = vrot.slane %v3659_v36, 4  ;;  %v5433_v36 = vld [vmem:[%s6312_s23 + $0x54] sm:$0xf]  ;;  %v7796_v10 = vrot.slane %v3651_v33, 4 }
  0xf5   : > { %6064 = vmatprep.mubr.msk.bf16.mxu1 %vm658_vm4, %v8962_v21  ;;  %v3683_v21 = vshrl.u32 %v5430_v62, 16  ;;  %v7787_v62 = vrot.slane %v3641_v43, 4  ;;  %v3674_v43 = vrot.slane %v3672_v56, 4  ;;  %v3720_v56 = vshrl.u32 %v7793_v47, 16 }
  0xf6   : > { %v7785_v55 = vpop.f32.mrf.mxu0  ;;  %v3665_v31 = vor.u32 %v3664_v2, %v3661_v49  ;;  %v3707_v2 = vshrl.u32 %v5433_v36, 16  ;;  %v3710_v49 = vshll.u32 %v5433_v36, 16 }
  0xf7   : > { %8964 = vst [vmem:[#allocation3_spill] sm:$0xff] %v7785_v55  ;;  %v3685_v18 = vrot.slane %v3683_v21, 4  ;;  %v7834_v21 = vsel %vm6630_vm8, %v4346_v45, %v4347_v13  ;;  %v3699_v45 = vor.u32 %v3698_v12, %v7804_v44  ;;  %v4358_v12 = vrot.slane %v7756_v53, 5  ;;  %v7861_v55 = vld [vmem:[%s6312_s23 + $0x5c] sm:$0x1] }
  0xf8   : > { %v7822_v11 = vpop.f32.mrf.mxu0  ;;  %v3709_v27 = vrot.slane %v3707_v2, 4  ;;  %v8971_v53 = vcombine.low %v7510_v52, %v7527_v41  ;;  %v8973_v52 = vcombine.low %v7531_v61, %v7541_v48  ;;  %v6241_v41 = vld [vmem:[%s6312_s23 + $0x9c] sm:$0xff]   ;;  %v4365_v61 = vrot.slane %v7793_v47, 5 }
  0xf9   : > { %6099 = vmatmul.mubr.msk.bf16.gmra.mxu0 %vm658_vm4, %v6237_v24  ;;  %v7801_v24 = vrot.slane %v3668_v58, 5  ;;  %v3716_v58 = vshll.u32 %v7793_v47, 16  ;;  %8968 = vst [vmem:[#allocation10_spill] sm:$0xff] %v7822_v11  ;;  %v3712_v11 = vrot.slane %v3710_v49, 5 }
  0xfa   : > { %6102 = vmatprep.mubr.msk.bf16.mxu0 %vm658_vm4, %v6238_v60  ;;  %v7810_v33 = vpop.f32.mrf.mxu1  ;;  %v7813_v60 = vld [vmem:[%s6312_s23 + $0x50] sm:$0x1]  ;;  %v7854_v40 = vpop.f32.mrf.mxu0 }
  0xfb   : > { %8966 = vst [vmem:[#allocation9_spill] sm:$0xff] %v7810_v33  ;;  %v3675_v36 = vor.u32 %v3674_v43, %v7801_v24  ;;  %v7844_v33 = vrot.slane %v3665_v31, 4  ;;  %v7851_v7 = vrot.slane %v3716_v58, 5  ;;  %v3722_v43 = vrot.slane %v3720_v56, 4  ;;  %8970 = vst [vmem:[#allocation11_spill] sm:$0xff] %v7854_v40 }
  0xfc   : > { %6065 = vmatmul.mubr.msk.bf16.gmra.mxu1 %vm658_vm4, %v8965_v23  ;;  %v7830_v23 = vsel %vm6630_vm8, %v5517_v32, %v4344_v14  ;;  %v3689_v14 = vor.u32 %v3688_v37, %v3685_v18  ;;  %v3702_v32 = vshll.u32 %v7813_v60, 16  ;;  %v7849_v13 = vpop.f32.mrf.mxu1  ;;  %v4353_v31 = vrot.slane %v4351_v20, 4  ;;  %v5503_v58 = vld [vmem:[%s6312_s23 + $0x48] sm:$0xe] }
  0xfd   : > { %6068 = vmatprep.mubr.msk.bf16.mxu1 %vm658_vm4, %v8967_v54  ;;  %v3678_v54 = vshll.u32 %v7799_v0, 16  ;;  %8969 = vst [vmem:[#allocation12_spill] sm:$0xff] %v7849_v13  ;;  %v4354_v18 = vrot.slane %v7799_v0, 5  ;;  %v3676_v2 = vrot.slane %v3675_v36, 4  ;;  %v3731_v56 = vshrl.u32 %v5436_v6, 16 }
  0xfe   : > { %v7867_v13 = vsel %vm6630_vm8, %v5518_v35, %v4351_v20  ;;  %v3690_v37 = vrot.slane %v3689_v14, 4  ;;  %v3700_v40 = vrot.slane %v3699_v45, 4  ;;  %v3704_v0 = vrot.slane %v3702_v32, 5  ;;  %v7882_v14 = vld [vmem:[%s6312_s23 + $0x64] sm:$0xf]  ;;  %v7889_v45 = vpop.f32.mrf.mxu0 }
  0xff   : > { %v3680_v49 = vrot.slane %v3678_v54, 5  ;;  %v3671_v36 = vsel %vm6364_vm5, %v7844_v33, %v7801_v24  ;;  %v3713_v54 = vor.u32 %v3712_v11, %v3709_v27  ;;  %v3723_v35 = vor.u32 %v3722_v43, %v7851_v7  ;;  %8974 = vst [vmem:[#allocation2_spill] sm:$0xff] %v7889_v45  ;;  %v5504_v11 = vld [vmem:[%s6312_s23 + $0x54] sm:$0xe]  ;;  %v6245_v45 = vld [vmem:[%s6312_s23 + $0xcc] sm:$0xff]  }
 0x100   : > { %v3726_v20 = vshll.u32 %v7861_v55, 16  ;;  %v7893_v32 = vsel %vm6630_vm8, %v4353_v31, %v4354_v18  ;;  %v5519_v24 = vrot.slane %v5503_v58, 9  ;;  %v4360_v27 = vrot.slane %v4358_v12, 4 }
 0x101   : > { %6103 = vmatmul.mubr.msk.bf16.gmra.mxu0 %vm658_vm4, %v6239_v50  ;;  %v3734_v50 = vshll.u32 %v5436_v6, 16  ;;  %v4361_v33 = vrot.slane %v7813_v60, 5  ;;  %v6242_v6 = vld [vmem:[%s6312_s23 + $0xa8] sm:$0xff]   ;;  %v3681_v43 = vsel %vm6364_vm5, %v3676_v2, %v3680_v49  ;;  %v3733_v48 = vrot.slane %v3731_v56, 4 }
 0x102   : > { %6106 = vmatprep.mubr.msk.bf16.mxu0 %vm658_vm4, %v6240_v8  ;;  %v7873_v8 = vpop.f32.mrf.mxu1  ;;  %v3705_v31 = vsel %vm6364_vm5, %v3700_v40, %v3704_v0  ;;  %v3740_v18 = vshll.u32 %v7882_v14, 16  ;;  %v3744_v60 = vshrl.u32 %v7882_v14, 16  ;;  %v3724_v2 = vrot.slane %v3723_v35, 4  ;;  %v7911_v56 = vld [vmem:[%s6312_s23 + $0x68] sm:$0x1] }
 0x103   : > { %8972 = vst [vmem:[#allocation4_spill] sm:$0xff] %v7873_v8  ;;  %v3714_v8 = vrot.slane %v3713_v54, 4  ;;  %v3728_v47 = vrot.slane %v3726_v20, 5  ;;  %v5520_v49 = vrot.slane %v5504_v11, 9  ;;  %v8977_v40 = vsel %vm6364_vm5, %v7796_v10, %v7789_v17  ;;  %v5439_v20 = vld [vmem:[%s6312_s23 + $0x6c] sm:$0xf] }
 0x104   : > { %6069 = vmatmul.mubr.msk.bf16.gmra.mxu1 %vm658_vm4, %v8971_v53  ;;  %v3736_v53 = vrot.slane %v3734_v50, 5  ;;  %v7908_v58 = vpop.f32.mrf.mxu1  ;;  %v7932_v54 = vsel %vm6630_vm8, %v5519_v24, %v4358_v12  ;;  %v7936_v35 = vsel %vm6630_vm8, %v4360_v27, %v4361_v33  ;;  %v7939_v17 = vcombine.low %v3671_v36, %v3681_v43  ;;  %v5505_v33 = vld [vmem:[%s6312_s23 + $0x60] sm:$0xe]  ;;  %v5445_v43 = vld [vmem:[%s6312_s23 + $0x84] sm:$0xf] }
 0x105   : > { %6072 = vmatprep.mubr.msk.bf16.mxu1 %vm658_vm4, %v8973_v52  ;;  %v3695_v52 = vsel %vm6364_vm5, %v3690_v37, %v7804_v44  ;;  %8975 = vst [vmem:[#allocation13_spill] sm:$0xff] %v7908_v58  ;;  %v8978_v37 = vsel %vm6364_vm5, %v7787_v62, %v7723_v4  ;;  %v4367_v4 = vrot.slane %v4365_v61, 4  ;;  %v4368_v62 = vrot.slane %v7861_v55, 5 }
 0x106   : > { %v7926_v50 = vcombine.low %v8978_v37, %v8977_v40  ;;  %8979 = vst [vmem:[#allocation15_spill] sm:$0xff] %v7939_v17  ;;  %v3737_v10 = vor.u32 %v3736_v53, %v3733_v48  ;;  %v7946_v11 = vcombine.low %v3695_v52, %v3705_v31  ;;  %v7948_v12 = vrot.slane %v3740_v18, 5 }
 0x107   : > { %v7914_v44 = vpop.f32.mrf.mxu0  ;;  %v7950_v24 = vrot.slane %v3744_v60, 4  ;;  %v3750_v27 = vshll.u32 %v7911_v56, 16  ;;  %v8981_v36 = vcombine.low %v7549_v19, %v7564_v46  ;;  %v3719_v48 = vsel %vm6364_vm5, %v3714_v8, %v7851_v7  ;;  %v5442_v19 = vld [vmem:[%s6312_s23 + $0x78] sm:$0xf] }
 0x108   : > { %8976 = vst [vmem:[#allocation14_spill] sm:$0xff] %v7914_v44  ;;  %8980 = vst [vmem:[#allocation16_spill] sm:$0xff] %v7946_v11  ;;  %v3729_v53 = vsel %vm6364_vm5, %v3724_v2, %v3728_v47  ;;  %v7970_v52 = vsel %vm6630_vm8, %v5520_v49, %v4365_v61  ;;  %v8983_v46 = vcombine.low %v7556_v42, %v7577_v16  ;;  %v3755_v18 = vshrl.u32 %v5439_v20, 16  ;;  %v7982_v2 = vld [vmem:[%s6312_s23 + $0x7c] sm:$0xf]  ;;  %v6244_v61 = vld [vmem:[%s6312_s23 + $0xc0] sm:$0xff]  }
 0x109   : > { %6107 = vmatmul.mubr.msk.bf16.gmra.mxu0 %vm658_vm4, %v6241_v41  ;;  %v7944_v41 = vld [vmem:[%s6312_s23 + $0x70] sm:$0xf]  ;;  %v7977_v31 = vpop.f32.mrf.mxu0  ;;  %v3758_v60 = vshll.u32 %v5439_v20, 16  ;;  %v7987_v47 = vsel %vm6630_vm8, %v4367_v4, %v4368_v62  ;;  %v7989_v42 = vrot.slane %v3737_v10, 4  ;;  %v5521_v16 = vrot.slane %v5505_v33, 9 }
 0x10a   : > { %6110 = vmatprep.mubr.msk.bf16.mxu0 %vm658_vm4, %v6242_v6  ;;  %v6243_v6 = vld [vmem:[%s6312_s23 + $0xb4] sm:$0xff]   ;;  %8984 = vst [vmem:[#allocation18_spill] sm:$0xff] %v7977_v31  ;;  %v3764_v7 = vshll.u32 %v7944_v41, 16  ;;  %v3768_v8 = vshrl.u32 %v7944_v41, 16  ;;  %v4372_v49 = vrot.slane %v7882_v14, 5  ;;  %v7992_v40 = vcombine.low %v3719_v48, %v3729_v53 }
 0x10b   : > { %v3747_v37 = vor.u32 %v7950_v24, %v7948_v12  ;;  %v7996_v20 = vrot.slane %v3750_v27, 5  ;;  %v3779_v4 = vshrl.u32 %v5442_v19, 16  ;;  %v3782_v62 = vshll.u32 %v5442_v19, 16  ;;  %v8008_v33 = vld [vmem:[%s6312_s23 + $0x88] sm:$0xf]  ;;  %v8011_v24 = vpop.f32.mrf.mxu0 }
 0x10c   : > { %6073 = vmatmul.mubr.msk.bf16.gmra.mxu1 %vm658_vm4, %v8981_v36  ;;  %v7958_v55 = vpop.f32.mrf.mxu1  ;;  %8985 = vst [vmem:[#allocation19_spill] sm:$0xff] %v7992_v40  ;;  %v4375_v36 = vrot.slane %v7911_v56, 5  ;;  %v3788_v14 = vshll.u32 %v7982_v2, 16  ;;  %v3792_v10 = vshrl.u32 %v7982_v2, 16  ;;  %8987 = vst [vmem:[#allocation21_spill] sm:$0xff] %v8011_v24  ;;  %v3757_v56 = vrot.slane %v3755_v18, 4 }
 0x10d   : > { %8982 = vst [vmem:[#allocation17_spill] sm:$0xff] %v7958_v55  ;;  %6076 = vmatprep.mubr.msk.bf16.mxu1 %vm658_vm4, %v8983_v46  ;;  %v8000_v46 = vld [vmem:[%s6312_s23 + $0x74] sm:$0x1]  ;;  %v3760_v27 = vrot.slane %v3758_v60, 5  ;;  %v8013_v48 = vrot.slane %v3764_v7, 5  ;;  %v3770_v53 = vrot.slane %v3768_v8, 4  ;;  %v8988_v19 = vcombine.low %v7568_v22, %v7584_v28  ;;  %v8041_v40 = vpop.f32.mrf.mxu0 }
 0x10e   : > { %v8003_v0 = vpop.f32.mrf.mxu1  ;;  %v4374_v55 = vrot.slane %v4372_v49, 4  ;;  %v8026_v18 = vld [vmem:[%s6312_s23 + $0x80] sm:$0x1]  ;;  %v8029_v60 = vld [vmem:[%s6312_s23 + $0x6c] sm:$0xe]  ;;  %v3803_v7 = vshrl.u32 %v5445_v43, 16 }
 0x10f   : > { %8986 = vst [vmem:[#allocation20_spill] sm:$0xff] %v8003_v0  ;;  %v8022_v0 = vsel %vm6630_vm8, %v5521_v16, %v4372_v49  ;;  %v3806_v8 = vshll.u32 %v5445_v43, 16  ;;  %v3816_v58 = vshrl.u32 %v8008_v33, 16  ;;  %v3781_v49 = vrot.slane %v3779_v4, 4  ;;  %8990 = vst [vmem:[#allocation23_spill] sm:$0xff] %v8041_v40 }
 0x110   : > { %v8037_v16 = vpop.f32.mrf.mxu1  ;;  %v3784_v24 = vrot.slane %v3782_v62, 5  ;;  %v8039_v31 = vrot.slane %v3788_v14, 5  ;;  %v3794_v44 = vrot.slane %v3792_v10, 4  ;;  %v8991_v43 = vcombine.low %v7588_v9, %v7616_v3  ;;  %v8060_v3 = vld [vmem:[%s6312_s23 + $0x8c] sm:$0x1] }
 0x111   : > { %6111 = vmatmul.mubr.msk.bf16.gmra.mxu0 %vm658_vm4, %v6243_v6  ;;  %v3774_v6 = vshll.u32 %v8000_v46, 16  ;;  %8989 = vst [vmem:[#allocation22_spill] sm:$0xff] %v8037_v16  ;;  %v3761_v22 = vor.u32 %v3760_v27, %v3757_v56  ;;  %v3771_v28 = vor.u32 %v3770_v53, %v8013_v48  ;;  %v3798_v4 = vshll.u32 %v8026_v18, 16  ;;  %v5507_v56 = vld [vmem:[%s6312_s23 + $0x78] sm:$0xe] }
 0x112   : > { %6114 = vmatprep.mubr.msk.bf16.mxu0 %vm658_vm4, %v6244_v61  ;;  %v3812_v61 = vshll.u32 %v8008_v33, 16  ;;  %v8051_v62 = vrot.slane %v3747_v37, 4  ;;  %v8055_v14 = vsel %vm6630_vm8, %v4374_v55, %v4375_v36  ;;  %v5522_v10 = vrot.slane %v8029_v60, 9  ;;  %v8065_v16 = vpop.f32.mrf.mxu1  ;;  %v5448_v60 = vld [vmem:[%s6312_s23 + $0x90] sm:$0xf] }
 0x113   : > { %v4386_v9 = vrot.slane %v7982_v2, 5  ;;  %v3805_v27 = vrot.slane %v3803_v7, 4  ;;  %v3808_v53 = vrot.slane %v3806_v8, 5  ;;  %8992 = vst [vmem:[#allocation24_spill] sm:$0xff] %v8065_v16  ;;  %v3776_v37 = vrot.slane %v3774_v6, 5 }
 0x114   : > { %6077 = vmatmul.mubr.msk.bf16.gmra.mxu1 %vm658_vm4, %v8988_v19  ;;  %v4379_v19 = vrot.slane %v7944_v41, 5  ;;  %v8063_v41 = vrot.slane %v3812_v61, 5  ;;  %v4382_v40 = vrot.slane %v8000_v46, 5  ;;  %v3785_v55 = vor.u32 %v3784_v24, %v3781_v49  ;;  %v8074_v61 = vld [vmem:[%s6312_s23 + $0x94] sm:$0xf] }
 0x115   : > { %6080 = vmatprep.mubr.msk.bf16.mxu1 %vm658_vm4, %v8991_v43  ;;  %v3818_v43 = vrot.slane %v3816_v58, 4  ;;  %v3795_v36 = vor.u32 %v3794_v44, %v8039_v31  ;;  %v3762_v2 = vrot.slane %v3761_v22, 4  ;;  %v3772_v7 = vrot.slane %v3771_v28, 4 }
 0x116   : > { %v4381_v17 = vrot.slane %v4379_v19, 4  ;;  %v3800_v8 = vrot.slane %v3798_v4, 5  ;;  %v8993_v58 = vcombine.low %v7707_v39, %v7711_v29  ;;  %v5523_v46 = vrot.slane %v5507_v56, 9 }
 0x117   : > { %v4388_v24 = vrot.slane %v4386_v9, 4  ;;  %v4389_v44 = vrot.slane %v8026_v18, 5  ;;  %v3822_v6 = vshll.u32 %v8060_v3, 16  ;;  %v3819_v22 = vor.u32 %v3818_v43, %v8063_v41 }
 0x118   : > { %v3827_v28 = vshrl.u32 %v5448_v60, 16  ;;  %v3830_v4 = vshll.u32 %v5448_v60, 16  ;;  %v8995_v39 = vcombine.low %v7628_v34, %v7633_v57  ;;  %v3786_v29 = vrot.slane %v3785_v55, 4 }
 0x119   : > { %v8070_v11 = vpop.f32.mrf.mxu0  ;;  %6115 = vmatmul.mubr.msk.bf16.gmra.mxu0 %vm658_vm4, %v6245_v45  ;;  %v3809_v45 = vor.u32 %v3808_v53, %v3805_v27  ;;  %v3796_v56 = vrot.slane %v3795_v36, 4  ;;  %v3836_v18 = vshll.u32 %v8074_v61, 16  ;;  %v3753_v27 = vsel %vm6364_vm5, %v8051_v62, %v7996_v20 }
 0x11a   : > { %6154 = vmatprep.mubr.msk.bf16.mxu0 %vm658_vm4, %v8993_v58  ;;  %v3840_v58 = vshrl.u32 %v8074_v61, 16  ;;  %v3767_v34 = vsel %vm6364_vm5, %v3762_v2, %v8013_v48  ;;  %v8106_v57 = vsel %vm6630_vm8, %v5522_v10, %v4379_v19  ;;  %v8110_v53 = vsel %vm6630_vm8, %v4381_v17, %v4382_v40  ;;  %v5508_v19 = vld [vmem:[%s6312_s23 + $0x84] sm:$0xe]  ;;  %v9034_v38 = vld [vmem:[#allocation24_spill] sm:$0xff] }
 0x11b   : > { %v8082_v49 = vpop.f32.mrf.mxu0  ;;  %v8118_v20 = vsel %vm6630_vm8, %v5523_v46, %v4386_v9  ;;  %v8122_v48 = vsel %vm6630_vm8, %v4388_v24, %v4389_v44  ;;  %v3824_v62 = vrot.slane %v3822_v6, 5  ;;  %v3810_v17 = vrot.slane %v3809_v45, 4  ;;  %v8146_v45 = vld [vmem:[%s6312_s23 + $0x98] sm:$0x1] }
 0x11c   : > { %8994 = vst [vmem:[#allocation25_spill] sm:$0xff] %v8082_v49  ;;  %v8085_v16 = vpop.f32.mrf.mxu1  ;;  %6081 = vmatmul.mubr.msk.bf16.gmra.mxu1 %vm658_vm4, %v8995_v39  ;;  %v3820_v40 = vrot.slane %v3819_v22, 4  ;;  %v3829_v55 = vrot.slane %v3827_v28, 4  ;;  %v3832_v36 = vrot.slane %v3830_v4, 5  ;;  %v3791_v9 = vsel %vm6364_vm5, %v3786_v29, %v8039_v31  ;;  %v5451_v22 = vld [vmem:[%s6312_s23 + $0x9c] sm:$0xf] }
 0x11d   : > { %v8093_v49 = vpop.f32.mrf.mxu0  ;;  %6120 = vmatprep.mubr.msk.bf16.mxu1 %vm658_vm4, %v7777_v30  ;;  %v3777_v30 = vsel %vm6364_vm5, %v3772_v7, %v3776_v37  ;;  %v3801_v37 = vsel %vm6364_vm5, %v3796_v56, %v3800_v8  ;;  %v8134_v2 = vrot.slane %v3836_v18, 5  ;;  %v3842_v7 = vrot.slane %v3840_v58, 4  ;;  %v8177_v58 = vld [vmem:[%s6312_s23 + $0xa0] sm:$0xf] }
 0x11e   : > { %v8112_v43 = vpop.f32.mrf.mxu1  ;;  %v8996_v24 = vcombine.low %v7747_v25, %v7751_v1  ;;  %v5537_v44 = vcombine.low %v7970_v52, %v7987_v47  ;;  %v5538_v6 = vcombine.low %v8022_v0, %v8055_v14  ;;  %v5524_v31 = vrot.slane %v5508_v19, 9 }
 0x11f   : > { %v8125_v10 = vpop.f32.mrf.mxu0  ;;  %v4393_v8 = vrot.slane %v8008_v33, 5  ;;  %v8997_v25 = vcombine.low %v7830_v23, %v7834_v21  ;;  %v8998_v1 = vsel %vm6364_vm5, %v7989_v42, %v7948_v12  ;;  %v8162_v39 = vcombine.low %v3767_v34, %v3777_v30  ;;  %v5509_v42 = vld [vmem:[%s6312_s23 + $0x90] sm:$0xe]  ;;  %v9005_v33 = vld [vmem:[#allocation11_spill] sm:$0xff] }
 0x120   : > { %v8127_v60 = vpop.f32.mrf.mxu1  ;;  %v8160_v4 = vcombine.low %v8998_v1, %v3753_v27  ;;  %v8168_v18 = vcombine.low %v3791_v9, %v3801_v37  ;;  %v3815_v23 = vsel %vm6364_vm5, %v3810_v17, %v8063_v41  ;;  %v3825_v21 = vsel %vm6364_vm5, %v3820_v40, %v3824_v62 }
 0x121   : > { %v5952_v46 = vpop.f32.mrf.mxu0  ;;  %6155 = vmatmul.mubr.msk.bf16.vlgmr.msra.gmra.mxu0 %vm658_vm4, %v8996_v24  ;;  %v3833_v12 = vor.u32 %v3832_v36, %v3829_v55  ;;  %v3843_v34 = vor.u32 %v3842_v7, %v8134_v2  ;;  %v3846_v30 = vshll.u32 %v8146_v45, 16  ;;  %v3851_v19 = vshrl.u32 %v5451_v22, 16 }
 0x122   : > { %v8149_v28 = vpop.f32.mrf.mxu1  ;;  %6158 = vmatprep.mubr.msk.bf16.mxu0 %vm658_vm4, %v8997_v25  ;;  %v3854_v9 = vshll.u32 %v5451_v22, 16  ;;  %v8188_v62 = vsel %vm6630_vm8, %v5524_v31, %v4393_v8  ;;  %v4395_v17 = vrot.slane %v4393_v8, 4  ;;  %v4396_v40 = vrot.slane %v8060_v3, 5 }
 0x123   : > { %v1465_v56 = vpop.f32.mrf.mxu0  ;;  %v5525_v55 = vrot.slane %v5509_v42, 9  ;;  %v4400_v36 = vrot.slane %v8074_v61, 5  ;;  %v3860_v7 = vshll.u32 %v8177_v58, 16  ;;  %v3864_v24 = vshrl.u32 %v8177_v58, 16 }
 0x124   : > { %v5918_v27 = vpop.f32.mrf.mxu1  ;;  %6121 = vmatmul.mubr.msk.bf16.vlgmr.msra.gmra.mxu1 %vm658_vm4, %v7779_v59  ;;  %v8197_v25 = vcombine.low %v3815_v23, %v3825_v21  ;;  %v8199_v31 = vrot.slane %v3833_v12, 4  ;;  %v3844_v3 = vrot.slane %v3843_v34, 4  ;;  %v3848_v1 = vrot.slane %v3846_v30, 5  ;;  %v5454_v21 = vld [vmem:[%s6312_s23 + $0xa8] sm:$0xf] }
 0x125   : > { %v1049_v37 = vadd.f32 %v5918_v27, %v7675_v5  ;;  %v5953_v41 = vpop.f32.mrf.mxu0  ;;  %6124 = vmatprep.mubr.msk.bf16.mxu1 %vm658_vm4, %v7926_v50  ;;  %v3853_v42 = vrot.slane %v3851_v19, 4  ;;  %v3856_v61 = vrot.slane %v3854_v9, 5  ;;  %v4403_v23 = vrot.slane %v8146_v45, 5  ;;  %v8225_v30 = vld [vmem:[%s6312_s23 + $0xac] sm:$0xf] }
 0x126   : > { %v1040_v59 = vpop.f32.mrf.mxu1  ;;  %v3866_v34 = vrot.slane %v3864_v24, 4  ;;  %v9002_v24 = vld [vmem:[#allocation3_spill] sm:$0xff] }
 0x127   : > { %v8194_v5 = vadd.f32 %v5952_v46, %v1049_v37  ;;  %v1041_v50 = vadd.f32 %v1040_v59, %v7699_v15  ;;  %v1468_v22 = vpop.f32.mrf.mxu0  ;;  %v8999_v37 = vcombine.low %v7867_v13, %v7893_v32  ;;  %v8210_v15 = vsel %vm6630_vm8, %v4395_v17, %v4396_v40  ;;  %v5510_v17 = vld [vmem:[%s6312_s23 + $0x9c] sm:$0xe] }
 0x128   : > { %v5919_v8 = vpop.f32.mrf.mxu1  ;;  %v4402_v13 = vrot.slane %v4400_v36, 4  ;;  %v8222_v32 = vrot.slane %v3860_v7, 5  ;;  %v4407_v40 = vrot.slane %v8177_v58, 5  ;;  %v3884_v58 = vshll.u32 %v8225_v30, 16 }
 0x129   : > { %v8201_v27 = vadd.f32 %v1465_v56, %v1041_v50  ;;  %v1052_v29 = vadd.f32 %v5919_v8, %v7718_v26  ;;  %v5956_v46 = vpop.f32.mrf.mxu0  ;;  %6159 = vmatmul.mubr.msk.bf16.gmra.mxu0 %vm658_vm4, %v8999_v37  ;;  %v9000_v56 = vcombine.low %v7932_v54, %v7936_v35  ;;  %v8220_v26 = vsel %vm6630_vm8, %v5525_v55, %v4400_v36  ;;  %v5453_v35 = vld [vmem:[%s6312_s23 + $0xa4] sm:$0x1]  ;;  %v9001_v55 = vld [vmem:[#allocation15_spill] sm:$0xff] }
 0x12a   : > { %v1043_v12 = vpop.f32.mrf.mxu1  ;;  %v3839_v54 = vsel %vm6364_vm5, %v8199_v31, %v8134_v2  ;;  %v3875_v36 = vshrl.u32 %v5454_v21, 16  ;;  %v9003_v2 = vld [vmem:[#allocation16_spill] sm:$0xff]  ;;  %v3888_v31 = vshrl.u32 %v8225_v30, 16 }
 0x12b   : > { %6162 = vmatprep.mubr.msk.bf16.mxu0 %vm658_vm4, %v9000_v56  ;;  %v8227_v19 = vadd.f32 %v5953_v41, %v1052_v29  ;;  %v1044_v45 = vadd.f32 %v1043_v12, %v7763_v51  ;;  %v1481_v9 = vpop.f32.mrf.mxu0  ;;  %v3849_v29 = vsel %vm6364_vm5, %v3844_v3, %v3848_v1  ;;  %v3857_v41 = vor.u32 %v3856_v61, %v3853_v42  ;;  %v9004_v61 = vld [vmem:[#allocation10_spill] sm:$0xff] }
 0x12c   : > { %v5922_v59 = vpop.f32.mrf.mxu1  ;;  %6125 = vmatmul.mubr.msk.bf16.gmra.mxu1 %vm658_vm4, %v9001_v55  ;;  %v3878_v51 = vshll.u32 %v5454_v21, 16  ;;  %v8250_v12 = vsel %vm6630_vm8, %v4402_v13, %v4403_v23  ;;  %v3867_v3 = vor.u32 %v3866_v34, %v8222_v32  ;;  %v3870_v1 = vshll.u32 %v5453_v35, 16 }
 0x12d   : > { %v8241_v7 = vadd.f32 %v1468_v22, %v1044_v45  ;;  %v1065_v50 = vadd.f32 %v5922_v59, %v9002_v24  ;;  %v5957_v8 = vpop.f32.mrf.mxu0  ;;  %6128 = vmatprep.mubr.msk.bf16.mxu1 %vm658_vm4, %v9003_v2  ;;  %v5526_v22 = vrot.slane %v5510_v17, 9  ;;  %v4409_v45 = vrot.slane %v4407_v40, 4 }
 0x12e   : > { %v1056_v37 = vpop.f32.mrf.mxu1  ;;  %v4410_v59 = vrot.slane %v5453_v35, 5  ;;  %v8258_v2 = vrot.slane %v3857_v41, 4  ;;  %v3877_v23 = vrot.slane %v3875_v36, 4  ;;  %v3880_v13 = vrot.slane %v3878_v51, 5  ;;  %v8268_v35 = vld [vmem:[%s6312_s23 + $0xb0] sm:$0x1] }
 0x12f   : > { %v8253_v42 = vadd.f32 %v5956_v46, %v1065_v50  ;;  %v1057_v21 = vadd.f32 %v1056_v37, %v9004_v61  ;;  %v1484_v56 = vpop.f32.mrf.mxu0  ;;  %v8270_v50 = vrot.slane %v3884_v58, 5  ;;  %v3890_v41 = vrot.slane %v3888_v31, 4  ;;  %v9006_v51 = vld [vmem:[#allocation2_spill] sm:$0xff] }
 0x130   : > { %v5923_v55 = vpop.f32.mrf.mxu1  ;;  %v8280_v52 = vrot.slane %v3867_v3, 4  ;;  %v8282_v47 = vrot.slane %v3870_v1, 5  ;;  %v8290_v0 = vsel %vm6630_vm8, %v5526_v22, %v4407_v40  ;;  %v8294_v14 = vsel %vm6630_vm8, %v4409_v45, %v4410_v59  ;;  %v8306_v22 = vld [vmem:[%s6312_s23 + $0xb8] sm:$0xf] }
 0x131   : > { %v8260_v34 = vadd.f32 %v1481_v9, %v1057_v21  ;;  %v1068_v17 = vadd.f32 %v5923_v55, %v9005_v33  ;;  %v5960_v46 = vpop.f32.mrf.mxu0  ;;  %6163 = vmatmul.mubr.msk.bf16.gmra.mxu0 %vm658_vm4, %v5537_v44  ;;  %v8276_v9 = vcombine.low %v3839_v54, %v3849_v29  ;;  %v5511_v44 = vld [vmem:[%s6312_s23 + $0xa8] sm:$0xe]  ;;  %v3881_v3 = vor.u32 %v3880_v13, %v3877_v23  ;;  %v9008_v21 = vld [vmem:[#allocation14_spill] sm:$0xff] }
 0x132   : > { %v1059_v37 = vpop.f32.mrf.mxu1  ;;  %6166 = vmatprep.mubr.msk.bf16.mxu0 %vm658_vm4, %v5538_v6  ;;  %v5457_v6 = vld [vmem:[%s6312_s23 + $0xb4] sm:$0xf]  ;;  %v9007_v29 = vld [vmem:[#allocation19_spill] sm:$0xff]  ;;  %v3894_v1 = vshll.u32 %v8268_v35, 16  ;;  %v4414_v40 = vrot.slane %v8225_v30, 5  ;;  %v3891_v55 = vor.u32 %v3890_v41, %v8270_v50  ;;  %v3873_v30 = vsel %vm6364_vm5, %v8280_v52, %v8282_v47 }
 0x133   : > { %v8285_v36 = vadd.f32 %v5957_v8, %v1068_v17  ;;  %v1060_v58 = vadd.f32 %v1059_v37, %v9006_v51  ;;  %v1497_v31 = vpop.f32.mrf.mxu0  ;;  %v5527_v17 = vrot.slane %v5511_v44, 9  ;;  %v3899_v23 = vshrl.u32 %v5457_v6, 16 }
 0x134   : > { %v5926_v54 = vpop.f32.mrf.mxu1  ;;  %6129 = vmatmul.mubr.msk.bf16.gmra.mxu1 %vm658_vm4, %v9007_v29  ;;  %v3902_v13 = vshll.u32 %v5457_v6, 16  ;;  %v3908_v41 = vshll.u32 %v8306_v22, 16  ;;  %v3912_v44 = vshrl.u32 %v8306_v22, 16  ;;  %v5460_v29 = vld [vmem:[%s6312_s23 + $0xc0] sm:$0xf]  ;;  %v3882_v33 = vrot.slane %v3881_v3, 4 }
 0x135   : > { %v8308_v61 = vadd.f32 %v1484_v56, %v1060_v58  ;;  %v1081_v45 = vadd.f32 %v5926_v54, %v9008_v21  ;;  %v5961_v59 = vpop.f32.mrf.mxu0  ;;  %6132 = vmatprep.mubr.msk.bf16.mxu1 %vm658_vm4, %v8160_v4  ;;  %v9010_v58 = vld [vmem:[#allocation18_spill] sm:$0xff]  ;;  %v3896_v52 = vrot.slane %v3894_v1, 5  ;;  %v4416_v47 = vrot.slane %v4414_v40, 4 }
 0x136   : > { %v1072_v37 = vpop.f32.mrf.mxu1  ;;  %v4417_v56 = vrot.slane %v8268_v35, 5  ;;  %v8336_v8 = vsel %vm6630_vm8, %v5527_v17, %v4414_v40  ;;  %v8339_v3 = vld [vmem:[%s6312_s23 + $0xc4] sm:$0xf]  ;;  %v9014_v35 = vcombine.low %v8118_v20, %v8122_v48  ;;  %v8351_v17 = vrot.slane %v3908_v41, 5 }
 0x137   : > { %v8320_v51 = vadd.f32 %v5960_v46, %v1081_v45  ;;  %v1073_v54 = vadd.f32 %v1072_v37, %v9010_v58  ;;  %v1500_v4 = vpop.f32.mrf.mxu0  ;;  %v9012_v46 = vld [vmem:[#allocation21_spill] sm:$0xff]  ;;  %v9013_v37 = vcombine.low %v8106_v57, %v8110_v53  ;;  %v3892_v58 = vrot.slane %v3891_v55, 4  ;;  %v9015_v55 = vld [vmem:[#allocation23_spill] sm:$0xff] }
 0x138   : > { %v5927_v21 = vpop.f32.mrf.mxu1  ;;  %v3923_v57 = vshrl.u32 %v5460_v29, 16  ;;  %v3926_v53 = vshll.u32 %v5460_v29, 16  ;;  %v3887_v20 = vsel %vm6364_vm5, %v3882_v33, %v8270_v50  ;;  %v8360_v48 = vsel %vm6630_vm8, %v4416_v47, %v4417_v56  ;;  %v5512_v29 = vld [vmem:[%s6312_s23 + $0xb4] sm:$0xe] }
 0x139   : > { %9009 = vst [vmem:[#allocation15_spill] sm:$0xff] %v8320_v51  ;;  %v8327_v24 = vadd.f32 %v1497_v31, %v1073_v54  ;;  %v1084_v6 = vadd.f32 %v5927_v21, %v9012_v46  ;;  %v5964_v45 = vpop.f32.mrf.mxu0  ;;  %6167 = vmatmul.mubr.msk.bf16.gmra.mxu0 %vm658_vm4, %v9013_v37  ;;  %v8346_v31 = vld [vmem:[%s6312_s23 + $0xbc] sm:$0x1]  ;;  %v3901_v54 = vrot.slane %v3899_v23, 4  ;;  %v3904_v21 = vrot.slane %v3902_v13, 5 }
 0x13a   : > { %v1075_v1 = vpop.f32.mrf.mxu1  ;;  %6170 = vmatprep.mubr.msk.bf16.mxu0 %vm658_vm4, %v9014_v35  ;;  %v3936_v23 = vshrl.u32 %v8339_v3, 16  ;;  %v3918_v50 = vshll.u32 %v8346_v31, 16  ;;  %v4421_v47 = vrot.slane %v8306_v22, 5  ;;  %v9016_v35 = vld [vmem:[#allocation25_spill] sm:$0xff] }
 0x13b   : > { %9011 = vst [vmem:[#allocation3_spill] sm:$0xff] %v8327_v24  ;;  %v8348_v46 = vadd.f32 %v5961_v59, %v1084_v6  ;;  %v1076_v37 = vadd.f32 %v1075_v1, %v9015_v55  ;;  %v1513_v40 = vpop.f32.mrf.mxu0  ;;  %v3914_v24 = vrot.slane %v3912_v44, 4  ;;  %v3932_v59 = vshll.u32 %v8339_v3, 16 }
 0x13c   : > { %v5930_v51 = vpop.f32.mrf.mxu1  ;;  %6133 = vmatmul.mubr.msk.bf16.gmra.mxu1 %vm658_vm4, %v8162_v39  ;;  %v3897_v39 = vsel %vm6364_vm5, %v3892_v58, %v3896_v52  ;;  %v3905_v56 = vor.u32 %v3904_v21, %v3901_v54  ;;  %v3925_v6 = vrot.slane %v3923_v57, 4  ;;  %v3928_v1 = vrot.slane %v3926_v53, 5 }
 0x13d   : > { %v8364_v13 = vadd.f32 %v1500_v4, %v1076_v37  ;;  %v1097_v41 = vadd.f32 %v5930_v51, %v8070_v11  ;;  %v5965_v44 = vpop.f32.mrf.mxu0  ;;  %6136 = vmatprep.mubr.msk.bf16.mxu1 %vm658_vm4, %v8168_v18  ;;  %v9017_v18 = vsel %vm6364_vm5, %v8258_v2, %v8222_v32  ;;  %v3915_v58 = vor.u32 %v3914_v24, %v8351_v17 }
 0x13e   : > { %v1088_v33 = vpop.f32.mrf.mxu1  ;;  %v8382_v52 = vcombine.low %v9017_v18, %v3873_v30  ;;  %v8385_v22 = vcombine.low %v3887_v20, %v3897_v39  ;;  %v8389_v21 = vrot.slane %v3932_v59, 5  ;;  %v3938_v57 = vrot.slane %v3936_v23, 4  ;;  %v5462_v30 = vld [vmem:[%s6312_s23 + $0xc8] sm:$0x1] }
 0x13f   : > { %v8374_v4 = vadd.f32 %v5964_v45, %v1097_v41  ;;  %v1089_v11 = vadd.f32 %v1088_v33, %v9016_v35  ;;  %v1516_v51 = vpop.f32.mrf.mxu0  ;;  %v5544_v45 = vcombine.low %v8336_v8, %v8360_v48  ;;  %v9018_v32 = vcombine.low %v8188_v62, %v8210_v15  ;;  %v5463_v8 = vld [vmem:[%s6312_s23 + $0xcc] sm:$0xf]  ;;  %v8410_v15 = vld [vmem:[%s6312_s23 + $0xd0] sm:$0xf]  ;;  %v5513_v33 = vld [vmem:[%s6312_s23 + $0xc0] sm:$0xe] }
 0x140   : > { %v5931_v54 = vpop.f32.mrf.mxu1  ;;  %v8398_v24 = vrot.slane %v3918_v50, 5  ;;  %v5528_v2 = vrot.slane %v5512_v29, 9  ;;  %v9019_v48 = vcombine.low %v8220_v26, %v8250_v12  ;;  %v4424_v59 = vrot.slane %v8346_v31, 5 }
 0x141   : > { %v8391_v53 = vadd.f32 %v1513_v40, %v1089_v11  ;;  %v1100_v55 = vadd.f32 %v5931_v54, %v8093_v49  ;;  %v5968_v37 = vpop.f32.mrf.mxu0  ;;  %6171 = vmatmul.mubr.msk.bf16.gmra.mxu0 %vm658_vm4, %v9018_v32  ;;  %v8406_v40 = vrot.slane %v3905_v56, 4  ;;  %v4423_v49 = vrot.slane %v4421_v47, 4 }
 0x142   : > { %v1091_v20 = vpop.f32.mrf.mxu1  ;;  %6174 = vmatprep.mubr.msk.bf16.mxu0 %vm658_vm4, %v9019_v48  ;;  %v3929_v62 = vor.u32 %v3928_v1, %v3925_v6  ;;  %v8415_v50 = vrot.slane %v3915_v58, 4  ;;  %v4428_v26 = vrot.slane %v8339_v3, 5  ;;  %v3939_v56 = vor.u32 %v3938_v57, %v8389_v21 }
 0x143   : > { %v8412_v23 = vadd.f32 %v5965_v44, %v1100_v55  ;;  %v1092_v41 = vadd.f32 %v1091_v20, %v8125_v10  ;;  %v1529_v39 = vpop.f32.mrf.mxu0  ;;  %v3942_v31 = vshll.u32 %v5462_v30, 16  ;;  %v3947_v29 = vshrl.u32 %v5463_v8, 16  ;;  %v9022_v44 = vld [vmem:[#allocation5_spill] sm:$0xff]  ;;  %v9023_v55 = vld [vmem:[#allocation6_spill] sm:$0xff] }
 0x144   : > { %v5934_v12 = vpop.f32.mrf.mxu1  ;;  %6137 = vmatmul.mubr.msk.bf16.gmra.mxu1 %vm658_vm4, %v8197_v25  ;;  %v3950_v6 = vshll.u32 %v5463_v8, 16  ;;  %v3956_v11 = vshll.u32 %v8410_v15, 16  ;;  %v3960_v3 = vshrl.u32 %v8410_v15, 16  ;;  %v4422_v25 = vsel %vm6630_vm8, %v5528_v2, %v4421_v47  ;;  %v9024_v47 = vld [vmem:[#allocation7_spill] sm:$0xff] }
 0x145   : > { %9020 = vst [vmem:[#allocation16_spill] sm:$0xff] %v8412_v23  ;;  %v8422_v1 = vadd.f32 %v1516_v51, %v1092_v41  ;;  %v1113_v35 = vadd.f32 %v5934_v12, %v9022_v44  ;;  %v5969_v10 = vpop.f32.mrf.mxu0  ;;  %6140 = vmatprep.mubr.msk.bf16.mxu1 %vm658_vm4, %v8276_v9  ;;  %v4425_v58 = vsel %vm6630_vm8, %v4423_v49, %v4424_v59  ;;  %v3930_v54 = vrot.slane %v3929_v62, 4 }
 0x146   : > { %v1104_v18 = vpop.f32.mrf.mxu1  ;;  %v5529_v51 = vrot.slane %v5513_v33, 9  ;;  %v4430_v20 = vrot.slane %v4428_v26, 4  ;;  %v4431_v9 = vrot.slane %v5462_v30, 5  ;;  %v3940_v41 = vrot.slane %v3939_v56, 4  ;;  %v5465_v56 = vld [vmem:[%s6312_s23 + $0xd4] sm:$0x1] }
 0x147   : > { %9021 = vst [vmem:[#allocation10_spill] sm:$0xff] %v8422_v1  ;;  %v8433_v57 = vadd.f32 %v5968_v37, %v1113_v35  ;;  %v1105_v32 = vadd.f32 %v1104_v18, %v9023_v55  ;;  %v1532_v8 = vpop.f32.mrf.mxu0  ;;  %v3944_v12 = vrot.slane %v3942_v31, 5  ;;  %v3949_v44 = vrot.slane %v3947_v29, 4  ;;  %v9026_v31 = vld [vmem:[#allocation8_spill] sm:$0xff] }
 0x148   : > { %v5935_v48 = vpop.f32.mrf.mxu1  ;;  %v3952_v1 = vrot.slane %v3950_v6, 5  ;;  %v9025_v37 = vcombine.low %v8290_v0, %v8294_v14  ;;  %v8443_v59 = vrot.slane %v3956_v11, 5  ;;  %v3962_v30 = vrot.slane %v3960_v3, 4 }
 0x149   : > { %v8436_v23 = vadd.f32 %v1529_v39, %v1105_v32  ;;  %v1116_v2 = vadd.f32 %v5935_v48, %v9024_v47  ;;  %v5972_v49 = vpop.f32.mrf.mxu0  ;;  %v3911_v39 = vsel %vm6364_vm5, %v8406_v40, %v8351_v17  ;;  %v3921_v33 = vsel %vm6364_vm5, %v8415_v50, %v8398_v24  ;;  %v5514_v17 = vld [vmem:[%s6312_s23 + $0xcc] sm:$0xe] }
 0x14a   : > { %6175 = vmatmul.mubr.msk.bf16.gmra.mxu0 %vm658_vm4, %v9025_v37  ;;  %v1107_v62 = vpop.f32.mrf.mxu1  ;;  %v4435_v0 = vrot.slane %v8410_v15, 5  ;;  %v4432_v35 = vsel %vm6630_vm8, %v4430_v20, %v4431_v9  ;;  %v5545_v24 = vcombine.low %v4422_v25, %v4425_v58  ;;  %v3935_v15 = vsel %vm6364_vm5, %v3930_v54, %v8389_v21  ;;  %v9028_v20 = vld [vmem:[#allocation12_spill] sm:$0xff] }
 0x14b   : > { %6178 = vmatprep.mubr.msk.bf16.mxu0 %vm658_vm4, %v5544_v45  ;;  %v8456_v14 = vadd.f32 %v5969_v10, %v1116_v2  ;;  %v1108_v29 = vadd.f32 %v1107_v62, %v9026_v31  ;;  %v1545_v6 = vpop.f32.mrf.mxu0  ;;  %v4429_v45 = vsel %vm6630_vm8, %v5529_v51, %v4428_v26  ;;  %v3945_v50 = vsel %vm6364_vm5, %v3940_v41, %v3944_v12  ;;  %v9027_v26 = vld [vmem:[#allocation9_spill] sm:$0xff] }
 0x14c   : > { %v5938_v40 = vpop.f32.mrf.mxu1  ;;  %6141 = vmatmul.mubr.msk.bf16.gmra.mxu1 %vm658_vm4, %v8382_v52  ;;  %v3953_v10 = vor.u32 %v3952_v1, %v3949_v44  ;;  %v3963_v51 = vor.u32 %v3962_v30, %v8443_v59  ;;  %v3966_v52 = vshll.u32 %v5465_v56, 16  ;;  %v5546_v58 = vcombine.low %v4429_v45, %v4432_v35 }
 0x14d   : > { %v8471_v11 = vadd.f32 %v1532_v8, %v1108_v29  ;;  %v1129_v3 = vadd.f32 %v5938_v40, %v9027_v26  ;;  %v5973_v18 = vpop.f32.mrf.mxu0  ;;  %6144 = vmatprep.mubr.msk.bf16.mxu1 %vm658_vm4, %v8385_v22  ;;  %v5530_v55 = vrot.slane %v5514_v17, 9  ;;  %v4437_v32 = vrot.slane %v4435_v0, 4  ;;  %v9029_v22 = vld [vmem:[#allocation4_spill] sm:$0xff]  ;;  %v9031_v17 = vld [vmem:[#allocation17_spill] sm:$0xff] }
 0x14e   : > { %v1120_v25 = vpop.f32.mrf.mxu1  ;;  %v4438_v21 = vrot.slane %v5465_v56, 5  ;;  %v5480_v48 = vcombine.low %v3911_v39, %v3921_v33  ;;  %v5481_v41 = vcombine.low %v3935_v15, %v3945_v50  ;;  %v3954_v12 = vrot.slane %v3953_v10, 4  ;;  %v9030_v56 = vld [vmem:[#allocation13_spill] sm:$0xff]  ;;  %v9032_v10 = vld [vmem:[#allocation20_spill] sm:$0xff] }
 0x14f   : > { %v8477_v54 = vadd.f32 %v5972_v49, %v1129_v3  ;;  %v1121_v1 = vadd.f32 %v1120_v25, %v9028_v20  ;;  %v1548_v8 = vpop.f32.mrf.mxu0  ;;  %v3964_v37 = vrot.slane %v3963_v51, 4  ;;  %v3968_v30 = vrot.slane %v3966_v52, 5  ;;  %v9033_v52 = vld [vmem:[#allocation22_spill] sm:$0xff] }
 0x150   : > { %v5939_v9 = vpop.f32.mrf.mxu1  ;;  %v4436_v49 = vsel %vm6630_vm8, %v5530_v55, %v4435_v0  ;;  %v4439_v39 = vsel %vm6630_vm8, %v4437_v32, %v4438_v21  ;;  %v3959_v45 = vsel %vm6364_vm5, %v3954_v12, %v8443_v59 }
 0x151   : > { %v8480_v44 = vadd.f32 %v1545_v6, %v1121_v1  ;;  %v1132_v47 = vadd.f32 %v5939_v9, %v9029_v22  ;;  %v5976_v2 = vpop.f32.mrf.mxu0  ;;  %v3969_v63 = vsel %vm6364_vm5, %v3964_v37, %v3968_v30 }
 0x152   : > { %6179 = vmatmul.mubr.msk.bf16.gmra.mxu0 %vm658_vm4, %v5545_v24  ;;  %v1123_v62 = vpop.f32.mrf.mxu1  ;;  %v5547_v24 = vcombine.low %v4436_v49, %v4439_v39  ;;  %v5482_v51 = vcombine.low %v3959_v45, %v3969_v63 }
 0x153   : > { %6182 = vmatprep.mubr.msk.bf16.mxu0 %vm658_vm4, %v5546_v58  ;;  %v8489_v33 = vadd.f32 %v5973_v18, %v1132_v47  ;;  %v1124_v31 = vadd.f32 %v1123_v62, %v9030_v56  ;;  %v1561_v29 = vpop.f32.mrf.mxu0 }
 0x154   : > { %v5942_v6 = vpop.f32.mrf.mxu1  ;;  %6145 = vmatmul.mubr.msk.bf16.gmra.mxu1 %vm658_vm4, %v5480_v48 }
 0x155   : > { %v8496_v35 = vadd.f32 %v1548_v8, %v1124_v31  ;;  %v1145_v40 = vadd.f32 %v5942_v6, %v9031_v17  ;;  %v5977_v0 = vpop.f32.mrf.mxu0  ;;  %6148 = vmatprep.mubr.msk.bf16.mxu1 %vm658_vm4, %v5481_v41 }
 0x156   : > { %v1136_v15 = vpop.f32.mrf.mxu1 }
 0x157   : > { %v8502_v50 = vadd.f32 %v5976_v2, %v1145_v40  ;;  %v1137_v26 = vadd.f32 %v1136_v15, %v9032_v10  ;;  %v1564_v3 = vpop.f32.mrf.mxu0 }
 0x158   : > { %v5943_v18 = vpop.f32.mrf.mxu1 }
 0x159   : > { %v8505_v59 = vadd.f32 %v1561_v29, %v1137_v26  ;;  %v1148_v25 = vadd.f32 %v5943_v18, %v9033_v52  ;;  %v5980_v58 = vpop.f32.mrf.mxu0 }
 0x15a   : > { %6183 = vmatmul.mubr.msk.bf16.gmra.mxu0 %vm658_vm4, %v5547_v24  ;;  %v1139_v55 = vpop.f32.mrf.mxu1 }
 0x15b   : > { %v8509_v32 = vadd.f32 %v5977_v0, %v1148_v25  ;;  %v1140_v21 = vadd.f32 %v1139_v55, %v9034_v38  ;;  %v1577_v20 = vpop.f32.mrf.mxu0 }
 0x15c   : > { %v5946_v1 = vpop.f32.mrf.mxu1  ;;  %6149 = vmatmul.mubr.msk.bf16.gmra.mxu1 %vm658_vm4, %v5482_v51 }
 0x15d   : > { %v8513_v8 = vadd.f32 %v1564_v3, %v1140_v21  ;;  %v1161_v9 = vadd.f32 %v5946_v1, %v8085_v16  ;;  %v5981_v48 = vpop.f32.mrf.mxu0 }
 0x15e   : > { %v1152_v41 = vpop.f32.mrf.mxu1 }
 0x15f   : > { %v8516_v12 = vadd.f32 %v5980_v58, %v1161_v9  ;;  %v1153_v22 = vadd.f32 %v1152_v41, %v8112_v43  ;;  %v1580_v47 = vpop.f32.mrf.mxu0 }
 0x160   : > { %v5947_v2 = vpop.f32.mrf.mxu1 }
 0x161   : > { %v8519_v37 = vadd.f32 %v1577_v20, %v1153_v22  ;;  %v1164_v30 = vadd.f32 %v5947_v2, %v8127_v60  ;;  %v6020_v62 = vpop.f32.mrf.mxu0  ;;  %v9035_v22 = vld [vmem:[#allocation15_spill] sm:$0xff] }
 0x162   : > { %v1155_v49 = vpop.f32.mrf.mxu1 }
 0x163   : > { %v8522_v39 = vadd.f32 %v5981_v48, %v1164_v30  ;;  %v1156_v56 = vadd.f32 %v1155_v49, %v8149_v28  ;;  %v2550_v31 = vpop.f32.mrf.mxu0 }
 0x164   : > { %v5986_v16 = vpop.f32.mrf.mxu1 }
 0x165   : > { %v8525_v29 = vadd.f32 %v1580_v47, %v1156_v56  ;;  %v1953_v6 = vadd.f32 %v5986_v16, %v8194_v5  ;;  %v6021_v45 = vpop.f32.mrf.mxu0 }
 0x166   : > { %v1824_v43 = vpop.f32.mrf.mxu1 }
 0x167   : > { %v8528_v17 = vadd.f32 %v6020_v62, %v1953_v6  ;;  %v1951_v40 = vadd.f32 %v1824_v43, %v8201_v27  ;;  %v2553_v0 = vpop.f32.mrf.mxu0  ;;  %v9036_v62 = vld [vmem:[#allocation3_spill] sm:$0xff] }
 0x168   : > { %v5987_v60 = vpop.f32.mrf.mxu1 }
 0x169   : > { %v8531_v63 = vadd.f32 %v2550_v31, %v1951_v40  ;;  %v1954_v24 = vadd.f32 %v5987_v60, %v8227_v19  ;;  %v6024_v15 = vpop.f32.mrf.mxu0 }
 0x16a   : > { %v1827_v28 = vpop.f32.mrf.mxu1 }
 0x16b   : > { %v8534_v10 = vadd.f32 %v6021_v45, %v1954_v24  ;;  %v1952_v26 = vadd.f32 %v1827_v28, %v8241_v7  ;;  %v2566_v3 = vpop.f32.mrf.mxu0 }
 0x16c   : > { %v5990_v5 = vpop.f32.mrf.mxu1 }
 0x16d   : > { %v8537_v18 = vadd.f32 %v2553_v0, %v1952_v26  ;;  %v1957_v51 = vadd.f32 %v5990_v5, %v8253_v42  ;;  %v6025_v52 = vpop.f32.mrf.mxu0 }
 0x16e   : > { %v1840_v27 = vpop.f32.mrf.mxu1 }
 0x16f   : > { %v8540_v25 = vadd.f32 %v6024_v15, %v1957_v51  ;;  %v1955_v58 = vadd.f32 %v1840_v27, %v8260_v34  ;;  %v2569_v55 = vpop.f32.mrf.mxu0 }
 0x170   : > { %v5991_v19 = vpop.f32.mrf.mxu1 }
 0x171   : > { %v8543_v38 = vadd.f32 %v2566_v3, %v1955_v58  ;;  %v1958_v21 = vadd.f32 %v5991_v19, %v8285_v36  ;;  %v6028_v20 = vpop.f32.mrf.mxu0  ;;  %v9038_v19 = vld [vmem:[#allocation10_spill] sm:$0xff] }
 0x172   : > { %v1843_v7 = vpop.f32.mrf.mxu1 }
 0x173   : > { %v8546_v1 = vadd.f32 %v6025_v52, %v1958_v21  ;;  %v1956_v9 = vadd.f32 %v1843_v7, %v8308_v61  ;;  %v2582_v48 = vpop.f32.mrf.mxu0  ;;  %v9037_v52 = vld [vmem:[#allocation16_spill] sm:$0xff] }
 0x174   : > { %v5994_v42 = vpop.f32.mrf.mxu1 }
 0x175   : > { %v8549_v41 = vadd.f32 %v2569_v55, %v1956_v9  ;;  %v1961_v47 = vadd.f32 %v5994_v42, %v9035_v22  ;;  %v6029_v2 = vpop.f32.mrf.mxu0 }
 0x176   : > { %v1856_v34 = vpop.f32.mrf.mxu1 }
 0x177   : > { %v8552_v30 = vadd.f32 %v6028_v20, %v1961_v47  ;;  %v1959_v49 = vadd.f32 %v1856_v34, %v9036_v62  ;;  %v2585_v56 = vpop.f32.mrf.mxu0 }
 0x178   : > { %v5995_v36 = vpop.f32.mrf.mxu1 }
 0x179   : > { %v8555_v31 = vadd.f32 %v2582_v48, %v1959_v49  ;;  %v1962_v16 = vadd.f32 %v5995_v36, %v8348_v46  ;;  %v6032_v6 = vpop.f32.mrf.mxu0 }
 0x17a   : > { %v1859_v61 = vpop.f32.mrf.mxu1 }
 0x17b   : > { %v8558_v45 = vadd.f32 %v6029_v2, %v1962_v16  ;;  %v1960_v43 = vadd.f32 %v1859_v61, %v8364_v13  ;;  %v2598_v40 = vpop.f32.mrf.mxu0 }
 0x17c   : > { %v5998_v0 = vpop.f32.mrf.mxu1 }
 0x17d   : > { %v8561_v60 = vadd.f32 %v2585_v56, %v1960_v43  ;;  %v1965_v24 = vadd.f32 %v5998_v0, %v8374_v4  ;;  %v6033_v15 = vpop.f32.mrf.mxu0 }
 0x17e   : > { %v1872_v28 = vpop.f32.mrf.mxu1 }
 0x17f   : > { %v8564_v26 = vadd.f32 %v6032_v6, %v1965_v24  ;;  %v1963_v3 = vadd.f32 %v1872_v28, %v8391_v53  ;;  %v2601_v5 = vpop.f32.mrf.mxu0 }
 0x180   : > { %v5999_v46 = vpop.f32.mrf.mxu1 }
 0x181   : > { %v8567_v51 = vadd.f32 %v2598_v40, %v1963_v3  ;;  %v1966_v27 = vadd.f32 %v5999_v46, %v9037_v52  ;;  %v6036_v58 = vpop.f32.mrf.mxu0 }
 0x182   : > { %v1875_v13 = vpop.f32.mrf.mxu1 }
 0x183   : > { %v8570_v55 = vadd.f32 %v6033_v15, %v1966_v27  ;;  %v1964_v21 = vadd.f32 %v1875_v13, %v9038_v19  ;;  %v2614_v20 = vpop.f32.mrf.mxu0 }
 0x184   : > { %v6002_v4 = vpop.f32.mrf.mxu1 }
 0x185   : > { %v8573_v7 = vadd.f32 %v2601_v5, %v1964_v21  ;;  %v1969_v9 = vadd.f32 %v6002_v4, %v8433_v57  ;;  %v6037_v48 = vpop.f32.mrf.mxu0 }
 0x186   : > { %v1888_v53 = vpop.f32.mrf.mxu1 }
 0x187   : > { %v8576_v42 = vadd.f32 %v6036_v58, %v1969_v9  ;;  %v1967_v22 = vadd.f32 %v1888_v53, %v8436_v23  ;;  %v2617_v47 = vpop.f32.mrf.mxu0 }
 0x188   : > { %v6003_v2 = vpop.f32.mrf.mxu1 }
 0x189   : > { %v8579_v34 = vadd.f32 %v2614_v20, %v1967_v22  ;;  %v1970_v62 = vadd.f32 %v6003_v2, %v8456_v14  ;;  %v6040_v49 = vpop.f32.mrf.mxu0 }
 0x18a   : > { %v1891_v56 = vpop.f32.mrf.mxu1 }
 0x18b   : > { %v8582_v36 = vadd.f32 %v6037_v48, %v1970_v62  ;;  %v1968_v16 = vadd.f32 %v1891_v56, %v8471_v11  ;;  %v2630_v6 = vpop.f32.mrf.mxu0 }
 0x18c   : > { %v6006_v57 = vpop.f32.mrf.mxu1 }
 0x18d   : > { %v8585_v61 = vadd.f32 %v2617_v47, %v1968_v16  ;;  %v1973_v43 = vadd.f32 %v6006_v57, %v8477_v54  ;;  %v6041_v40 = vpop.f32.mrf.mxu0 }
 0x18e   : > { %v1904_v23 = vpop.f32.mrf.mxu1 }
 0x18f   : > { %v8588_v0 = vadd.f32 %v6040_v49, %v1973_v43  ;;  %v1971_v24 = vadd.f32 %v1904_v23, %v8480_v44  ;;  %v2633_v15 = vpop.f32.mrf.mxu0 }
 0x190   : > { %v6007_v14 = vpop.f32.mrf.mxu1 }
 0x191   : > { %v8591_v28 = vadd.f32 %v2630_v6, %v1971_v24  ;;  %v1974_v3 = vadd.f32 %v6007_v14, %v8489_v33  ;;  %v6044_v5 = vpop.f32.mrf.mxu0 }
 0x192   : > { %v1907_v11 = vpop.f32.mrf.mxu1 }
 0x193   : > { %v8594_v46 = vadd.f32 %v6041_v40, %v1974_v3  ;;  %v1972_v52 = vadd.f32 %v1907_v11, %v8496_v35  ;;  %v2646_v27 = vpop.f32.mrf.mxu0 }
 0x194   : > { %v6010_v54 = vpop.f32.mrf.mxu1 }
 0x195   : > { %v8597_v58 = vadd.f32 %v2633_v15, %v1972_v52  ;;  %v1977_v13 = vadd.f32 %v6010_v54, %v8502_v50  ;;  %v6045_v19 = vpop.f32.mrf.mxu0 }
 0x196   : > { %v1920_v44 = vpop.f32.mrf.mxu1 }
 0x197   : > { %v8600_v21 = vadd.f32 %v6044_v5, %v1977_v13  ;;  %v1975_v20 = vadd.f32 %v1920_v44, %v8505_v59  ;;  %v2649_v4 = vpop.f32.mrf.mxu0 }
 0x198   : > { %v6011_v33 = vpop.f32.mrf.mxu1 }
 0x199   : > { %v8603_v9 = vadd.f32 %v2646_v27, %v1975_v20  ;;  %v1978_v48 = vadd.f32 %v6011_v33, %v8509_v32  ;;  %v6048_v53 = vpop.f32.mrf.mxu0 }
 0x19a   : > { %v1923_v35 = vpop.f32.mrf.mxu1 }
 0x19b   : > { %v8606_v22 = vadd.f32 %v6045_v19, %v1978_v48  ;;  %v1976_v47 = vadd.f32 %v1923_v35, %v8513_v8  ;;  %v2662_v2 = vpop.f32.mrf.mxu0 }
 0x19c   : > { %v6014_v50 = vpop.f32.mrf.mxu1 }
 0x19d   : > { %9039 = vst [vmem:[#allocation11_spill] sm:$0xff] %v8606_v22  ;;  %v8609_v62 = vadd.f32 %v2649_v4, %v1976_v47  ;;  %v1981_v49 = vadd.f32 %v6014_v50, %v8516_v12  ;;  %v6049_v56 = vpop.f32.mrf.mxu0 }
 0x19e   : > { %v1936_v59 = vpop.f32.mrf.mxu1 }
 0x19f   : > { %9040 = vst [vmem:[#allocation2_spill] sm:$0xff] %v8609_v62  ;;  %v8612_v16 = vadd.f32 %v6048_v53, %v1981_v49  ;;  %v1979_v6 = vadd.f32 %v1936_v59, %v8519_v37  ;;  %v2665_v57 = vpop.f32.mrf.mxu0 }
 0x1a0   : > { %v6015_v32 = vpop.f32.mrf.mxu1 }
 0x1a1   : > { %v8615_v43 = vadd.f32 %v2662_v2, %v1979_v6  ;;  %v1982_v40 = vadd.f32 %v6015_v32, %v8522_v39  ;;  %v6088_v23 = vpop.f32.mrf.mxu0 }
 0x1a2   : > { %v1939_v8 = vpop.f32.mrf.mxu1 }
 0x1a3   : > { %v8618_v24 = vadd.f32 %v6049_v56, %v1982_v40  ;;  %v1980_v15 = vadd.f32 %v1939_v8, %v8525_v29  ;;  %v3379_v14 = vpop.f32.mrf.mxu0 }
 0x1a4   : > { %v6054_v12 = vpop.f32.mrf.mxu1 }
 0x1a5   : > { %9041 = vst [vmem:[#allocation19_spill] sm:$0xff] %v8618_v24  ;;  %v8621_v3 = vadd.f32 %v2665_v57, %v1980_v15  ;;  %v3149_v5 = vadd.f32 %v6054_v12, %v8528_v17  ;;  %v8624_v11 = vpop.f32.mrf.mxu0 }
 0x1a6   : > { %v3020_v37 = vpop.f32.mrf.mxu1 }
 0x1a7   : > { %9042 = vst [vmem:[#allocation14_spill] sm:$0xff] %v8621_v3  ;;  %v8626_v52 = vadd.f32 %v6088_v23, %v3149_v5  ;;  %v3147_v27 = vadd.f32 %v3020_v37, %v8531_v63  ;;  %v8629_v39 = vpop.f32.mrf.mxu0 }
 0x1a8   : > { %v8631_v54 = vpop.f32.mrf.mxu1 }
 0x1a9   : > { %v8633_v13 = vadd.f32 %v3379_v14, %v3147_v27  ;;  %v6092_v29 = vpop.f32.mrf.mxu0 }
 0x1aa   : > { %v8635_v19 = vpop.f32.mrf.mxu1 }
 0x1ab   : > { %v3395_v44 = vpop.f32.mrf.mxu0 }
 0x1ac   : > { %v6058_v20 = vpop.f32.mrf.mxu1 }
 0x1ad   : > { %v3153_v17 = vadd.f32 %v6058_v20, %v8540_v25  ;;  %v8638_v4 = vpop.f32.mrf.mxu0 }
 0x1ae   : > { %v3036_v33 = vpop.f32.mrf.mxu1 }
 0x1af   : > { %v8640_v48 = vadd.f32 %v6092_v29, %v3153_v17  ;;  %v3151_v63 = vadd.f32 %v3036_v33, %v8543_v38  ;;  %v8643_v53 = vpop.f32.mrf.mxu0 }
 0x1b0   : > { %v8645_v35 = vpop.f32.mrf.mxu1 }
 0x1b1   : > { %v8647_v47 = vadd.f32 %v3395_v44, %v3151_v63  ;;  %v6096_v2 = vpop.f32.mrf.mxu0 }
 0x1b2   : > { %v8649_v50 = vpop.f32.mrf.mxu1 }
 0x1b3   : > { %v3411_v49 = vpop.f32.mrf.mxu0 }
 0x1b4   : > { %v6062_v56 = vpop.f32.mrf.mxu1 }
 0x1b5   : > { %v3157_v25 = vadd.f32 %v6062_v56, %v8552_v30  ;;  %v8652_v59 = vpop.f32.mrf.mxu0 }
 0x1b6   : > { %v3052_v6 = vpop.f32.mrf.mxu1 }
 0x1b7   : > { %v8654_v57 = vadd.f32 %v6096_v2, %v3157_v25  ;;  %v3155_v38 = vadd.f32 %v3052_v6, %v8555_v31  ;;  %v8657_v32 = vpop.f32.mrf.mxu0 }
 0x1b8   : > { %v8659_v40 = vpop.f32.mrf.mxu1 }
 0x1b9   : > { %v8661_v23 = vadd.f32 %v3411_v49, %v3155_v38  ;;  %v6100_v8 = vpop.f32.mrf.mxu0 }
 0x1ba   : > { %v8663_v15 = vpop.f32.mrf.mxu1 }
 0x1bb   : > { %v3427_v14 = vpop.f32.mrf.mxu0 }
 0x1bc   : > { %v6066_v12 = vpop.f32.mrf.mxu1 }
 0x1bd   : > { %v3161_v30 = vadd.f32 %v6066_v12, %v8564_v26  ;;  %v8666_v5 = vpop.f32.mrf.mxu0 }
 0x1be   : > { %v3068_v37 = vpop.f32.mrf.mxu1 }
 0x1bf   : > { %v8668_v27 = vadd.f32 %v6100_v8, %v3161_v30  ;;  %v3159_v31 = vadd.f32 %v3068_v37, %v8567_v51  ;;  %v8671_v29 = vpop.f32.mrf.mxu0 }
 0x1c0   : > { %v8673_v44 = vpop.f32.mrf.mxu1 }
 0x1c1   : > { %v8675_v20 = vadd.f32 %v3427_v14, %v3159_v31  ;;  %v6104_v17 = vpop.f32.mrf.mxu0 }
 0x1c2   : > { %v8677_v33 = vpop.f32.mrf.mxu1 }
 0x1c3   : > { %v3443_v63 = vpop.f32.mrf.mxu0 }
 0x1c4   : > { %v6070_v2 = vpop.f32.mrf.mxu1 }
 0x1c5   : > { %v3165_v26 = vadd.f32 %v6070_v2, %v8576_v42  ;;  %v8680_v49 = vpop.f32.mrf.mxu0 }
 0x1c6   : > { %v3084_v56 = vpop.f32.mrf.mxu1 }
 0x1c7   : > { %v8682_v25 = vadd.f32 %v6104_v17, %v3165_v26  ;;  %v3163_v51 = vadd.f32 %v3084_v56, %v8579_v34  ;;  %v8685_v6 = vpop.f32.mrf.mxu0 }
 0x1c8   : > { %v8687_v38 = vpop.f32.mrf.mxu1 }
 0x1c9   : > { %v8689_v8 = vadd.f32 %v3443_v63, %v3163_v51  ;;  %v6108_v14 = vpop.f32.mrf.mxu0 }
 0x1ca   : > { %v8691_v12 = vpop.f32.mrf.mxu1 }
 0x1cb   : > { %v3459_v30 = vpop.f32.mrf.mxu0 }
 0x1cc   : > { %v6074_v37 = vpop.f32.mrf.mxu1 }
 0x1cd   : > { %v3169_v42 = vadd.f32 %v6074_v37, %v8588_v0  ;;  %v8694_v31 = vpop.f32.mrf.mxu0 }
 0x1ce   : > { %9043 = vst [vmem:[#allocation18_spill] sm:$0xff] %v8694_v31  ;;  %v3100_v2 = vpop.f32.mrf.mxu1 }
 0x1cf   : > { %v8696_v17 = vadd.f32 %v6108_v14, %v3169_v42  ;;  %v3167_v34 = vadd.f32 %v3100_v2, %v8591_v28  ;;  %v8699_v26 = vpop.f32.mrf.mxu0 }
 0x1d0   : > { %9044 = vst [vmem:[#allocation21_spill] sm:$0xff] %v8699_v26  ;;  %v8701_v56 = vpop.f32.mrf.mxu1 }
 0x1d1   : > { %v8703_v63 = vadd.f32 %v3459_v30, %v3167_v34  ;;  %v6112_v51 = vpop.f32.mrf.mxu0 }
 0x1d2   : > { %v8705_v3 = vpop.f32.mrf.mxu1 }
 0x1d3   : > { %9045 = vst [vmem:[#allocation23_spill] sm:$0xff] %v8703_v63  ;;  %v3475_v24 = vpop.f32.mrf.mxu0 }
 0x1d4   : > { %v6078_v62 = vpop.f32.mrf.mxu1 }
 0x1d5   : > { %v3173_v0 = vadd.f32 %v6078_v62, %v8600_v21  ;;  %v8708_v37 = vpop.f32.mrf.mxu0 }
 0x1d6   : > { %9046 = vst [vmem:[#allocation25_spill] sm:$0xff] %v8708_v37  ;;  %v3116_v22 = vpop.f32.mrf.mxu1 }
 0x1d7   : > { %v8710_v14 = vadd.f32 %v6112_v51, %v3173_v0  ;;  %v3171_v28 = vadd.f32 %v3116_v22, %v8603_v9  ;;  %v8713_v42 = vpop.f32.mrf.mxu0 }
 0x1d8   : > { %9047 = vst [vmem:[#allocation5_spill] sm:$0xff] %v8713_v42  ;;  %v8715_v2 = vpop.f32.mrf.mxu1 }
 0x1d9   : > { %v8717_v30 = vadd.f32 %v3475_v24, %v3171_v28  ;;  %v6116_v34 = vpop.f32.mrf.mxu0 }
 0x1da   : > { %v8719_v26 = vpop.f32.mrf.mxu1 }
 0x1db   : > { %9048 = vst [vmem:[#allocation6_spill] sm:$0xff] %v8717_v30  ;;  %v3491_v63 = vpop.f32.mrf.mxu0  ;;  %v3150_v30 = vadd.f32 %v8631_v54, %v8534_v10  ;;  %v8745_v10 = vld [vmem:[%s8863_s2] ss:$0 sm:$0xff] }
 0x1dc   : > { %v6082_v31 = vpop.f32.mrf.mxu1 }
 0x1dd   : > { %v3177_v21 = vadd.f32 %v6082_v31, %v8612_v16  ;;  %v8722_v62 = vpop.f32.mrf.mxu0 }
 0x1de   : > { %9049 = vst [vmem:[#allocation7_spill] sm:$0xff] %v8722_v62  ;;  %v3132_v37 = vpop.f32.mrf.mxu1 }
 0x1df   : > { %v8724_v51 = vadd.f32 %v6116_v34, %v3177_v21  ;;  %v3175_v9 = vadd.f32 %v3132_v37, %v8615_v43  ;;  %v8727_v22 = vpop.f32.mrf.mxu0  ;;  %v3148_v34 = vadd.f32 %v8635_v19, %v8537_v18 }
 0x1e0   : > { %9051 = vst [vmem:[#allocation9_spill] sm:$0xff] %v8727_v22  ;;  %v8729_v0 = vpop.f32.mrf.mxu1  ;;  %v3509_v22 = vadd.f32 %v8624_v11, %v3150_v30 }
 0x1e1   : > { %9050 = vst [vmem:[#allocation8_spill] sm:$0xff] %v8724_v51  ;;  %v8731_v24 = vadd.f32 %v3491_v63, %v3175_v9  ;;  %v6156_v28 = vpop.f32.mrf.mxu0 }
 0x1e2   : > { %v8733_v42 = vpop.f32.mrf.mxu1 }
 0x1e3   : > { %9052 = vst [vmem:[#allocation12_spill] sm:$0xff] %v8731_v24  ;;  %9053 = vst [vmem:[#allocation4_spill] sm:$0xff] %v8733_v42  ;;  %v4575_v16 = vpop.f32.mrf.mxu0  ;;  %v3507_v24 = vadd.f32 %v8629_v39, %v3148_v34 }
 0x1e4   : > { %v6122_v31 = vpop.f32.mrf.mxu1 }
 0x1e5   : > { %v4234_v21 = vadd.f32 %v6122_v31, %v8626_v52  ;;  %v6157_v43 = vpop.f32.mrf.mxu0 }
 0x1e6   : > { %v4105_v37 = vpop.f32.mrf.mxu1 }
 0x1e7   : > { %v4704_v62 = vadd.f32 %v6156_v28, %v4234_v21  ;;  %v4232_v63 = vadd.f32 %v4105_v37, %v8633_v13  ;;  %v4578_v9 = vpop.f32.mrf.mxu0  ;;  %v3154_v13 = vadd.f32 %v8645_v35, %v8546_v1  ;;  %v3152_v21 = vadd.f32 %v8649_v50, %v8549_v41 }
 0x1e8   : > { %v6123_v54 = vpop.f32.mrf.mxu1 }
 0x1e9   : > { %v4702_v18 = vadd.f32 %v4575_v16, %v4232_v63  ;;  %v4235_v19 = vadd.f32 %v6123_v54, %v3509_v22  ;;  %v6160_v52 = vpop.f32.mrf.mxu0  ;;  %v4743_v51 = vadd.f32 %v8745_v10, %v4704_v62  ;;  %v3513_v41 = vadd.f32 %v8638_v4, %v3154_v13 }
 0x1ea   : > { %v4108_v31 = vpop.f32.mrf.mxu1  ;;  %v3511_v50 = vadd.f32 %v8643_v53, %v3152_v21  ;;  %v3158_v4 = vadd.f32 %v8659_v40, %v8558_v45 }
 0x1eb   : > { %v4705_v11 = vadd.f32 %v6157_v43, %v4235_v19  ;;  %v4233_v30 = vadd.f32 %v4108_v31, %v3507_v24  ;;  %v4591_v28 = vpop.f32.mrf.mxu0  ;;  %v4741_v42 = vadd.f32 %v8745_v10, %v4702_v18  ;;  %v4775_v43 = vmax.f32 %v4743_v51, 0.0 }
 0x1ec   : > { %v6126_v37 = vpop.f32.mrf.mxu1 }
 0x1ed   : > { %v4744_v39 = vadd.f32 %v8745_v10, %v4705_v11  ;;  %v4703_v22 = vadd.f32 %v4578_v9, %v4233_v30  ;;  %v4238_v16 = vadd.f32 %v6126_v37, %v8640_v48  ;;  %v6161_v34 = vpop.f32.mrf.mxu0  ;;  %v4773_v51 = vmax.f32 %v4741_v42, 0.0 }
 0x1ee   : > { %v4121_v62 = vpop.f32.mrf.mxu1 }
 0x1ef   : > { %v4776_v24 = vmax.f32 %v4744_v39, 0.0  ;;  %v4742_v63 = vadd.f32 %v8745_v10, %v4703_v22  ;;  %v4236_v1 = vadd.f32 %v4121_v62, %v8647_v47  ;;  %v4594_v35 = vpop.f32.mrf.mxu0  ;;  %v4708_v48 = vadd.f32 %v6160_v52, %v4238_v16 }
 0x1f0   : > { %v6127_v9 = vpop.f32.mrf.mxu1  ;;  %v3156_v16 = vadd.f32 %v8663_v15, %v8561_v60  ;;  %v3517_v62 = vadd.f32 %v8652_v59, %v3158_v4  ;;  %v3162_v59 = vadd.f32 %v8673_v44, %v8570_v55  ;;  %v3160_v4 = vadd.f32 %v8677_v33, %v8573_v7 }
 0x1f1   : > { %v5640_v54 = vpack.c.bf16 %v4776_v24, %v4775_v43  ;;  %v4774_v18 = vmax.f32 %v4742_v63, 0.0  ;;  %v4706_v19 = vadd.f32 %v4591_v28, %v4236_v1  ;;  %v6164_v31 = vpop.f32.mrf.mxu0  ;;  %v4239_v47 = vadd.f32 %v6127_v9, %v3513_v41 }
 0x1f2   : > { %v4124_v11 = vpop.f32.mrf.mxu1  ;;  %v4747_v21 = vadd.f32 %v8745_v10, %v4708_v48  ;;  %v3515_v15 = vadd.f32 %v8657_v32, %v3156_v16  ;;  %v3521_v44 = vadd.f32 %v8666_v5, %v3162_v59 }
 0x1f3   : > { %5712 = vst [vmem:[%s8764_s15 + $0x8] sm:$0xff] %v5640_v54   ;;  %v5635_v53 = vpack.c.bf16 %v4774_v18, %v4773_v51  ;;  %v4237_v30 = vadd.f32 %v4124_v11, %v3511_v50  ;;  %v4607_v13 = vpop.f32.mrf.mxu0  ;;  %v4709_v37 = vadd.f32 %v6161_v34, %v4239_v47  ;;  %v4745_v42 = vadd.f32 %v8745_v10, %v4706_v19 }
 0x1f4   : > { %v6130_v52 = vpop.f32.mrf.mxu1  ;;  %v4779_v1 = vmax.f32 %v4747_v21, 0.0 }
 0x1f5   : > { %5636 = vst [vmem:[%s8764_s15] sm:$0xff] %v5635_v53   ;;  %v4707_v39 = vadd.f32 %v4594_v35, %v4237_v30  ;;  %v4242_v28 = vadd.f32 %v6130_v52, %v8654_v57  ;;  %v6165_v22 = vpop.f32.mrf.mxu0  ;;  %v4748_v45 = vadd.f32 %v8745_v10, %v4709_v37  ;;  %v4777_v57 = vmax.f32 %v4745_v42, 0.0 }
 0x1f6   : > { %v4137_v40 = vpop.f32.mrf.mxu1 }
 0x1f7   : > { %v4746_v43 = vadd.f32 %v8745_v10, %v4707_v39  ;;  %v4712_v24 = vadd.f32 %v6164_v31, %v4242_v28  ;;  %v4240_v34 = vadd.f32 %v4137_v40, %v8661_v23  ;;  %v4610_v63 = vpop.f32.mrf.mxu0  ;;  %v4780_v35 = vmax.f32 %v4748_v45, 0.0 }
 0x1f8   : > { %v6131_v41 = vpop.f32.mrf.mxu1 }
 0x1f9   : > { %v4778_v50 = vmax.f32 %v4746_v43, 0.0  ;;  %v4243_v48 = vadd.f32 %v6131_v41, %v3517_v62  ;;  %v6168_v60 = vpop.f32.mrf.mxu0  ;;  %v5650_v9 = vpack.c.bf16 %v4780_v35, %v4779_v1  ;;  %v4710_v51 = vadd.f32 %v4607_v13, %v4240_v34 }
 0x1fa   : > { %v4140_v54 = vpop.f32.mrf.mxu1  ;;  %v4751_v23 = vadd.f32 %v8745_v10, %v4712_v24  ;;  %v3166_v1 = vadd.f32 %v8687_v38, %v8582_v36 }
 0x1fb   : > { %v5645_v18 = vpack.c.bf16 %v4778_v50, %v4777_v57  ;;  %v4713_v19 = vadd.f32 %v6165_v22, %v4243_v48  ;;  %v4623_v31 = vpop.f32.mrf.mxu0  ;;  %5714 = vst [vmem:[%s8764_s15 + $0x18] sm:$0xff] %v5650_v9   ;;  %v4241_v47 = vadd.f32 %v4140_v54, %v3515_v15  ;;  %v4749_v30 = vadd.f32 %v8745_v10, %v4710_v51 }
 0x1fc   : > { %v6134_v11 = vpop.f32.mrf.mxu1  ;;  %v4783_v37 = vmax.f32 %v4751_v23, 0.0  ;;  %v3519_v22 = vadd.f32 %v8671_v29, %v3160_v4  ;;  %v3164_v29 = vadd.f32 %v8691_v12, %v8585_v61  ;;  %v3525_v12 = vadd.f32 %v8680_v49, %v3166_v1 }
 0x1fd   : > { %5713 = vst [vmem:[%s8764_s15 + $0x10] sm:$0xff] %v5645_v18   ;;  %v4752_v32 = vadd.f32 %v8745_v10, %v4713_v19  ;;  %v4246_v53 = vadd.f32 %v6134_v11, %v8668_v27  ;;  %v6169_v55 = vpop.f32.mrf.mxu0  ;;  %v4711_v13 = vadd.f32 %v4610_v63, %v4241_v47  ;;  %v4781_v40 = vmax.f32 %v4749_v30, 0.0 }
 0x1fe   : > { %v4153_v21 = vpop.f32.mrf.mxu1  ;;  %v3523_v54 = vadd.f32 %v8685_v6, %v3164_v29 }
 0x1ff   : > { %v4784_v52 = vmax.f32 %v4752_v32, 0.0  ;;  %v4716_v42 = vadd.f32 %v6168_v60, %v4246_v53  ;;  %v4244_v39 = vadd.f32 %v4153_v21, %v8675_v20  ;;  %v4626_v28 = vpop.f32.mrf.mxu0  ;;  %v4750_v7 = vadd.f32 %v8745_v10, %v4711_v13 }
 0x200   : > { %v6135_v33 = vpop.f32.mrf.mxu1  ;;  %v3170_v53 = vadd.f32 %v8701_v56, %v8594_v46 }
 0x201   : > { %v5660_v27 = vpack.c.bf16 %v4784_v52, %v4783_v37  ;;  %v4714_v16 = vadd.f32 %v4623_v31, %v4244_v39  ;;  %v4247_v45 = vadd.f32 %v6135_v33, %v3521_v44  ;;  %v6172_v5 = vpop.f32.mrf.mxu0  ;;  %v4782_v62 = vmax.f32 %v4750_v7, 0.0  ;;  %v9054_v39 = vld [vmem:[#allocation18_spill] sm:$0xff] }
 0x202   : > { %v4156_v43 = vpop.f32.mrf.mxu1  ;;  %v4755_v24 = vadd.f32 %v8745_v10, %v4716_v42  ;;  %v3168_v42 = vadd.f32 %v8705_v3, %v8597_v58  ;;  %v9056_v3 = vld [vmem:[#allocation21_spill] sm:$0xff] }
 0x203   : > { %5716 = vst [vmem:[%s8764_s15 + $0x28] sm:$0xff] %v5660_v27   ;;  %v4717_v34 = vadd.f32 %v6169_v55, %v4247_v45  ;;  %v4245_v63 = vadd.f32 %v4156_v43, %v3519_v22  ;;  %v4639_v20 = vpop.f32.mrf.mxu0  ;;  %v5655_v35 = vpack.c.bf16 %v4782_v62, %v4781_v40  ;;  %v4753_v57 = vadd.f32 %v8745_v10, %v4714_v16  ;;  %v9055_v22 = vld [vmem:[#allocation23_spill] sm:$0xff] }
 0x204   : > { %v6138_v41 = vpop.f32.mrf.mxu1  ;;  %v4787_v9 = vmax.f32 %v4755_v24, 0.0  ;;  %v3527_v24 = vadd.f32 %v9056_v3, %v3168_v42  ;;  %v9063_v42 = vld [vmem:[#allocation14_spill] sm:$0xff] }
 0x205   : > { %v4756_v50 = vadd.f32 %v8745_v10, %v4717_v34  ;;  %v4715_v48 = vadd.f32 %v4626_v28, %v4245_v63  ;;  %v4250_v60 = vadd.f32 %v6138_v41, %v8682_v25  ;;  %v6173_v15 = vpop.f32.mrf.mxu0  ;;  %5715 = vst [vmem:[%s8764_s15 + $0x20] sm:$0xff] %v5655_v35   ;;  %v4785_v19 = vmax.f32 %v4753_v57, 0.0  ;;  %v9057_v34 = vld [vmem:[#allocation11_spill] sm:$0xff] }
 0x206   : > { %v4169_v59 = vpop.f32.mrf.mxu1  ;;  %v3529_v28 = vadd.f32 %v9054_v39, %v3170_v53  ;;  %v3174_v63 = vadd.f32 %v8715_v2, %v9057_v34 }
 0x207   : > { %v4788_v51 = vmax.f32 %v4756_v50, 0.0  ;;  %v4754_v36 = vadd.f32 %v8745_v10, %v4715_v48  ;;  %v4248_v38 = vadd.f32 %v4169_v59, %v8689_v8  ;;  %v4642_v61 = vpop.f32.mrf.mxu0  ;;  %v4720_v18 = vadd.f32 %v6172_v5, %v4250_v60 }
 0x208   : > { %v6139_v23 = vpop.f32.mrf.mxu1 }
 0x209   : > { %v5670_v25 = vpack.c.bf16 %v4788_v51, %v4787_v9  ;;  %v4786_v31 = vmax.f32 %v4754_v36, 0.0  ;;  %v4718_v47 = vadd.f32 %v4639_v20, %v4248_v38  ;;  %v4251_v4 = vadd.f32 %v6139_v23, %v3525_v12  ;;  %v9059_v36 = vld [vmem:[#allocation25_spill] sm:$0xff] }
 0x20a   : > { %v6176_v11 = vpop.f32.mrf.mxu0  ;;  %v4172_v32 = vpop.f32.mrf.mxu1  ;;  %v4759_v49 = vadd.f32 %v8745_v10, %v4720_v18  ;;  %v3533_v38 = vadd.f32 %v9059_v36, %v3174_v63 }
 0x20b   : > { %5718 = vst [vmem:[%s8764_s15 + $0x38] sm:$0xff] %v5670_v25   ;;  %v5665_v8 = vpack.c.bf16 %v4786_v31, %v4785_v19  ;;  %v4249_v55 = vadd.f32 %v4172_v32, %v3523_v54  ;;  %v4721_v6 = vadd.f32 %v6173_v15, %v4251_v4  ;;  %v4757_v13 = vadd.f32 %v8745_v10, %v4718_v47  ;;  %v9058_v15 = vld [vmem:[#allocation2_spill] sm:$0xff]  ;;  %v9061_v4 = vld [vmem:[#allocation5_spill] sm:$0xff] }
 0x20c   : > { %v4655_v44 = vpop.f32.mrf.mxu0  ;;  %v6142_v30 = vpop.f32.mrf.mxu1  ;;  %v4791_v45 = vmax.f32 %v4759_v49, 0.0  ;;  %v3172_v59 = vadd.f32 %v8719_v26, %v9058_v15  ;;  %v9060_v25 = vld [vmem:[#allocation6_spill] sm:$0xff] }
 0x20d   : > { %5717 = vst [vmem:[%s8764_s15 + $0x30] sm:$0xff] %v5665_v8   ;;  %v4719_v21 = vadd.f32 %v4642_v61, %v4249_v55  ;;  %v4254_v37 = vadd.f32 %v6142_v30, %v8696_v17  ;;  %v4760_v46 = vadd.f32 %v8745_v10, %v4721_v6  ;;  %v4789_v17 = vmax.f32 %v4757_v13, 0.0 }
 0x20e   : > { %v6177_v52 = vpop.f32.mrf.mxu0  ;;  %v4185_v56 = vpop.f32.mrf.mxu1  ;;  %v3531_v32 = vadd.f32 %v9061_v4, %v3172_v59 }
 0x20f   : > { %v4758_v7 = vadd.f32 %v8745_v10, %v4719_v21  ;;  %v4724_v33 = vadd.f32 %v6176_v11, %v4254_v37  ;;  %v4252_v27 = vadd.f32 %v4185_v56, %v9055_v22  ;;  %v4792_v5 = vmax.f32 %v4760_v46, 0.0  ;;  %v9062_v37 = vld [vmem:[#allocation19_spill] sm:$0xff]  ;;  %v9064_v46 = vld [vmem:[#allocation4_spill] sm:$0xff] }
 0x210   : > { %v4658_v16 = vpop.f32.mrf.mxu0  ;;  %v6143_v40 = vpop.f32.mrf.mxu1  ;;  %v3176_v56 = vadd.f32 %v9064_v46, %v9063_v42 }
 0x211   : > { %v4790_v62 = vmax.f32 %v4758_v7, 0.0  ;;  %v4255_v43 = vadd.f32 %v6143_v40, %v3529_v28  ;;  %v5680_v20 = vpack.c.bf16 %v4792_v5, %v4791_v45  ;;  %v4722_v1 = vadd.f32 %v4655_v44, %v4252_v27 }
 0x212   : > { %v6180_v58 = vpop.f32.mrf.mxu0  ;;  %v4188_v29 = vpop.f32.mrf.mxu1  ;;  %v4763_v41 = vadd.f32 %v8745_v10, %v4724_v33 }
 0x213   : > { %v5675_v35 = vpack.c.bf16 %v4790_v62, %v4789_v17  ;;  %v4725_v57 = vadd.f32 %v6177_v52, %v4255_v43  ;;  %5720 = vst [vmem:[%s8764_s15 + $0x48] sm:$0xff] %v5680_v20   ;;  %v4253_v48 = vadd.f32 %v4188_v29, %v3527_v24  ;;  %v4761_v61 = vadd.f32 %v8745_v10, %v4722_v1  ;;  %v9066_v62 = vld [vmem:[#allocation12_spill] sm:$0xff]  ;;  %v9068_v24 = vld [vmem:[#allocation9_spill] sm:$0xff] }
 0x214   : > { %v4671_v50 = vpop.f32.mrf.mxu0  ;;  %v6146_v60 = vpop.f32.mrf.mxu1  ;;  %v4795_v18 = vmax.f32 %v4763_v41, 0.0  ;;  %v3178_v52 = vadd.f32 %v8729_v0, %v9062_v37  ;;  %v3535_v34 = vadd.f32 %v9068_v24, %v3176_v56 }
 0x215   : > { %5719 = vst [vmem:[%s8764_s15 + $0x40] sm:$0xff] %v5675_v35   ;;  %v4764_v9 = vadd.f32 %v8745_v10, %v4725_v57  ;;  %v4258_v51 = vadd.f32 %v6146_v60, %v8710_v14  ;;  %v4723_v12 = vadd.f32 %v4658_v16, %v4253_v48  ;;  %v4793_v44 = vmax.f32 %v4761_v61, 0.0  ;;  %v9065_v16 = vld [vmem:[#allocation8_spill] sm:$0xff] }
 0x216   : > { %v6181_v2 = vpop.f32.mrf.mxu0  ;;  %v4201_v54 = vpop.f32.mrf.mxu1 }
 0x217   : > { %v4796_v23 = vmax.f32 %v4764_v9, 0.0  ;;  %v4728_v19 = vadd.f32 %v6180_v58, %v4258_v51  ;;  %v4256_v31 = vadd.f32 %v4201_v54, %v9060_v25  ;;  %v4762_v26 = vadd.f32 %v8745_v10, %v4723_v12  ;;  %v9067_v58 = vld [vmem:[#allocation7_spill] sm:$0xff] }
 0x218   : > { %v4674_v47 = vpop.f32.mrf.mxu0  ;;  %v6147_v11 = vpop.f32.mrf.mxu1  ;;  %v3537_v3 = vadd.f32 %v9067_v58, %v3178_v52 }
 0x219   : > { %v5690_v14 = vpack.c.bf16 %v4796_v23, %v4795_v18  ;;  %v4726_v53 = vadd.f32 %v4671_v50, %v4256_v31  ;;  %v4259_v8 = vadd.f32 %v6147_v11, %v3533_v38  ;;  %v4794_v49 = vmax.f32 %v4762_v26, 0.0 }
 0x21a   : > { %v6184_v55 = vpop.f32.mrf.mxu0  ;;  %v4204_v6 = vpop.f32.mrf.mxu1  ;;  %v4767_v30 = vadd.f32 %v8745_v10, %v4728_v19 }
 0x21b   : > { %5722 = vst [vmem:[%s8764_s15 + $0x58] sm:$0xff] %v5690_v14   ;;  %v4729_v13 = vadd.f32 %v6181_v2, %v4259_v8  ;;  %v4257_v21 = vadd.f32 %v4204_v6, %v3531_v32  ;;  %v5685_v39 = vpack.c.bf16 %v4794_v49, %v4793_v44  ;;  %v4765_v33 = vadd.f32 %v8745_v10, %v4726_v53 }
 0x21c   : > { %v6150_v28 = vpop.f32.mrf.mxu1  ;;  %v4687_v7 = vpop.f32.mrf.mxu0  ;;  %v4799_v40 = vmax.f32 %v4767_v30, 0.0 }
 0x21d   : > { %v4768_v22 = vadd.f32 %v8745_v10, %v4729_v13  ;;  %v4727_v27 = vadd.f32 %v4674_v47, %v4257_v21  ;;  %v4262_v45 = vadd.f32 %v6150_v28, %v9065_v16  ;;  %5721 = vst [vmem:[%s8764_s15 + $0x50] sm:$0xff] %v5685_v39   ;;  %v4797_v29 = vmax.f32 %v4765_v33, 0.0 }
 0x21e   : > { %v4217_v5 = vpop.f32.mrf.mxu1  ;;  %v6185_v1 = vpop.f32.mrf.mxu0 }
 0x21f   : > { %v4800_v17 = vmax.f32 %v4768_v22, 0.0  ;;  %v4766_v0 = vadd.f32 %v8745_v10, %v4727_v27  ;;  %v4260_v43 = vadd.f32 %v4217_v5, %v9066_v62  ;;  %v4732_v63 = vadd.f32 %v6184_v55, %v4262_v45 }
 0x220   : > { %v6151_v20 = vpop.f32.mrf.mxu1  ;;  %v4690_v51 = vpop.f32.mrf.mxu0 }
 0x221   : > { %v5700_v35 = vpack.c.bf16 %v4800_v17, %v4799_v40  ;;  %v4798_v41 = vmax.f32 %v4766_v0, 0.0  ;;  %v4730_v57 = vadd.f32 %v4687_v7, %v4260_v43  ;;  %v4263_v50 = vadd.f32 %v6151_v20, %v3537_v3 }
 0x222   : > { %v4220_v48 = vpop.f32.mrf.mxu1  ;;  %v4771_v59 = vadd.f32 %v8745_v10, %v4732_v63 }
 0x223   : > { %5724 = vst [vmem:[%s8764_s15 + $0x68] sm:$0xff] %v5700_v35   ;;  %v5695_v60 = vpack.c.bf16 %v4798_v41, %v4797_v29  ;;  %v4261_v15 = vadd.f32 %v4220_v48, %v3535_v34  ;;  %v4733_v9 = vadd.f32 %v6185_v1, %v4263_v50  ;;  %v4769_v2 = vadd.f32 %v8745_v10, %v4730_v57 }
 0x224   : > { %v4803_v12 = vmax.f32 %v4771_v59, 0.0 }
 0x225   : > { %5723 = vst [vmem:[%s8764_s15 + $0x60] sm:$0xff] %v5695_v60   ;;  %v4731_v36 = vadd.f32 %v4690_v51, %v4261_v15  ;;  %v4772_v38 = vadd.f32 %v8745_v10, %v4733_v9  ;;  %v4801_v18 = vmax.f32 %v4769_v2, 0.0 }
 0x227   : > { %v4770_v61 = vadd.f32 %v8745_v10, %v4731_v36  ;;  %v4804_v54 = vmax.f32 %v4772_v38, 0.0 }
 0x229   : > { %v4802_v23 = vmax.f32 %v4770_v61, 0.0  ;;  %v5710_v19 = vpack.c.bf16 %v4804_v54, %v4803_v12 }
 0x22b   : > { %v5705_v25 = vpack.c.bf16 %v4802_v23, %v4801_v18  ;;  %5726 = vst [vmem:[%s8764_s15 + $0x78] sm:$0xff] %v5710_v19  }
 0x22d   : > { %5725 = vst [vmem:[%s8764_s15 + $0x70] sm:$0xff] %v5705_v25  }
 0x22e PF: > { %s13_s12 = sadd.s32 1, %s6257_s12  }
 0x22f   : > { %p10_p4 = scmp.ge.s32.totalorder %s13_s12, 6  }
 0x231   :  { %12 = sbr.rel (!%p10_p4) target bundleno = 1 (0x1), region = 72 }

// kernel: _lambda_.9
= control target key start
LH: loop header
LB: loop body
LE: loop exit
PB: predicated region body
PF: predicated region fallthrough
CT: control target
= control target key end

     0   :  { %s391_s0 = inlined_call_operand.vmem [shape: bf16[256,128], index: 0, kind: input, shape index: {}, may-alias: {0,1}]   ;;  %s392_s1 = inlined_call_operand.vmem [shape: bf16[256,128], index: 1, kind: input, shape index: {}, may-alias: {0,1}]   ;;  %s393_s2 = inlined_call_operand.hbm [shape: f32[1,1], index: 2, kind: output, shape index: {}]  }
   0x1   :  { %v214_v0 = vld [vmem:[%s391_s0] sm:$0xff]   ;;  %v277_v2 = vld [vmem:[%s391_s0 + $0x8] sm:$0xff]  }
   0x2   :  { %v284_v1 = vld [vmem:[%s392_s1 + $0x40] sm:$0xff]   ;;  %v285_v3 = vld [vmem:[%s392_s1 + $0x48] sm:$0xff]   ;;  %v215_v4 = vunpack.c.l.bf16 %v214_v0  ;;  %v216_v5 = vunpack.c.h.bf16 %v214_v0 }
   0x3   :  { %v247_v6 = vunpack.c.l.bf16 %v284_v1  ;;  %v248_v7 = vunpack.c.h.bf16 %v284_v1 }
   0x4   :  { %7 = vsyncpa [#allocation4], 0  ;;  %v219_v8 = vunpack.c.l.bf16 %v277_v2  ;;  %v251_v9 = vunpack.c.l.bf16 %v285_v3  ;;  %v278_v10 = vld [vmem:[%s391_s0 + $0x10] sm:$0xff]   ;;  %v220_v12 = vunpack.c.h.bf16 %v277_v2  ;;  %v252_v13 = vunpack.c.h.bf16 %v285_v3  ;;  %v279_v20 = vld [vmem:[%s391_s0 + $0x18] sm:$0xff]  }
   0x5   :  { %v286_v11 = vld [vmem:[%s392_s1 + $0x50] sm:$0xff]   ;;  %v104_v14 = vsub.f32 %v215_v4, %v247_v6  ;;  %v105_v15 = vsub.f32 %v216_v5, %v248_v7  ;;  %v223_v16 = vunpack.c.l.bf16 %v278_v10  ;;  %v224_v19 = vunpack.c.h.bf16 %v278_v10  ;;  %v287_v21 = vld [vmem:[%s392_s1 + $0x58] sm:$0xff]   ;;  %v280_v27 = vld [vmem:[%s391_s0 + $0x20] sm:$0xff]  }
   0x6   :  { %v255_v17 = vunpack.c.l.bf16 %v286_v11  ;;  %v106_v18 = vsub.f32 %v219_v8, %v251_v9  ;;  %v256_v22 = vunpack.c.h.bf16 %v286_v11  ;;  %v107_v23 = vsub.f32 %v220_v12, %v252_v13  ;;  %v288_v32 = vld [vmem:[%s392_s1 + $0x60] sm:$0xff]   ;;  %v281_v38 = vld [vmem:[%s391_s0 + $0x28] sm:$0xff]   ;;  %v282_v50 = vld [vmem:[%s391_s0 + $0x30] sm:$0xff]  }
   0x7   :  { %v121_v24 = vmul.f32 %v104_v14, %v104_v14  ;;  %v122_v25 = vmul.f32 %v105_v15, %v105_v15  ;;  %v227_v26 = vunpack.c.l.bf16 %v279_v20  ;;  %v259_v28 = vunpack.c.l.bf16 %v287_v21  ;;  %v289_v44 = vld [vmem:[%s392_s1 + $0x68] sm:$0xff]   ;;  %v290_v56 = vld [vmem:[%s392_s1 + $0x70] sm:$0xff]   ;;  %v283_v62 = vld [vmem:[%s391_s0 + $0x38] sm:$0xff]  }
   0x8   :  { %v108_v29 = vsub.f32 %v223_v16, %v255_v17  ;;  %v123_v30 = vmul.f32 %v106_v18, %v106_v18  ;;  %v228_v31 = vunpack.c.h.bf16 %v279_v20  ;;  %v260_v33 = vunpack.c.h.bf16 %v287_v21  ;;  %v291_v4 = vld [vmem:[%s392_s1 + $0x78] sm:$0xff]   ;;  %s321_s1 = smov [#allocation3]  }
   0x9   :  { %v109_v34 = vsub.f32 %v224_v19, %v256_v22  ;;  %v124_v35 = vmul.f32 %v107_v23, %v107_v23  ;;  %v137_v36 = vadd.f32 %v122_v25, %v121_v24  ;;  %v231_v37 = vunpack.c.l.bf16 %v280_v27  ;;  %s183_s13 = sshll.u32 %s321_s1, 4  ;;  %s184_s13 = int_to_ptr.vmem [resolvable:$true] %s183_s13 }
   0xa   :  { %v263_v39 = vunpack.c.l.bf16 %v288_v32  ;;  %v110_v40 = vsub.f32 %v227_v26, %v259_v28  ;;  %v125_v41 = vmul.f32 %v108_v29, %v108_v29  ;;  %v232_v43 = vunpack.c.h.bf16 %v280_v27  ;;  %s298_s14 = scalar_lea.vmem %s184_s13, 16  ;;  %s302_s15 = scalar_lea.vmem %s184_s13, 32 }
   0xb   :  { %v138_v42 = vadd.f32 %v137_v36, %v123_v30  ;;  %v264_v45 = vunpack.c.h.bf16 %v288_v32  ;;  %v111_v46 = vsub.f32 %v228_v31, %v260_v33  ;;  %v126_v47 = vmul.f32 %v109_v34, %v109_v34  ;;  %p299_p0 = scmp.ne.s32.totalorder %s184_s13, %s298_s14  ;;  %p303_p1 = scmp.lt.s32.totalorder %s184_s13, %s184_s13 }
   0xc   :  { %v235_v49 = vunpack.c.l.bf16 %v281_v38  ;;  %v267_v51 = vunpack.c.l.bf16 %v289_v44  ;;  %v112_v52 = vsub.f32 %v231_v37, %v263_v39  ;;  %v127_v53 = vmul.f32 %v110_v40, %v110_v40  ;;  %p304_p2 = scmp.lt.s32.totalorder %s302_s15, %s298_s14 }
   0xd   :  { %v139_v48 = vadd.f32 %v138_v42, %v124_v35  ;;  %v236_v55 = vunpack.c.h.bf16 %v281_v38  ;;  %v268_v57 = vunpack.c.h.bf16 %v289_v44  ;;  %v113_v58 = vsub.f32 %v232_v43, %v264_v45 }
   0xe   :  { %v128_v59 = vmul.f32 %v111_v46, %v111_v46  ;;  %v239_v61 = vunpack.c.l.bf16 %v282_v50  ;;  %v271_v63 = vunpack.c.l.bf16 %v290_v56  ;;  %v114_v0 = vsub.f32 %v235_v49, %v267_v51  ;;  %p305_p3 = por %p304_p2, %p303_p1 }
   0xf   :  { %v140_v54 = vadd.f32 %v139_v48, %v125_v41  ;;  %v129_v1 = vmul.f32 %v112_v52, %v112_v52  ;;  %v240_v3 = vunpack.c.h.bf16 %v282_v50  ;;  %v272_v5 = vunpack.c.h.bf16 %v290_v56 }
  0x10   :  { %v115_v6 = vsub.f32 %v236_v55, %v268_v57  ;;  %v130_v7 = vmul.f32 %v113_v58, %v113_v58  ;;  %v243_v9 = vunpack.c.l.bf16 %v283_v62  ;;  %v275_v10 = vunpack.c.l.bf16 %v291_v4  ;;  %p306_p4 = pnand %p305_p3, %p299_p0 }
  0x11   :  { %v141_v60 = vadd.f32 %v140_v54, %v126_v47  ;;  %v116_v11 = vsub.f32 %v239_v61, %v271_v63  ;;  %v131_v12 = vmul.f32 %v114_v0, %v114_v0  ;;  %v244_v14 = vunpack.c.h.bf16 %v283_v62 }
  0x12   :  { %v276_v15 = vunpack.c.h.bf16 %v291_v4  ;;  %v117_v16 = vsub.f32 %v240_v3, %v272_v5  ;;  %v132_v17 = vmul.f32 %v115_v6, %v115_v6  ;;  %v118_v19 = vsub.f32 %v243_v9, %v275_v10 }
  0x13   :  { %v142_v2 = vadd.f32 %v141_v60, %v127_v53  ;;  %v133_v20 = vmul.f32 %v116_v11, %v116_v11  ;;  %vm38_vm0 = vcmask 0   ;;  %v320_v31 = vmov 0.0  }
  0x14   :  { %v119_v22 = vsub.f32 %v244_v14, %v276_v15  ;;  %v134_v23 = vmul.f32 %v117_v16, %v117_v16  ;;  %v135_v25 = vmul.f32 %v118_v19, %v118_v19  ;;  %39 = vst.msk [vmem:[#allocation2] sm:$0x1] %vm38_vm0, %v320_v31 }
  0x15   :  { %v143_v8 = vadd.f32 %v142_v2, %v128_v59 }
  0x16   :  { %v136_v27 = vmul.f32 %v119_v22, %v119_v22 }
  0x17   :  { %v144_v13 = vadd.f32 %v143_v8, %v129_v1 }
  0x19   :  { %v145_v18 = vadd.f32 %v144_v13, %v130_v7 }
  0x1b   :  { %v146_v21 = vadd.f32 %v145_v18, %v131_v12  ;;  %v120_v39 = vld [vmem:[#allocation2] sm:$0x1] }
  0x1d   :  { %v147_v24 = vadd.f32 %v146_v21, %v132_v17 }
  0x1f   :  { %v148_v26 = vadd.f32 %v147_v24, %v133_v20 }
  0x21   :  { %v149_v28 = vadd.f32 %v148_v26, %v134_v23 }
  0x23   :  { %v150_v29 = vadd.f32 %v149_v28, %v135_v25 }
  0x25   :  { %v151_v30 = vadd.f32 %v150_v29, %v136_v27 }
  0x27   :  { %152 = vadd.xlane.f32.xlu0 %v151_v30 }
  0xb0   :  { %v153_v32 = vpop.xlane.xlu0 %152 }
  0xb1   :  { %v154_v33 = vrot.slane %v153_v32, 4 }
  0xb3   :  { %v155_v34 = vadd.f32 %v154_v33, %v153_v32 }
  0xb5   :  { %v156_v35 = vrot.slane %v155_v34, 2 }
  0xb7   :  { %v157_v36 = vadd.f32 %v156_v35, %v155_v34 }
  0xb9   :  { %v158_v37 = vrot.slane %v157_v36, 1 }
  0xbb   :  { %v159_v38 = vadd.f32 %v158_v37, %v157_v36 }
  0xbd   :  { %292 = vpush %v159_v38 }
  0xee   :  { %s293_s0 = spop %292 }
  0xef   :  { %v161_v40 = vstv %s293_s0 }
  0xf0   :  { %v162_v41 = vadd.f32 %v161_v40, %v120_v39 }
  0xf2   :  { %164 = vst.msk [vmem:[#allocation2] sm:$0x1] %vm38_vm0, %v162_v41 }
  0xf9   :  { %v168_v42 = vld [vmem:[#allocation2] sm:$0x1] }
  0xfa   :  { %296 = vrsqrt.f32 %v168_v42  ;;  %vm171_vm1 = vcmp.eq.f32.partialorder %v168_v42, inf  ;;  %v174_v45 = vand.u32 2147483648, %v168_v42  ;;  %vm173_vm2 = vcmp.eq.f32.partialorder %v168_v42, 0.0 }
 0x107   :  { %v297_v43 = vpop.eup %296 }
 0x108   :  { %v170_v44 = vmul.f32 %v297_v43, %v168_v42 }
 0x10a   :  { %v172_v46 = vsel %vm171_vm1, %v168_v42, %v170_v44 }
 0x10b   :  { %v175_v47 = vsel %vm173_vm2, %v174_v45, %v172_v46 }
 0x10c   :  { %176 = vst.msk [vmem:[#allocation3] sm:$0x1] %vm38_vm0, %v175_v47 }
 0x10d   :  { %309 = shalt.err (!%p306_p4)
}
 0x10e   :  { %186 = dma.vmem_to_hbm [thread:$0]  %s184_s13, 16, %s393_s2, [#allocation4]  }
 0x10f   :  { %318 = dma.done.wait [#allocation4], 16  }
 0x110   :  { %319 = vsyncadd [#allocation4], 4294967280 }
 0x111   :  { %190 = vsyncpa [#allocation4], 1 }

// kernel: _lambda_.6
= control target key start
LH: loop header
LB: loop body
LE: loop exit
PB: predicated region body
PF: predicated region fallthrough
CT: control target
= control target key end

     0   :  { %s6852_s12 = smov 0   ;;  %s9519_s0 = inlined_call_operand.vmem [shape: bf16[4,18,18,128], index: 0, kind: input, shape index: {}]   ;;  %s9520_s1 = inlined_call_operand.vmem [shape: bf16[9,128,128], index: 1, kind: input, shape index: {}]   ;;  %s9521_s2 = inlined_call_operand.vmem [shape: f32[1,128], index: 2, kind: input, shape index: {}]   ;;  %s9522_s3 = inlined_call_operand.vmem [shape: bf16[4,256,128], index: 3, kind: output, shape index: {}]  }
   0x1 LB: > { %s5267_s13 = sadd.s32 4294967295, %s6830_s12   ;;  %p5271_p0 = scmp.ge.s32.totalorder %s6830_s12, 1  ;;  %s6830_s12 = sphi %s6852_s12, %s13_s12  }
   0x2   : > { %p137_p1 = scmp.lt.s32.totalorder %s6830_s12, 5 }
   0x4   : > { %p138_p2 = pnand %p5271_p0, %p137_p1 }
   0x6   : > { %141 = sbr.rel (%p138_p2) target bundleno = 558 (0x22e), region = 32 }
   0xb   : > { %v6695_v0 = vld [vmem:[%s9520_s1 + $0x78] sm:$0xff]   ;;  %p161_p3 = scmp.lt.s32.totalorder %s5267_s13, 3  ;;  %v6696_v1 = vld [vmem:[%s9520_s1 + $0x70] sm:$0xff]   ;;  %v6697_v2 = vld [vmem:[%s9520_s1 + $0x68] sm:$0xff]   ;;  %vm236_vm0 = vsmask.f32 3328 }
   0xc   : > { %6238 = vmatprep.subr.bf16.mxu0 %v6695_v0  ;;  %6670 = vmatprep.subr.bf16.mxu1 %v6695_v0  ;;  %v6698_v3 = vld [vmem:[%s9520_s1 + $0x60] sm:$0xff]   ;;  %vm237_vm1 = vsmask.f32 7440  ;;  %v6699_v17 = vld [vmem:[%s9520_s1 + $0x58] sm:$0xff]   ;;  %v6700_v33 = vld [vmem:[%s9520_s1 + $0x50] sm:$0xff]   ;;  %vm1266_vm3 = vcmask 1042432  }
   0xd   : > { %s9715_s13 = smov (!%p161_p3, %s5267_s13), 3  ;;  %6239 = vmatpush3.bf16.msra.mxu0 %v6695_v0  ;;  %6678 = vmatpush3.bf16.msra.mxu1 %v6695_v0  ;;  %vm6906_vm2 = vmor %vm236_vm0, %vm237_vm1  ;;  %v6701_v58 = vld [vmem:[%s9520_s1 + $0x48] sm:$0xff]   ;;  %vm1267_vm4 = vcmask 1046532  }
   0xe   : > { %6240 = vmatprep.subr.bf16.mxu0 %v6696_v1  ;;  %6671 = vmatprep.subr.bf16.mxu1 %v6696_v1  ;;  %s6686_s20 = smul.u32 216, %s9715_s13  ;;  %vm7217_vm5 = vmor %vm1266_vm3, %vm1267_vm4  ;;  %s5894_s18 = sshll.u32 %s9715_s13, 7 }
  0x10   : > { %s6875_s23 = scalar_lea.vmem %s9519_s0, %s6686_s20  ;;  %s9422_s20 = scalar_lea.vmem %s9522_s3, %s5894_s18 }
  0x11   : > { %6241 = vmatpush3.bf16.msra.mxu0 %v6696_v1  ;;  %6679 = vmatpush3.bf16.msra.mxu1 %v6696_v1  ;;  %v6881_v4 = vld [vmem:[%s6875_s23] sm:$0xf]  ;;  %v6884_v5 = vld [vmem:[%s6875_s23 + $0x4] sm:$0xf]  ;;  %v6887_v6 = vld [vmem:[%s6875_s23 + $0x8] sm:$0x1] }
  0x12   : > { %6242 = vmatprep.subr.bf16.mxu0 %v6697_v2  ;;  %6672 = vmatprep.subr.bf16.mxu1 %v6697_v2  ;;  %v240_v7 = vshrl.u32 %v6881_v4, 16  ;;  %v243_v8 = vshll.u32 %v6881_v4, 16  ;;  %v249_v9 = vshll.u32 %v6884_v5, 16  ;;  %v253_v10 = vshrl.u32 %v6884_v5, 16  ;;  %v188_v12 = vld [vmem:[%s6875_s23 + $0x60] sm:$0xf] }
  0x13   : > { %v259_v11 = vshll.u32 %v6887_v6, 16  ;;  %v189_v15 = vld [vmem:[%s6875_s23 + $0x64] sm:$0xf]  ;;  %v228_v16 = vld [vmem:[%s6875_s23 + $0x68] sm:$0x1]  ;;  %v432_v21 = vshrl.u32 %v188_v12, 16 }
  0x14   : > { %v242_v13 = vrot.slane %v240_v7, 4  ;;  %v245_v14 = vrot.slane %v243_v8, 5  ;;  %v251_v18 = vrot.slane %v249_v9, 5  ;;  %v255_v19 = vrot.slane %v253_v10, 4  ;;  %v6902_v26 = vld [vmem:[%s6875_s23 + $0xc] sm:$0xf] }
  0x15   : > { %6243 = vmatpush3.bf16.msra.mxu0 %v6697_v2  ;;  %6680 = vmatpush3.bf16.msra.mxu1 %v6697_v2  ;;  %v435_v23 = vshll.u32 %v188_v12, 16  ;;  %v441_v24 = vshll.u32 %v189_v15, 16  ;;  %v445_v25 = vshrl.u32 %v189_v15, 16  ;;  %v261_v29 = vrot.slane %v259_v11, 5  ;;  %v6911_v32 = vld [vmem:[%s6875_s23 + $0x10] sm:$0xf] }
  0x16   : > { %6244 = vmatprep.subr.bf16.mxu0 %v6698_v3  ;;  %6673 = vmatprep.subr.bf16.mxu1 %v6698_v3  ;;  %v246_v22 = vor.u32 %v245_v14, %v242_v13  ;;  %v256_v28 = vor.u32 %v255_v19, %v251_v18  ;;  %v434_v30 = vrot.slane %v432_v21, 4  ;;  %v451_v31 = vshll.u32 %v228_v16, 16  ;;  %v6917_v40 = vld [vmem:[%s6875_s23 + $0x14] sm:$0x1]  ;;  %v190_v47 = vld [vmem:[%s6875_s23 + $0x6c] sm:$0xf] }
  0x17   : > { %v437_v35 = vrot.slane %v435_v23, 5  ;;  %v443_v36 = vrot.slane %v441_v24, 5  ;;  %v447_v37 = vrot.slane %v445_v25, 4  ;;  %v264_v41 = vshrl.u32 %v6902_v26, 16  ;;  %v191_v52 = vld [vmem:[%s6875_s23 + $0x70] sm:$0xf] }
  0x18   : > { %v247_v34 = vrot.slane %v246_v22, 4  ;;  %v257_v38 = vrot.slane %v256_v28, 4  ;;  %v453_v39 = vrot.slane %v451_v31, 5  ;;  %v267_v42 = vshll.u32 %v6902_v26, 16  ;;  %v229_v57 = vld [vmem:[%s6875_s23 + $0x74] sm:$0x1] }
  0x19   : > { %6245 = vmatpush3.bf16.msra.mxu0 %v6698_v3  ;;  %6681 = vmatpush3.bf16.msra.mxu1 %v6698_v3  ;;  %v438_v44 = vor.u32 %v437_v35, %v434_v30  ;;  %v448_v45 = vor.u32 %v447_v37, %v443_v36  ;;  %v273_v46 = vshll.u32 %v6911_v32, 16  ;;  %v266_v49 = vrot.slane %v264_v41, 4  ;;  %v6940_v14 = vld [vmem:[%s6875_s23 + $0x18] sm:$0xf]  ;;  %v6702_v15 = vld [vmem:[%s9520_s1 + $0x40] sm:$0xff]  }
  0x1a   : > { %6246 = vmatprep.subr.bf16.mxu0 %v6699_v17  ;;  %6674 = vmatprep.subr.bf16.mxu1 %v6699_v17  ;;  %v252_v43 = vsel %vm6906_vm2, %v247_v34, %v251_v18  ;;  %v262_v48 = vsel %vm6906_vm2, %v257_v38, %v261_v29  ;;  %v269_v50 = vrot.slane %v267_v42, 5  ;;  %v277_v51 = vshrl.u32 %v6911_v32, 16  ;;  %v6948_v19 = vld [vmem:[%s6875_s23 + $0x1c] sm:$0xf]  ;;  %v6953_v25 = vld [vmem:[%s6875_s23 + $0x20] sm:$0x1] }
  0x1b   : > { %v5291_v53 = vcombine.low %v252_v43, %v262_v48  ;;  %v439_v54 = vrot.slane %v438_v44, 4  ;;  %v449_v55 = vrot.slane %v448_v45, 4  ;;  %v275_v56 = vrot.slane %v273_v46, 5  ;;  %v192_v34 = vld [vmem:[%s6875_s23 + $0x78] sm:$0xf] }
  0x1c   : > { %v270_v59 = vor.u32 %v269_v50, %v266_v49  ;;  %v279_v60 = vrot.slane %v277_v51, 4  ;;  %v283_v61 = vshll.u32 %v6917_v40, 16  ;;  %v456_v1 = vshrl.u32 %v190_v47, 16  ;;  %v6703_v41 = vld [vmem:[%s9520_s1 + $0x38] sm:$0xff]   ;;  %v230_v49 = vld [vmem:[%s6875_s23 + $0x80] sm:$0x1] }
  0x1d   : > { %6247 = vmatpush3.bf16.msra.mxu0 %v6699_v17  ;;  %6682 = vmatpush3.bf16.msra.mxu1 %v6699_v17  ;;  %v444_v63 = vsel %vm6906_vm2, %v439_v54, %v443_v36  ;;  %v454_v0 = vsel %vm6906_vm2, %v449_v55, %v453_v39  ;;  %v459_v2 = vshll.u32 %v190_v47, 16  ;;  %v465_v12 = vshll.u32 %v191_v52, 16  ;;  %v6962_v39 = vld [vmem:[%s6875_s23 + $0x7c] sm:$0xf] }
  0x1e   : > { %6248 = vmatprep.subr.bf16.mxu0 %v6700_v33  ;;  %6675 = vmatprep.subr.bf16.mxu1 %v6700_v33  ;;  %v5299_v3 = vcombine.low %v444_v63, %v454_v0  ;;  %v271_v7 = vrot.slane %v270_v59, 4  ;;  %v280_v8 = vor.u32 %v279_v60, %v275_v56  ;;  %v285_v9 = vrot.slane %v283_v61, 5  ;;  %v6704_v42 = vld [vmem:[%s9520_s1 + $0xb8] sm:$0xff]   ;;  %v6706_v59 = vld [vmem:[%s9520_s1 + $0xb0] sm:$0xff]   ;;  %v6989_v0 = vld [vmem:[%s6875_s23 + $0x28] sm:$0xf] }
  0x1f   : > { %6254 = vmatprep.mubr.bf16.mxu0 %v5291_v53  ;;  %v458_v10 = vrot.slane %v456_v1, 4  ;;  %v461_v11 = vrot.slane %v459_v2, 5  ;;  %v469_v13 = vshrl.u32 %v191_v52, 16  ;;  %v475_v18 = vshll.u32 %v229_v57, 16  ;;  %v6705_v52 = vld [vmem:[%s9520_s1 + $0x30] sm:$0xff]  }
  0x20   : > { %v276_v16 = vsel %vm6906_vm2, %v271_v7, %v275_v56  ;;  %v281_v17 = vrot.slane %v280_v8, 4  ;;  %6270 = vmatprep.mubr.bf16.mxu1 %v5299_v3  ;;  %v467_v23 = vrot.slane %v465_v12, 5  ;;  %v288_v28 = vshrl.u32 %v6940_v14, 16  ;;  %v6980_v57 = vld [vmem:[%s6875_s23 + $0x24] sm:$0xf] }
  0x21   : > { %6249 = vmatpush3.bf16.msra.mxu0 %v6700_v33  ;;  %6683 = vmatpush3.bf16.msra.mxu1 %v6700_v33  ;;  %v462_v22 = vor.u32 %v461_v11, %v458_v10  ;;  %v471_v24 = vrot.slane %v469_v13, 4  ;;  %v477_v30 = vrot.slane %v475_v18, 5  ;;  %v291_v31 = vshll.u32 %v6940_v14, 16  ;;  %v6992_v8 = vld [vmem:[%s6875_s23 + $0x2c] sm:$0x1] }
  0x22   : > { %6250 = vmatprep.subr.bf16.mxu0 %v6701_v58  ;;  %6676 = vmatprep.subr.bf16.mxu1 %v6701_v58  ;;  %v286_v29 = vsel %vm6906_vm2, %v281_v17, %v285_v9  ;;  %v297_v33 = vshll.u32 %v6948_v19, 16  ;;  %v290_v38 = vrot.slane %v288_v28, 4  ;;  %v301_v45 = vshrl.u32 %v6948_v19, 16  ;;  %v6996_v13 = vld [vmem:[%s6875_s23 + $0x84] sm:$0xf] }
  0x23   : > { %v5292_v35 = vcombine.low %v276_v16, %v286_v29  ;;  %v463_v36 = vrot.slane %v462_v22, 4  ;;  %v472_v37 = vor.u32 %v471_v24, %v467_v23  ;;  %v293_v43 = vrot.slane %v291_v31, 5  ;;  %v7003_v22 = vld [vmem:[%s6875_s23 + $0x88] sm:$0xf] }
  0x24   : > { %v299_v44 = vrot.slane %v297_v33, 5  ;;  %v307_v46 = vshll.u32 %v6953_v25, 16  ;;  %v480_v50 = vshrl.u32 %v192_v34, 16  ;;  %v483_v51 = vshll.u32 %v192_v34, 16 }
  0x25   : > { %6251 = vmatpush3.bf16.msra.mxu0 %v6701_v58  ;;  %6684 = vmatpush3.bf16.msra.mxu1 %v6701_v58  ;;  %v468_v47 = vsel %vm6906_vm2, %v463_v36, %v467_v23  ;;  %v473_v48 = vrot.slane %v472_v37, 4  ;;  %v294_v53 = vor.u32 %v293_v43, %v290_v38  ;;  %v303_v54 = vrot.slane %v301_v45, 4  ;;  %v7012_v36 = vld [vmem:[%s6875_s23 + $0x8c] sm:$0x1] }
  0x26   : > { %6252 = vmatprep.subr.bf16.mxu0 %v6702_v15  ;;  %6677 = vmatprep.subr.bf16.mxu1 %v6702_v15  ;;  %v309_v55 = vrot.slane %v307_v46, 5  ;;  %v489_v56 = vshll.u32 %v6962_v39, 16  ;;  %v482_v60 = vrot.slane %v480_v50, 4  ;;  %v485_v61 = vrot.slane %v483_v51, 5  ;;  %v6708_v37 = vld [vmem:[%s9520_s1 + $0xa8] sm:$0xff]  }
  0x27   : > { %v478_v58 = vsel %vm6906_vm2, %v473_v48, %v477_v30  ;;  %v493_v63 = vshrl.u32 %v6962_v39, 16  ;;  %v295_v2 = vrot.slane %v294_v53, 4  ;;  %v304_v3 = vor.u32 %v303_v54, %v299_v44  ;;  %v6707_v30 = vld [vmem:[%s9520_s1 + $0x28] sm:$0xff]   ;;  %v7027_v53 = vld [vmem:[%s6875_s23 + $0x30] sm:$0xf] }
  0x28   : > { %v5300_v1 = vcombine.low %v468_v47, %v478_v58  ;;  %v491_v7 = vrot.slane %v489_v56, 5  ;;  %v486_v9 = vor.u32 %v485_v61, %v482_v60  ;;  %v499_v11 = vshll.u32 %v230_v49, 16  ;;  %v7036_v60 = vld [vmem:[%s6875_s23 + $0x34] sm:$0xf] }
  0x29   : > { %6253 = vmatpush3.bf16.msra.mxu0 %v6702_v15  ;;  %6685 = vmatpush3.bf16.msra.mxu1 %v6702_v15  ;;  %v495_v10 = vrot.slane %v493_v63, 4  ;;  %v312_v12 = vshrl.u32 %v6980_v57, 16  ;;  %v300_v15 = vsel %vm6906_vm2, %v295_v2, %v299_v44  ;;  %v305_v16 = vrot.slane %v304_v3, 4 }
  0x2a   : > { %6286 = vmatprep.subr.bf16.mxu1 %v6703_v41  ;;  %6334 = vmatprep.subr.bf16.mxu0 %v6704_v42  ;;  %v315_v17 = vshll.u32 %v6980_v57, 16  ;;  %v321_v18 = vshll.u32 %v6989_v0, 16  ;;  %v487_v23 = vrot.slane %v486_v9, 4  ;;  %v501_v28 = vrot.slane %v499_v11, 5 }
  0x2b   : > { %v496_v24 = vor.u32 %v495_v10, %v491_v7  ;;  %v314_v29 = vrot.slane %v312_v12, 4  ;;  %v310_v31 = vsel %vm6906_vm2, %v305_v16, %v309_v55  ;;  %v331_v43 = vshll.u32 %v6992_v8, 16  ;;  %v7044_v16 = vld [vmem:[%s6875_s23 + $0x38] sm:$0x1] }
  0x2c   : > { %6255 = vmatmul.mubr.bf16.vlgmr.msra.gmra.mxu0 %v5292_v35  ;;  %6271 = vmatmul.mubr.bf16.vlgmr.msra.gmra.mxu1 %v5300_v1  ;;  %v317_v33 = vrot.slane %v315_v17, 5  ;;  %v323_v34 = vrot.slane %v321_v18, 5  ;;  %v325_v35 = vshrl.u32 %v6989_v0, 16  ;;  %v5293_v38 = vcombine.low %v300_v15, %v310_v31  ;;  %v7048_v18 = vld [vmem:[%s6875_s23 + $0x90] sm:$0xf] }
  0x2d   : > { %6287 = vmatpush3.bf16.msra.mxu1 %v6703_v41  ;;  %6335 = vmatpush3.bf16.msra.mxu0 %v6704_v42  ;;  %v492_v41 = vsel %vm6906_vm2, %v487_v23, %v491_v7  ;;  %v497_v42 = vrot.slane %v496_v24, 4  ;;  %v504_v46 = vshrl.u32 %v6996_v13, 16  ;;  %v507_v47 = vshll.u32 %v6996_v13, 16  ;;  %v7054_v31 = vld [vmem:[%s6875_s23 + $0x94] sm:$0xf] }
  0x2e   : > { %6288 = vmatprep.subr.bf16.mxu1 %v6705_v52  ;;  %6336 = vmatprep.subr.bf16.mxu0 %v6706_v59  ;;  %v318_v44 = vor.u32 %v317_v33, %v314_v29  ;;  %v327_v45 = vrot.slane %v325_v35, 4  ;;  %v333_v49 = vrot.slane %v331_v43, 5  ;;  %v513_v50 = vshll.u32 %v7003_v22, 16 }
  0x2f   : > { %v502_v48 = vsel %vm6906_vm2, %v497_v42, %v501_v28  ;;  %v517_v51 = vshrl.u32 %v7003_v22, 16  ;;  %6258 = vmatprep.mubr.bf16.mxu0 %v5293_v38  ;;  %v506_v58 = vrot.slane %v504_v46, 4  ;;  %v509_v61 = vrot.slane %v507_v47, 5  ;;  %v6712_v38 = vld [vmem:[%s9520_s1 + $0x98] sm:$0xff]   ;;  %v6713_v46 = vld [vmem:[%s9520_s1 + $0x10] sm:$0xff]  }
  0x30   : > { %v5301_v54 = vcombine.low %v492_v41, %v502_v48  ;;  %v319_v55 = vrot.slane %v318_v44, 4  ;;  %v328_v56 = vor.u32 %v327_v45, %v323_v34  ;;  %v515_v63 = vrot.slane %v513_v50, 5  ;;  %v7064_v44 = vld [vmem:[%s6875_s23 + $0x98] sm:$0x1] }
  0x31   : > { %6289 = vmatpush3.bf16.msra.mxu1 %v6705_v52  ;;  %6337 = vmatpush3.bf16.msra.mxu0 %v6706_v59  ;;  %v6709_v52 = vld [vmem:[%s9520_s1 + $0x20] sm:$0xff]   ;;  %v519_v1 = vrot.slane %v517_v51, 4  ;;  %v523_v2 = vshll.u32 %v7012_v36, 16  ;;  %v336_v9 = vshrl.u32 %v7027_v53, 16  ;;  %v339_v10 = vshll.u32 %v7027_v53, 16 }
  0x32   : > { %6290 = vmatprep.subr.bf16.mxu1 %v6707_v30  ;;  %v6710_v59 = vld [vmem:[%s9520_s1 + $0xa0] sm:$0xff]   ;;  %6338 = vmatprep.subr.bf16.mxu0 %v6708_v37  ;;  %v324_v3 = vsel %vm6906_vm2, %v319_v55, %v323_v34  ;;  %v329_v7 = vrot.slane %v328_v56, 4  ;;  %v510_v11 = vor.u32 %v509_v61, %v506_v58  ;;  %v345_v17 = vshll.u32 %v7036_v60, 16  ;;  %v7077_v51 = vld [vmem:[%s6875_s23 + $0x3c] sm:$0xf]  ;;  %v6714_v55 = vld [vmem:[%s9520_s1 + $0x90] sm:$0xff]  }
  0x33   : > { %6274 = vmatprep.mubr.bf16.mxu1 %v5301_v54  ;;  %v520_v12 = vor.u32 %v519_v1, %v515_v63  ;;  %v525_v15 = vrot.slane %v523_v2, 5  ;;  %v338_v24 = vrot.slane %v336_v9, 4  ;;  %v341_v28 = vrot.slane %v339_v10, 5  ;;  %v7080_v54 = vld [vmem:[%s6875_s23 + $0x40] sm:$0xf] }
  0x34   : > { %v334_v23 = vsel %vm6906_vm2, %v329_v7, %v333_v49  ;;  %v349_v29 = vshrl.u32 %v7036_v60, 16  ;;  %v511_v34 = vrot.slane %v510_v11, 4  ;;  %v355_v43 = vshll.u32 %v7044_v16, 16  ;;  %v7087_v7 = vld [vmem:[%s6875_s23 + $0x44] sm:$0x1] }
  0x35   : > { %6291 = vmatpush3.bf16.msra.mxu1 %v6707_v30  ;;  %6339 = vmatpush3.bf16.msra.mxu0 %v6708_v37  ;;  %v6711_v30 = vld [vmem:[%s9520_s1 + $0x18] sm:$0xff]   ;;  %v5294_v33 = vcombine.low %v324_v3, %v334_v23  ;;  %v521_v35 = vrot.slane %v520_v12, 4  ;;  %v347_v37 = vrot.slane %v345_v17, 5  ;;  %v342_v41 = vor.u32 %v341_v28, %v338_v24  ;;  %v7099_v28 = vld [vmem:[%s6875_s23 + $0xa0] sm:$0xf] }
  0x36   : > { %6292 = vmatprep.subr.bf16.mxu1 %v6709_v52  ;;  %6340 = vmatprep.subr.bf16.mxu0 %v6710_v59  ;;  %v351_v42 = vrot.slane %v349_v29, 4  ;;  %v528_v45 = vshrl.u32 %v7048_v18, 16  ;;  %v516_v47 = vsel %vm6906_vm2, %v511_v34, %v515_v63  ;;  %v531_v49 = vshll.u32 %v7048_v18, 16  ;;  %v7090_v9 = vld [vmem:[%s6875_s23 + $0x9c] sm:$0xf]  ;;  %v6715_v29 = vld [vmem:[%s9520_s1 + $0x8] sm:$0xff]  }
  0x37   : > { %6259 = vmatmul.mubr.bf16.gmra.mxu0 %v5294_v33  ;;  %v526_v48 = vsel %vm6906_vm2, %v521_v35, %v525_v15  ;;  %v537_v50 = vshll.u32 %v7054_v31, 16  ;;  %v343_v58 = vrot.slane %v342_v41, 4  ;;  %v357_v63 = vrot.slane %v355_v43, 5  ;;  %v6716_v41 = vld [vmem:[%s9520_s1 + $0x88] sm:$0xff]  }
  0x38   : > { %v5302_v56 = vcombine.low %v516_v47, %v526_v48  ;;  %v352_v61 = vor.u32 %v351_v42, %v347_v37  ;;  %v533_v1 = vrot.slane %v531_v49, 5  ;;  %v541_v3 = vshrl.u32 %v7054_v31, 16 }
  0x39   : > { %6293 = vmatpush3.bf16.msra.mxu1 %v6709_v52  ;;  %6341 = vmatpush3.bf16.msra.mxu0 %v6710_v59  ;;  %v530_v52 = vrot.slane %v528_v45, 4  ;;  %v539_v2 = vrot.slane %v537_v50, 5  ;;  %v348_v10 = vsel %vm6906_vm2, %v343_v58, %v347_v37  ;;  %v547_v11 = vshll.u32 %v7064_v44, 16 }
  0x3a   : > { %6294 = vmatprep.subr.bf16.mxu1 %v6711_v30  ;;  %6342 = vmatprep.subr.bf16.mxu0 %v6712_v38  ;;  %v353_v59 = vrot.slane %v352_v61, 4  ;;  %v360_v12 = vshrl.u32 %v7077_v51, 16  ;;  %v543_v17 = vrot.slane %v541_v3, 4  ;;  %v363_v23 = vshll.u32 %v7077_v51, 16  ;;  %v7115_v61 = vld [vmem:[%s6875_s23 + $0xa4] sm:$0x1] }
  0x3b   : > { %6275 = vmatmul.mubr.bf16.gmra.mxu1 %v5302_v56  ;;  %v534_v15 = vor.u32 %v533_v1, %v530_v52  ;;  %v369_v24 = vshll.u32 %v7080_v54, 16  ;;  %v549_v34 = vrot.slane %v547_v11, 5  ;;  %v373_v37 = vshrl.u32 %v7080_v54, 16 }
  0x3c   : > { %v358_v33 = vsel %vm6906_vm2, %v353_v59, %v357_v63  ;;  %v362_v35 = vrot.slane %v360_v12, 4  ;;  %v544_v43 = vor.u32 %v543_v17, %v539_v2  ;;  %v365_v45 = vrot.slane %v363_v23, 5  ;;  %v7120_v59 = vld [vmem:[%s6875_s23 + $0x48] sm:$0xf]  ;;  %v7129_v17 = vld [vmem:[%s6875_s23 + $0x4c] sm:$0xf] }
  0x3d   : > { %6295 = vmatpush3.bf16.msra.mxu1 %v6711_v30  ;;  %6343 = vmatpush3.bf16.msra.mxu0 %v6712_v38  ;;  %v5295_v42 = vcombine.low %v348_v10, %v358_v33  ;;  %v535_v30 = vrot.slane %v534_v15, 4  ;;  %v371_v47 = vrot.slane %v369_v24, 5  ;;  %v375_v48 = vrot.slane %v373_v37, 4 }
  0x3e   : > { %6296 = vmatprep.subr.bf16.mxu1 %v6713_v46  ;;  %6344 = vmatprep.subr.bf16.mxu0 %v6714_v55  ;;  %v379_v49 = vshll.u32 %v7087_v7, 16  ;;  %v552_v50 = vshrl.u32 %v7090_v9, 16  ;;  %v545_v56 = vrot.slane %v544_v43, 4  ;;  %v366_v58 = vor.u32 %v365_v45, %v362_v35 }
  0x3f   : > { %6262 = vmatprep.mubr.bf16.mxu0 %v5295_v42  ;;  %v540_v38 = vsel %vm6906_vm2, %v535_v30, %v539_v2  ;;  %v555_v63 = vshll.u32 %v7090_v9, 16  ;;  %v376_v52 = vor.u32 %v375_v48, %v371_v47  ;;  %v561_v10 = vshll.u32 %v7099_v28, 16  ;;  %v6717_v2 = vld [vmem:[%s9520_s1] sm:$0xff]   ;;  %v7138_v30 = vld [vmem:[%s6875_s23 + $0x50] sm:$0x1] }
  0x40   : > { %v381_v1 = vrot.slane %v379_v49, 5  ;;  %v554_v3 = vrot.slane %v552_v50, 4  ;;  %v550_v11 = vsel %vm6906_vm2, %v545_v56, %v549_v34  ;;  %v367_v12 = vrot.slane %v366_v58, 4 }
  0x41   : > { %6297 = vmatpush3.bf16.msra.mxu1 %v6713_v46  ;;  %6345 = vmatpush3.bf16.msra.mxu0 %v6714_v55  ;;  %v557_v15 = vrot.slane %v555_v63, 5  ;;  %v565_v46 = vshrl.u32 %v7099_v28, 16  ;;  %v6718_v55 = vld [vmem:[%s9520_s1 + $0x80] sm:$0xff]   ;;  %v5303_v23 = vcombine.low %v540_v38, %v550_v11  ;;  %v377_v24 = vrot.slane %v376_v52, 4  ;;  %v7146_v38 = vld [vmem:[%s6875_s23 + $0xa8] sm:$0xf] }
  0x42   : > { %6298 = vmatprep.subr.bf16.mxu1 %v6715_v29  ;;  %6346 = vmatprep.subr.bf16.mxu0 %v6716_v41  ;;  %v563_v33 = vrot.slane %v561_v10, 5  ;;  %v571_v35 = vshll.u32 %v7115_v61, 16  ;;  %v372_v34 = vsel %vm6906_vm2, %v367_v12, %v371_v47  ;;  %v384_v43 = vshrl.u32 %v7120_v59, 16  ;;  %9549 = vst [vmem:[#allocation2_spill] sm:$0xff] %v7146_v38  ;;  %v7151_v47 = vld [vmem:[%s9520_s1 + $0xf8] sm:$0xff]  }
  0x43   : > { %v558_v37 = vor.u32 %v557_v15, %v554_v3  ;;  %v567_v42 = vrot.slane %v565_v46, 4  ;;  %6278 = vmatprep.mubr.bf16.mxu1 %v5303_v23  ;;  %v382_v45 = vsel %vm6906_vm2, %v377_v24, %v381_v1  ;;  %v387_v49 = vshll.u32 %v7120_v59, 16  ;;  %v7154_v52 = vld [vmem:[%s6875_s23 + $0xac] sm:$0xf]  ;;  %v7159_v1 = vld [vmem:[%s9520_s1 + $0x138] sm:$0xff]  }
  0x44   : > { %v573_v48 = vrot.slane %v571_v35, 5  ;;  %v393_v50 = vshll.u32 %v7129_v17, 16  ;;  %v386_v63 = vrot.slane %v384_v43, 4  ;;  %v397_v10 = vshrl.u32 %v7129_v17, 16  ;;  %v7164_v12 = vld [vmem:[%s6875_s23 + $0xb0] sm:$0x1] }
  0x45   : > { %6299 = vmatpush3.bf16.msra.mxu1 %v6715_v29  ;;  %6347 = vmatpush3.bf16.msra.mxu0 %v6716_v41  ;;  %v5296_v29 = vcombine.low %v372_v34, %v382_v45  ;;  %v559_v56 = vrot.slane %v558_v37, 4  ;;  %v568_v58 = vor.u32 %v567_v42, %v563_v33  ;;  %v389_v41 = vrot.slane %v387_v49, 5  ;;  %9550 = vst [vmem:[#allocation3_spill] sm:$0xff] %v7164_v12  ;;  %v7167_v15 = vld [vmem:[%s6875_s23 + $0x54] sm:$0xf] }
  0x46   : > { %6300 = vmatprep.subr.bf16.mxu1 %v6717_v2  ;;  %6348 = vmatprep.subr.bf16.mxu0 %v6718_v55  ;;  %v395_v3 = vrot.slane %v393_v50, 5  ;;  %v403_v11 = vshll.u32 %v7138_v30, 16  ;;  %v576_v24 = vshrl.u32 %v7146_v38, 16  ;;  %v579_v35 = vshll.u32 %v7146_v38, 16  ;;  %v7174_v34 = vld [vmem:[%s6875_s23 + $0x58] sm:$0xf] }
  0x47   : > { %6263 = vmatmul.mubr.bf16.gmra.mxu0 %v5296_v29  ;;  %v564_v46 = vsel %vm6906_vm2, %v559_v56, %v563_v33  ;;  %v569_v23 = vrot.slane %v568_v58, 4  ;;  %v390_v37 = vor.u32 %v389_v41, %v386_v63  ;;  %v399_v42 = vrot.slane %v397_v10, 4 }
  0x48   : > { %v405_v43 = vrot.slane %v403_v11, 5  ;;  %v585_v45 = vshll.u32 %v7154_v52, 16  ;;  %v578_v49 = vrot.slane %v576_v24, 4  ;;  %v581_v50 = vrot.slane %v579_v35, 5 }
  0x49   : > { %6301 = vmatpush3.bf16.msra.mxu1 %v6717_v2  ;;  %6349 = vmatpush3.bf16.msra.mxu0 %v6718_v55  ;;  %v574_v33 = vsel %vm6906_vm2, %v569_v23, %v573_v48  ;;  %v589_v29 = vshrl.u32 %v7154_v52, 16  ;;  %v391_v56 = vrot.slane %v390_v37, 4  ;;  %v400_v58 = vor.u32 %v399_v42, %v395_v3  ;;  %v7183_v55 = vld [vmem:[%s6875_s23 + $0x5c] sm:$0x1]  ;;  %v7188_v48 = vld [vmem:[%s6875_s23 + $0xb4] sm:$0xf] }
  0x4a   : > { %6382 = vmatprep.subr.bf16.mxu1 %v7151_v47  ;;  %6430 = vmatprep.subr.bf16.mxu0 %v7159_v1  ;;  %v5304_v2 = vcombine.low %v564_v46, %v574_v33  ;;  %v587_v63 = vrot.slane %v585_v45, 5  ;;  %v582_v41 = vor.u32 %v581_v50, %v578_v49  ;;  %v595_v11 = vshll.u32 %v7164_v12, 16  ;;  %9551 = vst [vmem:[#allocation4_spill] sm:$0xff] %v7188_v48  ;;  %v7195_v37 = vld [vmem:[%s6875_s23 + $0xb8] sm:$0xf] }
  0x4b   : > { %v591_v10 = vrot.slane %v589_v29, 4  ;;  %v408_v21 = vshrl.u32 %v7167_v15, 16  ;;  %v396_v23 = vsel %vm6906_vm2, %v391_v56, %v395_v3  ;;  %v401_v24 = vrot.slane %v400_v58, 4  ;;  %9552 = vst [vmem:[#allocation5_spill] sm:$0xff] %v7195_v37  ;;  %v7201_v3 = vld [vmem:[%s6875_s23 + $0xbc] sm:$0x1] }
  0x4c   : > { %6279 = vmatmul.mubr.bf16.gmra.mxu1 %v5304_v2  ;;  %v411_v46 = vshll.u32 %v7167_v15, 16  ;;  %v417_v35 = vshll.u32 %v7174_v34, 16  ;;  %v583_v42 = vrot.slane %v582_v41, 4  ;;  %v597_v33 = vrot.slane %v595_v11, 5  ;;  %9553 = vst [vmem:[#allocation6_spill] sm:$0xff] %v7201_v3 }
  0x4d   : > { %v592_v45 = vor.u32 %v591_v10, %v587_v63  ;;  %v410_v49 = vrot.slane %v408_v21, 4  ;;  %v406_v50 = vsel %vm6906_vm2, %v401_v24, %v405_v43  ;;  %v421_v62 = vshrl.u32 %v7174_v34, 16  ;;  %v1218_v10 = vld [vmem:[%s6875_s23] sm:$0xe] }
  0x4e   : > { %v413_v29 = vrot.slane %v411_v46, 5  ;;  %v419_v2 = vrot.slane %v417_v35, 5  ;;  %v5297_v56 = vcombine.low %v396_v23, %v406_v50  ;;  %v588_v58 = vsel %vm6906_vm2, %v583_v42, %v587_v63 }
  0x4f   : > { %v593_v20 = vrot.slane %v592_v45, 4  ;;  %v427_v41 = vshll.u32 %v7183_v55, 16  ;;  %v423_v21 = vrot.slane %v421_v62, 4  ;;  %v600_v12 = vshrl.u32 %v7188_v48, 16 }
  0x50   : > { %v414_v11 = vor.u32 %v413_v29, %v410_v49  ;;  %v603_v43 = vshll.u32 %v7188_v48, 16  ;;  %6266 = vmatprep.mubr.bf16.mxu0 %v5297_v56  ;;  %v609_v46 = vshll.u32 %v7195_v37, 16  ;;  %v613_v63 = vshrl.u32 %v7195_v37, 16  ;;  %v1219_v49 = vld [vmem:[%s6875_s23 + $0xc] sm:$0xe] }
  0x51   : > { %v598_v24 = vsel %vm6906_vm2, %v593_v20, %v597_v33  ;;  %v429_v23 = vrot.slane %v427_v41, 5  ;;  %v424_v45 = vor.u32 %v423_v21, %v419_v2  ;;  %v602_v50 = vrot.slane %v600_v12, 4  ;;  %v1220_v20 = vld [vmem:[%s6875_s23 + $0x18] sm:$0xe] }
  0x52   : > { %v5305_v35 = vcombine.low %v588_v58, %v598_v24  ;;  %v415_v42 = vrot.slane %v414_v11, 4  ;;  %v605_v62 = vrot.slane %v603_v43, 5  ;;  %v611_v29 = vrot.slane %v609_v46, 5 }
  0x53   : > { %v615_v38 = vrot.slane %v613_v63, 4  ;;  %v619_v48 = vshll.u32 %v7201_v3, 16  ;;  %v425_v58 = vrot.slane %v424_v45, 4  ;;  %v5339_v41 = vrot.slane %v1218_v10, 9 }
  0x54   : > { %6282 = vmatprep.mubr.bf16.mxu1 %v5305_v35  ;;  %v420_v33 = vsel %vm6906_vm2, %v415_v42, %v419_v2  ;;  %v1271_v12 = vrot.slane %v6884_v5, 5  ;;  %v606_v11 = vor.u32 %v605_v62, %v602_v50  ;;  %v5340_v24 = vrot.slane %v1219_v49, 9 }
  0x55   : > { %v616_v21 = vor.u32 %v615_v38, %v611_v29  ;;  %v621_v43 = vrot.slane %v619_v48, 5  ;;  %v430_v46 = vsel %vm6906_vm2, %v425_v58, %v429_v23  ;;  %v1278_v35 = vrot.slane %v6911_v32, 5 }
  0x56   : > { %v1272_v63 = vsel %vm7217_vm5, %v5339_v41, %v1271_v12  ;;  %v1273_v3 = vrot.slane %v1271_v12, 4  ;;  %v5298_v37 = vcombine.low %v420_v33, %v430_v46  ;;  %v607_v2 = vrot.slane %v606_v11, 4  ;;  %v1222_v12 = vld [vmem:[%s6875_s23 + $0x30] sm:$0xe]  ;;  %v1224_v46 = vld [vmem:[%s6875_s23 + $0x48] sm:$0xe] }
  0x57   : > { %v617_v42 = vrot.slane %v616_v21, 4  ;;  %v5315_v10 = vcombine.low %v6881_v4, %v6884_v5  ;;  %v9556_v38 = vrot.slane %v6887_v6, 5  ;;  %v1280_v45 = vrot.slane %v1278_v35, 4 }
  0x58   : > { %v5341_v23 = vrot.slane %v1220_v20, 9  ;;  %6267 = vmatmul.mubr.bf16.gmra.mxu0 %v5298_v37  ;;  %v612_v50 = vsel %vm6906_vm2, %v607_v2, %v611_v29  ;;  %v1285_v33 = vrot.slane %v6948_v19, 5  ;;  %v1279_v4 = vsel %vm7217_vm5, %v5340_v24, %v1278_v35  ;;  %v1223_v24 = vld [vmem:[%s6875_s23 + $0x3c] sm:$0xe] }
  0x59   : > { %v1275_v48 = vsel %vm7217_vm5, %v1273_v3, %v9556_v38  ;;  %v622_v49 = vsel %vm6906_vm2, %v617_v42, %v621_v43  ;;  %v9557_v5 = vrot.slane %v6917_v40, 5  ;;  %v1288_v37 = vrot.slane %v6953_v25, 5  ;;  %v1221_v3 = vld [vmem:[%s6875_s23 + $0x24] sm:$0xe]  ;;  %v6726_v25 = vld [vmem:[%s9520_s1 + $0x130] sm:$0xff]  }
  0x5a   : > { %v5371_v62 = vcombine.low %v1272_v63, %v1275_v48  ;;  %v5306_v58 = vcombine.low %v612_v50, %v622_v49  ;;  %v1286_v29 = vsel %vm7217_vm5, %v5341_v23, %v1285_v33  ;;  %v1287_v20 = vrot.slane %v1285_v33, 4  ;;  %v6725_v23 = vld [vmem:[%s9520_s1 + $0xf0] sm:$0xff]  }
  0x5b   : > { %v1282_v6 = vsel %vm7217_vm5, %v1280_v45, %v9557_v5  ;;  %v1292_v41 = vrot.slane %v6989_v0, 5  ;;  %v5342_v21 = vrot.slane %v1221_v3, 9  ;;  %v1299_v43 = vrot.slane %v7036_v60, 5  ;;  %v7292_v3 = vld [vmem:[%s6875_s23 + $0x68] sm:$0x1] }
  0x5c   : > { %6350 = vmatprep.mubr.bf16.mxu0 %v5371_v62  ;;  %6283 = vmatmul.mubr.bf16.gmra.mxu1 %v5306_v58  ;;  %v5372_v11 = vcombine.low %v1279_v4, %v1282_v6  ;;  %v1289_v40 = vsel %vm7217_vm5, %v1287_v20, %v1288_v37  ;;  %v1295_v2 = vrot.slane %v6992_v8, 5  ;;  %v5343_v42 = vrot.slane %v1222_v12, 9  ;;  %v1225_v37 = vld [vmem:[%s6875_s23 + $0x54] sm:$0xe]  ;;  %v7316_v12 = vld [vmem:[%s6875_s23 + $0x60] sm:$0xe] }
  0x5d   : > { %6302 = vmatprep.mubr.bf16.mxu1 %v5315_v10  ;;  %v5373_v63 = vcombine.low %v1286_v29, %v1289_v40  ;;  %v1294_v35 = vrot.slane %v1292_v41, 4  ;;  %v1301_v38 = vrot.slane %v1299_v43, 4  ;;  %v1302_v10 = vrot.slane %v7044_v16, 5 }
  0x5e   : > { %v1306_v48 = vrot.slane %v7080_v54, 5  ;;  %v5317_v45 = vcombine.low %v6940_v14, %v6948_v19  ;;  %v1313_v50 = vrot.slane %v7129_v17, 5  ;;  %v5344_v49 = vrot.slane %v1223_v24, 9  ;;  %v6734_v24 = vld [vmem:[%s9520_s1 + $0x120] sm:$0xff]  }
  0x5f   : > { %v1309_v8 = vrot.slane %v7087_v7, 5  ;;  %v5345_v33 = vrot.slane %v1224_v46, 9  ;;  %v1293_v14 = vsel %vm7217_vm5, %v5342_v21, %v1292_v41  ;;  %v1296_v19 = vsel %vm7217_vm5, %v1294_v35, %v1295_v2  ;;  %v7328_v46 = vld [vmem:[%s6875_s23 + $0x78] sm:$0xe]  ;;  %v6733_v2 = vld [vmem:[%s9520_s1 + $0xe0] sm:$0xff]  }
  0x60   : > { %6351 = vmatmul.mubr.bf16.vlgmr.msra.gmra.mxu0 %v5372_v11  ;;  %v1308_v62 = vrot.slane %v1306_v48, 4  ;;  %v1315_v16 = vrot.slane %v1313_v50, 4  ;;  %v1316_v58 = vrot.slane %v7138_v30, 5  ;;  %v1300_v4 = vsel %vm7217_vm5, %v5343_v42, %v1299_v43  ;;  %v7319_v11 = vld [vmem:[%s6875_s23 + $0x6c] sm:$0xe] }
  0x61   : > { %6431 = vmatpush3.bf16.msra.mxu0 %v7159_v1  ;;  %6354 = vmatprep.mubr.bf16.mxu0 %v5373_v63  ;;  %v1303_v7 = vsel %vm7217_vm5, %v1301_v38, %v1302_v10  ;;  %v6730_v1 = vld [vmem:[%s9520_s1 + $0x128] sm:$0xff]   ;;  %v1320_v5 = vrot.slane %v7174_v34, 5  ;;  %v9558_v6 = vcombine.low %v6902_v26, %v6911_v32  ;;  %v5318_v30 = vcombine.low %v6980_v57, %v6989_v0  ;;  %v1229_v63 = vld [vmem:[%s6875_s23 + $0x84] sm:$0xe]  ;;  %v1230_v42 = vld [vmem:[%s6875_s23 + $0x90] sm:$0xe] }
  0x62   : > { %6432 = vmatprep.subr.bf16.mxu0 %v6726_v25  ;;  %v1330_v29 = vrot.slane %v7292_v3, 5  ;;  %v5374_v20 = vcombine.low %v1293_v14, %v1296_v19  ;;  %v7298_v41 = vsel %vm7217_vm5, %v5344_v49, %v1306_v48  ;;  %v7302_v26 = vsel %vm7217_vm5, %v1308_v62, %v1309_v8  ;;  %v6729_v32 = vld [vmem:[%s9520_s1 + $0xe8] sm:$0xff]   ;;  %v7347_v48 = vld [vmem:[%s6875_s23 + $0x64] sm:$0xf]  ;;  %v1231_v49 = vld [vmem:[%s6875_s23 + $0x9c] sm:$0xe] }
  0x63   : > { %v5375_v57 = vcombine.low %v1300_v4, %v1303_v7  ;;  %v7309_v0 = vsel %vm7217_vm5, %v5345_v33, %v1313_v50  ;;  %v5319_v40 = vcombine.low %v7027_v53, %v7036_v60  ;;  %v5346_v21 = vrot.slane %v1225_v37, 9  ;;  %v7369_v4 = vld [vmem:[%s6875_s23 + $0x74] sm:$0x1] }
  0x64   : > { %6303 = vmatmul.mubr.bf16.vlgmr.msra.gmra.mxu1 %v9558_v6  ;;  %v1323_v43 = vrot.slane %v7183_v55, 5  ;;  %v5320_v35 = vcombine.low %v7077_v51, %v7080_v54  ;;  %v5376_v53 = vcombine.low %v7298_v41, %v7302_v26  ;;  %v5321_v60 = vcombine.low %v7120_v59, %v7129_v17  ;;  %v6819_v54 = vld [vmem:[%s6875_s23 + $0x80] sm:$0x1] }
  0x65   : > { %6383 = vmatpush3.bf16.msra.mxu1 %v7151_v47  ;;  %6306 = vmatprep.mubr.bf16.mxu1 %v5317_v45  ;;  %v7313_v47 = vsel %vm7217_vm5, %v1315_v16, %v1316_v58  ;;  %v5322_v55 = vcombine.low %v7167_v15, %v7174_v34  ;;  %v5347_v10 = vrot.slane %v7316_v12, 9  ;;  %v1327_v45 = vrot.slane %v7347_v48, 5  ;;  %v7365_v16 = vld [vmem:[%s6875_s23 + $0x70] sm:$0xf]  ;;  %v6820_v17 = vld [vmem:[%s6875_s23 + $0x60] sm:$0xf] }
  0x66   : > { %6384 = vmatprep.subr.bf16.mxu1 %v6725_v23  ;;  %6433 = vmatpush3.bf16.msra.mxu0 %v6726_v25  ;;  %v1322_v25 = vrot.slane %v1320_v5, 4  ;;  %v5377_v38 = vcombine.low %v7309_v0, %v7313_v47  ;;  %v5348_v62 = vrot.slane %v7319_v11, 9  ;;  %v1348_v8 = vrot.slane %v7003_v22, 5  ;;  %v1232_v0 = vld [vmem:[%s6875_s23 + $0xa8] sm:$0xe]  ;;  %v7549_v15 = vld [vmem:[%s9520_s1 + $0x1b8] sm:$0xff]  }
  0x67   : > { %6434 = vmatprep.subr.bf16.mxu0 %v6730_v1  ;;  %v1351_v33 = vrot.slane %v7012_v36, 5  ;;  %v7358_v14 = vsel %vm7217_vm5, %v5346_v21, %v1320_v5  ;;  %v1334_v58 = vrot.slane %v7365_v16, 5  ;;  %v1337_v7 = vrot.slane %v7369_v4, 5  ;;  %v6737_v36 = vld [vmem:[%s9520_s1 + $0xd8] sm:$0xff]  }
  0x68   : > { %6355 = vmatmul.mubr.bf16.gmra.mxu0 %v5374_v20  ;;  %v7362_v19 = vsel %vm7217_vm5, %v1322_v25, %v1323_v43  ;;  %v5349_v5 = vrot.slane %v7328_v46, 9  ;;  %v1350_v37 = vrot.slane %v1348_v8, 4  ;;  %v5351_v41 = vrot.slane %v1230_v42, 9  ;;  %v5467_v42 = vld [vmem:[%s6875_s23 + $0xc] sm:$0xf] }
  0x69   : > { %6385 = vmatpush3.bf16.msra.mxu1 %v6725_v23  ;;  %6358 = vmatprep.mubr.bf16.mxu0 %v5375_v57  ;;  %v5350_v23 = vrot.slane %v1229_v63, 9  ;;  %v1355_v26 = vrot.slane %v7054_v31, 5  ;;  %v1358_v57 = vrot.slane %v7064_v44, 5  ;;  %v1341_v47 = vrot.slane %v6962_v39, 5 }
  0x6a   : > { %6386 = vmatprep.subr.bf16.mxu1 %v6729_v32  ;;  %6435 = vmatpush3.bf16.msra.mxu0 %v6730_v1  ;;  %v6738_v1 = vld [vmem:[%s9520_s1 + $0x118] sm:$0xff]   ;;  %v7393_v21 = vsel %vm7217_vm5, %v1350_v37, %v1351_v33  ;;  %v1362_v63 = vrot.slane %v7099_v28, 5  ;;  %v5353_v33 = vrot.slane %v1232_v0, 9  ;;  %v1369_v37 = vrot.slane %v7154_v52, 5  ;;  %v6741_v0 = vld [vmem:[%s9520_s1 + $0xd0] sm:$0xff]  }
  0x6b   : > { %6436 = vmatprep.subr.bf16.mxu0 %v6734_v24  ;;  %v7381_v6 = vsel %vm7217_vm5, %v5350_v23, %v1348_v8  ;;  %v7401_v44 = vsel %vm7217_vm5, %v5351_v41, %v1355_v26  ;;  %v1357_v43 = vrot.slane %v1355_v26, 4  ;;  %v6742_v23 = vld [vmem:[%s9520_s1 + $0x110] sm:$0xff]   ;;  %v1365_v8 = vrot.slane %v7115_v61, 5  ;;  %v9560_v61 = vld [vmem:[#allocation3_spill] sm:$0xff] }
  0x6c   : > { %6307 = vmatmul.mubr.bf16.gmra.mxu1 %v5318_v30  ;;  %v1329_v30 = vrot.slane %v1327_v45, 4  ;;  %v1364_v20 = vrot.slane %v1362_v63, 4  ;;  %v1372_v50 = vrot.slane %v9560_v61, 5  ;;  %v1328_v61 = vsel %vm7217_vm5, %v5347_v10, %v1327_v45  ;;  %v5470_v45 = vld [vmem:[%s6875_s23 + $0x18] sm:$0xf] }
  0x6d   : > { %6310 = vmatprep.mubr.bf16.mxu1 %v5319_v40  ;;  %6387 = vmatpush3.bf16.msra.mxu1 %v6729_v32  ;;  %v5352_v40 = vrot.slane %v1231_v49, 9  ;;  %v7413_v32 = vld [vmem:[%s6875_s23 + $0x10] sm:$0xf]  ;;  %v7417_v41 = vsel %vm7217_vm5, %v1357_v43, %v1358_v57  ;;  %v1371_v57 = vrot.slane %v1369_v37, 4  ;;  %v2139_v12 = vshrl.u32 %v5467_v42, 16 }
  0x6e   : > { %6388 = vmatprep.subr.bf16.mxu1 %v6733_v2  ;;  %6437 = vmatpush3.bf16.msra.mxu0 %v6734_v24  ;;  %v9559_v24 = vld [vmem:[#allocation2_spill] sm:$0xff]  ;;  %v9562_v43 = vld [vmem:[#allocation4_spill] sm:$0xff]  ;;  %v2142_v10 = vshll.u32 %v5467_v42, 16  ;;  %v1336_v51 = vrot.slane %v1334_v58, 4  ;;  %v2148_v59 = vshll.u32 %v7413_v32, 16  ;;  %v1342_v4 = vsel %vm7217_vm5, %v5349_v5, %v1341_v47 }
  0x6f   : > { %6438 = vmatprep.subr.bf16.mxu0 %v6738_v1  ;;  %v7421_v26 = vsel %vm7217_vm5, %v5352_v40, %v1362_v63  ;;  %v9561_v40 = vld [vmem:[#allocation5_spill] sm:$0xff]  ;;  %v7487_v42 = vld [vmem:[%s6875_s23 + $0x14] sm:$0x1]  ;;  %v2141_v63 = vrot.slane %v2139_v12, 4  ;;  %v9564_v5 = vld [vmem:[#allocation6_spill] sm:$0xff] }
  0x70   : > { %6359 = vmatmul.mubr.bf16.gmra.mxu0 %v5376_v53  ;;  %v2144_v49 = vrot.slane %v2142_v10, 5  ;;  %v5473_v53 = vld [vmem:[%s6875_s23 + $0x24] sm:$0xf]  ;;  %v1338_v11 = vsel %vm7217_vm5, %v1336_v51, %v1337_v7 }
  0x71   : > { %6389 = vmatpush3.bf16.msra.mxu1 %v6733_v2  ;;  %6362 = vmatprep.mubr.bf16.mxu0 %v5377_v38  ;;  %v7431_v2 = vsel %vm7217_vm5, %v5353_v33, %v1369_v37  ;;  %v5378_v38 = vcombine.low %v7358_v14, %v7362_v19  ;;  %v1331_v33 = vsel %vm7217_vm5, %v1329_v30, %v1330_v29  ;;  %v6746_v14 = vld [vmem:[%s9520_s1 + $0x108] sm:$0xff]   ;;  %v6750_v30 = vld [vmem:[%s9520_s1 + $0x100] sm:$0xff]   ;;  %v7506_v19 = vrot.slane %v2148_v59, 5 }
  0x72   : > { %6390 = vmatprep.subr.bf16.mxu1 %v6737_v36  ;;  %6439 = vmatpush3.bf16.msra.mxu0 %v6738_v1  ;;  %v7449_v37 = vsel %vm7217_vm5, %v1364_v20, %v1365_v8  ;;  %v7461_v29 = vsel %vm7217_vm5, %v1371_v57, %v1372_v50  ;;  %v6745_v50 = vld [vmem:[%s9520_s1 + $0xc8] sm:$0xff]   ;;  %v7476_v1 = vld [vmem:[%s6875_s23 + $0xb4] sm:$0xe]  ;;  %v5379_v20 = vcombine.low %v1328_v61, %v1331_v33  ;;  %v2152_v8 = vshrl.u32 %v7413_v32, 16  ;;  %v7504_v61 = vld [vmem:[%s6875_s23 + $0x1c] sm:$0xf] }
  0x73   : > { %6440 = vmatprep.subr.bf16.mxu0 %v6742_v23  ;;  %v7491_v57 = vld [vmem:[%s6875_s23 + $0x6c] sm:$0xf]  ;;  %v2163_v33 = vshrl.u32 %v5470_v45, 16  ;;  %v2172_v51 = vshll.u32 %v7504_v61, 16  ;;  %v2176_v39 = vshrl.u32 %v7504_v61, 16  ;;  %v2187_v59 = vshrl.u32 %v5473_v53, 16 }
  0x74   : > { %6311 = vmatmul.mubr.bf16.gmra.mxu1 %v5320_v35  ;;  %v1344_v35 = vrot.slane %v6819_v54, 5  ;;  %v5324_v54 = vcombine.low %v7491_v57, %v7365_v16  ;;  %v2154_v3 = vrot.slane %v2152_v8, 4  ;;  %v2190_v46 = vshll.u32 %v5473_v53, 16  ;;  %v6823_v8 = vld [vmem:[%s6875_s23 + $0x7c] sm:$0xf] }
  0x75   : > { %6314 = vmatprep.mubr.bf16.mxu1 %v5321_v60  ;;  %6391 = vmatpush3.bf16.msra.mxu1 %v6737_v36  ;;  %v5323_v60 = vcombine.low %v6820_v17, %v7347_v48  ;;  %v1343_v36 = vrot.slane %v1341_v47, 4  ;;  %v7501_v48 = vsel %vm7217_vm5, %v5348_v62, %v1334_v58  ;;  %v2166_v17 = vshll.u32 %v5470_v45, 16  ;;  %v6749_v58 = vld [vmem:[%s9520_s1 + $0xc0] sm:$0xff]   ;;  %v7531_v45 = vld [vmem:[%s6875_s23 + $0x28] sm:$0xf] }
  0x76   : > { %6392 = vmatprep.subr.bf16.mxu1 %v6741_v0  ;;  %6441 = vmatpush3.bf16.msra.mxu0 %v6742_v23  ;;  %v9532_v62 = vrot.slane %v9561_v40, 5  ;;  %v7518_v23 = vld [vmem:[%s6875_s23 + $0x20] sm:$0x1]  ;;  %v2165_v12 = vrot.slane %v2163_v33, 4  ;;  %9563 = vst [vmem:[#allocation2_spill] sm:$0xff] %v7531_v45  ;;  %v5380_v34 = vcombine.low %v7501_v48, %v1338_v11  ;;  %v2196_v53 = vshll.u32 %v7531_v45, 16 }
  0x77   : > { %6442 = vmatprep.subr.bf16.mxu0 %v6746_v14  ;;  %v2168_v10 = vrot.slane %v2166_v17, 5  ;;  %v1345_v7 = vsel %vm7217_vm5, %v1343_v36, %v1344_v35  ;;  %v2145_v35 = vor.u32 %v2144_v49, %v2141_v63  ;;  %v7544_v36 = vld [vmem:[%s9520_s1 + $0x178] sm:$0xff]   ;;  %v5476_v63 = vld [vmem:[%s6875_s23 + $0x30] sm:$0xf]  ;;  %v7565_v48 = vld [vmem:[%s6875_s23 + $0x34] sm:$0xf] }
  0x78   : > { %6363 = vmatmul.mubr.bf16.gmra.mxu0 %v5378_v38  ;;  %v2158_v38 = vshll.u32 %v7487_v42, 16  ;;  %v5381_v17 = vcombine.low %v1342_v4, %v1345_v7  ;;  %9566 = vst [vmem:[#allocation5_spill] sm:$0xff] %v7565_v48  ;;  %v7567_v11 = vrot.slane %v2172_v51, 5  ;;  %v2192_v47 = vrot.slane %v2190_v46, 5  ;;  %v7586_v46 = vld [vmem:[%s6875_s23 + $0x40] sm:$0xf] }
  0x79   : > { %6393 = vmatpush3.bf16.msra.mxu1 %v6741_v0  ;;  %6366 = vmatprep.mubr.bf16.mxu0 %v5379_v20  ;;  %v2155_v20 = vor.u32 %v2154_v3, %v7506_v19  ;;  %v2169_v49 = vor.u32 %v2168_v10, %v2165_v12  ;;  %v6822_v3 = vld [vmem:[%s6875_s23 + $0x78] sm:$0xf]  ;;  %v2178_v12 = vrot.slane %v2176_v39, 4  ;;  %v2189_v10 = vrot.slane %v2187_v59, 4  ;;  %9567 = vst [vmem:[#allocation4_spill] sm:$0xff] %v7586_v46 }
  0x7a   : > { %6394 = vmatprep.subr.bf16.mxu1 %v6745_v50  ;;  %6443 = vmatpush3.bf16.msra.mxu0 %v6746_v14  ;;  %v2182_v14 = vshll.u32 %v7518_v23, 16  ;;  %v5325_v33 = vcombine.low %v6822_v3, %v6823_v8  ;;  %v7558_v25 = vrot.slane %v2158_v38, 5  ;;  %v7570_v0 = vld [vmem:[%s6875_s23 + $0x38] sm:$0x1]  ;;  %v7572_v4 = vrot.slane %v2145_v35, 4 }
  0x7b   : > { %6444 = vmatprep.subr.bf16.mxu0 %v6750_v30  ;;  %v7574_v7 = vrot.slane %v2155_v20, 4  ;;  %v2211_v3 = vshrl.u32 %v5476_v63, 16  ;;  %v5479_v8 = vld [vmem:[%s6875_s23 + $0x3c] sm:$0xf]  ;;  %v7582_v51 = vrot.slane %v2196_v53, 5  ;;  %v2214_v39 = vshll.u32 %v5476_v63, 16 }
  0x7c   : > { %6315 = vmatmul.mubr.bf16.gmra.mxu1 %v5322_v55  ;;  %v1378_v55 = vrot.slane %v9532_v62, 4  ;;  %v7576_v38 = vrot.slane %v2182_v14, 5  ;;  %v2220_v59 = vshll.u32 %v7565_v48, 16  ;;  %v2224_v20 = vshrl.u32 %v7565_v48, 16 }
  0x7d   : > { %6318 = vmatprep.mubr.bf16.mxu1 %v5323_v60  ;;  %6395 = vmatpush3.bf16.msra.mxu1 %v6745_v50  ;;  %v7561_v60 = vld [vmem:[%s6875_s23 + $0x2c] sm:$0x1]  ;;  %v2200_v50 = vshrl.u32 %v7531_v45, 16  ;;  %v2179_v14 = vor.u32 %v2178_v12, %v7567_v11  ;;  %v2213_v53 = vrot.slane %v2211_v3, 4  ;;  %v2216_v63 = vrot.slane %v2214_v39, 5 }
  0x7e   : > { %6396 = vmatprep.subr.bf16.mxu1 %v6749_v58  ;;  %9565 = vst [vmem:[#allocation3_spill] sm:$0xff] %v7561_v60  ;;  %6445 = vmatpush3.bf16.msra.mxu0 %v6750_v30  ;;  %v7580_v30 = vrot.slane %v2169_v49, 4  ;;  %v2235_v49 = vshrl.u32 %v5479_v8, 16  ;;  %v2238_v62 = vshll.u32 %v5479_v8, 16  ;;  %v2226_v48 = vrot.slane %v2224_v20, 4 }
  0x7f   : > { %6526 = vmatprep.subr.bf16.mxu0 %v7549_v15  ;;  %v2202_v35 = vrot.slane %v2200_v50, 4  ;;  %v7596_v50 = vrot.slane %v2220_v59, 5  ;;  %v7599_v45 = vld [vmem:[%s6875_s23 + $0x44] sm:$0x1]  ;;  %v2248_v12 = vshrl.u32 %v7586_v46, 16  ;;  %v9568_v16 = vrot.slane %v9561_v40, 5 }
  0x80   : > { %6367 = vmatmul.mubr.bf16.gmra.mxu0 %v5380_v34  ;;  %v2206_v34 = vshll.u32 %v7561_v60, 16  ;;  %v9569_v57 = vrot.slane %v7476_v1, 9  ;;  %v7620_v39 = vld [vmem:[%s6875_s23 + $0x4c] sm:$0xf]  ;;  %v2237_v59 = vrot.slane %v2235_v49, 4  ;;  %v2240_v20 = vrot.slane %v2238_v62, 5 }
  0x81   : > { %6397 = vmatpush3.bf16.msra.mxu1 %v6749_v58  ;;  %6370 = vmatprep.mubr.bf16.mxu0 %v5381_v17  ;;  %v2193_v58 = vor.u32 %v2192_v47, %v2189_v10  ;;  %v2230_v17 = vshll.u32 %v7570_v0, 16  ;;  %v2244_v47 = vshll.u32 %v7586_v46, 16  ;;  %v5482_v10 = vld [vmem:[%s6875_s23 + $0x48] sm:$0xf]  ;;  %v2203_v8 = vor.u32 %v2202_v35, %v7582_v51 }
  0x82   : > { %6478 = vmatprep.subr.bf16.mxu1 %v7544_v36  ;;  %v2250_v1 = vrot.slane %v2248_v12, 4  ;;  %v7624_v46 = vrot.slane %v2179_v14, 4  ;;  %v2151_v62 = vsel %vm6906_vm2, %v7572_v4, %v7506_v19  ;;  %v2161_v35 = vsel %vm6906_vm2, %v7574_v7, %v7558_v25  ;;  %v5485_v4 = vld [vmem:[%s6875_s23 + $0x54] sm:$0xf] }
  0x83   : > { %v7622_v60 = vrot.slane %v2244_v47, 5  ;;  %v2262_v14 = vshll.u32 %v5482_v10, 16  ;;  %v2254_v49 = vshll.u32 %v7599_v45, 16  ;;  %v2272_v19 = vshrl.u32 %v7620_v39, 16 }
  0x84   : > { %6319 = vmatmul.mubr.bf16.gmra.mxu1 %v5324_v54  ;;  %v7610_v54 = vsel %vm7217_vm5, %v9569_v57, %v9568_v16  ;;  %v7626_v16 = vrot.slane %v2193_v58, 4  ;;  %v7628_v57 = vrot.slane %v2206_v34, 5  ;;  %v2268_v58 = vshll.u32 %v7620_v39, 16 }
  0x85   : > { %6322 = vmatprep.mubr.bf16.mxu1 %v5325_v33  ;;  %v9570_v33 = vrot.slane %v9564_v5, 5  ;;  %v2259_v5 = vshrl.u32 %v5482_v10, 16  ;;  %v9572_v34 = vcombine.low %v7401_v44, %v7417_v41  ;;  %v7649_v47 = vrot.slane %v2203_v8, 4  ;;  %v7655_v10 = vld [vmem:[%s6875_s23 + $0x58] sm:$0xf] }
  0x86   : > { %v7651_v12 = vrot.slane %v2230_v17, 5  ;;  %v2241_v25 = vor.u32 %v2240_v20, %v2237_v59  ;;  %v2251_v7 = vor.u32 %v2250_v1, %v7622_v60  ;;  %v9573_v44 = vcombine.low %v6996_v13, %v7003_v22  ;;  %v7661_v41 = vld [vmem:[%s6875_s23 + $0x50] sm:$0x1] }
  0x87   : > { %v7616_v3 = vsel %vm7217_vm5, %v1378_v55, %v9570_v33  ;;  %v9571_v55 = vcombine.low %v7381_v6, %v7393_v21  ;;  %v2217_v6 = vor.u32 %v2216_v63, %v2213_v53  ;;  %v2227_v21 = vor.u32 %v2226_v48, %v7596_v50 }
  0x88   : > { %v2261_v48 = vrot.slane %v2259_v5, 4  ;;  %v2264_v53 = vrot.slane %v2262_v14, 5  ;;  %v7663_v63 = vrot.slane %v2268_v58, 5  ;;  %v2274_v17 = vrot.slane %v2272_v19, 4  ;;  %v5488_v5 = vld [vmem:[%s6875_s23 + $0x60] sm:$0xf] }
  0x89   : > { %6371 = vmatmul.mubr.bf16.gmra.mxu0 %v9571_v55  ;;  %v9574_v33 = vcombine.low %v7048_v18, %v7054_v31  ;;  %v2283_v8 = vshrl.u32 %v5485_v4, 16  ;;  %v2286_v59 = vshll.u32 %v5485_v4, 16  ;;  %v7668_v20 = vrot.slane %v2217_v6, 4  ;;  %v7685_v31 = vld [vmem:[%s6875_s23 + $0x64] sm:$0xf] }
  0x8a   : > { %6374 = vmatprep.mubr.bf16.mxu0 %v9572_v34  ;;  %v7670_v1 = vrot.slane %v2227_v21, 4  ;;  %v7672_v13 = vrot.slane %v2254_v49, 5  ;;  %v2292_v22 = vshll.u32 %v7655_v10, 16  ;;  %v5386_v55 = vcombine.low %v7610_v54, %v7616_v3  ;;  %v7681_v34 = vld [vmem:[%s6875_s23 + $0x5c] sm:$0x1] }
  0x8b   : > { %v5531_v14 = vcombine.low %v2151_v62, %v2161_v35  ;;  %v7678_v58 = vrot.slane %v2241_v25, 4  ;;  %v2296_v18 = vshrl.u32 %v7655_v10, 16  ;;  %v7687_v6 = vrot.slane %v2251_v7, 4 }
  0x8c   : > { %6323 = vmatmul.mubr.bf16.gmra.mxu1 %v9573_v44  ;;  %v2278_v21 = vshll.u32 %v7661_v41, 16  ;;  %v2307_v49 = vshrl.u32 %v5488_v5, 16  ;;  %v2310_v19 = vshll.u32 %v5488_v5, 16  ;;  %v9575_v4 = vcombine.low %v7421_v26, %v7449_v37 }
  0x8d   : > { %6326 = vmatprep.mubr.bf16.mxu1 %v9574_v33  ;;  %v2265_v54 = vor.u32 %v2264_v53, %v2261_v48  ;;  %v2275_v3 = vor.u32 %v2274_v17, %v7663_v63  ;;  %v2285_v62 = vrot.slane %v2283_v8, 4  ;;  %v2288_v35 = vrot.slane %v2286_v59, 5  ;;  %v7725_v8 = vld [vmem:[%s6875_s23 + $0x70] sm:$0xf] }
  0x8e   : > { %v9576_v25 = vcombine.low %v7431_v2, %v7461_v29  ;;  %v7697_v7 = vrot.slane %v2292_v22, 5  ;;  %v2298_v44 = vrot.slane %v2296_v18, 4  ;;  %v2302_v33 = vshll.u32 %v7681_v34, 16 }
  0x8f   : > { %v2316_v26 = vshll.u32 %v7685_v31, 16  ;;  %v2175_v37 = vsel %vm6906_vm2, %v7580_v30, %v7567_v11  ;;  %v2185_v2 = vsel %vm6906_vm2, %v7624_v46, %v7576_v38  ;;  %v2309_v29 = vrot.slane %v2307_v49, 4  ;;  %v5491_v46 = vld [vmem:[%s6875_s23 + $0x6c] sm:$0xf] }
  0x90   : > { %v2312_v48 = vrot.slane %v2310_v19, 5  ;;  %v9577_v53 = vcombine.low %v7090_v9, %v7099_v28  ;;  %v2199_v17 = vsel %vm6906_vm2, %v7626_v16, %v7582_v51  ;;  %v2209_v11 = vsel %vm6906_vm2, %v7649_v47, %v7628_v57  ;;  %v7733_v16 = vld [vmem:[%s6875_s23 + $0x68] sm:$0x1] }
  0x91   : > { %6375 = vmatmul.mubr.bf16.gmra.mxu0 %v9575_v4  ;;  %v7720_v30 = vrot.slane %v2278_v21, 5  ;;  %v2320_v38 = vshrl.u32 %v7685_v31, 16  ;;  %v9578_v9 = vcombine.low %v9559_v24, %v7154_v52  ;;  %v7730_v28 = vrot.slane %v2265_v54, 4  ;;  %v6751_v52 = vld [vmem:[%s6875_s23 + $0xc] sm:$0xff]  }
  0x92   : > { %6378 = vmatprep.mubr.bf16.mxu0 %v9576_v25  ;;  %v2289_v51 = vor.u32 %v2288_v35, %v2285_v62  ;;  %v2331_v59 = vshrl.u32 %v5491_v46, 16  ;;  %v2334_v57 = vshll.u32 %v5491_v46, 16  ;;  %v7735_v47 = vrot.slane %v2275_v3, 4  ;;  %v7746_v62 = vld [vmem:[%s6875_s23 + $0x74] sm:$0x1] }
  0x93   : > { %v2299_v22 = vor.u32 %v2298_v44, %v7697_v7  ;;  %v7738_v5 = vrot.slane %v2302_v33, 5  ;;  %v2340_v18 = vshll.u32 %v7725_v8, 16  ;;  %v2313_v24 = vor.u32 %v2312_v48, %v2309_v29  ;;  %v5494_v25 = vld [vmem:[%s6875_s23 + $0x78] sm:$0xf]  ;;  %v7750_v44 = vld [vmem:[%s6875_s23 + $0x7c] sm:$0xf] }
  0x94   : > { %6327 = vmatmul.mubr.bf16.gmra.mxu1 %v9577_v53  ;;  %v7742_v21 = vrot.slane %v2316_v26, 5  ;;  %v2322_v49 = vrot.slane %v2320_v38, 4  ;;  %v2344_v19 = vshrl.u32 %v7725_v8, 16  ;;  %v5532_v4 = vcombine.low %v2175_v37, %v2185_v2  ;;  %v7757_v26 = vld [vmem:[%s6875_s23 + $0x80] sm:$0x1] }
  0x95   : > { %6330 = vmatprep.mubr.bf16.mxu1 %v9578_v9  ;;  %v5533_v54 = vcombine.low %v2199_v17, %v2209_v11  ;;  %v2333_v3 = vrot.slane %v2331_v59, 4  ;;  %v2336_v35 = vrot.slane %v2334_v57, 5  ;;  %v7752_v33 = vrot.slane %v2289_v51, 4 }
  0x96   : > { %v7754_v53 = vrot.slane %v2340_v18, 5  ;;  %v2346_v29 = vrot.slane %v2344_v19, 4  ;;  %v2355_v48 = vshrl.u32 %v5494_v25, 16  ;;  %v2326_v37 = vshll.u32 %v7733_v16, 16  ;;  %v5497_v19 = vld [vmem:[%s6875_s23 + $0x84] sm:$0xf] }
  0x97   : > { %v2358_v2 = vshll.u32 %v5494_v25, 16  ;;  %v2364_v17 = vshll.u32 %v7750_v44, 16  ;;  %v2368_v11 = vshrl.u32 %v7750_v44, 16  ;;  %v7762_v38 = vrot.slane %v2299_v22, 4  ;;  %v6755_v25 = vld [vmem:[%s6875_s23 + $0x24] sm:$0xff]  }
  0x98   : > { %v7764_v46 = vrot.slane %v2313_v24, 4  ;;  %v2357_v9 = vrot.slane %v2355_v48, 4  ;;  %v9579_v51 = vcombine.low %v9562_v43, %v9561_v40  ;;  %v2223_v22 = vsel %vm6906_vm2, %v7668_v20, %v7596_v50 }
  0x99   : > { %6379 = vmatmul.mubr.bf16.gmra.mxu0 %v5386_v55  ;;  %v2323_v55 = vor.u32 %v2322_v49, %v7742_v21  ;;  %v2360_v59 = vrot.slane %v2358_v2, 5  ;;  %v7770_v57 = vrot.slane %v2364_v17, 5  ;;  %v2370_v18 = vrot.slane %v2368_v11, 4  ;;  %v7819_v17 = vld [vmem:[%s6875_s23 + $0x8c] sm:$0x1] }
  0x9a   : > { %6446 = vmatprep.mubr.bf16.mxu0 %v5531_v14  ;;  %v2337_v14 = vor.u32 %v2336_v35, %v2333_v3  ;;  %v2347_v24 = vor.u32 %v2346_v29, %v7754_v53  ;;  %v2350_v49 = vshll.u32 %v7746_v62, 16  ;;  %v2374_v40 = vshll.u32 %v7757_v26, 16  ;;  %v7793_v3 = vld [vmem:[%s6875_s23 + $0x88] sm:$0xf]  ;;  %v6752_v35 = vld [vmem:[%s6875_s23 + $0x18] sm:$0xff]  }
  0x9b   : > { %v2233_v43 = vsel %vm6906_vm2, %v7670_v1, %v7651_v12  ;;  %v2257_v50 = vsel %vm6906_vm2, %v7687_v6, %v7672_v13  ;;  %v2361_v20 = vor.u32 %v2360_v59, %v2357_v9  ;;  %v6758_v12 = vld [vmem:[%s9520_s1 + $0x1b0] sm:$0xff]   ;;  %v7800_v1 = vrot.slane %v2326_v37, 5  ;;  %v7824_v11 = vld [vmem:[%s9520_s1 + $0x1a8] sm:$0xff]  }
  0x9c   : > { %6331 = vmatmul.mubr.bf16.gmra.mxu1 %v9579_v51  ;;  %v2382_v29 = vshll.u32 %v5497_v19, 16  ;;  %v6757_v13 = vld [vmem:[%s9520_s1 + $0x170] sm:$0xff]   ;;  %v2271_v6 = vsel %vm6906_vm2, %v7730_v28, %v7663_v63  ;;  %v2281_v48 = vsel %vm6906_vm2, %v7735_v47, %v7720_v30  ;;  %v7814_v37 = vrot.slane %v2323_v55, 4 }
  0x9d   : > { %6398 = vmatprep.mubr.bf16.mxu1 %v6751_v52  ;;  %v2247_v52 = vsel %vm6906_vm2, %v7678_v58, %v7622_v60  ;;  %v2371_v60 = vor.u32 %v2370_v18, %v7770_v57  ;;  %v2379_v58 = vshrl.u32 %v5497_v19, 16  ;;  %v7816_v2 = vrot.slane %v2337_v14, 4  ;;  %v5500_v14 = vld [vmem:[%s6875_s23 + $0x90] sm:$0xf]  ;;  %v7847_v59 = vld [vmem:[%s6875_s23 + $0x94] sm:$0xf] }
  0x9e   : > { %v7826_v63 = vrot.slane %v2347_v24, 4  ;;  %v7828_v28 = vrot.slane %v2350_v49, 5  ;;  %v2388_v30 = vshll.u32 %v7793_v3, 16  ;;  %v2392_v47 = vshrl.u32 %v7793_v3, 16  ;;  %9580 = vst [vmem:[#allocation6_spill] sm:$0xff] %v7847_v59 }
  0x9f   : > { %v2305_v55 = vsel %vm6906_vm2, %v7762_v38, %v7738_v5  ;;  %v7841_v9 = vrot.slane %v2361_v20, 4  ;;  %v7843_v51 = vrot.slane %v2374_v40, 5  ;;  %v2384_v18 = vrot.slane %v2382_v29, 5  ;;  %v6761_v5 = vld [vmem:[%s9520_s1 + $0x168] sm:$0xff]  }
  0xa0   : > { %v2406_v38 = vshll.u32 %v5500_v14, 16  ;;  %v2412_v24 = vshll.u32 %v7847_v59, 16  ;;  %v2416_v49 = vshrl.u32 %v7847_v59, 16  ;;  %v5534_v40 = vcombine.low %v2223_v22, %v2233_v43 }
  0xa1   : > { %6447 = vmatmul.mubr.bf16.vlgmr.msra.gmra.mxu0 %v5532_v4  ;;  %v2295_v4 = vsel %vm6906_vm2, %v7752_v33, %v7697_v7  ;;  %v2398_v7 = vshll.u32 %v7819_v17, 16  ;;  %v2403_v33 = vshrl.u32 %v5500_v14, 16  ;;  %v5535_v20 = vcombine.low %v2247_v52, %v2257_v50 }
  0xa2   : > { %6527 = vmatpush3.bf16.msra.mxu0 %v7549_v15  ;;  %6450 = vmatprep.mubr.bf16.mxu0 %v5533_v54  ;;  %v7849_v15 = vrot.slane %v2371_v60, 4  ;;  %v2381_v54 = vrot.slane %v2379_v58, 4  ;;  %v7858_v19 = vrot.slane %v2388_v30, 5  ;;  %v6756_v60 = vld [vmem:[%s6875_s23 + $0x30] sm:$0xff]   ;;  %v6766_v58 = vld [vmem:[%s9520_s1 + $0x1a0] sm:$0xff]   ;;  %v2408_v14 = vrot.slane %v2406_v38, 5 }
  0xa3   : > { %6528 = vmatprep.subr.bf16.mxu0 %v6758_v12  ;;  %v2405_v29 = vrot.slane %v2403_v33, 4  ;;  %v2418_v22 = vrot.slane %v2416_v49, 4  ;;  %v7866_v43 = vcombine.low %v2271_v6, %v2281_v48  ;;  %v7869_v52 = vcombine.low %v2295_v4, %v2305_v55  ;;  %v5503_v30 = vld [vmem:[%s6875_s23 + $0x9c] sm:$0xf]  ;;  %v7891_v4 = vld [vmem:[%s6875_s23 + $0xa4] sm:$0x1] }
  0xa4   : > { %6399 = vmatmul.mubr.bf16.vlgmr.msra.gmra.mxu1 %v6752_v35  ;;  %v2394_v35 = vrot.slane %v2392_v47, 4  ;;  %v2385_v48 = vor.u32 %v2384_v18, %v2381_v54  ;;  %v7888_v47 = vld [vmem:[%s6875_s23 + $0xa0] sm:$0xf]  ;;  %9583 = vst [vmem:[#allocation9_spill] sm:$0xff] %v7891_v4  ;;  %v2427_v55 = vshrl.u32 %v5503_v30, 16  ;;  %v2430_v33 = vshll.u32 %v5503_v30, 16 }
  0xa5   : > { %6479 = vmatpush3.bf16.msra.mxu1 %v7544_v36  ;;  %6402 = vmatprep.mubr.bf16.mxu1 %v6755_v25  ;;  %v7864_v36 = vrot.slane %v2412_v24, 5  ;;  %v2329_v25 = vsel %vm6906_vm2, %v7814_v37, %v7800_v1  ;;  %9582 = vst [vmem:[#allocation8_spill] sm:$0xff] %v7888_v47  ;;  %v6759_v38 = vld [vmem:[%s6875_s23 + $0x3c] sm:$0xff]   ;;  %v2436_v37 = vshll.u32 %v7888_v47, 16  ;;  %v2440_v24 = vshrl.u32 %v7888_v47, 16 }
  0xa6   : > { %6480 = vmatprep.subr.bf16.mxu1 %v6757_v13  ;;  %6529 = vmatpush3.bf16.msra.mxu0 %v6758_v12  ;;  %v7880_v12 = vld [vmem:[%s6875_s23 + $0x98] sm:$0x1]  ;;  %v2395_v1 = vor.u32 %v2394_v35, %v7858_v19  ;;  %v6765_v54 = vld [vmem:[%s9520_s1 + $0x160] sm:$0xff]   ;;  %v2409_v18 = vor.u32 %v2408_v14, %v2405_v29  ;;  %v2429_v30 = vrot.slane %v2427_v55, 4  ;;  %v2432_v49 = vrot.slane %v2430_v33, 5 }
  0xa7   : > { %6530 = vmatprep.subr.bf16.mxu0 %v7824_v11  ;;  %9581 = vst [vmem:[#allocation7_spill] sm:$0xff] %v7880_v12  ;;  %v2422_v35 = vshll.u32 %v7880_v12, 16  ;;  %v2442_v6 = vrot.slane %v2440_v24, 4  ;;  %v2446_v50 = vshll.u32 %v7891_v4, 16  ;;  %v5506_v47 = vld [vmem:[%s6875_s23 + $0xa8] sm:$0xf] }
  0xa8   : > { %v6769_v29 = vld [vmem:[%s9520_s1 + $0x158] sm:$0xff]   ;;  %v7914_v14 = vrot.slane %v2385_v48, 4  ;;  %v2451_v55 = vshrl.u32 %v5506_v47, 16  ;;  %v2454_v33 = vshll.u32 %v5506_v47, 16  ;;  %v7927_v4 = vld [vmem:[%s6875_s23 + $0xb0] sm:$0x1] }
  0xa9   : > { %6451 = vmatmul.mubr.bf16.gmra.mxu0 %v5534_v40  ;;  %6481 = vmatpush3.bf16.msra.mxu1 %v6757_v13  ;;  %v6770_v13 = vld [vmem:[%s9520_s1 + $0x198] sm:$0xff]   ;;  %v2419_v40 = vor.u32 %v2418_v22, %v7864_v36  ;;  %v7916_v22 = vrot.slane %v2398_v7, 5  ;;  %v6760_v48 = vld [vmem:[%s6875_s23 + $0x48] sm:$0xff]   ;;  %v7930_v7 = vrot.slane %v2395_v1, 4  ;;  %v7932_v12 = vrot.slane %v2409_v18, 4 }
  0xaa   : > { %6454 = vmatprep.mubr.bf16.mxu0 %v5535_v20  ;;  %6482 = vmatprep.subr.bf16.mxu1 %v6761_v5  ;;  %v7907_v20 = vrot.slane %v2436_v37, 5  ;;  %v2433_v37 = vor.u32 %v2432_v49, %v2429_v30  ;;  %v7934_v59 = vrot.slane %v2422_v35, 5  ;;  %v6773_v49 = vld [vmem:[%s9520_s1 + $0x150] sm:$0xff]   ;;  %v7951_v18 = vrot.slane %v2454_v33, 5 }
  0xab   : > { %6531 = vmatpush3.bf16.msra.mxu0 %v7824_v11  ;;  %v7919_v11 = vld [vmem:[%s6875_s23 + $0xac] sm:$0xf]  ;;  %v2470_v35 = vshll.u32 %v7927_v4, 16 }
  0xac   : > { %6403 = vmatmul.mubr.bf16.gmra.mxu1 %v6756_v60  ;;  %6532 = vmatprep.subr.bf16.mxu0 %v6766_v58  ;;  %9584 = vst [vmem:[#allocation10_spill] sm:$0xff] %v7919_v11  ;;  %v2353_v60 = vsel %vm6906_vm2, %v7826_v63, %v7828_v28  ;;  %v2443_v24 = vor.u32 %v2442_v6, %v7907_v20  ;;  %v2460_v47 = vshll.u32 %v7919_v11, 16  ;;  %v6763_v63 = vld [vmem:[%s6875_s23 + $0x54] sm:$0xff]   ;;  %v7941_v28 = vrot.slane %v2419_v40, 4 }
  0xad   : > { %6406 = vmatprep.mubr.bf16.mxu1 %v6759_v38  ;;  %6483 = vmatpush3.bf16.msra.mxu1 %v6761_v5  ;;  %v6774_v5 = vld [vmem:[%s9520_s1 + $0x190] sm:$0xff]   ;;  %v7943_v6 = vrot.slane %v2446_v50, 5  ;;  %v7945_v38 = vrot.slane %v2451_v55, 4  ;;  %v2464_v1 = vshrl.u32 %v7919_v11, 16  ;;  %v7960_v40 = vrot.slane %v2433_v37, 4 }
  0xae   : > { %6484 = vmatprep.subr.bf16.mxu1 %v6765_v54  ;;  %v7962_v30 = vrot.slane %v2443_v24, 4  ;;  %v5509_v55 = vld [vmem:[%s6875_s23 + $0xb4] sm:$0xf]  ;;  %v7966_v11 = vld [vmem:[%s6875_s23 + $0xb8] sm:$0xf]  ;;  %v6777_v24 = vld [vmem:[%s9520_s1 + $0x148] sm:$0xff]  }
  0xaf   : > { %6533 = vmatpush3.bf16.msra.mxu0 %v6766_v58  ;;  %v9585_v58 = vsel %vm6906_vm2, %v7764_v46, %v7742_v21  ;;  %9586 = vst [vmem:[#allocation11_spill] sm:$0xff] %v7966_v11  ;;  %v2367_v21 = vsel %vm6906_vm2, %v7841_v9, %v7770_v57  ;;  %v7978_v46 = vrot.slane %v2460_v47, 5  ;;  %v5512_v37 = vld [vmem:[%s6875_s23 + $0xc0] sm:$0xf]  ;;  %v2377_v57 = vsel %vm6906_vm2, %v7849_v15, %v7843_v51  ;;  %v8005_v47 = vld [vmem:[%s6875_s23 + $0xc4] sm:$0xf] }
  0xb0   : > { %6534 = vmatprep.subr.bf16.mxu0 %v6770_v13  ;;  %v5538_v50 = vcombine.low %v9585_v58, %v2329_v25  ;;  %v2475_v25 = vshrl.u32 %v5509_v55, 16  ;;  %v2391_v9 = vsel %vm6906_vm2, %v7914_v14, %v7858_v19  ;;  %9589 = vst [vmem:[#allocation13_spill] sm:$0xff] %v8005_v47  ;;  %v8008_v51 = vld [vmem:[%s6875_s23 + $0xc8] sm:$0x1]  ;;  %v2508_v58 = vshll.u32 %v8005_v47, 16 }
  0xb1   : > { %6455 = vmatmul.mubr.bf16.gmra.mxu0 %v7866_v43  ;;  %6485 = vmatpush3.bf16.msra.mxu1 %v6765_v54  ;;  %v9587_v43 = vsel %vm6906_vm2, %v7816_v2, %v7754_v53  ;;  %v2466_v54 = vrot.slane %v2464_v1, 4  ;;  %v2478_v53 = vshll.u32 %v5509_v55, 16  ;;  %v2484_v2 = vshll.u32 %v7966_v11, 16 }
  0xb2   : > { %6458 = vmatprep.mubr.bf16.mxu0 %v7869_v52  ;;  %v5539_v33 = vcombine.low %v9587_v43, %v2353_v60  ;;  %6486 = vmatprep.subr.bf16.mxu1 %v6769_v29  ;;  %v6778_v52 = vld [vmem:[%s9520_s1 + $0x188] sm:$0xff]   ;;  %v2488_v60 = vshrl.u32 %v7966_v11, 16  ;;  %v2477_v15 = vrot.slane %v2475_v25, 4  ;;  %v9590_v55 = vrot.slane %v7413_v32, 5 }
  0xb3   : > { %6535 = vmatpush3.bf16.msra.mxu0 %v6770_v13  ;;  %v2401_v13 = vsel %vm6906_vm2, %v7930_v7, %v7916_v22  ;;  %v2480_v19 = vrot.slane %v2478_v53, 5  ;;  %v8010_v14 = vrot.slane %v2484_v2, 5  ;;  %v2499_v22 = vshrl.u32 %v5512_v37, 16  ;;  %v6764_v2 = vld [vmem:[%s6875_s23 + $0x60] sm:$0xff]  }
  0xb4   : > { %6407 = vmatmul.mubr.bf16.gmra.mxu1 %v6760_v48  ;;  %6536 = vmatprep.subr.bf16.mxu0 %v6774_v5  ;;  %v8002_v48 = vld [vmem:[%s6875_s23 + $0xbc] sm:$0x1]  ;;  %v2490_v1 = vrot.slane %v2488_v60, 4  ;;  %v2502_v7 = vshll.u32 %v5512_v37, 16  ;;  %v8015_v43 = vrot.slane %v9590_v55, 4  ;;  %v8020_v25 = vrot.slane %v2470_v35, 5 }
  0xb5   : > { %9588 = vst [vmem:[#allocation12_spill] sm:$0xff] %v8002_v48  ;;  %6410 = vmatprep.mubr.bf16.mxu1 %v6763_v63  ;;  %6487 = vmatpush3.bf16.msra.mxu1 %v6769_v29  ;;  %v2457_v63 = vor.u32 %v7951_v18, %v7945_v38  ;;  %v2467_v29 = vor.u32 %v2466_v54, %v7978_v46  ;;  %v2512_v53 = vshrl.u32 %v8005_v47, 16  ;;  %v2494_v60 = vshll.u32 %v8002_v48, 16  ;;  %v6767_v38 = vld [vmem:[%s6875_s23 + $0x6c] sm:$0xff]   ;;  %v8040_v48 = vld [vmem:[%s6875_s23 + $0x18] sm:$0xe] }
  0xb6   : > { %6488 = vmatprep.subr.bf16.mxu1 %v6773_v49  ;;  %v2501_v37 = vrot.slane %v2499_v22, 4  ;;  %v2504_v11 = vrot.slane %v2502_v7, 5  ;;  %v8025_v55 = vrot.slane %v2508_v58, 5  ;;  %v2481_v18 = vor.u32 %v2480_v19, %v2477_v15  ;;  %v6781_v22 = vld [vmem:[%s9520_s1 + $0x140] sm:$0xff]   ;;  %v8037_v58 = vld [vmem:[%s6875_s23 + $0xc] sm:$0xe] }
  0xb7   : > { %6537 = vmatpush3.bf16.msra.mxu0 %v6774_v5  ;;  %v6782_v5 = vld [vmem:[%s9520_s1 + $0x180] sm:$0xff]   ;;  %v2491_v35 = vor.u32 %v2490_v1, %v8010_v14  ;;  %v2514_v54 = vrot.slane %v2512_v53, 4  ;;  %v2518_v47 = vshll.u32 %v8008_v51, 16  ;;  %v5540_v15 = vcombine.low %v2367_v21, %v2377_v57 }
  0xb8   : > { %6538 = vmatprep.subr.bf16.mxu0 %v6778_v52  ;;  %v2505_v7 = vor.u32 %v2504_v11, %v2501_v37  ;;  %v5541_v19 = vcombine.low %v2391_v9, %v2401_v13  ;;  %v8048_v1 = vrot.slane %v2457_v63, 4  ;;  %v8050_v11 = vrot.slane %v2467_v29, 4  ;;  %v6768_v9 = vld [vmem:[%s6875_s23 + $0x78] sm:$0xff]   ;;  %v6771_v37 = vld [vmem:[%s6875_s23 + $0x84] sm:$0xff]  }
  0xb9   : > { %6459 = vmatmul.mubr.bf16.gmra.mxu0 %v5538_v50  ;;  %6489 = vmatpush3.bf16.msra.mxu1 %v6773_v49  ;;  %v8045_v49 = vld [vmem:[%s9520_s1 + $0x238] sm:$0xff]   ;;  %v2515_v50 = vor.u32 %v2514_v54, %v8025_v55  ;;  %v8059_v53 = vrot.slane %v2491_v35, 4  ;;  %v8061_v21 = vrot.slane %v2494_v60, 5  ;;  %v8067_v63 = vrot.slane %v2518_v47, 5  ;;  %v5558_v60 = vld [vmem:[%s6875_s23 + $0x30] sm:$0xe] }
  0xba   : > { %6462 = vmatprep.mubr.bf16.mxu0 %v5539_v33  ;;  %6490 = vmatprep.subr.bf16.mxu1 %v6777_v24  ;;  %v8055_v33 = vld [vmem:[%s9520_s1 + $0x1f8] sm:$0xff]   ;;  %v8065_v13 = vrot.slane %v2505_v7, 4  ;;  %v2913_v29 = vrot.slane %v7487_v42, 5  ;;  %v9591_v35 = vld [vmem:[#allocation2_spill] sm:$0xff]  ;;  %v5574_v47 = vrot.slane %v5558_v60, 9  ;;  %v9594_v60 = vld [vmem:[#allocation3_spill] sm:$0xff] }
  0xbb   : > { %6539 = vmatpush3.bf16.msra.mxu0 %v6778_v52  ;;  %v8057_v52 = vrot.slane %v2481_v18, 4  ;;  %v9592_v7 = vld [vmem:[#allocation5_spill] sm:$0xff]  ;;  %v2934_v18 = vrot.slane %v7570_v0, 5  ;;  %v2449_v0 = vsel %vm6906_vm2, %v7962_v30, %v7943_v6  ;;  %v2948_v30 = vrot.slane %v7661_v41, 5 }
  0xbc   : > { %6411 = vmatmul.mubr.bf16.gmra.mxu1 %v6764_v2  ;;  %6540 = vmatprep.subr.bf16.mxu0 %v6782_v5  ;;  %v2931_v57 = vrot.slane %v9592_v7, 5  ;;  %v9593_v2 = vld [vmem:[#allocation4_spill] sm:$0xff] }
  0xbd   : > { %6414 = vmatprep.mubr.bf16.mxu1 %v6767_v38  ;;  %6491 = vmatpush3.bf16.msra.mxu1 %v6777_v24  ;;  %v8072_v24 = vrot.slane %v2515_v50, 4  ;;  %v2917_v38 = vrot.slane %v7504_v61, 5  ;;  %v2415_v50 = vsel %vm6906_vm2, %v7932_v12, %v7864_v36  ;;  %v2938_v54 = vrot.slane %v9593_v2, 5  ;;  %v5559_v12 = vld [vmem:[%s6875_s23 + $0x3c] sm:$0xe] }
  0xbe   : > { %6492 = vmatprep.subr.bf16.mxu1 %v6781_v22  ;;  %v8094_v7 = vsel %vm7217_vm5, %v5574_v47, %v2931_v57  ;;  %v2933_v36 = vrot.slane %v2931_v57, 4  ;;  %v5575_v2 = vrot.slane %v5559_v12, 9  ;;  %v6772_v47 = vld [vmem:[%s6875_s23 + $0x90] sm:$0xff]   ;;  %v2955_v12 = vrot.slane %v7681_v34, 5 }
  0xbf   : > { %6541 = vmatpush3.bf16.msra.mxu0 %v6782_v5  ;;  %v2425_v5 = vsel %vm6906_vm2, %v7941_v28, %v7934_v59  ;;  %v2439_v59 = vsel %vm6906_vm2, %v7960_v40, %v7907_v20  ;;  %v2940_v28 = vrot.slane %v2938_v54, 4  ;;  %v2945_v20 = vrot.slane %v7620_v39, 5 }
  0xc0   : > { %6622 = vmatprep.subr.bf16.mxu0 %v8045_v49  ;;  %v8108_v57 = vsel %vm7217_vm5, %v2933_v36, %v2934_v18  ;;  %v5543_v18 = vcombine.low %v2439_v59, %v2449_v0  ;;  %v8123_v39 = vsel %vm7217_vm5, %v5575_v2, %v2938_v54  ;;  %v2463_v36 = vsel %vm6906_vm2, %v8048_v1, %v7978_v46  ;;  %v5561_v54 = vld [vmem:[%s6875_s23 + $0x54] sm:$0xe] }
  0xc1   : > { %6463 = vmatmul.mubr.bf16.gmra.mxu0 %v5540_v15  ;;  %6493 = vmatpush3.bf16.msra.mxu1 %v6781_v22  ;;  %v2927_v15 = vrot.slane %v9594_v60, 5  ;;  %v2941_v22 = vrot.slane %v7599_v45, 5  ;;  %v5606_v40 = vcombine.low %v8094_v7, %v8108_v57  ;;  %v5560_v45 = vld [vmem:[%s6875_s23 + $0x48] sm:$0xe]  ;;  %v2473_v46 = vsel %vm6906_vm2, %v8050_v11, %v8020_v25  ;;  %v6792_v7 = vld [vmem:[%s6875_s23 + $0x54] sm:$0xff]  }
  0xc2   : > { %6466 = vmatprep.mubr.bf16.mxu0 %v5541_v19  ;;  %6574 = vmatprep.subr.bf16.mxu1 %v8055_v33  ;;  %v5542_v19 = vcombine.low %v2415_v50, %v2425_v5  ;;  %v2947_v50 = vrot.slane %v2945_v20, 4  ;;  %v6775_v5 = vld [vmem:[%s6875_s23 + $0x9c] sm:$0xff]   ;;  %v2959_v2 = vrot.slane %v7685_v31, 5  ;;  %v2487_v34 = vsel %vm6906_vm2, %v8057_v52, %v8010_v14 }
  0xc3   : > { %v8115_v6 = vsel %vm7217_vm5, %v2940_v28, %v2941_v22  ;;  %v5577_v28 = vrot.slane %v5561_v54, 9  ;;  %v5562_v22 = vld [vmem:[%s6875_s23 + $0x60] sm:$0xe]  ;;  %v2962_v25 = vrot.slane %v7733_v16, 5  ;;  %v2497_v11 = vsel %vm6906_vm2, %v8059_v53, %v8061_v21 }
  0xc4   : > { %6415 = vmatmul.mubr.bf16.gmra.mxu1 %v6768_v9  ;;  %v2952_v9 = vrot.slane %v7655_v10, 5  ;;  %v5607_v41 = vcombine.low %v8123_v39, %v8115_v6  ;;  %v8138_v59 = vsel %vm7217_vm5, %v2947_v50, %v2948_v30  ;;  %v2966_v14 = vrot.slane %v7725_v8, 5  ;;  %v5788_v6 = vld [vmem:[%s6875_s23 + $0x24] sm:$0xe] }
  0xc5   : > { %6418 = vmatprep.mubr.bf16.mxu1 %v6771_v37  ;;  %v5576_v37 = vrot.slane %v5560_v45, 9  ;;  %v2961_v45 = vrot.slane %v2959_v2, 4  ;;  %v5544_v52 = vcombine.low %v2463_v36, %v2473_v46  ;;  %v2969_v8 = vrot.slane %v7746_v62, 5  ;;  %v5564_v36 = vld [vmem:[%s6875_s23 + $0x78] sm:$0xe] }
  0xc6   : > { %v2954_v0 = vrot.slane %v2952_v9, 4  ;;  %v8165_v31 = vsel %vm7217_vm5, %v5577_v28, %v2952_v9  ;;  %v2968_v9 = vrot.slane %v2966_v14, 4  ;;  %v2973_v54 = vrot.slane %v7750_v44, 5 }
  0xc7   : > { %v8134_v10 = vsel %vm7217_vm5, %v5576_v37, %v2945_v20  ;;  %v5578_v20 = vrot.slane %v5562_v22, 9  ;;  %v8177_v53 = vsel %vm7217_vm5, %v2961_v45, %v2962_v25  ;;  %v5545_v37 = vcombine.low %v2487_v34, %v2497_v11 }
  0xc8   : > { %v8193_v46 = vsel %vm7217_vm5, %v2968_v9, %v2969_v8  ;;  %v5580_v62 = vrot.slane %v5564_v36, 9  ;;  %v2980_v28 = vrot.slane %v7793_v3, 5  ;;  %v2975_v44 = vrot.slane %v2973_v54, 4  ;;  %v6783_v8 = vld [vmem:[%s6875_s23 + $0x18] sm:$0xff]   ;;  %v9599_v36 = vld [vmem:[#allocation8_spill] sm:$0xff] }
  0xc9   : > { %6467 = vmatmul.mubr.bf16.gmra.mxu0 %v5542_v19  ;;  %v8156_v19 = vsel %vm7217_vm5, %v2954_v0, %v2955_v12  ;;  %v8172_v16 = vsel %vm7217_vm5, %v5578_v20, %v2959_v2  ;;  %v2976_v0 = vrot.slane %v7757_v26, 5  ;;  %v2983_v26 = vrot.slane %v7819_v17, 5  ;;  %v5565_v20 = vld [vmem:[%s6875_s23 + $0x84] sm:$0xe] }
  0xca   : > { %6470 = vmatprep.mubr.bf16.mxu0 %v5543_v18  ;;  %v5563_v18 = vld [vmem:[%s6875_s23 + $0x6c] sm:$0xe]  ;;  %v2511_v2 = vsel %vm6906_vm2, %v8065_v13, %v8025_v55  ;;  %v8205_v34 = vsel %vm7217_vm5, %v5580_v62, %v2973_v54  ;;  %v2521_v3 = vsel %vm6906_vm2, %v8072_v24, %v8067_v63  ;;  %v5581_v25 = vrot.slane %v5565_v20, 9  ;;  %v9597_v63 = vld [vmem:[#allocation6_spill] sm:$0xff] }
  0xcb   : > { %v5579_v21 = vrot.slane %v5563_v18, 9  ;;  %v8214_v17 = vsel %vm7217_vm5, %v2975_v44, %v2976_v0  ;;  %v2982_v11 = vrot.slane %v2980_v28, 4  ;;  %v9595_v45 = vrot.slane %v7413_v32, 5  ;;  %v5566_v18 = vld [vmem:[%s6875_s23 + $0x90] sm:$0xe]  ;;  %v6795_v62 = vld [vmem:[%s6875_s23 + $0x60] sm:$0xff]  }
  0xcc   : > { %6419 = vmatmul.mubr.bf16.gmra.mxu1 %v6772_v47  ;;  %v6776_v47 = vld [vmem:[%s6875_s23 + $0xa8] sm:$0xff]   ;;  %v9596_v55 = vrot.slane %v8037_v58, 9  ;;  %v2987_v24 = vrot.slane %v9597_v63, 5  ;;  %v8231_v32 = vsel %vm7217_vm5, %v5581_v25, %v2980_v28  ;;  %v2994_v54 = vrot.slane %v9599_v36, 5 }
  0xcd   : > { %6422 = vmatprep.mubr.bf16.mxu1 %v6775_v5  ;;  %v6779_v5 = vld [vmem:[%s6875_s23 + $0xb4] sm:$0xff]   ;;  %v8189_v12 = vsel %vm7217_vm5, %v5579_v21, %v2966_v14  ;;  %v5557_v14 = vld [vmem:[%s6875_s23 + $0x24] sm:$0xe]  ;;  %v9598_v21 = vld [vmem:[#allocation7_spill] sm:$0xff]  ;;  %v8235_v58 = vsel %vm7217_vm5, %v2982_v11, %v2983_v26  ;;  %v5546_v0 = vcombine.low %v2511_v2, %v2521_v3  ;;  %v2914_v28 = vsel %vm7217_vm5, %v8015_v43, %v2913_v29 }
  0xce   : > { %v2911_v13 = vsel %vm7217_vm5, %v9596_v55, %v9595_v45  ;;  %v2990_v9 = vrot.slane %v9598_v21, 5  ;;  %v2989_v44 = vrot.slane %v2987_v24, 4  ;;  %v6780_v45 = vld [vmem:[%s6875_s23 + $0xc0] sm:$0xff]   ;;  %v2919_v26 = vrot.slane %v2917_v38, 4  ;;  %v5567_v2 = vld [vmem:[%s6875_s23 + $0x9c] sm:$0xe] }
  0xcf   : > { %v2996_v3 = vrot.slane %v2994_v54, 4  ;;  %v5583_v11 = vrot.slane %v5567_v2, 9  ;;  %v9601_v55 = vld [vmem:[#allocation10_spill] sm:$0xff]  ;;  %v5568_v63 = vld [vmem:[%s6875_s23 + $0xa8] sm:$0xe]  ;;  %v5603_v21 = vcombine.low %v2911_v13, %v2914_v28  ;;  %v9605_v28 = vrot.slane %v8040_v48, 9 }
  0xd0   : > { %v8256_v25 = vsel %vm7217_vm5, %v2989_v44, %v2990_v9  ;;  %v3001_v42 = vrot.slane %v9601_v55, 5  ;;  %v8379_v43 = vld [vmem:[%s6875_s23 + $0x34] sm:$0xf] }
  0xd1   : > { %6471 = vmatmul.mubr.bf16.gmra.mxu0 %v5544_v52  ;;  %v8269_v9 = vsel %vm7217_vm5, %v5583_v11, %v2994_v54  ;;  %v5569_v54 = vld [vmem:[%s6875_s23 + $0xb4] sm:$0xe]  ;;  %v3835_v39 = vshll.u32 %v8379_v43, 16 }
  0xd2   : > { %6474 = vmatprep.mubr.bf16.mxu0 %v5545_v37  ;;  %v5582_v37 = vrot.slane %v5566_v18, 9  ;;  %v5573_v18 = vrot.slane %v5557_v14, 9  ;;  %v3003_v36 = vrot.slane %v3001_v42, 4  ;;  %v9602_v14 = vrot.slane %v9591_v35, 5 }
  0xd3   : > { %v5585_v55 = vrot.slane %v5569_v54, 9 }
  0xd4   : > { %6423 = vmatmul.mubr.bf16.gmra.mxu1 %v6776_v47  ;;  %v9600_v47 = vld [vmem:[#allocation9_spill] sm:$0xff]  ;;  %v2926_v44 = vrot.slane %v9602_v14, 4  ;;  %v9607_v61 = vmov %v9602_v14  ;;  %v3018_v14 = vrot.slane %v8008_v51, 5  ;;  %v5705_v51 = vld [vmem:[%s6875_s23 + $0x30] sm:$0xf] }
  0xd5   : > { %6426 = vmatprep.mubr.bf16.mxu1 %v6779_v5  ;;  %v2997_v20 = vrot.slane %v9600_v47, 5  ;;  %v8251_v5 = vsel %vm7217_vm5, %v5582_v37, %v2987_v24  ;;  %v3004_v24 = vrot.slane %v7927_v4, 5  ;;  %v5584_v37 = vrot.slane %v5568_v63, 9 }
  0xd6   : > { %v9606_v63 = vrot.slane %v7518_v23, 5  ;;  %v2925_v48 = vsel %vm7217_vm5, %v5573_v18, %v9607_v61  ;;  %v2928_v23 = vsel %vm7217_vm5, %v2926_v44, %v2927_v15  ;;  %v8349_v61 = vld [vmem:[%s6875_s23 + $0x28] sm:$0xf] }
  0xd7   : > { %v8263_v29 = vsel %vm7217_vm5, %v2996_v3, %v2997_v20  ;;  %v9603_v20 = vld [vmem:[#allocation11_spill] sm:$0xff]  ;;  %v8278_v4 = vsel %vm7217_vm5, %v5584_v37, %v3001_v42  ;;  %v8282_v13 = vsel %vm7217_vm5, %v3003_v36, %v3004_v24  ;;  %v2918_v3 = vsel %vm7217_vm5, %v9605_v28, %v2917_v38  ;;  %v5570_v37 = vld [vmem:[%s6875_s23 + $0xc0] sm:$0xe]  ;;  %v9608_v38 = vld [vmem:[#allocation13_spill] sm:$0xff] }
  0xd8   : > { %v3008_v2 = vrot.slane %v9603_v20, 5  ;;  %v2921_v24 = vsel %vm7217_vm5, %v2919_v26, %v9606_v63  ;;  %v3015_v36 = vrot.slane %v9608_v38, 5  ;;  %v5586_v18 = vrot.slane %v5570_v37, 9  ;;  %v6790_v20 = vld [vmem:[%s9520_s1 + $0x230] sm:$0xff]   ;;  %v5702_v63 = vld [vmem:[%s6875_s23 + $0x24] sm:$0xf] }
  0xd9   : > { %6475 = vmatmul.mubr.bf16.gmra.mxu0 %v5546_v0  ;;  %v5604_v15 = vcombine.low %v2918_v3, %v2921_v24  ;;  %v5605_v54 = vcombine.low %v2925_v48, %v2928_v23  ;;  %v6789_v28 = vld [vmem:[%s9520_s1 + $0x1f0] sm:$0xff]   ;;  %v6788_v48 = vld [vmem:[%s6875_s23 + $0x3c] sm:$0xff]   ;;  %v3802_v37 = vshrl.u32 %v5702_v63, 16  ;;  %v6791_v38 = vld [vmem:[%s6875_s23 + $0x48] sm:$0xff]   ;;  %v3811_v23 = vshll.u32 %v8349_v61, 16 }
  0xda   : > { %6542 = vmatprep.mubr.bf16.mxu0 %v6783_v8  ;;  %v9604_v8 = vld [vmem:[#allocation12_spill] sm:$0xff]  ;;  %v3010_v42 = vrot.slane %v3008_v2, 4  ;;  %v8313_v26 = vsel %vm7217_vm5, %v5585_v55, %v3008_v2  ;;  %v3017_v60 = vrot.slane %v3015_v36, 4  ;;  %v8326_v44 = vsel %vm7217_vm5, %v5586_v18, %v3015_v36  ;;  %v5699_v2 = vld [vmem:[%s6875_s23 + $0x18] sm:$0xf]  ;;  %v6794_v55 = vld [vmem:[%s9520_s1 + $0x228] sm:$0xff]  }
  0xdb   : > { %v3011_v0 = vrot.slane %v9604_v8, 5  ;;  %v3781_v24 = vshll.u32 %v5699_v2, 16  ;;  %v6793_v36 = vld [vmem:[%s9520_s1 + $0x1e8] sm:$0xff]   ;;  %v5701_v18 = vld [vmem:[%s6875_s23 + $0x20] sm:$0x1]  ;;  %v3804_v11 = vrot.slane %v3802_v37, 4 }
  0xdc   : > { %6427 = vmatmul.mubr.bf16.gmra.mxu1 %v6780_v45  ;;  %v6784_v45 = vld [vmem:[%s6875_s23 + $0x24] sm:$0xff]   ;;  %v8331_v8 = vsel %vm7217_vm5, %v3017_v60, %v3018_v14  ;;  %v3805_v14 = vshll.u32 %v5702_v63, 16  ;;  %v8369_v63 = vld [vmem:[%s6875_s23 + $0x2c] sm:$0x1]  ;;  %v3826_v37 = vshrl.u32 %v5705_v51, 16 }
  0xdd   : > { %6494 = vmatprep.mubr.bf16.mxu1 %v5603_v21  ;;  %v6787_v21 = vld [vmem:[%s6875_s23 + $0x30] sm:$0xff]   ;;  %v8317_v35 = vsel %vm7217_vm5, %v3010_v42, %v3011_v0  ;;  %v8334_v0 = vld [vmem:[%s6875_s23 + $0x1c] sm:$0xf]  ;;  %v3778_v42 = vshrl.u32 %v5699_v2, 16 }
  0xde   : > { %v4549_v3 = vrot.slane %v8334_v0, 5  ;;  %v3807_v47 = vrot.slane %v3805_v14, 5 }
  0xdf   : > { %v3780_v60 = vrot.slane %v3778_v42, 4  ;;  %v6797_v42 = vld [vmem:[%s9520_s1 + $0x1e0] sm:$0xff]  }
  0xe1   : > { %6543 = vmatmul.mubr.bf16.vlgmr.msra.gmra.mxu0 %v6784_v45  ;;  %v3791_v45 = vshrl.u32 %v8334_v0, 16 }
  0xe2   : > { %6623 = vmatpush3.bf16.msra.mxu0 %v8045_v49  ;;  %6546 = vmatprep.mubr.bf16.mxu0 %v6787_v21  ;;  %v3787_v49 = vshll.u32 %v8334_v0, 16  ;;  %v3815_v21 = vshrl.u32 %v8349_v61, 16 }
  0xe3   : > { %6624 = vmatprep.subr.bf16.mxu0 %v6790_v20 }
  0xe4   : > { %6495 = vmatmul.mubr.bf16.vlgmr.msra.gmra.mxu1 %v5604_v15  ;;  %v5787_v15 = vld [vmem:[%s6875_s23 + $0x18] sm:$0xe]  ;;  %v8364_v2 = vrot.slane %v3787_v49, 5  ;;  %v3797_v49 = vshll.u32 %v5701_v18, 16  ;;  %v3817_v0 = vrot.slane %v3815_v21, 4 }
  0xe5   : > { %6575 = vmatpush3.bf16.msra.mxu1 %v8055_v33  ;;  %6498 = vmatprep.mubr.bf16.mxu1 %v5605_v54  ;;  %v6798_v33 = vld [vmem:[%s9520_s1 + $0x220] sm:$0xff]   ;;  %v3793_v54 = vrot.slane %v3791_v45, 4  ;;  %v8376_v45 = vrot.slane %v3811_v23, 5  ;;  %v6802_v23 = vld [vmem:[%s9520_s1 + $0x218] sm:$0xff]  }
  0xe6   : > { %6576 = vmatprep.subr.bf16.mxu1 %v6789_v28  ;;  %6625 = vmatpush3.bf16.msra.mxu0 %v6790_v20  ;;  %v3783_v20 = vrot.slane %v3781_v24, 5 }
  0xe7   : > { %6626 = vmatprep.subr.bf16.mxu0 %v6794_v55  ;;  %v3794_v21 = vor.u32 %v3793_v54, %v8364_v2  ;;  %v3818_v54 = vor.u32 %v3817_v0, %v8376_v45 }
  0xe9   : > { %6547 = vmatmul.mubr.bf16.gmra.mxu0 %v6788_v48  ;;  %6577 = vmatpush3.bf16.msra.mxu1 %v6789_v28  ;;  %v5803_v48 = vrot.slane %v5787_v15, 9  ;;  %v4552_v28 = vrot.slane %v5701_v18, 5  ;;  %v4551_v18 = vrot.slane %v4549_v3, 4  ;;  %v3821_v15 = vshll.u32 %v8369_v63, 16 }
  0xea   : > { %6550 = vmatprep.mubr.bf16.mxu0 %v6791_v38  ;;  %6578 = vmatprep.subr.bf16.mxu1 %v6793_v36  ;;  %v3829_v38 = vshll.u32 %v5705_v51, 16  ;;  %v4556_v51 = vrot.slane %v8349_v61, 5  ;;  %v3839_v61 = vshrl.u32 %v8379_v43, 16 }
  0xeb   : > { %6627 = vmatpush3.bf16.msra.mxu0 %v6794_v55  ;;  %v3784_v55 = vor.u32 %v3783_v20, %v3780_v60  ;;  %v6801_v60 = vld [vmem:[%s9520_s1 + $0x1d8] sm:$0xff]   ;;  %v8402_v20 = vrot.slane %v3797_v49, 5  ;;  %v6806_v49 = vld [vmem:[%s9520_s1 + $0x210] sm:$0xff]  }
  0xec   : > { %v8374_v24 = vpop.f32.mrf.mxu0  ;;  %6499 = vmatmul.mubr.bf16.gmra.mxu1 %v5606_v40  ;;  %6628 = vmatprep.subr.bf16.mxu0 %v6798_v33  ;;  %v8384_v14 = vpop.f32.mrf.mxu1  ;;  %v3808_v40 = vor.u32 %v3807_v47, %v3804_v11  ;;  %v3828_v47 = vrot.slane %v3826_v37, 4  ;;  %v3831_v11 = vrot.slane %v3829_v38, 5  ;;  %v8429_v37 = vld [vmem:[%s6875_s23 + $0x40] sm:$0xf]  ;;  %v4558_v50 = vrot.slane %v4556_v51, 4 }
  0xed   : > { %9609 = vst [vmem:[#allocation2_spill] sm:$0xff] %v8384_v14  ;;  %6502 = vmatprep.mubr.bf16.mxu1 %v5607_v41  ;;  %6579 = vmatpush3.bf16.msra.mxu1 %v6793_v36  ;;  %v8409_v41 = vsel %vm7217_vm5, %v5803_v48, %v4549_v3  ;;  %v5708_v36 = vld [vmem:[%s6875_s23 + $0x3c] sm:$0xf]  ;;  %v8418_v0 = vrot.slane %v3784_v55, 4  ;;  %v8424_v3 = vsel %vm7217_vm5, %v4551_v18, %v4552_v28  ;;  %v8426_v48 = vrot.slane %v3821_v15, 5  ;;  %v6805_v55 = vld [vmem:[%s9520_s1 + $0x1d0] sm:$0xff]  }
  0xee   : > { %v8395_v57 = vpop.f32.mrf.mxu0  ;;  %6580 = vmatprep.subr.bf16.mxu1 %v6797_v42  ;;  %v8413_v52 = vpop.f32.mrf.mxu1  ;;  %v8436_v22 = vrot.slane %v3808_v40, 4  ;;  %v4559_v28 = vrot.slane %v8369_v63, 5  ;;  %v3819_v18 = vrot.slane %v3818_v54, 4  ;;  %v8440_v15 = vld [vmem:[%s6875_s23 + $0x38] sm:$0x1]  ;;  %v3853_v30 = vshll.u32 %v5708_v36, 16 }
  0xef   : > { %6629 = vmatpush3.bf16.msra.mxu0 %v6798_v33  ;;  %9610 = vst [vmem:[#allocation5_spill] sm:$0xff] %v8413_v52  ;;  %v8420_v33 = vrot.slane %v3794_v21, 4  ;;  %v5804_v21 = vrot.slane %v5788_v6, 9  ;;  %v3832_v1 = vor.u32 %v3831_v11, %v3828_v47  ;;  %v8444_v52 = vrot.slane %v3839_v61, 4  ;;  %v5789_v40 = vld [vmem:[%s6875_s23 + $0x30] sm:$0xe] }
  0xf0   : > { %6630 = vmatprep.subr.bf16.mxu0 %v6802_v23  ;;  %v8431_v38 = vpop.f32.mrf.mxu0  ;;  %v3859_v6 = vshll.u32 %v8429_v37, 16  ;;  %v3863_v63 = vshrl.u32 %v8429_v37, 16  ;;  %v8452_v54 = vpop.f32.mrf.mxu1  ;;  %v9613_v11 = vcombine.low %v8165_v31, %v8156_v19  ;;  %v6796_v61 = vld [vmem:[%s6875_s23 + $0x6c] sm:$0xff]   ;;  %v8485_v19 = vsel %vm7217_vm5, %v4558_v50, %v4559_v28  ;;  %v8503_v28 = vld [vmem:[%s6875_s23 + $0x44] sm:$0x1] }
  0xf1   : > { %6551 = vmatmul.mubr.bf16.gmra.mxu0 %v6792_v7  ;;  %6581 = vmatpush3.bf16.msra.mxu1 %v6797_v42  ;;  %v8442_v7 = vrot.slane %v3835_v39, 5  ;;  %v3850_v42 = vshrl.u32 %v5708_v36, 16  ;;  %9612 = vst [vmem:[#allocation4_spill] sm:$0xff] %v8452_v54  ;;  %v3790_v39 = vsel %vm6906_vm2, %v8418_v0, %v8364_v2  ;;  %v3800_v47 = vsel %vm6906_vm2, %v8420_v33, %v8402_v20  ;;  %v6799_v36 = vld [vmem:[%s6875_s23 + $0x78] sm:$0xff]   ;;  %v8496_v33 = vld [vmem:[%s6875_s23 + $0x4c] sm:$0xf] }
  0xf2   : > { %6554 = vmatprep.mubr.bf16.mxu0 %v6795_v62  ;;  %6582 = vmatprep.subr.bf16.mxu1 %v6801_v60  ;;  %v9611_v62 = vcombine.low %v8134_v10, %v8138_v59  ;;  %v4563_v59 = vrot.slane %v8379_v43, 5  ;;  %v3814_v2 = vsel %vm6906_vm2, %v8436_v22, %v8376_v45  ;;  %v8481_v20 = vsel %vm7217_vm5, %v5804_v21, %v4556_v51  ;;  %v5711_v43 = vld [vmem:[%s6875_s23 + $0x48] sm:$0xf]  ;;  %v8507_v54 = vpop.f32.mrf.mxu1  ;;  %v5790_v14 = vld [vmem:[%s6875_s23 + $0x3c] sm:$0xe] }
  0xf3   : > { %6631 = vmatpush3.bf16.msra.mxu0 %v6802_v23  ;;  %v6810_v23 = vld [vmem:[%s9520_s1 + $0x208] sm:$0xff]   ;;  %v3845_v31 = vshll.u32 %v8440_v15, 16  ;;  %v3824_v22 = vsel %vm6906_vm2, %v3819_v18, %v8426_v48  ;;  %v5805_v45 = vrot.slane %v5789_v40, 9  ;;  %v3852_v0 = vrot.slane %v3850_v42, 4  ;;  %9615 = vst [vmem:[#allocation6_spill] sm:$0xff] %v8507_v54  ;;  %v6813_v42 = vld [vmem:[%s9520_s1 + $0x1c0] sm:$0xff]  }
  0xf4   : > { %6503 = vmatmul.mubr.bf16.gmra.mxu1 %v9611_v62  ;;  %6632 = vmatprep.subr.bf16.mxu0 %v6806_v49  ;;  %v8473_v62 = vpop.f32.mrf.mxu0  ;;  %v3855_v51 = vrot.slane %v3853_v30, 5  ;;  %v8498_v50 = vrot.slane %v3832_v1, 4  ;;  %v3842_v21 = vor.u32 %v8444_v52, %v8442_v7  ;;  %v3865_v10 = vrot.slane %v3863_v63, 4  ;;  %v6814_v30 = vld [vmem:[%s9520_s1 + $0x200] sm:$0xff]  }
  0xf5   : > { %6506 = vmatprep.mubr.bf16.mxu1 %v9613_v11  ;;  %6583 = vmatpush3.bf16.msra.mxu1 %v6801_v60  ;;  %9614 = vst [vmem:[#allocation3_spill] sm:$0xff] %v8473_v62  ;;  %v6809_v60 = vld [vmem:[%s9520_s1 + $0x1c8] sm:$0xff]   ;;  %v8505_v11 = vrot.slane %v3859_v6, 5  ;;  %v4565_v48 = vrot.slane %v4563_v59, 4  ;;  %v3874_v1 = vshrl.u32 %v5711_v43, 16  ;;  %v3877_v18 = vshll.u32 %v5711_v43, 16 }
  0xf6   : > { %6584 = vmatprep.subr.bf16.mxu1 %v6805_v55  ;;  %v8518_v40 = vcombine.low %v3790_v39, %v3800_v47  ;;  %v3887_v63 = vshrl.u32 %v8496_v33, 16  ;;  %v8526_v43 = vrot.slane %v3845_v31, 5  ;;  %v3869_v54 = vshll.u32 %v8503_v28, 16  ;;  %v5714_v39 = vld [vmem:[%s6875_s23 + $0x54] sm:$0xf]  ;;  %v6800_v6 = vld [vmem:[%s6875_s23 + $0x84] sm:$0xff]  }
  0xf7   : > { %6633 = vmatpush3.bf16.msra.mxu0 %v6806_v49  ;;  %v4566_v49 = vrot.slane %v8440_v15, 5  ;;  %v8513_v52 = vpop.f32.mrf.mxu0  ;;  %v3883_v15 = vshll.u32 %v8496_v33, 16  ;;  %v4570_v31 = vrot.slane %v8429_v37, 5  ;;  %v9619_v37 = vcombine.low %v8189_v12, %v8193_v46  ;;  %v6803_v47 = vld [vmem:[%s6875_s23 + $0x90] sm:$0xff]  }
  0xf8   : > { %6634 = vmatprep.subr.bf16.mxu0 %v6810_v23  ;;  %9616 = vst [vmem:[#allocation7_spill] sm:$0xff] %v8513_v52 }
  0xf9   : > { %6555 = vmatmul.mubr.bf16.gmra.mxu0 %v6796_v61  ;;  %6585 = vmatpush3.bf16.msra.mxu1 %v6805_v55  ;;  %v8524_v61 = vcombine.low %v3814_v2, %v3824_v22  ;;  %v3856_v55 = vor.u32 %v3855_v51, %v3852_v0  ;;  %v3866_v2 = vor.u32 %v3865_v10, %v8505_v11  ;;  %v8542_v22 = vld [vmem:[%s6875_s23 + $0x58] sm:$0xf]  ;;  %v8549_v51 = vrot.slane %v3842_v21, 4 }
  0xfa   : > { %6558 = vmatprep.mubr.bf16.mxu0 %v6799_v36  ;;  %6586 = vmatprep.subr.bf16.mxu1 %v6809_v60  ;;  %v8537_v36 = vsel %vm7217_vm5, %v5805_v45, %v4563_v59  ;;  %v9617_v0 = vcombine.low %v8172_v16, %v8177_v53  ;;  %v8553_v59 = vsel %vm7217_vm5, %v4565_v48, %v4566_v49  ;;  %v3876_v45 = vrot.slane %v3874_v1, 4  ;;  %v8560_v16 = vpop.f32.mrf.mxu0  ;;  %v5713_v1 = vld [vmem:[%s6875_s23 + $0x50] sm:$0x1] }
  0xfb   : > { %6635 = vmatpush3.bf16.msra.mxu0 %v6810_v23  ;;  %v8547_v23 = vpop.f32.mrf.mxu1  ;;  %v3879_v10 = vrot.slane %v3877_v18, 5  ;;  %9620 = vst [vmem:[#allocation9_spill] sm:$0xff] %v8560_v16  ;;  %v5806_v53 = vrot.slane %v5790_v14, 9  ;;  %v3889_v21 = vrot.slane %v3887_v63, 4  ;;  %v3857_v48 = vrot.slane %v3856_v55, 4 }
  0xfc   : > { %6507 = vmatmul.mubr.bf16.gmra.mxu1 %v9617_v0  ;;  %9618 = vst [vmem:[#allocation8_spill] sm:$0xff] %v8547_v23  ;;  %6636 = vmatprep.subr.bf16.mxu0 %v6814_v30  ;;  %v8562_v0 = vrot.slane %v3883_v15, 5  ;;  %v3898_v23 = vshrl.u32 %v5714_v39, 16  ;;  %v3871_v49 = vrot.slane %v3869_v54, 5  ;;  %v3901_v18 = vshll.u32 %v5714_v39, 16  ;;  %v8578_v39 = vpop.f32.mrf.mxu0 }
  0xfd   : > { %6510 = vmatprep.mubr.bf16.mxu1 %v9619_v37  ;;  %6587 = vmatpush3.bf16.msra.mxu1 %v6809_v60  ;;  %v3907_v52 = vshll.u32 %v8542_v22, 16  ;;  %v3867_v12 = vrot.slane %v3866_v2, 4  ;;  %v4572_v46 = vrot.slane %v4570_v31, 4  ;;  %v4573_v37 = vrot.slane %v8503_v28, 5  ;;  %v8568_v60 = vpop.f32.mrf.mxu1  ;;  %v5717_v55 = vld [vmem:[%s6875_s23 + $0x60] sm:$0xf] }
  0xfe   : > { %6588 = vmatprep.subr.bf16.mxu1 %v6813_v42  ;;  %v3911_v14 = vshrl.u32 %v8542_v22, 16  ;;  %9621 = vst [vmem:[#allocation10_spill] sm:$0xff] %v8568_v60  ;;  %v3848_v15 = vsel %vm6906_vm2, %v8549_v51, %v8526_v43  ;;  %v3880_v63 = vor.u32 %v3879_v10, %v3876_v45  ;;  %v3890_v28 = vor.u32 %v3889_v21, %v8562_v0  ;;  %v5791_v60 = vld [vmem:[%s6875_s23 + $0x48] sm:$0xe] }
  0xff   : > { %6637 = vmatpush3.bf16.msra.mxu0 %v6814_v30  ;;  %v4577_v30 = vrot.slane %v8496_v33, 5  ;;  %v3893_v2 = vshll.u32 %v5713_v1, 16  ;;  %v3900_v16 = vrot.slane %v3898_v23, 4  ;;  %v3903_v62 = vrot.slane %v3901_v18, 5  ;;  %v8603_v10 = vpop.f32.mrf.mxu1 }
 0x100   : > { %v3862_v43 = vsel %vm6906_vm2, %v3857_v48, %v8505_v11  ;;  %v8587_v33 = vsel %vm7217_vm5, %v5806_v53, %v4570_v31  ;;  %v3872_v51 = vsel %vm6906_vm2, %v3867_v12, %v3871_v49  ;;  %v8595_v23 = vsel %vm7217_vm5, %v4572_v46, %v4573_v37  ;;  %9623 = vst [vmem:[#allocation11_spill] sm:$0xff] %v8603_v10  ;;  %v8606_v49 = vld [vmem:[%s6875_s23 + $0x64] sm:$0xf]  ;;  %v6804_v12 = vld [vmem:[%s6875_s23 + $0x9c] sm:$0xff]   ;;  %v8612_v46 = vpop.f32.mrf.mxu0 }
 0x101   : > { %6559 = vmatmul.mubr.bf16.gmra.mxu0 %v6800_v6  ;;  %6589 = vmatpush3.bf16.msra.mxu1 %v6813_v42  ;;  %v8589_v6 = vrot.slane %v3907_v52, 5  ;;  %v3913_v42 = vrot.slane %v3911_v14, 4  ;;  %v3922_v45 = vshrl.u32 %v5717_v55, 16  ;;  %v3925_v11 = vshll.u32 %v5717_v55, 16  ;;  %v6807_v55 = vld [vmem:[%s6875_s23 + $0xa8] sm:$0xff]  }
 0x102   : > { %6562 = vmatprep.mubr.bf16.mxu0 %v6803_v47  ;;  %v8598_v47 = vld [vmem:[%s6875_s23 + $0x5c] sm:$0x1]  ;;  %v9622_v31 = vcombine.low %v8205_v34, %v8214_v17  ;;  %v3881_v52 = vrot.slane %v3880_v63, 4  ;;  %v5807_v53 = vrot.slane %v5791_v60, 9  ;;  %v4579_v21 = vrot.slane %v4577_v30, 4 }
 0x103   : > { %v4580_v48 = vrot.slane %v5713_v1, 5  ;;  %v9624_v18 = vcombine.low %v8231_v32, %v8235_v58  ;;  %v3891_v37 = vrot.slane %v3890_v28, 4  ;;  %v3895_v14 = vrot.slane %v3893_v2, 5  ;;  %v5792_v63 = vld [vmem:[%s6875_s23 + $0x54] sm:$0xe]  ;;  %v8630_v28 = vpop.f32.mrf.mxu1 }
 0x104   : > { %6511 = vmatmul.mubr.bf16.gmra.mxu1 %v9622_v31  ;;  %v3904_v34 = vor.u32 %v3903_v62, %v3900_v16  ;;  %v4584_v17 = vrot.slane %v8542_v22, 5  ;;  %v3914_v60 = vor.u32 %v3913_v42, %v8589_v6  ;;  %v3917_v1 = vshll.u32 %v8598_v47, 16  ;;  %9626 = vst [vmem:[#allocation12_spill] sm:$0xff] %v8630_v28  ;;  %v5793_v62 = vld [vmem:[%s6875_s23 + $0x60] sm:$0xe] }
 0x105   : > { %6514 = vmatprep.mubr.bf16.mxu1 %v9624_v18  ;;  %v3924_v31 = vrot.slane %v3922_v45, 4  ;;  %v3927_v54 = vrot.slane %v3925_v11, 5  ;;  %v9625_v32 = vsel %vm6906_vm2, %v8498_v50, %v8442_v7  ;;  %v3931_v22 = vshll.u32 %v8606_v49, 16 }
 0x106   : > { %v8624_v58 = vcombine.low %v9625_v32, %v3848_v15  ;;  %v3935_v16 = vshrl.u32 %v8606_v49, 16  ;;  %v8632_v2 = vcombine.low %v3862_v43, %v3872_v51  ;;  %v3886_v42 = vsel %vm6906_vm2, %v3881_v52, %v8562_v0  ;;  %v5720_v15 = vld [vmem:[%s6875_s23 + $0x6c] sm:$0xf]  ;;  %v8650_v32 = vld [vmem:[%s6875_s23 + $0x70] sm:$0xf] }
 0x107   : > { %v8639_v7 = vsel %vm7217_vm5, %v5807_v53, %v4577_v30  ;;  %v8643_v50 = vsel %vm7217_vm5, %v4579_v21, %v4580_v48  ;;  %v8646_v45 = vpop.f32.mrf.mxu0  ;;  %v3905_v43 = vrot.slane %v3904_v34, 4  ;;  %v5808_v51 = vrot.slane %v5792_v63, 9  ;;  %v5719_v53 = vld [vmem:[%s6875_s23 + $0x68] sm:$0x1] }
 0x108   : > { %9627 = vst [vmem:[#allocation13_spill] sm:$0xff] %v8646_v45  ;;  %v4586_v11 = vrot.slane %v4584_v17, 4  ;;  %v4587_v18 = vrot.slane %v8598_v47, 5  ;;  %v3896_v0 = vsel %vm6906_vm2, %v3891_v37, %v3895_v14  ;;  %v3915_v30 = vrot.slane %v3914_v60, 4  ;;  %v5795_v45 = vld [vmem:[%s6875_s23 + $0x78] sm:$0xe] }
 0x109   : > { %6563 = vmatmul.mubr.bf16.gmra.mxu0 %v6804_v12  ;;  %v3919_v52 = vrot.slane %v3917_v1, 5  ;;  %v3928_v21 = vor.u32 %v3927_v54, %v3924_v31  ;;  %v8655_v48 = vrot.slane %v3931_v22, 5  ;;  %v3937_v12 = vrot.slane %v3935_v16, 4  ;;  %v6808_v31 = vld [vmem:[%s6875_s23 + $0xb4] sm:$0xff]  }
 0x10a   : > { %6566 = vmatprep.mubr.bf16.mxu0 %v6807_v55  ;;  %v3946_v34 = vshrl.u32 %v5720_v15, 16  ;;  %v3949_v63 = vshll.u32 %v5720_v15, 16  ;;  %v9628_v47 = vcombine.low %v8251_v5, %v8256_v25  ;;  %v4591_v14 = vrot.slane %v8606_v49, 5  ;;  %v8672_v5 = vpop.f32.mrf.mxu0 }
 0x10b   : > { %v3955_v54 = vshll.u32 %v8650_v32, 16  ;;  %v3959_v60 = vshrl.u32 %v8650_v32, 16  ;;  %v9630_v1 = vcombine.low %v8269_v9, %v8263_v29  ;;  %9631 = vst [vmem:[#allocation15_spill] sm:$0xff] %v8672_v5  ;;  %v8674_v25 = vcombine.low %v3886_v42, %v3896_v0  ;;  %v5723_v29 = vld [vmem:[%s6875_s23 + $0x78] sm:$0xf]  ;;  %v6811_v9 = vld [vmem:[%s6875_s23 + $0xc0] sm:$0xff]  }
 0x10c   : > { %6515 = vmatmul.mubr.bf16.gmra.mxu1 %v9628_v47  ;;  %v8661_v55 = vpop.f32.mrf.mxu1  ;;  %v3910_v22 = vsel %vm6906_vm2, %v3905_v43, %v8589_v6  ;;  %v8681_v49 = vsel %vm7217_vm5, %v5808_v51, %v4584_v17  ;;  %v8685_v16 = vsel %vm7217_vm5, %v4586_v11, %v4587_v18  ;;  %v3920_v15 = vsel %vm6906_vm2, %v3915_v30, %v3919_v52  ;;  %v8698_v43 = vld [vmem:[%s6875_s23 + $0x74] sm:$0x1]  ;;  %v8755_v5 = vld [vmem:[%s6875_s23 + $0x8c] sm:$0x1] }
 0x10d   : > { %9629 = vst [vmem:[#allocation14_spill] sm:$0xff] %v8661_v55  ;;  %6518 = vmatprep.mubr.bf16.mxu1 %v9630_v1  ;;  %v8691_v47 = vrot.slane %v3928_v21, 4  ;;  %v3941_v42 = vshll.u32 %v5719_v53, 16  ;;  %v5809_v0 = vrot.slane %v5793_v62, 9  ;;  %v8694_v1 = vld [vmem:[%s6875_s23 + $0x7c] sm:$0xf]  ;;  %v3938_v6 = vor.u32 %v3937_v12, %v8655_v48  ;;  %v8704_v21 = vpop.f32.mrf.mxu0 }
 0x10e   : > { %v4594_v17 = vrot.slane %v5719_v53, 5  ;;  %v3948_v51 = vrot.slane %v3946_v34, 4  ;;  %v3951_v11 = vrot.slane %v3949_v63, 5  ;;  %v8700_v18 = vpop.f32.mrf.mxu1  ;;  %v4593_v37 = vrot.slane %v4591_v14, 4  ;;  %9633 = vst [vmem:[#allocation17_spill] sm:$0xff] %v8704_v21 }
 0x10f   : > { %9632 = vst [vmem:[#allocation16_spill] sm:$0xff] %v8700_v18  ;;  %v8702_v55 = vrot.slane %v3955_v54, 5  ;;  %v3961_v30 = vrot.slane %v3959_v60, 4  ;;  %v3970_v52 = vshrl.u32 %v5723_v29, 16  ;;  %v5794_v53 = vld [vmem:[%s6875_s23 + $0x6c] sm:$0xe]  ;;  %v8711_v18 = vcombine.low %v3910_v22, %v3920_v15 }
 0x110   : > { %v3973_v12 = vshll.u32 %v5723_v29, 16  ;;  %v3979_v34 = vshll.u32 %v8694_v1, 16  ;;  %v3983_v63 = vshrl.u32 %v8694_v1, 16  ;;  %v8713_v54 = vrot.slane %v3941_v42, 5  ;;  %v5726_v62 = vld [vmem:[%s6875_s23 + $0x84] sm:$0xf]  ;;  %v8734_v42 = vpop.f32.mrf.mxu1 }
 0x111   : > { %6567 = vmatmul.mubr.bf16.gmra.mxu0 %v6808_v31  ;;  %9634 = vst [vmem:[#allocation18_spill] sm:$0xff] %v8711_v18  ;;  %v8717_v60 = vsel %vm7217_vm5, %v5809_v0, %v4591_v14  ;;  %v3965_v31 = vshll.u32 %v8698_v43, 16  ;;  %v8725_v28 = vrot.slane %v3938_v6, 4  ;;  %v4598_v22 = vrot.slane %v8650_v32, 5  ;;  %v8729_v15 = vld [vmem:[%s6875_s23 + $0x88] sm:$0xf] }
 0x112   : > { %6570 = vmatprep.mubr.bf16.mxu0 %v6811_v9  ;;  %v3952_v9 = vor.u32 %v3951_v11, %v3948_v51  ;;  %v9635_v14 = vcombine.low %v8278_v4, %v8282_v13  ;;  %9636 = vst [vmem:[#allocation19_spill] sm:$0xff] %v8734_v42  ;;  %v6812_v0 = vld [vmem:[%s6875_s23 + $0xcc] sm:$0xff]   ;;  %v8739_v10 = vsel %vm7217_vm5, %v4593_v37, %v4594_v17  ;;  %v5810_v6 = vrot.slane %v5794_v53, 9  ;;  %v8742_v11 = vpop.f32.mrf.mxu0  ;;  %v8748_v4 = vld [vmem:[%s6875_s23 + $0x80] sm:$0x1] }
 0x113   : > { %v3962_v29 = vor.u32 %v3961_v30, %v8702_v55  ;;  %v3972_v51 = vrot.slane %v3970_v52, 4  ;;  %9637 = vst [vmem:[#allocation20_spill] sm:$0xff] %v8742_v11  ;;  %v9638_v32 = vcombine.low %v8313_v26, %v8317_v35  ;;  %v3975_v13 = vrot.slane %v3973_v12, 5 }
 0x114   : > { %6519 = vmatmul.mubr.bf16.gmra.mxu1 %v9635_v14  ;;  %v8750_v14 = vrot.slane %v3979_v34, 5  ;;  %v3985_v42 = vrot.slane %v3983_v63, 4  ;;  %v3994_v21 = vshrl.u32 %v5726_v62, 16  ;;  %v3967_v37 = vrot.slane %v3965_v31, 5 }
 0x115   : > { %6522 = vmatprep.mubr.bf16.mxu1 %v9638_v32  ;;  %v4601_v17 = vrot.slane %v8698_v43, 5  ;;  %v3997_v30 = vshll.u32 %v5726_v62, 16  ;;  %v4003_v52 = vshll.u32 %v8729_v15, 16  ;;  %v3953_v53 = vrot.slane %v3952_v9, 4  ;;  %v8758_v32 = vpop.f32.mrf.mxu1 }
 0x116   : > { %v4600_v11 = vrot.slane %v4598_v22, 4  ;;  %v3996_v26 = vrot.slane %v3994_v21, 4  ;;  %v4007_v35 = vshrl.u32 %v8729_v15, 16  ;;  %v3963_v12 = vrot.slane %v3962_v29, 4 }
 0x117   : > { %v3989_v34 = vshll.u32 %v8748_v4, 16  ;;  %v3999_v63 = vrot.slane %v3997_v30, 5  ;;  %v8761_v31 = vrot.slane %v4003_v52, 5  ;;  %v3976_v62 = vor.u32 %v3975_v13, %v3972_v51  ;;  %v5796_v52 = vld [vmem:[%s6875_s23 + $0x84] sm:$0xe] }
 0x118   : > { %v8763_v43 = vpop.f32.mrf.mxu0  ;;  %v3986_v9 = vor.u32 %v3985_v42, %v8750_v14  ;;  %v4605_v21 = vrot.slane %v8694_v1, 5  ;;  %v4009_v18 = vrot.slane %v4007_v35, 4  ;;  %v9639_v29 = vcombine.low %v8409_v41, %v8424_v3 }
 0x119   : > { %6571 = vmatmul.mubr.bf16.gmra.mxu0 %v6812_v0  ;;  %v3944_v30 = vsel %vm6906_vm2, %v8725_v28, %v8713_v54  ;;  %v8779_v51 = vsel %vm7217_vm5, %v5810_v6, %v4598_v22  ;;  %v4013_v42 = vshll.u32 %v8755_v5, 16  ;;  %v3958_v41 = vsel %vm6906_vm2, %v3953_v53, %v8702_v55  ;;  %v5729_v54 = vld [vmem:[%s6875_s23 + $0x90] sm:$0xf] }
 0x11a   : > { %6638 = vmatprep.mubr.bf16.mxu0 %v9639_v29  ;;  %v8782_v1 = vpop.f32.mrf.mxu0  ;;  %v4000_v3 = vor.u32 %v3999_v63, %v3996_v26  ;;  %v4010_v13 = vor.u32 %v4009_v18, %v8761_v31  ;;  %v4612_v28 = vrot.slane %v8729_v15, 5  ;;  %v9641_v22 = vcombine.low %v8326_v44, %v8331_v8 }
 0x11b   : > { %v3968_v6 = vsel %vm6906_vm2, %v3963_v12, %v3967_v37  ;;  %v8800_v55 = vsel %vm7217_vm5, %v4600_v11, %v4601_v17  ;;  %v3991_v53 = vrot.slane %v3989_v34, 5  ;;  %v5811_v18 = vrot.slane %v5795_v45, 9  ;;  %v8809_v12 = vld [vmem:[%s6875_s23 + $0x94] sm:$0xf] }
 0x11c   : > { %v8791_v35 = vpop.f32.mrf.mxu1  ;;  %6523 = vmatmul.mubr.bf16.gmra.mxu1 %v9641_v22  ;;  %v8802_v26 = vpop.f32.mrf.mxu0  ;;  %v3977_v15 = vrot.slane %v3976_v62, 4  ;;  %v3987_v63 = vrot.slane %v3986_v9, 4  ;;  %v4607_v29 = vrot.slane %v4605_v21, 4  ;;  %v4608_v0 = vrot.slane %v8748_v4, 5 }
 0x11d   : > { %9640 = vst [vmem:[#allocation21_spill] sm:$0xff] %v8791_v35  ;;  %6590 = vmatprep.mubr.bf16.mxu1 %v8518_v40  ;;  %v4015_v8 = vrot.slane %v4013_v42, 5  ;;  %v5812_v37 = vrot.slane %v5796_v52, 9  ;;  %v4018_v11 = vshrl.u32 %v5729_v54, 16  ;;  %v4021_v17 = vshll.u32 %v5729_v54, 16 }
 0x11e   : > { %v8806_v44 = vpop.f32.mrf.mxu1  ;;  %v8811_v34 = vpop.f32.mrf.mxu0  ;;  %v4001_v45 = vrot.slane %v4000_v3, 4  ;;  %v4011_v22 = vrot.slane %v4010_v13, 4  ;;  %v4614_v40 = vrot.slane %v4612_v28, 4  ;;  %v4615_v62 = vrot.slane %v8755_v5, 5  ;;  %v8832_v54 = vld [vmem:[%s6875_s23 + $0x98] sm:$0x1] }
 0x11f   : > { %9642 = vst [vmem:[#allocation22_spill] sm:$0xff] %v8806_v44  ;;  %v9644_v4 = vsel %vm6906_vm2, %v8691_v47, %v8655_v48  ;;  %v8823_v52 = vcombine.low %v3958_v41, %v3968_v6  ;;  %v8829_v13 = vsel %vm7217_vm5, %v5811_v18, %v4605_v21  ;;  %v3982_v48 = vsel %vm6906_vm2, %v3977_v15, %v8750_v14  ;;  %v5732_v41 = vld [vmem:[%s6875_s23 + $0x9c] sm:$0xf]  ;;  %v8849_v6 = vld [vmem:[%s6875_s23 + $0xa0] sm:$0xf] }
 0x120   : > { %v8814_v9 = vpop.f32.mrf.mxu1  ;;  %v8821_v42 = vcombine.low %v9644_v4, %v3944_v30  ;;  %v6352_v5 = vpop.f32.mrf.mxu0  ;;  %v3992_v47 = vsel %vm6906_vm2, %v3987_v63, %v3991_v53  ;;  %v8844_v30 = vsel %vm7217_vm5, %v4607_v29, %v4608_v0  ;;  %v4027_v21 = vshll.u32 %v8809_v12, 16  ;;  %v8936_v35 = vld [vmem:[%s6875_s23 + $0xb0] sm:$0x1] }
 0x121   : > { %9643 = vst [vmem:[#allocation23_spill] sm:$0xff] %v8814_v9  ;;  %v9645_v9 = vcombine.low %v8481_v20, %v8485_v19  ;;  %v9647_v20 = vcombine.low %v8537_v36, %v8553_v59  ;;  %v8858_v19 = vsel %vm7217_vm5, %v5812_v37, %v4612_v28  ;;  %v4020_v14 = vrot.slane %v4018_v11, 4  ;;  %v8873_v37 = vld [vmem:[%s6875_s23 + $0x90] sm:$0xe] }
 0x122   : > { %v8851_v18 = vpop.f32.mrf.mxu1  ;;  %v4023_v53 = vrot.slane %v4021_v17, 5  ;;  %v4031_v0 = vshrl.u32 %v8809_v12, 16  ;;  %v1544_v15 = vpop.f32.mrf.mxu0  ;;  %v4006_v63 = vsel %vm6906_vm2, %v4001_v45, %v8761_v31  ;;  %v4016_v29 = vsel %vm6906_vm2, %v4011_v22, %v4015_v8 }
 0x123   : > { %6639 = vmatmul.mubr.bf16.vlgmr.msra.gmra.mxu0 %v9645_v9  ;;  %9646 = vst [vmem:[#allocation24_spill] sm:$0xff] %v8851_v18  ;;  %v8868_v36 = vsel %vm7217_vm5, %v4614_v40, %v4615_v62  ;;  %v4037_v59 = vshll.u32 %v8832_v54, 16  ;;  %v4042_v11 = vshrl.u32 %v5732_v41, 16  ;;  %v4045_v17 = vshll.u32 %v5732_v41, 16 }
 0x124   : > { %6642 = vmatprep.mubr.bf16.mxu0 %v9647_v20  ;;  %v6304_v28 = vpop.f32.mrf.mxu1  ;;  %6591 = vmatmul.mubr.bf16.vlgmr.msra.gmra.mxu1 %v8524_v61  ;;  %v4051_v9 = vshll.u32 %v8849_v6, 16  ;;  %v4055_v31 = vshrl.u32 %v8849_v6, 16  ;;  %v6353_v45 = vpop.f32.mrf.mxu0  ;;  %v8879_v22 = vcombine.low %v3982_v48, %v3992_v47  ;;  %v8883_v40 = vrot.slane %v4027_v21, 5  ;;  %v8897_v61 = vld [vmem:[%s6875_s23 + $0xa4] sm:$0x1] }
 0x125   : > { %v1100_v8 = vadd.f32 %v6304_v28, %v8374_v24  ;;  %6594 = vmatprep.mubr.bf16.mxu1 %v8624_v58  ;;  %v8885_v4 = vcombine.low %v4006_v63, %v4016_v29  ;;  %v4024_v20 = vor.u32 %v4023_v53, %v4020_v14  ;;  %v4033_v24 = vrot.slane %v4031_v0, 4  ;;  %v5735_v28 = vld [vmem:[%s6875_s23 + $0xa8] sm:$0xf]  ;;  %v8902_v14 = vld [vmem:[%s6875_s23 + $0xac] sm:$0xf] }
 0x126   : > { %v1091_v62 = vpop.f32.mrf.mxu1  ;;  %v1547_v48 = vpop.f32.mrf.mxu0  ;;  %v8893_v47 = vrot.slane %v4037_v59, 5  ;;  %v5813_v21 = vrot.slane %v8873_v37, 9  ;;  %v4044_v29 = vrot.slane %v4042_v11, 4  ;;  %v4047_v18 = vrot.slane %v4045_v17, 5 }
 0x127   : > { %v8890_v3 = vadd.f32 %v6352_v5, %v1100_v8  ;;  %v1092_v58 = vadd.f32 %v1091_v62, %v8395_v57  ;;  %v8899_v44 = vrot.slane %v4051_v9, 5  ;;  %v4057_v41 = vrot.slane %v4055_v31, 4  ;;  %v9653_v62 = vld [vmem:[#allocation3_spill] sm:$0xff] }
 0x128   : > { %v6305_v63 = vpop.f32.mrf.mxu1  ;;  %v6356_v5 = vpop.f32.mrf.mxu0  ;;  %v9650_v0 = vcombine.low %v8587_v33, %v8595_v23  ;;  %v4066_v59 = vshrl.u32 %v5735_v28, 16  ;;  %v4069_v37 = vshll.u32 %v5735_v28, 16  ;;  %v9651_v11 = vcombine.low %v8639_v7, %v8643_v50 }
 0x129   : > { %9648 = vst [vmem:[#allocation25_spill] sm:$0xff] %v8890_v3  ;;  %v8904_v53 = vadd.f32 %v1544_v15, %v1092_v58  ;;  %v1103_v57 = vadd.f32 %v6305_v63, %v8431_v38  ;;  %v8913_v17 = vrot.slane %v4024_v20, 4  ;;  %v4034_v15 = vor.u32 %v4033_v24, %v8883_v40  ;;  %v5798_v58 = vld [vmem:[%s6875_s23 + $0x9c] sm:$0xe] }
 0x12a   : > { %v1094_v8 = vpop.f32.mrf.mxu1  ;;  %v4619_v9 = vrot.slane %v8809_v12, 5  ;;  %v4061_v38 = vshll.u32 %v8897_v61, 16  ;;  %v1560_v23 = vpop.f32.mrf.mxu0  ;;  %v4622_v28 = vrot.slane %v8832_v54, 5  ;;  %v4075_v63 = vshll.u32 %v8902_v14, 16 }
 0x12b   : > { %9649 = vst [vmem:[#allocation26_spill] sm:$0xff] %v8904_v53  ;;  %6643 = vmatmul.mubr.bf16.gmra.mxu0 %v9650_v0  ;;  %v8918_v31 = vadd.f32 %v6353_v45, %v1103_v57  ;;  %v1095_v33 = vadd.f32 %v1094_v8, %v9653_v62  ;;  %v4048_v50 = vor.u32 %v4047_v18, %v4044_v29  ;;  %v4626_v12 = vrot.slane %v8849_v6, 5  ;;  %v9654_v57 = vld [vmem:[#allocation7_spill] sm:$0xff]  ;;  %v9655_v6 = vld [vmem:[#allocation9_spill] sm:$0xff] }
 0x12c   : > { %6646 = vmatprep.mubr.bf16.mxu0 %v9651_v11  ;;  %v6308_v7 = vpop.f32.mrf.mxu1  ;;  %6595 = vmatmul.mubr.bf16.gmra.mxu1 %v8632_v2  ;;  %v4058_v20 = vor.u32 %v4057_v41, %v8899_v44  ;;  %v4079_v45 = vshrl.u32 %v8902_v14, 16  ;;  %v6357_v8 = vpop.f32.mrf.mxu0  ;;  %v4068_v54 = vrot.slane %v4066_v59, 4  ;;  %v4071_v11 = vrot.slane %v4069_v37, 5 }
 0x12d   : > { %9652 = vst [vmem:[#allocation27_spill] sm:$0xff] %v8918_v31  ;;  %v8928_v24 = vadd.f32 %v1547_v48, %v1095_v33  ;;  %v1116_v0 = vadd.f32 %v6308_v7, %v9654_v57  ;;  %6598 = vmatprep.mubr.bf16.mxu1 %v8674_v25  ;;  %v4035_v31 = vrot.slane %v4034_v15, 4  ;;  %v4621_v2 = vrot.slane %v4619_v9, 4 }
 0x12e   : > { %v1107_v62 = vpop.f32.mrf.mxu1  ;;  %v4063_v18 = vrot.slane %v4061_v38, 5  ;;  %v5814_v29 = vrot.slane %v5798_v58, 9  ;;  %v1563_v3 = vpop.f32.mrf.mxu0  ;;  %v8938_v48 = vrot.slane %v4075_v63, 5  ;;  %v4081_v33 = vrot.slane %v4079_v45, 4 }
 0x12f   : > { %v8932_v41 = vadd.f32 %v6356_v5, %v1116_v0  ;;  %v1108_v53 = vadd.f32 %v1107_v62, %v9655_v6  ;;  %v4049_v57 = vrot.slane %v4048_v50, 4  ;;  %v4059_v25 = vrot.slane %v4058_v20, 4 }
 0x130   : > { %v6309_v7 = vpop.f32.mrf.mxu1  ;;  %v4628_v59 = vrot.slane %v4626_v12, 4  ;;  %v4629_v37 = vrot.slane %v8897_v61, 5  ;;  %v6360_v38 = vpop.f32.mrf.mxu0  ;;  %v9656_v58 = vcombine.low %v8681_v49, %v8685_v16  ;;  %v8949_v63 = vsel %vm7217_vm5, %v5813_v21, %v4619_v9  ;;  %v5799_v21 = vld [vmem:[%s6875_s23 + $0xa8] sm:$0xe] }
 0x131   : > { %v8941_v15 = vadd.f32 %v1560_v23, %v1108_v53  ;;  %v1119_v5 = vadd.f32 %v6309_v7, %v8578_v39  ;;  %v4072_v50 = vor.u32 %v4071_v11, %v4068_v54  ;;  %v9657_v20 = vcombine.low %v8717_v60, %v8739_v10 }
 0x132   : > { %v1110_v45 = vpop.f32.mrf.mxu1  ;;  %v4030_v39 = vsel %vm6906_vm2, %v8913_v17, %v8883_v40  ;;  %v4040_v49 = vsel %vm6906_vm2, %v4035_v31, %v8893_v47  ;;  %v8963_v16 = vsel %vm7217_vm5, %v4621_v2, %v4622_v28  ;;  %v4085_v61 = vshll.u32 %v8936_v35, 16  ;;  %v1576_v60 = vpop.f32.mrf.mxu0  ;;  %v5738_v17 = vld [vmem:[%s6875_s23 + $0xb4] sm:$0xf]  ;;  %v9658_v47 = vld [vmem:[#allocation18_spill] sm:$0xff]  ;;  %v8992_v2 = vld [vmem:[%s6875_s23 + $0xb8] sm:$0xf] }
 0x133   : > { %6647 = vmatmul.mubr.bf16.gmra.mxu0 %v9656_v58  ;;  %v8967_v53 = vadd.f32 %v6357_v8, %v1119_v5  ;;  %v1111_v10 = vadd.f32 %v1110_v45, %v8612_v46  ;;  %v4082_v9 = vor.u32 %v4081_v33, %v8938_v48  ;;  %v4633_v40 = vrot.slane %v8902_v14, 5  ;;  %v9659_v8 = vld [vmem:[#allocation13_spill] sm:$0xff] }
 0x134   : > { %6650 = vmatprep.mubr.bf16.mxu0 %v9657_v20  ;;  %v6312_v23 = vpop.f32.mrf.mxu1  ;;  %6599 = vmatmul.mubr.bf16.gmra.mxu1 %v9658_v47  ;;  %v4054_v31 = vsel %vm6906_vm2, %v4049_v57, %v8899_v44  ;;  %v4064_v28 = vsel %vm6906_vm2, %v4059_v25, %v4063_v18  ;;  %v8981_v46 = vsel %vm7217_vm5, %v5814_v29, %v4626_v12  ;;  %v6361_v11 = vpop.f32.mrf.mxu0  ;;  %v4073_v62 = vrot.slane %v4072_v50, 4  ;;  %v9660_v57 = vld [vmem:[#allocation15_spill] sm:$0xff]  ;;  %v9664_v47 = vld [vmem:[#allocation20_spill] sm:$0xff] }
 0x135   : > { %v8985_v0 = vsel %vm7217_vm5, %v4628_v59, %v4629_v37  ;;  %v8987_v14 = vadd.f32 %v1563_v3, %v1111_v10  ;;  %v1132_v54 = vadd.f32 %v6312_v23, %v9659_v8  ;;  %6602 = vmatprep.mubr.bf16.mxu1 %v8821_v42  ;;  %v5815_v44 = vrot.slane %v5799_v21, 9 }
 0x136   : > { %v1123_v18 = vpop.f32.mrf.mxu1  ;;  %v4087_v6 = vrot.slane %v4085_v61, 5  ;;  %v4636_v12 = vrot.slane %v8936_v35, 5  ;;  %v4090_v29 = vshrl.u32 %v5738_v17, 16  ;;  %v4093_v33 = vshll.u32 %v5738_v17, 16  ;;  %v1579_v25 = vpop.f32.mrf.mxu0 }
 0x137   : > { %v8995_v7 = vadd.f32 %v6360_v38, %v1132_v54  ;;  %v1124_v3 = vadd.f32 %v1123_v18, %v9660_v57  ;;  %v4083_v59 = vrot.slane %v4082_v9, 4  ;;  %v4635_v37 = vrot.slane %v4633_v40, 4  ;;  %v9661_v38 = vld [vmem:[#allocation17_spill] sm:$0xff] }
 0x138   : > { %v6313_v42 = vpop.f32.mrf.mxu1  ;;  %v8998_v5 = vcombine.low %v4030_v39, %v4040_v49  ;;  %v5845_v58 = vcombine.low %v8949_v63, %v8963_v16  ;;  %v9002_v50 = vcombine.low %v4054_v31, %v4064_v28  ;;  %v4099_v35 = vshll.u32 %v8992_v2, 16  ;;  %v6364_v61 = vpop.f32.mrf.mxu0  ;;  %v5741_v49 = vld [vmem:[%s6875_s23 + $0xc0] sm:$0xf]  ;;  %v9016_v16 = vld [vmem:[%s6875_s23 + $0xc4] sm:$0xf] }
 0x139   : > { %v9005_v45 = vadd.f32 %v1576_v60, %v1124_v3  ;;  %v1135_v20 = vadd.f32 %v6313_v42, %v9661_v38  ;;  %v9662_v21 = vcombine.low %v8779_v51, %v8800_v55  ;;  %v5846_v39 = vcombine.low %v8981_v46, %v8985_v0  ;;  %v9669_v46 = vld [vmem:[#allocation6_spill] sm:$0xff] }
 0x13a   : > { %v4103_v63 = vshrl.u32 %v8992_v2, 16  ;;  %v1126_v10 = vpop.f32.mrf.mxu1  ;;  %v9663_v60 = vcombine.low %v8829_v13, %v8844_v30  ;;  %v4078_v51 = vsel %vm6906_vm2, %v4073_v62, %v8938_v48  ;;  %v9026_v55 = vsel %vm7217_vm5, %v5815_v44, %v4633_v40  ;;  %v1592_v28 = vpop.f32.mrf.mxu0  ;;  %v9038_v30 = vld [vmem:[%s6875_s23 + $0xbc] sm:$0x1]  ;;  %v5800_v48 = vld [vmem:[%s6875_s23 + $0xb4] sm:$0xe] }
 0x13b   : > { %6651 = vmatmul.mubr.bf16.gmra.mxu0 %v9662_v21  ;;  %v4092_v9 = vrot.slane %v4090_v29, 4  ;;  %v4095_v17 = vrot.slane %v4093_v33, 5  ;;  %v9028_v23 = vadd.f32 %v6361_v11, %v1135_v20  ;;  %v1127_v31 = vadd.f32 %v1126_v10, %v9664_v47  ;;  %v9060_v20 = vld [vmem:[%s6875_s23 + $0xc8] sm:$0x1] }
 0x13c   : > { %6654 = vmatprep.mubr.bf16.mxu0 %v9663_v60  ;;  %v4088_v8 = vsel %vm6906_vm2, %v4083_v59, %v4087_v6  ;;  %v9035_v13 = vsel %vm7217_vm5, %v4635_v37, %v4636_v12  ;;  %v6316_v54 = vpop.f32.mrf.mxu1  ;;  %6603 = vmatmul.mubr.bf16.gmra.mxu1 %v8823_v52  ;;  %v9042_v40 = vrot.slane %v4099_v35, 5  ;;  %v4114_v11 = vshrl.u32 %v5741_v49, 16  ;;  %v6365_v29 = vpop.f32.mrf.mxu0 }
 0x13d   : > { %v4117_v62 = vshll.u32 %v5741_v49, 16  ;;  %v4123_v44 = vshll.u32 %v9016_v16, 16  ;;  %v9045_v18 = vadd.f32 %v1579_v25, %v1127_v31  ;;  %v1148_v6 = vadd.f32 %v6316_v54, %v8763_v43  ;;  %6606 = vmatprep.mubr.bf16.mxu1 %v8879_v22 }
 0x13e   : > { %v4105_v12 = vrot.slane %v4103_v63, 4  ;;  %v4127_v33 = vshrl.u32 %v9016_v16, 16  ;;  %v1139_v57 = vpop.f32.mrf.mxu1  ;;  %v4096_v3 = vor.u32 %v4095_v17, %v4092_v9  ;;  %v4109_v52 = vshll.u32 %v9038_v30, 16  ;;  %v1595_v43 = vpop.f32.mrf.mxu0  ;;  %v5744_v9 = vld [vmem:[%s6875_s23 + $0xcc] sm:$0xf] }
 0x13f   : > { %v5816_v59 = vrot.slane %v5800_v48, 9  ;;  %v4640_v37 = vrot.slane %v8992_v2, 5  ;;  %v9052_v42 = vadd.f32 %v6364_v61, %v1148_v6  ;;  %v1140_v25 = vadd.f32 %v1139_v57, %v8782_v1  ;;  %v5801_v48 = vld [vmem:[%s6875_s23 + $0xc0] sm:$0xe] }
 0x140   : > { %v9055_v35 = vcombine.low %v4078_v51, %v4088_v8  ;;  %v5847_v22 = vcombine.low %v9026_v55, %v9035_v13  ;;  %v6317_v38 = vpop.f32.mrf.mxu1  ;;  %v4116_v21 = vrot.slane %v4114_v11, 4  ;;  %v4119_v63 = vrot.slane %v4117_v62, 5  ;;  %v6368_v10 = vpop.f32.mrf.mxu0  ;;  %v9082_v8 = vld [vmem:[%s6875_s23 + $0xd0] sm:$0xf] }
 0x141   : > { %v9062_v49 = vrot.slane %v4123_v44, 5  ;;  %v4129_v2 = vrot.slane %v4127_v33, 4  ;;  %v9064_v61 = vadd.f32 %v1592_v28, %v1140_v25  ;;  %v1151_v1 = vadd.f32 %v6317_v38, %v8802_v26 }
 0x142   : > { %v9665_v60 = vcombine.low %v8858_v19, %v8868_v36  ;;  %v4106_v51 = vor.u32 %v4105_v12, %v9042_v40  ;;  %v4643_v55 = vrot.slane %v9038_v30, 5  ;;  %v1142_v17 = vpop.f32.mrf.mxu1  ;;  %v9073_v47 = vrot.slane %v4096_v3, 4  ;;  %v1608_v13 = vpop.f32.mrf.mxu0 }
 0x143   : > { %v9075_v31 = vrot.slane %v4109_v52, 5  ;;  %v9079_v26 = vsel %vm7217_vm5, %v5816_v59, %v4640_v37  ;;  %v4642_v28 = vrot.slane %v4640_v37, 4  ;;  %v9084_v19 = vadd.f32 %v6365_v29, %v1151_v1  ;;  %v9666_v29 = vld [vmem:[#allocation2_spill] sm:$0xff] }
 0x144   : > { %6655 = vmatmul.mubr.bf16.gmra.mxu0 %v9665_v60  ;;  %v1143_v36 = vadd.f32 %v1142_v17, %v8811_v34  ;;  %v4133_v30 = vshll.u32 %v9060_v20, 16  ;;  %v6320_v54 = vpop.f32.mrf.mxu1  ;;  %6607 = vmatmul.mubr.bf16.gmra.mxu1 %v8885_v4  ;;  %v4120_v11 = vor.u32 %v4119_v63, %v4116_v21  ;;  %v4130_v62 = vor.u32 %v4129_v2, %v9062_v49  ;;  %v6369_v57 = vpop.f32.mrf.mxu0 }
 0x145   : > { %6658 = vmatprep.mubr.bf16.mxu0 %v5845_v58  ;;  %v4647_v58 = vrot.slane %v9016_v16, 5  ;;  %v4138_v44 = vshrl.u32 %v5744_v9, 16  ;;  %v4141_v6 = vshll.u32 %v5744_v9, 16  ;;  %v1164_v33 = vadd.f32 %v6320_v54, %v9666_v29  ;;  %6610 = vmatprep.mubr.bf16.mxu1 %v8998_v5 }
 0x146   : > { %v9092_v12 = vadd.f32 %v1595_v43, %v1143_v36  ;;  %v4147_v34 = vshll.u32 %v9082_v8, 16  ;;  %v4151_v3 = vshrl.u32 %v9082_v8, 16  ;;  %v1155_v16 = vpop.f32.mrf.mxu1  ;;  %v4107_v52 = vrot.slane %v4106_v51, 4  ;;  %v9667_v43 = vld [vmem:[#allocation5_spill] sm:$0xff]  ;;  %v1611_v21 = vpop.f32.mrf.mxu0  ;;  %v9668_v36 = vld [vmem:[#allocation4_spill] sm:$0xff] }
 0x147   : > { %v4644_v4 = vsel %vm7217_vm5, %v4642_v28, %v4643_v55  ;;  %v5817_v59 = vrot.slane %v5801_v48, 9  ;;  %v4650_v37 = vrot.slane %v9060_v20, 5  ;;  %v9101_v25 = vadd.f32 %v6368_v10, %v1164_v33  ;;  %v5746_v20 = vld [vmem:[%s6875_s23 + $0xd4] sm:$0x1] }
 0x148   : > { %v1156_v38 = vadd.f32 %v1155_v16, %v9667_v43  ;;  %v4135_v63 = vrot.slane %v4133_v30, 5  ;;  %v4649_v5 = vrot.slane %v4647_v58, 4  ;;  %v6321_v2 = vpop.f32.mrf.mxu1  ;;  %v4121_v1 = vrot.slane %v4120_v11, 4 }
 0x149   : > { %v4131_v60 = vrot.slane %v4130_v62, 4  ;;  %v4140_v9 = vrot.slane %v4138_v44, 4  ;;  %v4143_v17 = vrot.slane %v4141_v6, 5  ;;  %v1167_v55 = vadd.f32 %v6321_v2, %v9668_v36  ;;  %v6372_v28 = vpop.f32.mrf.mxu0  ;;  %v5802_v6 = vld [vmem:[%s6875_s23 + $0xcc] sm:$0xe] }
 0x14a   : > { %v9104_v51 = vadd.f32 %v1608_v13, %v1156_v38  ;;  %v9111_v10 = vrot.slane %v4147_v34, 5  ;;  %v4153_v30 = vrot.slane %v4151_v3, 4  ;;  %v1158_v48 = vpop.f32.mrf.mxu1  ;;  %v4102_v13 = vsel %vm6906_vm2, %v9073_v47, %v9042_v40 }
 0x14b   : > { %v4112_v54 = vsel %vm6906_vm2, %v4107_v52, %v9075_v31  ;;  %v4654_v11 = vrot.slane %v9082_v8, 5  ;;  %v9121_v62 = vadd.f32 %v6369_v57, %v1167_v55  ;;  %v1159_v0 = vadd.f32 %v1158_v48, %v9669_v46  ;;  %v9670_v57 = vld [vmem:[#allocation8_spill] sm:$0xff] }
 0x14c   : > { %6659 = vmatmul.mubr.bf16.gmra.mxu0 %v5846_v39  ;;  %v1624_v39 = vpop.f32.mrf.mxu0  ;;  %v4648_v44 = vsel %vm7217_vm5, %v5817_v59, %v4647_v58  ;;  %v6324_v29 = vpop.f32.mrf.mxu1  ;;  %6611 = vmatmul.mubr.bf16.gmra.mxu1 %v9002_v50  ;;  %v5848_v40 = vcombine.low %v9079_v26, %v4644_v4  ;;  %v4126_v47 = vsel %vm6906_vm2, %v4121_v1, %v9062_v49  ;;  %v4157_v8 = vshll.u32 %v5746_v20, 16  ;;  %v9673_v48 = vld [vmem:[#allocation12_spill] sm:$0xff] }
 0x14d   : > { %6662 = vmatprep.mubr.bf16.mxu0 %v5847_v22  ;;  %v4651_v22 = vsel %vm7217_vm5, %v4649_v5, %v4650_v37  ;;  %v4144_v31 = vor.u32 %v4143_v17, %v4140_v9  ;;  %v9134_v33 = vadd.f32 %v1611_v21, %v1159_v0  ;;  %v1180_v34 = vadd.f32 %v6324_v29, %v9670_v57  ;;  %v9671_v37 = vld [vmem:[#allocation10_spill] sm:$0xff]  ;;  %v9672_v9 = vld [vmem:[#allocation11_spill] sm:$0xff] }
 0x14e   : > { %v6373_v58 = vpop.f32.mrf.mxu0  ;;  %6614 = vmatprep.mubr.bf16.mxu1 %v9055_v35  ;;  %v4136_v3 = vsel %vm6906_vm2, %v4131_v60, %v4135_v63  ;;  %v4154_v50 = vor.u32 %v4153_v30, %v9111_v10  ;;  %v1171_v16 = vpop.f32.mrf.mxu1  ;;  %v5849_v26 = vcombine.low %v4648_v44, %v4651_v22  ;;  %v5818_v52 = vrot.slane %v5802_v6, 9  ;;  %v9674_v44 = vld [vmem:[#allocation14_spill] sm:$0xff] }
 0x14f   : > { %v4656_v4 = vrot.slane %v4654_v11, 4  ;;  %v4657_v59 = vrot.slane %v5746_v20, 5  ;;  %v9141_v49 = vadd.f32 %v6372_v28, %v1180_v34  ;;  %v1172_v43 = vadd.f32 %v1171_v16, %v9671_v37  ;;  %v9677_v37 = vld [vmem:[#allocation21_spill] sm:$0xff] }
 0x150   : > { %v1627_v38 = vpop.f32.mrf.mxu0  ;;  %v6325_v21 = vpop.f32.mrf.mxu1  ;;  %v5776_v5 = vcombine.low %v4102_v13, %v4112_v54  ;;  %v5777_v2 = vcombine.low %v4126_v47, %v4136_v3  ;;  %v4145_v1 = vrot.slane %v4144_v31, 4  ;;  %v4155_v17 = vrot.slane %v4154_v50, 4  ;;  %v9675_v47 = vld [vmem:[#allocation16_spill] sm:$0xff] }
 0x151   : > { %v9144_v35 = vadd.f32 %v1624_v39, %v1172_v43  ;;  %v1183_v63 = vadd.f32 %v6325_v21, %v9672_v9  ;;  %v4159_v36 = vrot.slane %v4157_v8, 5  ;;  %v4655_v28 = vsel %vm7217_vm5, %v5818_v52, %v4654_v11 }
 0x152   : > { %v6376_v60 = vpop.f32.mrf.mxu0  ;;  %v1174_v55 = vpop.f32.mrf.mxu1  ;;  %v4658_v20 = vsel %vm7217_vm5, %v4656_v4, %v4657_v59  ;;  %v4150_v0 = vsel %vm6906_vm2, %v4145_v1, %v9111_v10  ;;  %v9676_v10 = vld [vmem:[#allocation19_spill] sm:$0xff] }
 0x153   : > { %v9151_v30 = vadd.f32 %v6373_v58, %v1183_v63  ;;  %v1175_v13 = vadd.f32 %v1174_v55, %v9673_v48  ;;  %v4160_v56 = vsel %vm6906_vm2, %v4155_v17, %v4159_v36  ;;  %v5850_v11 = vcombine.low %v4655_v28, %v4658_v20  ;;  %v9679_v17 = vld [vmem:[#allocation23_spill] sm:$0xff]  ;;  %v9680_v20 = vld [vmem:[#allocation24_spill] sm:$0xff] }
 0x154   : > { %6663 = vmatmul.mubr.bf16.gmra.mxu0 %v5848_v40  ;;  %v1640_v54 = vpop.f32.mrf.mxu0  ;;  %v6328_v46 = vpop.f32.mrf.mxu1  ;;  %6615 = vmatmul.mubr.bf16.gmra.mxu1 %v5776_v5  ;;  %v5778_v34 = vcombine.low %v4150_v0, %v4160_v56  ;;  %v9681_v0 = vld [vmem:[#allocation25_spill] sm:$0xff] }
 0x155   : > { %6666 = vmatprep.mubr.bf16.mxu0 %v5849_v26  ;;  %v9157_v39 = vadd.f32 %v1627_v38, %v1175_v13  ;;  %v1196_v22 = vadd.f32 %v6328_v46, %v9674_v44  ;;  %6618 = vmatprep.mubr.bf16.mxu1 %v5777_v2  ;;  %v9678_v2 = vld [vmem:[#allocation22_spill] sm:$0xff] }
 0x156   : > { %v6377_v6 = vpop.f32.mrf.mxu0  ;;  %v1187_v29 = vpop.f32.mrf.mxu1 }
 0x157   : > { %v9162_v40 = vadd.f32 %v6376_v60, %v1196_v22  ;;  %v1188_v31 = vadd.f32 %v1187_v29, %v9675_v47 }
 0x158   : > { %v1643_v8 = vpop.f32.mrf.mxu0  ;;  %v6329_v57 = vpop.f32.mrf.mxu1 }
 0x159   : > { %v9165_v58 = vadd.f32 %v1640_v54, %v1188_v31  ;;  %v1199_v3 = vadd.f32 %v6329_v57, %v9676_v10  ;;  %v9683_v57 = vld [vmem:[#allocation27_spill] sm:$0xff] }
 0x15a   : > { %v6380_v50 = vpop.f32.mrf.mxu0  ;;  %v1190_v16 = vpop.f32.mrf.mxu1 }
 0x15b   : > { %v9168_v26 = vadd.f32 %v6377_v6, %v1199_v3  ;;  %v1191_v27 = vadd.f32 %v1190_v16, %v8758_v32 }
 0x15c   : > { %6667 = vmatmul.mubr.bf16.gmra.mxu0 %v5850_v11  ;;  %v1656_v52 = vpop.f32.mrf.mxu0  ;;  %v6332_v4 = vpop.f32.mrf.mxu1  ;;  %6619 = vmatmul.mubr.bf16.gmra.mxu1 %v5778_v34  ;;  %v9682_v11 = vld [vmem:[#allocation26_spill] sm:$0xff] }
 0x15d   : > { %v9171_v59 = vadd.f32 %v1643_v8, %v1191_v27  ;;  %v1212_v43 = vadd.f32 %v6332_v4, %v9677_v37 }
 0x15e   : > { %v6381_v38 = vpop.f32.mrf.mxu0  ;;  %v1203_v21 = vpop.f32.mrf.mxu1 }
 0x15f   : > { %v9174_v5 = vadd.f32 %v6380_v50, %v1212_v43  ;;  %v1204_v1 = vadd.f32 %v1203_v21, %v9678_v2 }
 0x160   : > { %v1659_v9 = vpop.f32.mrf.mxu0  ;;  %v6333_v63 = vpop.f32.mrf.mxu1 }
 0x161   : > { %v9177_v60 = vadd.f32 %v1656_v52, %v1204_v1  ;;  %v1215_v36 = vadd.f32 %v6333_v63, %v9679_v17 }
 0x162   : > { %v6448_v32 = vpop.f32.mrf.mxu0  ;;  %v1206_v55 = vpop.f32.mrf.mxu1 }
 0x163   : > { %v9180_v28 = vadd.f32 %v6381_v38, %v1215_v36  ;;  %v1207_v48 = vadd.f32 %v1206_v55, %v9680_v20 }
 0x164   : > { %v2685_v13 = vpop.f32.mrf.mxu0  ;;  %v6400_v54 = vpop.f32.mrf.mxu1 }
 0x165   : > { %v9183_v46 = vadd.f32 %v1659_v9, %v1207_v48  ;;  %v2060_v44 = vadd.f32 %v6400_v54, %v9681_v0 }
 0x166   : > { %v6449_v22 = vpop.f32.mrf.mxu0  ;;  %v1931_v6 = vpop.f32.mrf.mxu1 }
 0x167   : > { %v9186_v56 = vadd.f32 %v6448_v32, %v2060_v44  ;;  %v2058_v29 = vadd.f32 %v1931_v6, %v9682_v11 }
 0x168   : > { %v2688_v47 = vpop.f32.mrf.mxu0  ;;  %v6401_v31 = vpop.f32.mrf.mxu1 }
 0x169   : > { %v9189_v8 = vadd.f32 %v2685_v13, %v2058_v29  ;;  %v2061_v34 = vadd.f32 %v6401_v31, %v9683_v57 }
 0x16a   : > { %v6452_v10 = vpop.f32.mrf.mxu0  ;;  %v1934_v3 = vpop.f32.mrf.mxu1 }
 0x16b   : > { %v9192_v50 = vadd.f32 %v6449_v22, %v2061_v34  ;;  %v2059_v16 = vadd.f32 %v1934_v3, %v8928_v24 }
 0x16c   : > { %v2701_v27 = vpop.f32.mrf.mxu0  ;;  %v6404_v52 = vpop.f32.mrf.mxu1 }
 0x16d   : > { %v9195_v4 = vadd.f32 %v2688_v47, %v2059_v16  ;;  %v2064_v37 = vadd.f32 %v6404_v52, %v8932_v41 }
 0x16e   : > { %v6453_v43 = vpop.f32.mrf.mxu0  ;;  %v1947_v38 = vpop.f32.mrf.mxu1 }
 0x16f   : > { %v9198_v21 = vadd.f32 %v6452_v10, %v2064_v37  ;;  %v2062_v2 = vadd.f32 %v1947_v38, %v8941_v15 }
 0x170   : > { %v2704_v1 = vpop.f32.mrf.mxu0  ;;  %v6405_v9 = vpop.f32.mrf.mxu1 }
 0x171   : > { %v9201_v63 = vadd.f32 %v2701_v27, %v2062_v2  ;;  %v2065_v17 = vadd.f32 %v6405_v9, %v8967_v53 }
 0x172   : > { %v6456_v36 = vpop.f32.mrf.mxu0  ;;  %v1950_v24 = vpop.f32.mrf.mxu1 }
 0x173   : > { %v9204_v32 = vadd.f32 %v6453_v43, %v2065_v17  ;;  %v2063_v55 = vadd.f32 %v1950_v24, %v8987_v14 }
 0x174   : > { %v2717_v20 = vpop.f32.mrf.mxu0  ;;  %v6408_v41 = vpop.f32.mrf.mxu1 }
 0x175   : > { %v9207_v48 = vadd.f32 %v2704_v1, %v2063_v55  ;;  %v2068_v13 = vadd.f32 %v6408_v41, %v8995_v7 }
 0x176   : > { %v6457_v54 = vpop.f32.mrf.mxu0  ;;  %v1963_v15 = vpop.f32.mrf.mxu1 }
 0x177   : > { %v9210_v0 = vadd.f32 %v6456_v36, %v2068_v13  ;;  %v2066_v44 = vadd.f32 %v1963_v15, %v9005_v45 }
 0x178   : > { %v2720_v22 = vpop.f32.mrf.mxu0  ;;  %v6409_v53 = vpop.f32.mrf.mxu1 }
 0x179   : > { %v9213_v6 = vadd.f32 %v2717_v20, %v2066_v44  ;;  %v2069_v11 = vadd.f32 %v6409_v53, %v9028_v23 }
 0x17a   : > { %v6460_v29 = vpop.f32.mrf.mxu0  ;;  %v1966_v14 = vpop.f32.mrf.mxu1 }
 0x17b   : > { %v9216_v47 = vadd.f32 %v6457_v54, %v2069_v11  ;;  %v2067_v31 = vadd.f32 %v1966_v14, %v9045_v18 }
 0x17c   : > { %v2733_v57 = vpop.f32.mrf.mxu0  ;;  %v6412_v7 = vpop.f32.mrf.mxu1 }
 0x17d   : > { %v9219_v34 = vadd.f32 %v2720_v22, %v2067_v31  ;;  %v2072_v10 = vadd.f32 %v6412_v7, %v9052_v42 }
 0x17e   : > { %v6461_v3 = vpop.f32.mrf.mxu0  ;;  %v1979_v45 = vpop.f32.mrf.mxu1 }
 0x17f   : > { %v9222_v16 = vadd.f32 %v6460_v29, %v2072_v10  ;;  %v2070_v27 = vadd.f32 %v1979_v45, %v9064_v61 }
 0x180   : > { %v2736_v52 = vpop.f32.mrf.mxu0  ;;  %v6413_v23 = vpop.f32.mrf.mxu1 }
 0x181   : > { %v9225_v37 = vadd.f32 %v2733_v57, %v2070_v27  ;;  %v2073_v43 = vadd.f32 %v6413_v23, %v9084_v19 }
 0x182   : > { %v6464_v38 = vpop.f32.mrf.mxu0  ;;  %v1982_v18 = vpop.f32.mrf.mxu1 }
 0x183   : > { %v9228_v2 = vadd.f32 %v6461_v3, %v2073_v43  ;;  %v2071_v1 = vadd.f32 %v1982_v18, %v9092_v12 }
 0x184   : > { %v2749_v9 = vpop.f32.mrf.mxu0  ;;  %v6416_v42 = vpop.f32.mrf.mxu1 }
 0x185   : > { %v9231_v17 = vadd.f32 %v2736_v52, %v2071_v1  ;;  %v2076_v36 = vadd.f32 %v6416_v42, %v9101_v25 }
 0x186   : > { %v6465_v24 = vpop.f32.mrf.mxu0  ;;  %v1995_v61 = vpop.f32.mrf.mxu1 }
 0x187   : > { %v9234_v55 = vadd.f32 %v6464_v38, %v2076_v36  ;;  %v2074_v20 = vadd.f32 %v1995_v61, %v9104_v51 }
 0x188   : > { %v2752_v41 = vpop.f32.mrf.mxu0  ;;  %v6417_v19 = vpop.f32.mrf.mxu1 }
 0x189   : > { %v9237_v13 = vadd.f32 %v2749_v9, %v2074_v20  ;;  %v2077_v54 = vadd.f32 %v6417_v19, %v9121_v62 }
 0x18a   : > { %v6468_v15 = vpop.f32.mrf.mxu0  ;;  %v1998_v12 = vpop.f32.mrf.mxu1 }
 0x18b   : > { %v9240_v44 = vadd.f32 %v6465_v24, %v2077_v54  ;;  %v2075_v22 = vadd.f32 %v1998_v12, %v9134_v33 }
 0x18c   : > { %v2765_v53 = vpop.f32.mrf.mxu0  ;;  %v6420_v25 = vpop.f32.mrf.mxu1 }
 0x18d   : > { %v9243_v11 = vadd.f32 %v2752_v41, %v2075_v22  ;;  %v2080_v29 = vadd.f32 %v6420_v25, %v9141_v49 }
 0x18e   : > { %v6469_v14 = vpop.f32.mrf.mxu0  ;;  %v2011_v51 = vpop.f32.mrf.mxu1 }
 0x18f   : > { %v9246_v31 = vadd.f32 %v6468_v15, %v2080_v29  ;;  %v2078_v57 = vadd.f32 %v2011_v51, %v9144_v35 }
 0x190   : > { %v2768_v7 = vpop.f32.mrf.mxu0  ;;  %v6421_v62 = vpop.f32.mrf.mxu1 }
 0x191   : > { %v9249_v10 = vadd.f32 %v2765_v53, %v2078_v57  ;;  %v2081_v3 = vadd.f32 %v6421_v62, %v9151_v30 }
 0x192   : > { %v6472_v45 = vpop.f32.mrf.mxu0  ;;  %v2014_v33 = vpop.f32.mrf.mxu1 }
 0x193   : > { %v9252_v27 = vadd.f32 %v6469_v14, %v2081_v3  ;;  %v2079_v52 = vadd.f32 %v2014_v33, %v9157_v39 }
 0x194   : > { %v2781_v23 = vpop.f32.mrf.mxu0  ;;  %v6424_v49 = vpop.f32.mrf.mxu1 }
 0x195   : > { %v9255_v43 = vadd.f32 %v2768_v7, %v2079_v52  ;;  %v2084_v38 = vadd.f32 %v6424_v49, %v9162_v40 }
 0x196   : > { %v6473_v18 = vpop.f32.mrf.mxu0  ;;  %v2027_v35 = vpop.f32.mrf.mxu1 }
 0x197   : > { %v9258_v1 = vadd.f32 %v6472_v45, %v2084_v38  ;;  %v2082_v9 = vadd.f32 %v2027_v35, %v9165_v58 }
 0x198   : > { %v2784_v42 = vpop.f32.mrf.mxu0  ;;  %v6425_v30 = vpop.f32.mrf.mxu1 }
 0x199   : > { %v9261_v36 = vadd.f32 %v2781_v23, %v2082_v9  ;;  %v2085_v24 = vadd.f32 %v6425_v30, %v9168_v26 }
 0x19a   : > { %v6476_v61 = vpop.f32.mrf.mxu0  ;;  %v2030_v39 = vpop.f32.mrf.mxu1 }
 0x19b   : > { %v9264_v20 = vadd.f32 %v6473_v18, %v2085_v24  ;;  %v2083_v41 = vadd.f32 %v2030_v39, %v9171_v59 }
 0x19c   : > { %v2797_v19 = vpop.f32.mrf.mxu0  ;;  %v6428_v40 = vpop.f32.mrf.mxu1 }
 0x19d   : > { %9684 = vst [vmem:[#allocation3_spill] sm:$0xff] %v9264_v20  ;;  %v9267_v54 = vadd.f32 %v2784_v42, %v2083_v41  ;;  %v2088_v15 = vadd.f32 %v6428_v40, %v9174_v5 }
 0x19e   : > { %v6477_v12 = vpop.f32.mrf.mxu0  ;;  %v2043_v58 = vpop.f32.mrf.mxu1 }
 0x19f   : > { %9685 = vst [vmem:[#allocation7_spill] sm:$0xff] %v9267_v54  ;;  %v9270_v22 = vadd.f32 %v6476_v61, %v2088_v15  ;;  %v2086_v53 = vadd.f32 %v2043_v58, %v9177_v60 }
 0x1a0   : > { %v2800_v25 = vpop.f32.mrf.mxu0  ;;  %v6429_v26 = vpop.f32.mrf.mxu1 }
 0x1a1   : > { %v9273_v29 = vadd.f32 %v2797_v19, %v2086_v53  ;;  %v2089_v14 = vadd.f32 %v6429_v26, %v9180_v28 }
 0x1a2   : > { %v6544_v51 = vpop.f32.mrf.mxu0  ;;  %v2046_v59 = vpop.f32.mrf.mxu1 }
 0x1a3   : > { %v9276_v57 = vadd.f32 %v6477_v12, %v2089_v14  ;;  %v2087_v7 = vadd.f32 %v2046_v59, %v9183_v46 }
 0x1a4   : > { %v3570_v62 = vpop.f32.mrf.mxu0  ;;  %v6496_v5 = vpop.f32.mrf.mxu1 }
 0x1a5   : > { %9686 = vst [vmem:[#allocation9_spill] sm:$0xff] %v9276_v57  ;;  %v9279_v3 = vadd.f32 %v2800_v25, %v2087_v7  ;;  %v3312_v45 = vadd.f32 %v6496_v5, %v9186_v56 }
 0x1a6   : > { %v9282_v33 = vpop.f32.mrf.mxu0  ;;  %v3183_v60 = vpop.f32.mrf.mxu1 }
 0x1a7   : > { %9687 = vst [vmem:[#allocation18_spill] sm:$0xff] %v9279_v3  ;;  %v9284_v52 = vadd.f32 %v6544_v51, %v3312_v45  ;;  %v3310_v23 = vadd.f32 %v3183_v60, %v9189_v8 }
 0x1a8   : > { %v9287_v28 = vpop.f32.mrf.mxu0  ;;  %v9289_v49 = vpop.f32.mrf.mxu1 }
 0x1a9   : > { %v9291_v38 = vadd.f32 %v3570_v62, %v3310_v23 }
 0x1aa   : > { %v6548_v46 = vpop.f32.mrf.mxu0  ;;  %v9293_v18 = vpop.f32.mrf.mxu1 }
 0x1ac   : > { %v3586_v35 = vpop.f32.mrf.mxu0  ;;  %v6500_v9 = vpop.f32.mrf.mxu1 }
 0x1ad   : > { %v3316_v56 = vadd.f32 %v6500_v9, %v9198_v21 }
 0x1ae   : > { %v9296_v42 = vpop.f32.mrf.mxu0  ;;  %v3199_v30 = vpop.f32.mrf.mxu1 }
 0x1af   : > { %v9298_v24 = vadd.f32 %v6548_v46, %v3316_v56  ;;  %v3314_v8 = vadd.f32 %v3199_v30, %v9201_v63 }
 0x1b0   : > { %v9301_v61 = vpop.f32.mrf.mxu0  ;;  %v9303_v39 = vpop.f32.mrf.mxu1 }
 0x1b1   : > { %v9305_v41 = vadd.f32 %v3586_v35, %v3314_v8 }
 0x1b2   : > { %v6552_v19 = vpop.f32.mrf.mxu0  ;;  %v9307_v40 = vpop.f32.mrf.mxu1 }
 0x1b4   : > { %v3602_v15 = vpop.f32.mrf.mxu0  ;;  %v6504_v12 = vpop.f32.mrf.mxu1 }
 0x1b5   : > { %v3320_v21 = vadd.f32 %v6504_v12, %v9210_v0 }
 0x1b6   : > { %v9310_v58 = vpop.f32.mrf.mxu0  ;;  %v3215_v53 = vpop.f32.mrf.mxu1 }
 0x1b7   : > { %v9312_v25 = vadd.f32 %v6552_v19, %v3320_v21  ;;  %v3318_v63 = vadd.f32 %v3215_v53, %v9213_v6 }
 0x1b8   : > { %v9315_v26 = vpop.f32.mrf.mxu0  ;;  %v9317_v14 = vpop.f32.mrf.mxu1 }
 0x1b9   : > { %v9319_v51 = vadd.f32 %v3602_v15, %v3318_v63 }
 0x1ba   : > { %v6556_v59 = vpop.f32.mrf.mxu0  ;;  %v9321_v7 = vpop.f32.mrf.mxu1 }
 0x1bc   : > { %v3618_v62 = vpop.f32.mrf.mxu0  ;;  %v6508_v5 = vpop.f32.mrf.mxu1 }
 0x1bd   : > { %v3324_v0 = vadd.f32 %v6508_v5, %v9222_v16 }
 0x1be   : > { %v9324_v45 = vpop.f32.mrf.mxu0  ;;  %v3231_v60 = vpop.f32.mrf.mxu1 }
 0x1bf   : > { %v9326_v23 = vadd.f32 %v6556_v59, %v3324_v0  ;;  %v3322_v6 = vadd.f32 %v3231_v60, %v9225_v37 }
 0x1c0   : > { %v9329_v46 = vpop.f32.mrf.mxu0  ;;  %v9331_v35 = vpop.f32.mrf.mxu1 }
 0x1c1   : > { %v9333_v9 = vadd.f32 %v3618_v62, %v3322_v6 }
 0x1c2   : > { %v6560_v56 = vpop.f32.mrf.mxu0  ;;  %v9335_v30 = vpop.f32.mrf.mxu1 }
 0x1c4   : > { %v3634_v8 = vpop.f32.mrf.mxu0  ;;  %v6512_v19 = vpop.f32.mrf.mxu1 }
 0x1c5   : > { %v3328_v16 = vadd.f32 %v6512_v19, %v9234_v55 }
 0x1c6   : > { %v9338_v15 = vpop.f32.mrf.mxu0  ;;  %v3247_v12 = vpop.f32.mrf.mxu1 }
 0x1c7   : > { %v9340_v21 = vadd.f32 %v6560_v56, %v3328_v16  ;;  %v3326_v37 = vadd.f32 %v3247_v12, %v9237_v13 }
 0x1c8   : > { %v9343_v53 = vpop.f32.mrf.mxu0  ;;  %v9345_v63 = vpop.f32.mrf.mxu1 }
 0x1c9   : > { %v9347_v59 = vadd.f32 %v3634_v8, %v3326_v37 }
 0x1ca   : > { %v6564_v62 = vpop.f32.mrf.mxu0  ;;  %v9349_v5 = vpop.f32.mrf.mxu1 }
 0x1cc   : > { %v3650_v0 = vpop.f32.mrf.mxu0  ;;  %v6516_v60 = vpop.f32.mrf.mxu1 }
 0x1cd   : > { %v3332_v55 = vadd.f32 %v6516_v60, %v9246_v31 }
 0x1ce   : > { %v9352_v6 = vpop.f32.mrf.mxu0  ;;  %v3263_v19 = vpop.f32.mrf.mxu1 }
 0x1cf   : > { %9688 = vst [vmem:[#allocation13_spill] sm:$0xff] %v9352_v6  ;;  %v9354_v56 = vadd.f32 %v6564_v62, %v3332_v55  ;;  %v3330_v13 = vadd.f32 %v3263_v19, %v9249_v10 }
 0x1d0   : > { %v9357_v16 = vpop.f32.mrf.mxu0  ;;  %v9359_v12 = vpop.f32.mrf.mxu1 }
 0x1d1   : > { %9689 = vst [vmem:[#allocation15_spill] sm:$0xff] %v9357_v16  ;;  %v9361_v8 = vadd.f32 %v3650_v0, %v3330_v13 }
 0x1d2   : > { %v6568_v37 = vpop.f32.mrf.mxu0  ;;  %v9363_v3 = vpop.f32.mrf.mxu1 }
 0x1d3   : > { %9690 = vst [vmem:[#allocation17_spill] sm:$0xff] %v9361_v8 }
 0x1d4   : > { %v3666_v57 = vpop.f32.mrf.mxu0  ;;  %v6520_v54 = vpop.f32.mrf.mxu1 }
 0x1d5   : > { %v3336_v31 = vadd.f32 %v6520_v54, %v9258_v1 }
 0x1d6   : > { %v9366_v60 = vpop.f32.mrf.mxu0  ;;  %v3279_v20 = vpop.f32.mrf.mxu1 }
 0x1d7   : > { %9691 = vst [vmem:[#allocation20_spill] sm:$0xff] %v9366_v60  ;;  %v9368_v62 = vadd.f32 %v6568_v37, %v3336_v31  ;;  %v3334_v10 = vadd.f32 %v3279_v20, %v9261_v36 }
 0x1d8   : > { %v9371_v55 = vpop.f32.mrf.mxu0  ;;  %v9373_v19 = vpop.f32.mrf.mxu1 }
 0x1d9   : > { %9692 = vst [vmem:[#allocation2_spill] sm:$0xff] %v9371_v55  ;;  %v9375_v0 = vadd.f32 %v3666_v57, %v3334_v10 }
 0x1da   : > { %v6572_v13 = vpop.f32.mrf.mxu0  ;;  %v9377_v16 = vpop.f32.mrf.mxu1 }
 0x1db   : > { %9693 = vst [vmem:[#allocation5_spill] sm:$0xff] %v9375_v0  ;;  %v3313_v0 = vadd.f32 %v9289_v49, %v9192_v50  ;;  %v9403_v50 = vld [vmem:[%s9521_s2] ss:$0 sm:$0xff] }
 0x1dc   : > { %v3682_v8 = vpop.f32.mrf.mxu0  ;;  %v6524_v6 = vpop.f32.mrf.mxu1 }
 0x1dd   : > { %v3340_v1 = vadd.f32 %v6524_v6, %v9270_v22 }
 0x1de   : > { %v9380_v54 = vpop.f32.mrf.mxu0  ;;  %v3295_v60 = vpop.f32.mrf.mxu1 }
 0x1df   : > { %9694 = vst [vmem:[#allocation4_spill] sm:$0xff] %v9380_v54  ;;  %v9382_v37 = vadd.f32 %v6572_v13, %v3340_v1  ;;  %v3338_v36 = vadd.f32 %v3295_v60, %v9273_v29  ;;  %v3311_v13 = vadd.f32 %v9293_v18, %v9195_v4 }
 0x1e0   : > { %v9385_v20 = vpop.f32.mrf.mxu0  ;;  %v9387_v31 = vpop.f32.mrf.mxu1 }
 0x1e1   : > { %9695 = vst [vmem:[#allocation6_spill] sm:$0xff] %v9382_v37  ;;  %9696 = vst [vmem:[#allocation8_spill] sm:$0xff] %v9385_v20  ;;  %v9389_v57 = vadd.f32 %v3682_v8, %v3338_v36  ;;  %v3700_v20 = vadd.f32 %v9282_v33, %v3313_v0 }
 0x1e2   : > { %v9391_v55 = vpop.f32.mrf.mxu1 }
 0x1e3   : > { %9697 = vst [vmem:[#allocation10_spill] sm:$0xff] %v9389_v57  ;;  %v6640_v10 = vpop.f32.mrf.mxu0  ;;  %9698 = vst [vmem:[#allocation11_spill] sm:$0xff] %v9391_v55  ;;  %v3698_v57 = vadd.f32 %v9287_v28, %v3311_v13 }
 0x1e4   : > { %v6592_v6 = vpop.f32.mrf.mxu1 }
 0x1e5   : > { %v4822_v22 = vpop.f32.mrf.mxu0  ;;  %v4453_v1 = vadd.f32 %v6592_v6, %v9284_v52 }
 0x1e6   : > { %v4324_v60 = vpop.f32.mrf.mxu1 }
 0x1e7   : > { %v6641_v29 = vpop.f32.mrf.mxu0  ;;  %v4951_v54 = vadd.f32 %v6640_v10, %v4453_v1  ;;  %v4451_v8 = vadd.f32 %v4324_v60, %v9291_v38  ;;  %v3317_v38 = vadd.f32 %v9303_v39, %v9204_v32  ;;  %v3315_v1 = vadd.f32 %v9307_v40, %v9207_v48 }
 0x1e8   : > { %v6593_v49 = vpop.f32.mrf.mxu1 }
 0x1e9   : > { %v4825_v36 = vpop.f32.mrf.mxu0  ;;  %v4949_v4 = vadd.f32 %v4822_v22, %v4451_v8  ;;  %v4454_v18 = vadd.f32 %v6593_v49, %v3700_v20  ;;  %v4990_v37 = vadd.f32 %v9403_v50, %v4951_v54  ;;  %v3704_v48 = vadd.f32 %v9296_v42, %v3317_v38 }
 0x1ea   : > { %v4327_v6 = vpop.f32.mrf.mxu1  ;;  %v3702_v40 = vadd.f32 %v9301_v61, %v3315_v1  ;;  %v3321_v42 = vadd.f32 %v9317_v14, %v9216_v47 }
 0x1eb   : > { %v6644_v52 = vpop.f32.mrf.mxu0  ;;  %v4952_v33 = vadd.f32 %v6641_v29, %v4454_v18  ;;  %v4452_v0 = vadd.f32 %v4327_v6, %v3698_v57  ;;  %v4988_v55 = vadd.f32 %v9403_v50, %v4949_v4  ;;  %v5022_v29 = vmax.f32 %v4990_v37, 0.0 }
 0x1ec   : > { %v6596_v60 = vpop.f32.mrf.mxu1 }
 0x1ed   : > { %v4838_v10 = vpop.f32.mrf.mxu0  ;;  %v4991_v28 = vadd.f32 %v9403_v50, %v4952_v33  ;;  %v4950_v20 = vadd.f32 %v4825_v36, %v4452_v0  ;;  %v4457_v22 = vadd.f32 %v6596_v60, %v9298_v24  ;;  %v5020_v37 = vmax.f32 %v4988_v55, 0.0 }
 0x1ee   : > { %v4340_v54 = vpop.f32.mrf.mxu1 }
 0x1ef   : > { %v6645_v13 = vpop.f32.mrf.mxu0  ;;  %v5023_v57 = vmax.f32 %v4991_v28, 0.0  ;;  %v4989_v8 = vadd.f32 %v9403_v50, %v4950_v20  ;;  %v4455_v32 = vadd.f32 %v4340_v54, %v9305_v41  ;;  %v4955_v24 = vadd.f32 %v6644_v52, %v4457_v22 }
 0x1f0   : > { %v6597_v36 = vpop.f32.mrf.mxu1  ;;  %v3319_v22 = vadd.f32 %v9321_v7, %v9219_v34  ;;  %v3708_v54 = vadd.f32 %v9310_v58, %v3321_v42  ;;  %v3325_v58 = vadd.f32 %v9331_v35, %v9228_v2  ;;  %v3323_v42 = vadd.f32 %v9335_v30, %v9231_v17 }
 0x1f1   : > { %v4841_v39 = vpop.f32.mrf.mxu0  ;;  %v5935_v49 = vpack.c.bf16 %v5023_v57, %v5022_v29  ;;  %v5021_v4 = vmax.f32 %v4989_v8, 0.0  ;;  %v4953_v18 = vadd.f32 %v4838_v10, %v4455_v32  ;;  %v4458_v41 = vadd.f32 %v6597_v36, %v3704_v48 }
 0x1f2   : > { %v4343_v33 = vpop.f32.mrf.mxu1  ;;  %v4994_v1 = vadd.f32 %v9403_v50, %v4955_v24  ;;  %v3706_v7 = vadd.f32 %v9315_v26, %v3319_v22  ;;  %v3712_v35 = vadd.f32 %v9324_v45, %v3325_v58 }
 0x1f3   : > { %v6648_v6 = vpop.f32.mrf.mxu0  ;;  %6007 = vst [vmem:[%s9422_s20 + $0x8] sm:$0xff] %v5935_v49   ;;  %v5930_v61 = vpack.c.bf16 %v5021_v4, %v5020_v37  ;;  %v4456_v0 = vadd.f32 %v4343_v33, %v3702_v40  ;;  %v4956_v60 = vadd.f32 %v6645_v13, %v4458_v41  ;;  %v4992_v55 = vadd.f32 %v9403_v50, %v4953_v18 }
 0x1f4   : > { %v6600_v52 = vpop.f32.mrf.mxu1  ;;  %v5026_v32 = vmax.f32 %v4994_v1, 0.0 }
 0x1f5   : > { %v4854_v38 = vpop.f32.mrf.mxu0  ;;  %5931 = vst [vmem:[%s9422_s20] sm:$0xff] %v5930_v61   ;;  %v4954_v28 = vadd.f32 %v4841_v39, %v4456_v0  ;;  %v4461_v10 = vadd.f32 %v6600_v52, %v9312_v25  ;;  %v4995_v47 = vadd.f32 %v9403_v50, %v4956_v60  ;;  %v5024_v25 = vmax.f32 %v4992_v55, 0.0 }
 0x1f6   : > { %v4356_v14 = vpop.f32.mrf.mxu1 }
 0x1f7   : > { %v6649_v20 = vpop.f32.mrf.mxu0  ;;  %v4993_v29 = vadd.f32 %v9403_v50, %v4954_v28  ;;  %v4959_v57 = vadd.f32 %v6648_v6, %v4461_v10  ;;  %v4459_v13 = vadd.f32 %v4356_v14, %v9319_v51  ;;  %v5027_v39 = vmax.f32 %v4995_v47, 0.0 }
 0x1f8   : > { %v6601_v48 = vpop.f32.mrf.mxu1 }
 0x1f9   : > { %v4857_v8 = vpop.f32.mrf.mxu0  ;;  %v5025_v40 = vmax.f32 %v4993_v29, 0.0  ;;  %v4462_v24 = vadd.f32 %v6601_v48, %v3708_v54  ;;  %v5945_v36 = vpack.c.bf16 %v5027_v39, %v5026_v32  ;;  %v4957_v37 = vadd.f32 %v4854_v38, %v4459_v13 }
 0x1fa   : > { %v4359_v49 = vpop.f32.mrf.mxu1  ;;  %v4998_v51 = vadd.f32 %v9403_v50, %v4959_v57  ;;  %v3329_v32 = vadd.f32 %v9345_v63, %v9240_v44 }
 0x1fb   : > { %v6652_v34 = vpop.f32.mrf.mxu0  ;;  %v5940_v4 = vpack.c.bf16 %v5025_v40, %v5024_v25  ;;  %v4960_v18 = vadd.f32 %v6649_v20, %v4462_v24  ;;  %6009 = vst [vmem:[%s9422_s20 + $0x18] sm:$0xff] %v5945_v36   ;;  %v4460_v41 = vadd.f32 %v4359_v49, %v3706_v7  ;;  %v4996_v0 = vadd.f32 %v9403_v50, %v4957_v37 }
 0x1fc   : > { %v6604_v33 = vpop.f32.mrf.mxu1  ;;  %v5030_v60 = vmax.f32 %v4998_v51, 0.0  ;;  %v3710_v20 = vadd.f32 %v9329_v46, %v3323_v42  ;;  %v3327_v46 = vadd.f32 %v9349_v5, %v9243_v11  ;;  %v3716_v5 = vadd.f32 %v9338_v15, %v3329_v32 }
 0x1fd   : > { %v4870_v6 = vpop.f32.mrf.mxu0  ;;  %6008 = vst [vmem:[%s9422_s20 + $0x10] sm:$0xff] %v5940_v4   ;;  %v4999_v26 = vadd.f32 %v9403_v50, %v4960_v18  ;;  %v4465_v61 = vadd.f32 %v6604_v33, %v9326_v23  ;;  %v4958_v38 = vadd.f32 %v4857_v8, %v4460_v41  ;;  %v5028_v14 = vmax.f32 %v4996_v0, 0.0 }
 0x1fe   : > { %v4372_v1 = vpop.f32.mrf.mxu1  ;;  %v3714_v49 = vadd.f32 %v9343_v53, %v3327_v46 }
 0x1ff   : > { %v6653_v2 = vpop.f32.mrf.mxu0  ;;  %v5031_v52 = vmax.f32 %v4999_v26, 0.0  ;;  %v4963_v55 = vadd.f32 %v6652_v34, %v4465_v61  ;;  %v4463_v28 = vadd.f32 %v4372_v1, %v9333_v9  ;;  %v4997_v17 = vadd.f32 %v9403_v50, %v4958_v38 }
 0x200   : > { %v6605_v30 = vpop.f32.mrf.mxu1  ;;  %v3333_v61 = vadd.f32 %v9359_v12, %v9252_v27 }
 0x201   : > { %v4873_v10 = vpop.f32.mrf.mxu0  ;;  %v5955_v23 = vpack.c.bf16 %v5031_v52, %v5030_v60  ;;  %v4961_v22 = vadd.f32 %v4870_v6, %v4463_v28  ;;  %v4466_v47 = vadd.f32 %v6605_v30, %v3712_v35  ;;  %v5029_v54 = vmax.f32 %v4997_v17, 0.0  ;;  %v9699_v28 = vld [vmem:[#allocation13_spill] sm:$0xff] }
 0x202   : > { %v4375_v29 = vpop.f32.mrf.mxu1  ;;  %v5002_v57 = vadd.f32 %v9403_v50, %v4963_v55  ;;  %v3331_v55 = vadd.f32 %v9363_v3, %v9255_v43  ;;  %v9701_v3 = vld [vmem:[#allocation15_spill] sm:$0xff] }
 0x203   : > { %6011 = vst [vmem:[%s9422_s20 + $0x28] sm:$0xff] %v5955_v23   ;;  %v4964_v13 = vadd.f32 %v6653_v2, %v4466_v47  ;;  %v4464_v8 = vadd.f32 %v4375_v29, %v3710_v20  ;;  %v5950_v39 = vpack.c.bf16 %v5029_v54, %v5028_v14  ;;  %v5000_v25 = vadd.f32 %v9403_v50, %v4961_v22  ;;  %v9700_v20 = vld [vmem:[#allocation17_spill] sm:$0xff] }
 0x204   : > { %v6656_v45 = vpop.f32.mrf.mxu0  ;;  %v6608_v48 = vpop.f32.mrf.mxu1  ;;  %v5034_v36 = vmax.f32 %v5002_v57, 0.0  ;;  %v3718_v57 = vadd.f32 %v9701_v3, %v3331_v55  ;;  %v9708_v55 = vld [vmem:[#allocation18_spill] sm:$0xff] }
 0x205   : > { %v5003_v40 = vadd.f32 %v9403_v50, %v4964_v13  ;;  %v4962_v24 = vadd.f32 %v4873_v10, %v4464_v8  ;;  %v4469_v34 = vadd.f32 %v6608_v48, %v9340_v21  ;;  %6010 = vst [vmem:[%s9422_s20 + $0x20] sm:$0xff] %v5950_v39   ;;  %v5032_v18 = vmax.f32 %v5000_v25, 0.0  ;;  %v9702_v13 = vld [vmem:[#allocation3_spill] sm:$0xff] }
 0x206   : > { %v4886_v9 = vpop.f32.mrf.mxu0  ;;  %v4388_v58 = vpop.f32.mrf.mxu1  ;;  %v3720_v10 = vadd.f32 %v9699_v28, %v3333_v61  ;;  %v3337_v8 = vadd.f32 %v9373_v19, %v9702_v13 }
 0x207   : > { %v5035_v37 = vmax.f32 %v5003_v40, 0.0  ;;  %v5001_v44 = vadd.f32 %v9403_v50, %v4962_v24  ;;  %v4467_v63 = vadd.f32 %v4388_v58, %v9347_v59  ;;  %v4967_v4 = vadd.f32 %v6656_v45, %v4469_v34 }
 0x208   : > { %v6657_v7 = vpop.f32.mrf.mxu0  ;;  %v6609_v51 = vpop.f32.mrf.mxu1 }
 0x209   : > { %v5965_v21 = vpack.c.bf16 %v5035_v37, %v5034_v36  ;;  %v5033_v6 = vmax.f32 %v5001_v44, 0.0  ;;  %v4965_v41 = vadd.f32 %v4886_v9, %v4467_v63  ;;  %v4470_v42 = vadd.f32 %v6609_v51, %v3716_v5  ;;  %v9704_v44 = vld [vmem:[#allocation20_spill] sm:$0xff] }
 0x20a   : > { %v4889_v11 = vpop.f32.mrf.mxu0  ;;  %v4391_v26 = vpop.f32.mrf.mxu1  ;;  %v5006_v15 = vadd.f32 %v9403_v50, %v4967_v4  ;;  %v3724_v63 = vadd.f32 %v9704_v44, %v3337_v8 }
 0x20b   : > { %6013 = vst [vmem:[%s9422_s20 + $0x38] sm:$0xff] %v5965_v21   ;;  %v5960_v59 = vpack.c.bf16 %v5033_v6, %v5032_v18  ;;  %v4468_v2 = vadd.f32 %v4391_v26, %v3714_v49  ;;  %v4968_v53 = vadd.f32 %v6657_v7, %v4470_v42  ;;  %v5004_v38 = vadd.f32 %v9403_v50, %v4965_v41  ;;  %v9703_v7 = vld [vmem:[#allocation7_spill] sm:$0xff]  ;;  %v9705_v21 = vld [vmem:[#allocation5_spill] sm:$0xff]  ;;  %v9706_v42 = vld [vmem:[#allocation2_spill] sm:$0xff] }
 0x20c   : > { %v6660_v33 = vpop.f32.mrf.mxu0  ;;  %v6612_v0 = vpop.f32.mrf.mxu1  ;;  %v5038_v47 = vmax.f32 %v5006_v15, 0.0  ;;  %v3335_v58 = vadd.f32 %v9377_v16, %v9703_v7 }
 0x20d   : > { %6012 = vst [vmem:[%s9422_s20 + $0x30] sm:$0xff] %v5960_v59   ;;  %v4966_v1 = vadd.f32 %v4889_v11, %v4468_v2  ;;  %v4473_v60 = vadd.f32 %v6612_v0, %v9354_v56  ;;  %v5007_v27 = vadd.f32 %v9403_v50, %v4968_v53  ;;  %v5036_v56 = vmax.f32 %v5004_v38, 0.0 }
 0x20e   : > { %v4902_v35 = vpop.f32.mrf.mxu0  ;;  %v4404_v12 = vpop.f32.mrf.mxu1  ;;  %v3722_v26 = vadd.f32 %v9706_v42, %v3335_v58 }
 0x20f   : > { %v5005_v17 = vadd.f32 %v9403_v50, %v4966_v1  ;;  %v4971_v30 = vadd.f32 %v6660_v33, %v4473_v60  ;;  %v4471_v23 = vadd.f32 %v4404_v12, %v9700_v20  ;;  %v5039_v45 = vmax.f32 %v5007_v27, 0.0  ;;  %v9707_v60 = vld [vmem:[#allocation9_spill] sm:$0xff]  ;;  %v9709_v27 = vld [vmem:[#allocation11_spill] sm:$0xff] }
 0x210   : > { %v6661_v52 = vpop.f32.mrf.mxu0  ;;  %v6613_v14 = vpop.f32.mrf.mxu1  ;;  %v3339_v12 = vadd.f32 %v9709_v27, %v9708_v55 }
 0x211   : > { %v5037_v54 = vmax.f32 %v5005_v17, 0.0  ;;  %v4474_v29 = vadd.f32 %v6613_v14, %v3720_v10  ;;  %v5975_v9 = vpack.c.bf16 %v5039_v45, %v5038_v47  ;;  %v4969_v32 = vadd.f32 %v4902_v35, %v4471_v23 }
 0x212   : > { %v4905_v22 = vpop.f32.mrf.mxu0  ;;  %v4407_v46 = vpop.f32.mrf.mxu1  ;;  %v5010_v48 = vadd.f32 %v9403_v50, %v4971_v30 }
 0x213   : > { %v5970_v39 = vpack.c.bf16 %v5037_v54, %v5036_v56  ;;  %v4972_v25 = vadd.f32 %v6661_v52, %v4474_v29  ;;  %6015 = vst [vmem:[%s9422_s20 + $0x48] sm:$0xff] %v5975_v9   ;;  %v4472_v24 = vadd.f32 %v4407_v46, %v3718_v57  ;;  %v5008_v11 = vadd.f32 %v9403_v50, %v4969_v32  ;;  %v9711_v54 = vld [vmem:[#allocation10_spill] sm:$0xff]  ;;  %v9713_v57 = vld [vmem:[#allocation8_spill] sm:$0xff] }
 0x214   : > { %v6664_v43 = vpop.f32.mrf.mxu0  ;;  %v6616_v34 = vpop.f32.mrf.mxu1  ;;  %v5042_v4 = vmax.f32 %v5010_v48, 0.0  ;;  %v3341_v52 = vadd.f32 %v9387_v31, %v9707_v60  ;;  %v3726_v13 = vadd.f32 %v9713_v57, %v3339_v12 }
 0x215   : > { %6014 = vst [vmem:[%s9422_s20 + $0x40] sm:$0xff] %v5970_v39   ;;  %v5011_v36 = vadd.f32 %v9403_v50, %v4972_v25  ;;  %v4477_v37 = vadd.f32 %v6616_v34, %v9368_v62  ;;  %v4970_v5 = vadd.f32 %v4905_v22, %v4472_v24  ;;  %v5040_v35 = vmax.f32 %v5008_v11, 0.0  ;;  %v9710_v22 = vld [vmem:[#allocation6_spill] sm:$0xff] }
 0x216   : > { %v4918_v40 = vpop.f32.mrf.mxu0  ;;  %v4420_v49 = vpop.f32.mrf.mxu1 }
 0x217   : > { %v5043_v51 = vmax.f32 %v5011_v36, 0.0  ;;  %v4975_v18 = vadd.f32 %v6664_v43, %v4477_v37  ;;  %v4475_v6 = vadd.f32 %v4420_v49, %v9705_v21  ;;  %v5009_v16 = vadd.f32 %v9403_v50, %v4970_v5  ;;  %v9712_v43 = vld [vmem:[#allocation4_spill] sm:$0xff] }
 0x218   : > { %v6665_v19 = vpop.f32.mrf.mxu0  ;;  %v6617_v33 = vpop.f32.mrf.mxu1  ;;  %v3728_v3 = vadd.f32 %v9712_v43, %v3341_v52 }
 0x219   : > { %v5985_v62 = vpack.c.bf16 %v5043_v51, %v5042_v4  ;;  %v4973_v61 = vadd.f32 %v4918_v40, %v4475_v6  ;;  %v4478_v59 = vadd.f32 %v6617_v33, %v3724_v63  ;;  %v5041_v15 = vmax.f32 %v5009_v16, 0.0 }
 0x21a   : > { %v4921_v41 = vpop.f32.mrf.mxu0  ;;  %v4423_v53 = vpop.f32.mrf.mxu1  ;;  %v5014_v0 = vadd.f32 %v9403_v50, %v4975_v18 }
 0x21b   : > { %6017 = vst [vmem:[%s9422_s20 + $0x58] sm:$0xff] %v5985_v62   ;;  %v4976_v38 = vadd.f32 %v6665_v19, %v4478_v59  ;;  %v4476_v1 = vadd.f32 %v4423_v53, %v3722_v26  ;;  %v5980_v28 = vpack.c.bf16 %v5041_v15, %v5040_v35  ;;  %v5012_v30 = vadd.f32 %v9403_v50, %v4973_v61 }
 0x21c   : > { %v6668_v2 = vpop.f32.mrf.mxu0  ;;  %v6620_v10 = vpop.f32.mrf.mxu1  ;;  %v5046_v14 = vmax.f32 %v5014_v0, 0.0 }
 0x21d   : > { %v5015_v20 = vadd.f32 %v9403_v50, %v4976_v38  ;;  %v4974_v23 = vadd.f32 %v4921_v41, %v4476_v1  ;;  %v4481_v47 = vadd.f32 %v6620_v10, %v9710_v22  ;;  %6016 = vst [vmem:[%s9422_s20 + $0x50] sm:$0xff] %v5980_v28   ;;  %v5044_v46 = vmax.f32 %v5012_v30, 0.0 }
 0x21e   : > { %v4934_v17 = vpop.f32.mrf.mxu0  ;;  %v4436_v45 = vpop.f32.mrf.mxu1 }
 0x21f   : > { %v5047_v56 = vmax.f32 %v5015_v20, 0.0  ;;  %v5013_v31 = vadd.f32 %v9403_v50, %v4974_v23  ;;  %v4479_v29 = vadd.f32 %v4436_v45, %v9711_v54  ;;  %v4979_v8 = vadd.f32 %v6668_v2, %v4481_v47 }
 0x220   : > { %v6621_v9 = vpop.f32.mrf.mxu1  ;;  %v6669_v32 = vpop.f32.mrf.mxu0 }
 0x221   : > { %v5995_v39 = vpack.c.bf16 %v5047_v56, %v5046_v14  ;;  %v5045_v48 = vmax.f32 %v5013_v31, 0.0  ;;  %v4977_v25 = vadd.f32 %v4934_v17, %v4479_v29  ;;  %v4482_v40 = vadd.f32 %v6621_v9, %v3728_v3 }
 0x222   : > { %v4439_v24 = vpop.f32.mrf.mxu1  ;;  %v5018_v58 = vadd.f32 %v9403_v50, %v4979_v8  ;;  %v4937_v37 = vpop.f32.mrf.mxu0 }
 0x223   : > { %6019 = vst [vmem:[%s9422_s20 + $0x68] sm:$0xff] %v5995_v39   ;;  %v5990_v34 = vpack.c.bf16 %v5045_v48, %v5044_v46  ;;  %v4480_v7 = vadd.f32 %v4439_v24, %v3726_v13  ;;  %v4980_v36 = vadd.f32 %v6669_v32, %v4482_v40  ;;  %v5016_v19 = vadd.f32 %v9403_v50, %v4977_v25 }
 0x224   : > { %v5050_v5 = vmax.f32 %v5018_v58, 0.0 }
 0x225   : > { %6018 = vst [vmem:[%s9422_s20 + $0x60] sm:$0xff] %v5990_v34   ;;  %v4978_v44 = vadd.f32 %v4937_v37, %v4480_v7  ;;  %v5019_v63 = vadd.f32 %v9403_v50, %v4980_v36  ;;  %v5048_v4 = vmax.f32 %v5016_v19, 0.0 }
 0x227   : > { %v5017_v11 = vadd.f32 %v9403_v50, %v4978_v44  ;;  %v5051_v49 = vmax.f32 %v5019_v63, 0.0 }
 0x229   : > { %v5049_v51 = vmax.f32 %v5017_v11, 0.0  ;;  %v6005_v18 = vpack.c.bf16 %v5051_v49, %v5050_v5 }
 0x22b   : > { %v6000_v21 = vpack.c.bf16 %v5049_v51, %v5048_v4  ;;  %6021 = vst [vmem:[%s9422_s20 + $0x78] sm:$0xff] %v6005_v18  }
 0x22d   : > { %6020 = vst [vmem:[%s9422_s20 + $0x70] sm:$0xff] %v6000_v21  }
 0x22e PF: > { %s13_s12 = sadd.s32 1, %s6830_s12  }
 0x22f   : > { %p10_p4 = scmp.ge.s32.totalorder %s13_s12, 6  }
 0x231   :  { %12 = sbr.rel (!%p10_p4) target bundleno = 1 (0x1), region = 72 }

</bundles_post_ra>
